<compile_context>
chip_gen: v7x
topology: tpu7x:2x2x1
jax: 0.10.0
libtpu: 0.0.40
codegen_flags: <defaults>
</compile_context>

<pallas_src>
import functools

import jax
import jax.numpy as jnp
from jax.experimental import pallas as pl
from jax.experimental.pallas import tpu as pltpu


def _round_up(x, m):
    return (x + m - 1) // m * m


# ---------------------------------------------------------------------------
# Pallas kernels
# ---------------------------------------------------------------------------
def _mm_bias_act_kernel(x_ref, w_ref, b_ref, o_ref, *, act):
    """Tiled matmul accumulating into the resident f32 output block.

    Grid = (m_tiles, n_tiles, k_tiles); bias + activation applied on the last
    K step (output block index is constant across k, so it stays resident).
    """
    k = pl.program_id(2)
    part = jnp.dot(x_ref[...], w_ref[...], preferred_element_type=jnp.float32)

    @pl.when(k == 0)
    def _():
        o_ref[...] = part

    @pl.when(k > 0)
    def _():
        o_ref[...] += part

    @pl.when(k == pl.num_programs(2) - 1)
    def _():
        y = o_ref[...] + b_ref[...]
        if act == "relu":
            y = jnp.maximum(y, 0.0)
        elif act == "sigmoid":
            y = jax.nn.sigmoid(y)
        elif act == "tanh":
            y = jnp.tanh(y)
        o_ref[...] = y


def _mm_gru_kernel(x_ref, w_ref, b_ref, h_ref, z_ref, o_ref):
    """convq matmul with the GRU blend fused into the epilogue:

        o = (1 - z) * h + z * tanh(x @ w + b)
    """
    k = pl.program_id(2)
    part = jnp.dot(x_ref[...], w_ref[...], preferred_element_type=jnp.float32)

    @pl.when(k == 0)
    def _():
        o_ref[...] = part

    @pl.when(k > 0)
    def _():
        o_ref[...] += part

    @pl.when(k == pl.num_programs(2) - 1)
    def _():
        q = jnp.tanh(o_ref[...] + b_ref[...])
        z = z_ref[...]
        o_ref[...] = (1.0 - z) * h_ref[...] + z * q


# ---------------------------------------------------------------------------
# Matmul launcher (shared by all convs)
# ---------------------------------------------------------------------------
def _launch_matmul(patches, w, b, meta, kernel_fn, extra_inputs,
                   transcendental):
    """y[:M, :N] = epilogue(patches @ w + b);  tiled (M, N, K) Pallas matmul."""
    M, K = patches.shape
    Kp, Np, TK, N = meta["Kp"], meta["Np"], meta["TK"], meta["N"]

    TM = min(256, _round_up(max(M, 8), 8))
    Mp = _round_up(M, TM)
    TN = 128
    nm, nn, nk = Mp // TM, Np // TN, Kp // TK

    xp = jnp.pad(patches, ((0, Mp - M), (0, Kp - K))).astype(jnp.bfloat16)

    extras, extra_specs = [], []
    for e in extra_inputs:
        extras.append(
            jnp.pad(e.astype(jnp.float32), ((0, Mp - M), (0, Np - e.shape[1]))))
        extra_specs.append(pl.BlockSpec((TM, TN), lambda i, j, k: (i, j)))

    cost = pl.CostEstimate(
        flops=2 * Mp * Kp * Np,
        transcendentals=Mp * Np if transcendental else 0,
        bytes_accessed=(int(xp.size) * 2 + int(w.size) * 2 + Mp * Np * 4
                        + sum(int(e.size) * 4 for e in extras)),
    )

    out = pl.pallas_call(
        kernel_fn,
        out_shape=jax.ShapeDtypeStruct((Mp, Np), jnp.float32),
        grid_spec=pltpu.PrefetchScalarGridSpec(
            num_scalar_prefetch=0,
            grid=(nm, nn, nk),
            in_specs=[
                pl.BlockSpec((TM, TK), lambda i, j, k: (i, k)),
                pl.BlockSpec((TK, TN), lambda i, j, k: (k, j)),
                pl.BlockSpec((1, TN), lambda i, j, k: (0, j)),
            ] + extra_specs,
            out_specs=pl.BlockSpec((TM, TN), lambda i, j, k: (i, j)),
        ),
        compiler_params=pltpu.CompilerParams(
            dimension_semantics=("parallel", "parallel", "arbitrary"),
            vmem_limit_bytes=32 * 1024 * 1024,
        ),
        cost_estimate=cost,
    )(xp, w, b, *extras)
    return out[:M, :N]


# ---------------------------------------------------------------------------
# Conv3d wrappers (im2col glue + Pallas matmul)
# ---------------------------------------------------------------------------
def _im2col3d(x, ksize, pad):
    """x: (B, D, H, W, C) -> (B*D*H*W, ksize^3*C); tap order (kd, kh, kw, c)."""
    B, D, H, W, C = x.shape
    if ksize == 1 and pad == 0:
        return x.reshape(B * D * H * W, C)
    xp = jnp.pad(x, ((0, 0), (pad, pad), (pad, pad), (pad, pad), (0, 0)))
    cols = []
    for kd in range(ksize):
        for kh in range(ksize):
            for kw in range(ksize):
                cols.append(xp[:, kd:kd + D, kh:kh + H, kw:kw + W, :])
    patches = jnp.concatenate(cols, axis=-1)
    return patches.reshape(B * D * H * W, ksize ** 3 * C)


def conv3d(x, lp, lm):
    """'same'-style Conv3d with fused bias + activation."""
    B, D, H, W, _ = x.shape
    patches = _im2col3d(x, lm["ksize"], lm["pad"])
    kernel = functools.partial(_mm_bias_act_kernel, act=lm["act"])
    y = _launch_matmul(patches, lp["w"], lp["b"], lm, kernel, (),
                       lm["act"] in ("sigmoid", "tanh"))
    return y.reshape(B, D, H, W, lm["N"])


def conv3d_gru(x, lp, lm, h, z):
    """(1 - z) * h + z * tanh(conv3d(x));  h, z: (B, D, H, W, Cout)."""
    B, D, H, W, _ = x.shape
    N = lm["N"]
    patches = _im2col3d(x, lm["ksize"], lm["pad"])
    y = _launch_matmul(patches, lp["w"], lp["b"], lm, _mm_gru_kernel,
                       (h.reshape(-1, N), z.reshape(-1, N)), True)
    return y.reshape(B, D, H, W, N)


# ---------------------------------------------------------------------------
# UpdateBlock3D forward (pure function; static layer metadata is closed over)
# ---------------------------------------------------------------------------
def update_block3d_forward(meta, params, net, inp, corr, flow):
    def cv(x, name):
        return conv3d(x, params[name], meta[name])

    # --- MotionEncoder3D ---
    cor = cv(corr, "convc1")
    cor = cv(cor, "convc2")
    flo = cv(flow, "convf1")
    flo = cv(flo, "convf2")
    cor_flo = jnp.concatenate([cor, flo], axis=-1)               # 128 + 64
    enc_out = cv(cor_flo, "conv")                                # 61
    motion_features = jnp.concatenate([enc_out, flow], axis=-1)  # 64

    # --- ConvGRU3D (z|r fused into one conv; GRU blend fused into convq) ---
    x = jnp.concatenate([inp, motion_features], axis=-1)         # 32 + 64 = 96
    hx = jnp.concatenate([net, x], axis=-1)                      # 32 + 96 = 128
    hidden = net.shape[-1]
    zr = cv(hx, "convzr")                                        # sigmoid, 2*hidden
    z = zr[..., :hidden]
    r = zr[..., hidden:]
    rh_x = jnp.concatenate([r * net, x], axis=-1)                # 128
    h = conv3d_gru(rh_x, params["convq"], meta["convq"], net, z)

    # --- FlowHead3D ---
    f = cv(h, "fh1")
    delta_flow = cv(f, "fh2")
    return h, delta_flow


# ---------------------------------------------------------------------------
# Parameters: raw init + one-time prepare (flatten / pad / bf16 / z|r fusion)
# ---------------------------------------------------------------------------
def _conv_raw(key, ksize, cin, cout):
    kw_, kb_ = jax.random.split(key)
    fan_in = (ksize ** 3) * cin
    w = jax.random.normal(kw_, (ksize, ksize, ksize, cin, cout),
                          jnp.float32) / jnp.sqrt(float(fan_in))
    b = 0.01 * jax.random.normal(kb_, (cout,), jnp.float32)
    return w, b


def make_raw_params(key, cor_planes, hidden_dim=32):
    gru_in = hidden_dim + (hidden_dim + 61 + 3)  # 128
    specs = [
        ("convc1", 1, 0, cor_planes, 256, "relu"),
        ("convc2", 3, 1, 256, 128, "relu"),
        ("convf1", 7, 3, 3, 128, "relu"),
        ("convf2", 3, 1, 128, 64, "relu"),
        ("conv",   3, 1, 64 + 128, 64 - 3, "relu"),
        ("convz",  3, 1, gru_in, hidden_dim, "sigmoid"),
        ("convr",  3, 1, gru_in, hidden_dim, "sigmoid"),
        ("convq",  3, 1, gru_in, hidden_dim, "tanh"),
        ("fh1",    3, 1, hidden_dim, 64, "relu"),
        ("fh2",    3, 1, 64, 3, "none"),
    ]
    keys = jax.random.split(key, len(specs))
    raw = {}
    for k_i, (name, ksize, pad, cin, cout, act) in zip(keys, specs):
        w, b = _conv_raw(k_i, ksize, cin, cout)
        raw[name] = dict(w=w, b=b, ksize=ksize, pad=pad, act=act)
    return raw


def prepare_params(raw):
    """One-time weight flatten / pad / bf16 cast + convz|convr fusion.

    Returns (params, meta): params holds only device arrays (jit-traceable),
    meta holds static Python layer metadata (closed over at jit time).
    """
    params, meta = {}, {}

    def add(name, w, b, ksize, pad, act):
        K = int(w.shape[0] * w.shape[1] * w.shape[2] * w.shape[3])
        N = int(w.shape[4])
        TK = _round_up(K, 128) if K <= 256 else 256
        Kp = _round_up(K, TK)
        Np = _round_up(N, 128)
        wp = jnp.pad(w.reshape(K, N),
                     ((0, Kp - K), (0, Np - N))).astype(jnp.bfloat16)
        bp = jnp.pad(b, (0, Np - N)).reshape(1, Np).astype(jnp.float32)
        params[name] = dict(w=wp, b=bp)
        meta[name] = dict(K=K, N=N, Kp=Kp, Np=Np, TK=TK,
                          ksize=ksize, pad=pad, act=act)

    for name, lyr in raw.items():
        if name in ("convz", "convr"):
            continue
        add(name, lyr["w"], lyr["b"], lyr["ksize"], lyr["pad"], lyr["act"])

    z, r = raw["convz"], raw["convr"]
    add("convzr",
        jnp.concatenate([z["w"], r["w"]], axis=-1),
        jnp.concatenate([z["b"], r["b"]], axis=-1),
        z["ksize"], z["pad"], "sigmoid")
    return params, meta


# ---------------------------------------------------------------------------
if __name__ == "__main__":
    # args.corr_levels = 1, args.corr_radius = 1 -> cor_planes = 1*(2*1+1)^3 = 27
    corr_levels, corr_radius = 1, 1
    cor_planes = corr_levels * (2 * corr_radius + 1) ** 3
    hidden_dim = 32
    B, S = 1, 8  # batch, spatial (D = H = W = S) -> M = 512 (exercises M tiling)

    root = jax.random.PRNGKey(0)
    kp, kn, ki, kc, kf = jax.random.split(root, 5)

    raw = make_raw_params(kp, cor_planes, hidden_dim)
    params, meta = prepare_params(raw)   # one-time pad / flatten / bf16 cast

    # activations in NDHWC (PyTorch equivalents would be NCDHW)
    net = jax.random.normal(kn, (B, S, S, S, hidden_dim), jnp.float32)
    inp = jax.random.normal(ki, (B, S, S, S, hidden_dim), jnp.float32)
    corr = jax.random.normal(kc, (B, S, S, S, cor_planes), jnp.float32)
    flow = jax.random.normal(kf, (B, S, S, S, 3), jnp.float32)

    fwd = jax.jit(functools.partial(update_block3d_forward, meta))
    new_net, delta_flow = fwd(params, net, inp, corr, flow)
    jax.block_until_ready((new_net, delta_flow))

    assert new_net.shape == (B, S, S, S, hidden_dim)
    assert delta_flow.shape == (B, S, S, S, 3)
    assert bool(jnp.isfinite(new_net).all())
    assert bool(jnp.isfinite(delta_flow).all())

    print("KERNEL_OK")
</pallas_src>

<mosaic_0001>
module attributes {stable_mosaic.version = 11 : i64} {
  func.func @_mm_bias_act_kernel(%arg0: i32, %arg1: i32, %arg2: i32, %arg3: memref<256x256xbf16, #tpu.memory_space<vmem>>, %arg4: memref<256x128xbf16, #tpu.memory_space<vmem>>, %arg5: memref<1x128xf32, #tpu.memory_space<vmem>>, %arg6: memref<256x128xf32, #tpu.memory_space<vmem>>) attributes {dimension_semantics = [#tpu.dimension_semantics<parallel>, #tpu.dimension_semantics<parallel>, #tpu.dimension_semantics<arbitrary>], iteration_bounds = array<i64: 2, 1, 5>, scalar_prefetch = 0 : i64, scratch_operands = 0 : i64, tpu.core_type = #tpu.core_type<tc>, window_params = [{transform_indices = @transform_0, window_bounds = array<i64: 256, 256>}, {transform_indices = @transform_1, window_bounds = array<i64: 256, 128>}, {transform_indices = @transform_2, window_bounds = array<i64: 1, 128>}, {transform_indices = @transform_3, window_bounds = array<i64: 256, 128>}]} {
    %c0 = arith.constant 0 : index
    %c0_0 = arith.constant 0 : index
    %0 = vector.load %arg3[%c0, %c0_0] : memref<256x256xbf16, #tpu.memory_space<vmem>>, vector<256x256xbf16>
    %c0_1 = arith.constant 0 : index
    %c0_2 = arith.constant 0 : index
    %1 = vector.load %arg4[%c0_1, %c0_2] : memref<256x128xbf16, #tpu.memory_space<vmem>>, vector<256x128xbf16>
    %cst = arith.constant dense<0.000000e+00> : vector<256x128xf32>
    %2 = tpu.matmul %0, %1, %cst {dimension_numbers = #tpu.dot_dimension_numbers<[1], [0], [0], [1], [0, 0, 1, 1], [], []>} : vector<256x256xbf16>, vector<256x128xbf16>, vector<256x128xf32> -> vector<256x128xf32>
    %c0_i32 = arith.constant 0 : i32
    %3 = arith.cmpi eq, %arg2, %c0_i32 : i32
    %4 = arith.extui %3 : i1 to i32
    %c0_i32_3 = arith.constant 0 : i32
    %5 = arith.cmpi ne, %4, %c0_i32_3 : i32
    scf.if %5 {
      %c0_7 = arith.constant 0 : index
      %c0_8 = arith.constant 0 : index
      %12 = vector.load %arg6[%c0_7, %c0_8] : memref<256x128xf32, #tpu.memory_space<vmem>>, vector<256x128xf32>
      tpu.vector_store %arg6[%c0_7, %c0_8], %2 {strides = array<i32>} : memref<256x128xf32, #tpu.memory_space<vmem>>, vector<256x128xf32>,
    } else {
    }
    %c0_i32_4 = arith.constant 0 : i32
    %6 = arith.cmpi sgt, %arg2, %c0_i32_4 : i32
    %7 = arith.extui %6 : i1 to i32
    %c0_i32_5 = arith.constant 0 : i32
    %8 = arith.cmpi ne, %7, %c0_i32_5 : i32
    scf.if %8 {
      %c0_7 = arith.constant 0 : index
      %c0_8 = arith.constant 0 : index
      %12 = vector.load %arg6[%c0_7, %c0_8] : memref<256x128xf32, #tpu.memory_space<vmem>>, vector<256x128xf32>
      %13 = arith.addf %12, %2 : vector<256x128xf32>
      %c0_9 = arith.constant 0 : index
      %c0_10 = arith.constant 0 : index
      %14 = vector.load %arg6[%c0_9, %c0_10] : memref<256x128xf32, #tpu.memory_space<vmem>>, vector<256x128xf32>
      tpu.vector_store %arg6[%c0_9, %c0_10], %13 {strides = array<i32>} : memref<256x128xf32, #tpu.memory_space<vmem>>, vector<256x128xf32>,
    } else {
    }
    %c4_i32 = arith.constant 4 : i32
    %9 = arith.cmpi eq, %arg2, %c4_i32 : i32
    %10 = arith.extui %9 : i1 to i32
    %c0_i32_6 = arith.constant 0 : i32
    %11 = arith.cmpi ne, %10, %c0_i32_6 : i32
    scf.if %11 {
      %c0_7 = arith.constant 0 : index
      %c0_8 = arith.constant 0 : index
      %12 = vector.load %arg6[%c0_7, %c0_8] : memref<256x128xf32, #tpu.memory_space<vmem>>, vector<256x128xf32>
      %c0_9 = arith.constant 0 : index
      %c0_10 = arith.constant 0 : index
      %13 = vector.load %arg5[%c0_9, %c0_10] : memref<1x128xf32, #tpu.memory_space<vmem>>, vector<1x128xf32>
      %14 = vector.broadcast %13 : vector<1x128xf32> to vector<256x128xf32>
      %15 = arith.addf %12, %14 : vector<256x128xf32>
      %cst_11 = arith.constant 0.000000e+00 : f32
      %16 = vector.broadcast %cst_11 : f32 to vector<256x128xf32>
      %17 = arith.maximumf %15, %16 : vector<256x128xf32>
      %c0_12 = arith.constant 0 : index
      %c0_13 = arith.constant 0 : index
      %18 = vector.load %arg6[%c0_12, %c0_13] : memref<256x128xf32, #tpu.memory_space<vmem>>, vector<256x128xf32>
      tpu.vector_store %arg6[%c0_12, %c0_13], %17 {strides = array<i32>} : memref<256x128xf32, #tpu.memory_space<vmem>>, vector<256x128xf32>,
    } else {
    }
    return
  }
  func.func @transform_0(%arg0: i32, %arg1: i32, %arg2: i32) -> (i32, i32) {
    %c0_i32 = arith.constant 0 : i32
    return %arg0, %arg2 : i32, i32
  }
  func.func @transform_1(%arg0: i32, %arg1: i32, %arg2: i32) -> (i32, i32) {
    %c0_i32 = arith.constant 0 : i32
    return %arg2, %arg1 : i32, i32
  }
  func.func @transform_2(%arg0: i32, %arg1: i32, %arg2: i32) -> (i32, i32) {
    %c0_i32 = arith.constant 0 : i32
    %c0_i32_0 = arith.constant 0 : i32
    return %c0_i32, %arg1 : i32, i32
  }
  func.func @transform_3(%arg0: i32, %arg1: i32, %arg2: i32) -> (i32, i32) {
    %c0_i32 = arith.constant 0 : i32
    return %arg0, %arg1 : i32, i32
  }
}

module attributes {stable_mosaic.version = 11 : i64} {
  func.func @_mm_bias_act_kernel(%arg0: i32, %arg1: i32, %arg2: i32, %arg3: memref<256x256xbf16, #tpu.memory_space<vmem>>, %arg4: memref<256x128xbf16, #tpu.memory_space<vmem>>, %arg5: memref<1x128xf32, #tpu.memory_space<vmem>>, %arg6: memref<256x128xf32, #tpu.memory_space<vmem>>) attributes {dimension_semantics = [#tpu.dimension_semantics<parallel>, #tpu.dimension_semantics<parallel>, #tpu.dimension_semantics<arbitrary>], iteration_bounds = array<i64: 2, 1, 14>, scalar_prefetch = 0 : i64, scratch_operands = 0 : i64, tpu.core_type = #tpu.core_type<tc>, window_params = [{transform_indices = @transform_0, window_bounds = array<i64: 256, 256>}, {transform_indices = @transform_1, window_bounds = array<i64: 256, 128>}, {transform_indices = @transform_2, window_bounds = array<i64: 1, 128>}, {transform_indices = @transform_3, window_bounds = array<i64: 256, 128>}]} {
    %c0 = arith.constant 0 : index
    %c0_0 = arith.constant 0 : index
    %0 = vector.load %arg3[%c0, %c0_0] : memref<256x256xbf16, #tpu.memory_space<vmem>>, vector<256x256xbf16>
    %c0_1 = arith.constant 0 : index
    %c0_2 = arith.constant 0 : index
    %1 = vector.load %arg4[%c0_1, %c0_2] : memref<256x128xbf16, #tpu.memory_space<vmem>>, vector<256x128xbf16>
    %cst = arith.constant dense<0.000000e+00> : vector<256x128xf32>
    %2 = tpu.matmul %0, %1, %cst {dimension_numbers = #tpu.dot_dimension_numbers<[1], [0], [0], [1], [0, 0, 1, 1], [], []>} : vector<256x256xbf16>, vector<256x128xbf16>, vector<256x128xf32> -> vector<256x128xf32>
    %c0_i32 = arith.constant 0 : i32
    %3 = arith.cmpi eq, %arg2, %c0_i32 : i32
    %4 = arith.extui %3 : i1 to i32
    %c0_i32_3 = arith.constant 0 : i32
    %5 = arith.cmpi ne, %4, %c0_i32_3 : i32
    scf.if %5 {
      %c0_7 = arith.constant 0 : index
      %c0_8 = arith.constant 0 : index
      %12 = vector.load %arg6[%c0_7, %c0_8] : memref<256x128xf32, #tpu.memory_space<vmem>>, vector<256x128xf32>
      tpu.vector_store %arg6[%c0_7, %c0_8], %2 {strides = array<i32>} : memref<256x128xf32, #tpu.memory_space<vmem>>, vector<256x128xf32>,
    } else {
    }
    %c0_i32_4 = arith.constant 0 : i32
    %6 = arith.cmpi sgt, %arg2, %c0_i32_4 : i32
    %7 = arith.extui %6 : i1 to i32
    %c0_i32_5 = arith.constant 0 : i32
    %8 = arith.cmpi ne, %7, %c0_i32_5 : i32
    scf.if %8 {
      %c0_7 = arith.constant 0 : index
      %c0_8 = arith.constant 0 : index
      %12 = vector.load %arg6[%c0_7, %c0_8] : memref<256x128xf32, #tpu.memory_space<vmem>>, vector<256x128xf32>
      %13 = arith.addf %12, %2 : vector<256x128xf32>
      %c0_9 = arith.constant 0 : index
      %c0_10 = arith.constant 0 : index
      %14 = vector.load %arg6[%c0_9, %c0_10] : memref<256x128xf32, #tpu.memory_space<vmem>>, vector<256x128xf32>
      tpu.vector_store %arg6[%c0_9, %c0_10], %13 {strides = array<i32>} : memref<256x128xf32, #tpu.memory_space<vmem>>, vector<256x128xf32>,
    } else {
    }
    %c13_i32 = arith.constant 13 : i32
    %9 = arith.cmpi eq, %arg2, %c13_i32 : i32
    %10 = arith.extui %9 : i1 to i32
    %c0_i32_6 = arith.constant 0 : i32
    %11 = arith.cmpi ne, %10, %c0_i32_6 : i32
    scf.if %11 {
      %c0_7 = arith.constant 0 : index
      %c0_8 = arith.constant 0 : index
      %12 = vector.load %arg6[%c0_7, %c0_8] : memref<256x128xf32, #tpu.memory_space<vmem>>, vector<256x128xf32>
      %c0_9 = arith.constant 0 : index
      %c0_10 = arith.constant 0 : index
      %13 = vector.load %arg5[%c0_9, %c0_10] : memref<1x128xf32, #tpu.memory_space<vmem>>, vector<1x128xf32>
      %14 = vector.broadcast %13 : vector<1x128xf32> to vector<256x128xf32>
      %15 = arith.addf %12, %14 : vector<256x128xf32>
      %cst_11 = arith.constant 0.000000e+00 : f32
      %16 = vector.broadcast %cst_11 : f32 to vector<256x128xf32>
      %17 = arith.maximumf %15, %16 : vector<256x128xf32>
      %c0_12 = arith.constant 0 : index
      %c0_13 = arith.constant 0 : index
      %18 = vector.load %arg6[%c0_12, %c0_13] : memref<256x128xf32, #tpu.memory_space<vmem>>, vector<256x128xf32>
      tpu.vector_store %arg6[%c0_12, %c0_13], %17 {strides = array<i32>} : memref<256x128xf32, #tpu.memory_space<vmem>>, vector<256x128xf32>,
    } else {
    }
    return
  }
  func.func @transform_0(%arg0: i32, %arg1: i32, %arg2: i32) -> (i32, i32) {
    %c0_i32 = arith.constant 0 : i32
    return %arg0, %arg2 : i32, i32
  }
  func.func @transform_1(%arg0: i32, %arg1: i32, %arg2: i32) -> (i32, i32) {
    %c0_i32 = arith.constant 0 : i32
    return %arg2, %arg1 : i32, i32
  }
  func.func @transform_2(%arg0: i32, %arg1: i32, %arg2: i32) -> (i32, i32) {
    %c0_i32 = arith.constant 0 : i32
    %c0_i32_0 = arith.constant 0 : i32
    return %c0_i32, %arg1 : i32, i32
  }
  func.func @transform_3(%arg0: i32, %arg1: i32, %arg2: i32) -> (i32, i32) {
    %c0_i32 = arith.constant 0 : i32
    return %arg0, %arg1 : i32, i32
  }
}

module attributes {stable_mosaic.version = 11 : i64} {
  func.func @_mm_bias_act_kernel(%arg0: i32, %arg1: i32, %arg2: i32, %arg3: memref<256x128xbf16, #tpu.memory_space<vmem>>, %arg4: memref<128x128xbf16, #tpu.memory_space<vmem>>, %arg5: memref<1x128xf32, #tpu.memory_space<vmem>>, %arg6: memref<256x128xf32, #tpu.memory_space<vmem>>) attributes {dimension_semantics = [#tpu.dimension_semantics<parallel>, #tpu.dimension_semantics<parallel>, #tpu.dimension_semantics<arbitrary>], iteration_bounds = array<i64: 2, 2, 1>, scalar_prefetch = 0 : i64, scratch_operands = 0 : i64, tpu.core_type = #tpu.core_type<tc>, window_params = [{transform_indices = @transform_0, window_bounds = array<i64: 256, 128>}, {transform_indices = @transform_1, window_bounds = array<i64: 128, 128>}, {transform_indices = @transform_2, window_bounds = array<i64: 1, 128>}, {transform_indices = @transform_3, window_bounds = array<i64: 256, 128>}]} {
    %c0 = arith.constant 0 : index
    %c0_0 = arith.constant 0 : index
    %0 = vector.load %arg3[%c0, %c0_0] : memref<256x128xbf16, #tpu.memory_space<vmem>>, vector<256x128xbf16>
    %c0_1 = arith.constant 0 : index
    %c0_2 = arith.constant 0 : index
    %1 = vector.load %arg4[%c0_1, %c0_2] : memref<128x128xbf16, #tpu.memory_space<vmem>>, vector<128x128xbf16>
    %cst = arith.constant dense<0.000000e+00> : vector<256x128xf32>
    %2 = tpu.matmul %0, %1, %cst {dimension_numbers = #tpu.dot_dimension_numbers<[1], [0], [0], [1], [0, 0, 1, 1], [], []>} : vector<256x128xbf16>, vector<128x128xbf16>, vector<256x128xf32> -> vector<256x128xf32>
    %c0_i32 = arith.constant 0 : i32
    %3 = arith.cmpi eq, %arg2, %c0_i32 : i32
    %4 = arith.extui %3 : i1 to i32
    %c0_i32_3 = arith.constant 0 : i32
    %5 = arith.cmpi ne, %4, %c0_i32_3 : i32
    scf.if %5 {
      %c0_8 = arith.constant 0 : index
      %c0_9 = arith.constant 0 : index
      %12 = vector.load %arg6[%c0_8, %c0_9] : memref<256x128xf32, #tpu.memory_space<vmem>>, vector<256x128xf32>
      tpu.vector_store %arg6[%c0_8, %c0_9], %2 {strides = array<i32>} : memref<256x128xf32, #tpu.memory_space<vmem>>, vector<256x128xf32>,
    } else {
    }
    %c0_i32_4 = arith.constant 0 : i32
    %6 = arith.cmpi sgt, %arg2, %c0_i32_4 : i32
    %7 = arith.extui %6 : i1 to i32
    %c0_i32_5 = arith.constant 0 : i32
    %8 = arith.cmpi ne, %7, %c0_i32_5 : i32
    scf.if %8 {
      %c0_8 = arith.constant 0 : index
      %c0_9 = arith.constant 0 : index
      %12 = vector.load %arg6[%c0_8, %c0_9] : memref<256x128xf32, #tpu.memory_space<vmem>>, vector<256x128xf32>
      %13 = arith.addf %12, %2 : vector<256x128xf32>
      %c0_10 = arith.constant 0 : index
      %c0_11 = arith.constant 0 : index
      %14 = vector.load %arg6[%c0_10, %c0_11] : memref<256x128xf32, #tpu.memory_space<vmem>>, vector<256x128xf32>
      tpu.vector_store %arg6[%c0_10, %c0_11], %13 {strides = array<i32>} : memref<256x128xf32, #tpu.memory_space<vmem>>, vector<256x128xf32>,
    } else {
    }
    %c0_i32_6 = arith.constant 0 : i32
    %9 = arith.cmpi eq, %arg2, %c0_i32_6 : i32
    %10 = arith.extui %9 : i1 to i32
    %c0_i32_7 = arith.constant 0 : i32
    %11 = arith.cmpi ne, %10, %c0_i32_7 : i32
    scf.if %11 {
      %c0_8 = arith.constant 0 : index
      %c0_9 = arith.constant 0 : index
      %12 = vector.load %arg6[%c0_8, %c0_9] : memref<256x128xf32, #tpu.memory_space<vmem>>, vector<256x128xf32>
      %c0_10 = arith.constant 0 : index
      %c0_11 = arith.constant 0 : index
      %13 = vector.load %arg5[%c0_10, %c0_11] : memref<1x128xf32, #tpu.memory_space<vmem>>, vector<1x128xf32>
      %14 = vector.broadcast %13 : vector<1x128xf32> to vector<256x128xf32>
      %15 = arith.addf %12, %14 : vector<256x128xf32>
      %cst_12 = arith.constant 0.000000e+00 : f32
      %16 = vector.broadcast %cst_12 : f32 to vector<256x128xf32>
      %17 = arith.maximumf %15, %16 : vector<256x128xf32>
      %c0_13 = arith.constant 0 : index
      %c0_14 = arith.constant 0 : index
      %18 = vector.load %arg6[%c0_13, %c0_14] : memref<256x128xf32, #tpu.memory_space<vmem>>, vector<256x128xf32>
      tpu.vector_store %arg6[%c0_13, %c0_14], %17 {strides = array<i32>} : memref<256x128xf32, #tpu.memory_space<vmem>>, vector<256x128xf32>,
    } else {
    }
    return
  }
  func.func @transform_0(%arg0: i32, %arg1: i32, %arg2: i32) -> (i32, i32) {
    %c0_i32 = arith.constant 0 : i32
    return %arg0, %arg2 : i32, i32
  }
  func.func @transform_1(%arg0: i32, %arg1: i32, %arg2: i32) -> (i32, i32) {
    %c0_i32 = arith.constant 0 : i32
    return %arg2, %arg1 : i32, i32
  }
  func.func @transform_2(%arg0: i32, %arg1: i32, %arg2: i32) -> (i32, i32) {
    %c0_i32 = arith.constant 0 : i32
    %c0_i32_0 = arith.constant 0 : i32
    return %c0_i32, %arg1 : i32, i32
  }
  func.func @transform_3(%arg0: i32, %arg1: i32, %arg2: i32) -> (i32, i32) {
    %c0_i32 = arith.constant 0 : i32
    return %arg0, %arg1 : i32, i32
  }
}

module attributes {stable_mosaic.version = 11 : i64} {
  func.func @_mm_bias_act_kernel(%arg0: i32, %arg1: i32, %arg2: i32, %arg3: memref<256x256xbf16, #tpu.memory_space<vmem>>, %arg4: memref<256x128xbf16, #tpu.memory_space<vmem>>, %arg5: memref<1x128xf32, #tpu.memory_space<vmem>>, %arg6: memref<256x128xf32, #tpu.memory_space<vmem>>) attributes {dimension_semantics = [#tpu.dimension_semantics<parallel>, #tpu.dimension_semantics<parallel>, #tpu.dimension_semantics<arbitrary>], iteration_bounds = array<i64: 2, 1, 27>, scalar_prefetch = 0 : i64, scratch_operands = 0 : i64, tpu.core_type = #tpu.core_type<tc>, window_params = [{transform_indices = @transform_0, window_bounds = array<i64: 256, 256>}, {transform_indices = @transform_1, window_bounds = array<i64: 256, 128>}, {transform_indices = @transform_2, window_bounds = array<i64: 1, 128>}, {transform_indices = @transform_3, window_bounds = array<i64: 256, 128>}]} {
    %c0 = arith.constant 0 : index
    %c0_0 = arith.constant 0 : index
    %0 = vector.load %arg3[%c0, %c0_0] : memref<256x256xbf16, #tpu.memory_space<vmem>>, vector<256x256xbf16>
    %c0_1 = arith.constant 0 : index
    %c0_2 = arith.constant 0 : index
    %1 = vector.load %arg4[%c0_1, %c0_2] : memref<256x128xbf16, #tpu.memory_space<vmem>>, vector<256x128xbf16>
    %cst = arith.constant dense<0.000000e+00> : vector<256x128xf32>
    %2 = tpu.matmul %0, %1, %cst {dimension_numbers = #tpu.dot_dimension_numbers<[1], [0], [0], [1], [0, 0, 1, 1], [], []>} : vector<256x256xbf16>, vector<256x128xbf16>, vector<256x128xf32> -> vector<256x128xf32>
    %c0_i32 = arith.constant 0 : i32
    %3 = arith.cmpi eq, %arg2, %c0_i32 : i32
    %4 = arith.extui %3 : i1 to i32
    %c0_i32_3 = arith.constant 0 : i32
    %5 = arith.cmpi ne, %4, %c0_i32_3 : i32
    scf.if %5 {
      %c0_7 = arith.constant 0 : index
      %c0_8 = arith.constant 0 : index
      %12 = vector.load %arg6[%c0_7, %c0_8] : memref<256x128xf32, #tpu.memory_space<vmem>>, vector<256x128xf32>
      tpu.vector_store %arg6[%c0_7, %c0_8], %2 {strides = array<i32>} : memref<256x128xf32, #tpu.memory_space<vmem>>, vector<256x128xf32>,
    } else {
    }
    %c0_i32_4 = arith.constant 0 : i32
    %6 = arith.cmpi sgt, %arg2, %c0_i32_4 : i32
    %7 = arith.extui %6 : i1 to i32
    %c0_i32_5 = arith.constant 0 : i32
    %8 = arith.cmpi ne, %7, %c0_i32_5 : i32
    scf.if %8 {
      %c0_7 = arith.constant 0 : index
      %c0_8 = arith.constant 0 : index
      %12 = vector.load %arg6[%c0_7, %c0_8] : memref<256x128xf32, #tpu.memory_space<vmem>>, vector<256x128xf32>
      %13 = arith.addf %12, %2 : vector<256x128xf32>
      %c0_9 = arith.constant 0 : index
      %c0_10 = arith.constant 0 : index
      %14 = vector.load %arg6[%c0_9, %c0_10] : memref<256x128xf32, #tpu.memory_space<vmem>>, vector<256x128xf32>
      tpu.vector_store %arg6[%c0_9, %c0_10], %13 {strides = array<i32>} : memref<256x128xf32, #tpu.memory_space<vmem>>, vector<256x128xf32>,
    } else {
    }
    %c26_i32 = arith.constant 26 : i32
    %9 = arith.cmpi eq, %arg2, %c26_i32 : i32
    %10 = arith.extui %9 : i1 to i32
    %c0_i32_6 = arith.constant 0 : i32
    %11 = arith.cmpi ne, %10, %c0_i32_6 : i32
    scf.if %11 {
      %c0_7 = arith.constant 0 : index
      %c0_8 = arith.constant 0 : index
      %12 = vector.load %arg6[%c0_7, %c0_8] : memref<256x128xf32, #tpu.memory_space<vmem>>, vector<256x128xf32>
      %c0_9 = arith.constant 0 : index
      %c0_10 = arith.constant 0 : index
      %13 = vector.load %arg5[%c0_9, %c0_10] : memref<1x128xf32, #tpu.memory_space<vmem>>, vector<1x128xf32>
      %14 = vector.broadcast %13 : vector<1x128xf32> to vector<256x128xf32>
      %15 = arith.addf %12, %14 : vector<256x128xf32>
      %cst_11 = arith.constant 0.000000e+00 : f32
      %16 = vector.broadcast %cst_11 : f32 to vector<256x128xf32>
      %17 = arith.maximumf %15, %16 : vector<256x128xf32>
      %c0_12 = arith.constant 0 : index
      %c0_13 = arith.constant 0 : index
      %18 = vector.load %arg6[%c0_12, %c0_13] : memref<256x128xf32, #tpu.memory_space<vmem>>, vector<256x128xf32>
      tpu.vector_store %arg6[%c0_12, %c0_13], %17 {strides = array<i32>} : memref<256x128xf32, #tpu.memory_space<vmem>>, vector<256x128xf32>,
    } else {
    }
    return
  }
  func.func @transform_0(%arg0: i32, %arg1: i32, %arg2: i32) -> (i32, i32) {
    %c0_i32 = arith.constant 0 : i32
    return %arg0, %arg2 : i32, i32
  }
  func.func @transform_1(%arg0: i32, %arg1: i32, %arg2: i32) -> (i32, i32) {
    %c0_i32 = arith.constant 0 : i32
    return %arg2, %arg1 : i32, i32
  }
  func.func @transform_2(%arg0: i32, %arg1: i32, %arg2: i32) -> (i32, i32) {
    %c0_i32 = arith.constant 0 : i32
    %c0_i32_0 = arith.constant 0 : i32
    return %c0_i32, %arg1 : i32, i32
  }
  func.func @transform_3(%arg0: i32, %arg1: i32, %arg2: i32) -> (i32, i32) {
    %c0_i32 = arith.constant 0 : i32
    return %arg0, %arg1 : i32, i32
  }
}

module attributes {stable_mosaic.version = 11 : i64} {
  func.func @_mm_bias_act_kernel(%arg0: i32, %arg1: i32, %arg2: i32, %arg3: memref<256x256xbf16, #tpu.memory_space<vmem>>, %arg4: memref<256x128xbf16, #tpu.memory_space<vmem>>, %arg5: memref<1x128xf32, #tpu.memory_space<vmem>>, %arg6: memref<256x128xf32, #tpu.memory_space<vmem>>) attributes {dimension_semantics = [#tpu.dimension_semantics<parallel>, #tpu.dimension_semantics<parallel>, #tpu.dimension_semantics<arbitrary>], iteration_bounds = array<i64: 2, 1, 21>, scalar_prefetch = 0 : i64, scratch_operands = 0 : i64, tpu.core_type = #tpu.core_type<tc>, window_params = [{transform_indices = @transform_0, window_bounds = array<i64: 256, 256>}, {transform_indices = @transform_1, window_bounds = array<i64: 256, 128>}, {transform_indices = @transform_2, window_bounds = array<i64: 1, 128>}, {transform_indices = @transform_3, window_bounds = array<i64: 256, 128>}]} {
    %c0 = arith.constant 0 : index
    %c0_0 = arith.constant 0 : index
    %0 = vector.load %arg3[%c0, %c0_0] : memref<256x256xbf16, #tpu.memory_space<vmem>>, vector<256x256xbf16>
    %c0_1 = arith.constant 0 : index
    %c0_2 = arith.constant 0 : index
    %1 = vector.load %arg4[%c0_1, %c0_2] : memref<256x128xbf16, #tpu.memory_space<vmem>>, vector<256x128xbf16>
    %cst = arith.constant dense<0.000000e+00> : vector<256x128xf32>
    %2 = tpu.matmul %0, %1, %cst {dimension_numbers = #tpu.dot_dimension_numbers<[1], [0], [0], [1], [0, 0, 1, 1], [], []>} : vector<256x256xbf16>, vector<256x128xbf16>, vector<256x128xf32> -> vector<256x128xf32>
    %c0_i32 = arith.constant 0 : i32
    %3 = arith.cmpi eq, %arg2, %c0_i32 : i32
    %4 = arith.extui %3 : i1 to i32
    %c0_i32_3 = arith.constant 0 : i32
    %5 = arith.cmpi ne, %4, %c0_i32_3 : i32
    scf.if %5 {
      %c0_7 = arith.constant 0 : index
      %c0_8 = arith.constant 0 : index
      %12 = vector.load %arg6[%c0_7, %c0_8] : memref<256x128xf32, #tpu.memory_space<vmem>>, vector<256x128xf32>
      tpu.vector_store %arg6[%c0_7, %c0_8], %2 {strides = array<i32>} : memref<256x128xf32, #tpu.memory_space<vmem>>, vector<256x128xf32>,
    } else {
    }
    %c0_i32_4 = arith.constant 0 : i32
    %6 = arith.cmpi sgt, %arg2, %c0_i32_4 : i32
    %7 = arith.extui %6 : i1 to i32
    %c0_i32_5 = arith.constant 0 : i32
    %8 = arith.cmpi ne, %7, %c0_i32_5 : i32
    scf.if %8 {
      %c0_7 = arith.constant 0 : index
      %c0_8 = arith.constant 0 : index
      %12 = vector.load %arg6[%c0_7, %c0_8] : memref<256x128xf32, #tpu.memory_space<vmem>>, vector<256x128xf32>
      %13 = arith.addf %12, %2 : vector<256x128xf32>
      %c0_9 = arith.constant 0 : index
      %c0_10 = arith.constant 0 : index
      %14 = vector.load %arg6[%c0_9, %c0_10] : memref<256x128xf32, #tpu.memory_space<vmem>>, vector<256x128xf32>
      tpu.vector_store %arg6[%c0_9, %c0_10], %13 {strides = array<i32>} : memref<256x128xf32, #tpu.memory_space<vmem>>, vector<256x128xf32>,
    } else {
    }
    %c20_i32 = arith.constant 20 : i32
    %9 = arith.cmpi eq, %arg2, %c20_i32 : i32
    %10 = arith.extui %9 : i1 to i32
    %c0_i32_6 = arith.constant 0 : i32
    %11 = arith.cmpi ne, %10, %c0_i32_6 : i32
    scf.if %11 {
      %c0_7 = arith.constant 0 : index
      %c0_8 = arith.constant 0 : index
      %12 = vector.load %arg6[%c0_7, %c0_8] : memref<256x128xf32, #tpu.memory_space<vmem>>, vector<256x128xf32>
      %c0_9 = arith.constant 0 : index
      %c0_10 = arith.constant 0 : index
      %13 = vector.load %arg5[%c0_9, %c0_10] : memref<1x128xf32, #tpu.memory_space<vmem>>, vector<1x128xf32>
      %14 = vector.broadcast %13 : vector<1x128xf32> to vector<256x128xf32>
      %15 = arith.addf %12, %14 : vector<256x128xf32>
      %cst_11 = arith.constant 0.000000e+00 : f32
      %16 = vector.broadcast %cst_11 : f32 to vector<256x128xf32>
      %17 = arith.maximumf %15, %16 : vector<256x128xf32>
      %c0_12 = arith.constant 0 : index
      %c0_13 = arith.constant 0 : index
      %18 = vector.load %arg6[%c0_12, %c0_13] : memref<256x128xf32, #tpu.memory_space<vmem>>, vector<256x128xf32>
      tpu.vector_store %arg6[%c0_12, %c0_13], %17 {strides = array<i32>} : memref<256x128xf32, #tpu.memory_space<vmem>>, vector<256x128xf32>,
    } else {
    }
    return
  }
  func.func @transform_0(%arg0: i32, %arg1: i32, %arg2: i32) -> (i32, i32) {
    %c0_i32 = arith.constant 0 : i32
    return %arg0, %arg2 : i32, i32
  }
  func.func @transform_1(%arg0: i32, %arg1: i32, %arg2: i32) -> (i32, i32) {
    %c0_i32 = arith.constant 0 : i32
    return %arg2, %arg1 : i32, i32
  }
  func.func @transform_2(%arg0: i32, %arg1: i32, %arg2: i32) -> (i32, i32) {
    %c0_i32 = arith.constant 0 : i32
    %c0_i32_0 = arith.constant 0 : i32
    return %c0_i32, %arg1 : i32, i32
  }
  func.func @transform_3(%arg0: i32, %arg1: i32, %arg2: i32) -> (i32, i32) {
    %c0_i32 = arith.constant 0 : i32
    return %arg0, %arg1 : i32, i32
  }
}

module attributes {stable_mosaic.version = 11 : i64} {
  func.func @_mm_bias_act_kernel(%arg0: i32, %arg1: i32, %arg2: i32, %arg3: memref<256x256xbf16, #tpu.memory_space<vmem>>, %arg4: memref<256x128xbf16, #tpu.memory_space<vmem>>, %arg5: memref<1x128xf32, #tpu.memory_space<vmem>>, %arg6: memref<256x128xf32, #tpu.memory_space<vmem>>) attributes {dimension_semantics = [#tpu.dimension_semantics<parallel>, #tpu.dimension_semantics<parallel>, #tpu.dimension_semantics<arbitrary>], iteration_bounds = array<i64: 2, 1, 14>, scalar_prefetch = 0 : i64, scratch_operands = 0 : i64, tpu.core_type = #tpu.core_type<tc>, window_params = [{transform_indices = @transform_0, window_bounds = array<i64: 256, 256>}, {transform_indices = @transform_1, window_bounds = array<i64: 256, 128>}, {transform_indices = @transform_2, window_bounds = array<i64: 1, 128>}, {transform_indices = @transform_3, window_bounds = array<i64: 256, 128>}]} {
    %c0 = arith.constant 0 : index
    %c0_0 = arith.constant 0 : index
    %0 = vector.load %arg3[%c0, %c0_0] : memref<256x256xbf16, #tpu.memory_space<vmem>>, vector<256x256xbf16>
    %c0_1 = arith.constant 0 : index
    %c0_2 = arith.constant 0 : index
    %1 = vector.load %arg4[%c0_1, %c0_2] : memref<256x128xbf16, #tpu.memory_space<vmem>>, vector<256x128xbf16>
    %cst = arith.constant dense<0.000000e+00> : vector<256x128xf32>
    %2 = tpu.matmul %0, %1, %cst {dimension_numbers = #tpu.dot_dimension_numbers<[1], [0], [0], [1], [0, 0, 1, 1], [], []>} : vector<256x256xbf16>, vector<256x128xbf16>, vector<256x128xf32> -> vector<256x128xf32>
    %c0_i32 = arith.constant 0 : i32
    %3 = arith.cmpi eq, %arg2, %c0_i32 : i32
    %4 = arith.extui %3 : i1 to i32
    %c0_i32_3 = arith.constant 0 : i32
    %5 = arith.cmpi ne, %4, %c0_i32_3 : i32
    scf.if %5 {
      %c0_7 = arith.constant 0 : index
      %c0_8 = arith.constant 0 : index
      %12 = vector.load %arg6[%c0_7, %c0_8] : memref<256x128xf32, #tpu.memory_space<vmem>>, vector<256x128xf32>
      tpu.vector_store %arg6[%c0_7, %c0_8], %2 {strides = array<i32>} : memref<256x128xf32, #tpu.memory_space<vmem>>, vector<256x128xf32>,
    } else {
    }
    %c0_i32_4 = arith.constant 0 : i32
    %6 = arith.cmpi sgt, %arg2, %c0_i32_4 : i32
    %7 = arith.extui %6 : i1 to i32
    %c0_i32_5 = arith.constant 0 : i32
    %8 = arith.cmpi ne, %7, %c0_i32_5 : i32
    scf.if %8 {
      %c0_7 = arith.constant 0 : index
      %c0_8 = arith.constant 0 : index
      %12 = vector.load %arg6[%c0_7, %c0_8] : memref<256x128xf32, #tpu.memory_space<vmem>>, vector<256x128xf32>
      %13 = arith.addf %12, %2 : vector<256x128xf32>
      %c0_9 = arith.constant 0 : index
      %c0_10 = arith.constant 0 : index
      %14 = vector.load %arg6[%c0_9, %c0_10] : memref<256x128xf32, #tpu.memory_space<vmem>>, vector<256x128xf32>
      tpu.vector_store %arg6[%c0_9, %c0_10], %13 {strides = array<i32>} : memref<256x128xf32, #tpu.memory_space<vmem>>, vector<256x128xf32>,
    } else {
    }
    %c13_i32 = arith.constant 13 : i32
    %9 = arith.cmpi eq, %arg2, %c13_i32 : i32
    %10 = arith.extui %9 : i1 to i32
    %c0_i32_6 = arith.constant 0 : i32
    %11 = arith.cmpi ne, %10, %c0_i32_6 : i32
    scf.if %11 {
      %c0_7 = arith.constant 0 : index
      %c0_8 = arith.constant 0 : index
      %12 = vector.load %arg6[%c0_7, %c0_8] : memref<256x128xf32, #tpu.memory_space<vmem>>, vector<256x128xf32>
      %c0_9 = arith.constant 0 : index
      %c0_10 = arith.constant 0 : index
      %13 = vector.load %arg5[%c0_9, %c0_10] : memref<1x128xf32, #tpu.memory_space<vmem>>, vector<1x128xf32>
      %14 = vector.broadcast %13 : vector<1x128xf32> to vector<256x128xf32>
      %15 = arith.addf %12, %14 : vector<256x128xf32>
      %16 = arith.negf %15 : vector<256x128xf32>
      %17 = math.exp %16 : vector<256x128xf32>
      %cst_11 = arith.constant 1.000000e+00 : f32
      %18 = vector.broadcast %cst_11 : f32 to vector<256x128xf32>
      %19 = arith.addf %18, %17 : vector<256x128xf32>
      %20 = arith.divf %18, %19 : vector<256x128xf32>
      %c0_12 = arith.constant 0 : index
      %c0_13 = arith.constant 0 : index
      %21 = vector.load %arg6[%c0_12, %c0_13] : memref<256x128xf32, #tpu.memory_space<vmem>>, vector<256x128xf32>
      tpu.vector_store %arg6[%c0_12, %c0_13], %20 {strides = array<i32>} : memref<256x128xf32, #tpu.memory_space<vmem>>, vector<256x128xf32>,
    } else {
    }
    return
  }
  func.func @transform_0(%arg0: i32, %arg1: i32, %arg2: i32) -> (i32, i32) {
    %c0_i32 = arith.constant 0 : i32
    return %arg0, %arg2 : i32, i32
  }
  func.func @transform_1(%arg0: i32, %arg1: i32, %arg2: i32) -> (i32, i32) {
    %c0_i32 = arith.constant 0 : i32
    return %arg2, %arg1 : i32, i32
  }
  func.func @transform_2(%arg0: i32, %arg1: i32, %arg2: i32) -> (i32, i32) {
    %c0_i32 = arith.constant 0 : i32
    %c0_i32_0 = arith.constant 0 : i32
    return %c0_i32, %arg1 : i32, i32
  }
  func.func @transform_3(%arg0: i32, %arg1: i32, %arg2: i32) -> (i32, i32) {
    %c0_i32 = arith.constant 0 : i32
    return %arg0, %arg1 : i32, i32
  }
}

module attributes {stable_mosaic.version = 11 : i64} {
  func.func @_mm_gru_kernel(%arg0: i32, %arg1: i32, %arg2: i32, %arg3: memref<256x256xbf16, #tpu.memory_space<vmem>>, %arg4: memref<256x128xbf16, #tpu.memory_space<vmem>>, %arg5: memref<1x128xf32, #tpu.memory_space<vmem>>, %arg6: memref<256x128xf32, #tpu.memory_space<vmem>>, %arg7: memref<256x128xf32, #tpu.memory_space<vmem>>, %arg8: memref<256x128xf32, #tpu.memory_space<vmem>>) attributes {dimension_semantics = [#tpu.dimension_semantics<parallel>, #tpu.dimension_semantics<parallel>, #tpu.dimension_semantics<arbitrary>], iteration_bounds = array<i64: 2, 1, 14>, scalar_prefetch = 0 : i64, scratch_operands = 0 : i64, tpu.core_type = #tpu.core_type<tc>, window_params = [{transform_indices = @transform_0, window_bounds = array<i64: 256, 256>}, {transform_indices = @transform_1, window_bounds = array<i64: 256, 128>}, {transform_indices = @transform_2, window_bounds = array<i64: 1, 128>}, {transform_indices = @transform_3, window_bounds = array<i64: 256, 128>}, {transform_indices = @transform_4, window_bounds = array<i64: 256, 128>}, {transform_indices = @transform_5, window_bounds = array<i64: 256, 128>}]} {
    %c0 = arith.constant 0 : index
    %c0_0 = arith.constant 0 : index
    %0 = vector.load %arg3[%c0, %c0_0] : memref<256x256xbf16, #tpu.memory_space<vmem>>, vector<256x256xbf16>
    %c0_1 = arith.constant 0 : index
    %c0_2 = arith.constant 0 : index
    %1 = vector.load %arg4[%c0_1, %c0_2] : memref<256x128xbf16, #tpu.memory_space<vmem>>, vector<256x128xbf16>
    %cst = arith.constant dense<0.000000e+00> : vector<256x128xf32>
    %2 = tpu.matmul %0, %1, %cst {dimension_numbers = #tpu.dot_dimension_numbers<[1], [0], [0], [1], [0, 0, 1, 1], [], []>} : vector<256x256xbf16>, vector<256x128xbf16>, vector<256x128xf32> -> vector<256x128xf32>
    %c0_i32 = arith.constant 0 : i32
    %3 = arith.cmpi eq, %arg2, %c0_i32 : i32
    %4 = arith.extui %3 : i1 to i32
    %c0_i32_3 = arith.constant 0 : i32
    %5 = arith.cmpi ne, %4, %c0_i32_3 : i32
    scf.if %5 {
      %c0_7 = arith.constant 0 : index
      %c0_8 = arith.constant 0 : index
      %12 = vector.load %arg8[%c0_7, %c0_8] : memref<256x128xf32, #tpu.memory_space<vmem>>, vector<256x128xf32>
      tpu.vector_store %arg8[%c0_7, %c0_8], %2 {strides = array<i32>} : memref<256x128xf32, #tpu.memory_space<vmem>>, vector<256x128xf32>,
    } else {
    }
    %c0_i32_4 = arith.constant 0 : i32
    %6 = arith.cmpi sgt, %arg2, %c0_i32_4 : i32
    %7 = arith.extui %6 : i1 to i32
    %c0_i32_5 = arith.constant 0 : i32
    %8 = arith.cmpi ne, %7, %c0_i32_5 : i32
    scf.if %8 {
      %c0_7 = arith.constant 0 : index
      %c0_8 = arith.constant 0 : index
      %12 = vector.load %arg8[%c0_7, %c0_8] : memref<256x128xf32, #tpu.memory_space<vmem>>, vector<256x128xf32>
      %13 = arith.addf %12, %2 : vector<256x128xf32>
      %c0_9 = arith.constant 0 : index
      %c0_10 = arith.constant 0 : index
      %14 = vector.load %arg8[%c0_9, %c0_10] : memref<256x128xf32, #tpu.memory_space<vmem>>, vector<256x128xf32>
      tpu.vector_store %arg8[%c0_9, %c0_10], %13 {strides = array<i32>} : memref<256x128xf32, #tpu.memory_space<vmem>>, vector<256x128xf32>,
    } else {
    }
    %c13_i32 = arith.constant 13 : i32
    %9 = arith.cmpi eq, %arg2, %c13_i32 : i32
    %10 = arith.extui %9 : i1 to i32
    %c0_i32_6 = arith.constant 0 : i32
    %11 = arith.cmpi ne, %10, %c0_i32_6 : i32
    scf.if %11 {
      %c0_7 = arith.constant 0 : index
      %c0_8 = arith.constant 0 : index
      %12 = vector.load %arg8[%c0_7, %c0_8] : memref<256x128xf32, #tpu.memory_space<vmem>>, vector<256x128xf32>
      %c0_9 = arith.constant 0 : index
      %c0_10 = arith.constant 0 : index
      %13 = vector.load %arg5[%c0_9, %c0_10] : memref<1x128xf32, #tpu.memory_space<vmem>>, vector<1x128xf32>
      %14 = vector.broadcast %13 : vector<1x128xf32> to vector<256x128xf32>
      %15 = arith.addf %12, %14 : vector<256x128xf32>
      %16 = math.tanh %15 : vector<256x128xf32>
      %c0_11 = arith.constant 0 : index
      %c0_12 = arith.constant 0 : index
      %17 = vector.load %arg7[%c0_11, %c0_12] : memref<256x128xf32, #tpu.memory_space<vmem>>, vector<256x128xf32>
      %cst_13 = arith.constant 1.000000e+00 : f32
      %18 = vector.broadcast %cst_13 : f32 to vector<256x128xf32>
      %19 = arith.subf %18, %17 : vector<256x128xf32>
      %c0_14 = arith.constant 0 : index
      %c0_15 = arith.constant 0 : index
      %20 = vector.load %arg6[%c0_14, %c0_15] : memref<256x128xf32, #tpu.memory_space<vmem>>, vector<256x128xf32>
      %21 = arith.mulf %19, %20 : vector<256x128xf32>
      %22 = arith.mulf %17, %16 : vector<256x128xf32>
      %23 = arith.addf %21, %22 : vector<256x128xf32>
      %c0_16 = arith.constant 0 : index
      %c0_17 = arith.constant 0 : index
      %24 = vector.load %arg8[%c0_16, %c0_17] : memref<256x128xf32, #tpu.memory_space<vmem>>, vector<256x128xf32>
      tpu.vector_store %arg8[%c0_16, %c0_17], %23 {strides = array<i32>} : memref<256x128xf32, #tpu.memory_space<vmem>>, vector<256x128xf32>,
    } else {
    }
    return
  }
  func.func @transform_0(%arg0: i32, %arg1: i32, %arg2: i32) -> (i32, i32) {
    %c0_i32 = arith.constant 0 : i32
    return %arg0, %arg2 : i32, i32
  }
  func.func @transform_1(%arg0: i32, %arg1: i32, %arg2: i32) -> (i32, i32) {
    %c0_i32 = arith.constant 0 : i32
    return %arg2, %arg1 : i32, i32
  }
  func.func @transform_2(%arg0: i32, %arg1: i32, %arg2: i32) -> (i32, i32) {
    %c0_i32 = arith.constant 0 : i32
    %c0_i32_0 = arith.constant 0 : i32
    return %c0_i32, %arg1 : i32, i32
  }
  func.func @transform_3(%arg0: i32, %arg1: i32, %arg2: i32) -> (i32, i32) {
    %c0_i32 = arith.constant 0 : i32
    return %arg0, %arg1 : i32, i32
  }
  func.func @transform_4(%arg0: i32, %arg1: i32, %arg2: i32) -> (i32, i32) {
    %c0_i32 = arith.constant 0 : i32
    return %arg0, %arg1 : i32, i32
  }
  func.func @transform_5(%arg0: i32, %arg1: i32, %arg2: i32) -> (i32, i32) {
    %c0_i32 = arith.constant 0 : i32
    return %arg0, %arg1 : i32, i32
  }
}

module attributes {stable_mosaic.version = 11 : i64} {
  func.func @_mm_bias_act_kernel(%arg0: i32, %arg1: i32, %arg2: i32, %arg3: memref<256x256xbf16, #tpu.memory_space<vmem>>, %arg4: memref<256x128xbf16, #tpu.memory_space<vmem>>, %arg5: memref<1x128xf32, #tpu.memory_space<vmem>>, %arg6: memref<256x128xf32, #tpu.memory_space<vmem>>) attributes {dimension_semantics = [#tpu.dimension_semantics<parallel>, #tpu.dimension_semantics<parallel>, #tpu.dimension_semantics<arbitrary>], iteration_bounds = array<i64: 2, 1, 4>, scalar_prefetch = 0 : i64, scratch_operands = 0 : i64, tpu.core_type = #tpu.core_type<tc>, window_params = [{transform_indices = @transform_0, window_bounds = array<i64: 256, 256>}, {transform_indices = @transform_1, window_bounds = array<i64: 256, 128>}, {transform_indices = @transform_2, window_bounds = array<i64: 1, 128>}, {transform_indices = @transform_3, window_bounds = array<i64: 256, 128>}]} {
    %c0 = arith.constant 0 : index
    %c0_0 = arith.constant 0 : index
    %0 = vector.load %arg3[%c0, %c0_0] : memref<256x256xbf16, #tpu.memory_space<vmem>>, vector<256x256xbf16>
    %c0_1 = arith.constant 0 : index
    %c0_2 = arith.constant 0 : index
    %1 = vector.load %arg4[%c0_1, %c0_2] : memref<256x128xbf16, #tpu.memory_space<vmem>>, vector<256x128xbf16>
    %cst = arith.constant dense<0.000000e+00> : vector<256x128xf32>
    %2 = tpu.matmul %0, %1, %cst {dimension_numbers = #tpu.dot_dimension_numbers<[1], [0], [0], [1], [0, 0, 1, 1], [], []>} : vector<256x256xbf16>, vector<256x128xbf16>, vector<256x128xf32> -> vector<256x128xf32>
    %c0_i32 = arith.constant 0 : i32
    %3 = arith.cmpi eq, %arg2, %c0_i32 : i32
    %4 = arith.extui %3 : i1 to i32
    %c0_i32_3 = arith.constant 0 : i32
    %5 = arith.cmpi ne, %4, %c0_i32_3 : i32
    scf.if %5 {
      %c0_7 = arith.constant 0 : index
      %c0_8 = arith.constant 0 : index
      %12 = vector.load %arg6[%c0_7, %c0_8] : memref<256x128xf32, #tpu.memory_space<vmem>>, vector<256x128xf32>
      tpu.vector_store %arg6[%c0_7, %c0_8], %2 {strides = array<i32>} : memref<256x128xf32, #tpu.memory_space<vmem>>, vector<256x128xf32>,
    } else {
    }
    %c0_i32_4 = arith.constant 0 : i32
    %6 = arith.cmpi sgt, %arg2, %c0_i32_4 : i32
    %7 = arith.extui %6 : i1 to i32
    %c0_i32_5 = arith.constant 0 : i32
    %8 = arith.cmpi ne, %7, %c0_i32_5 : i32
    scf.if %8 {
      %c0_7 = arith.constant 0 : index
      %c0_8 = arith.constant 0 : index
      %12 = vector.load %arg6[%c0_7, %c0_8] : memref<256x128xf32, #tpu.memory_space<vmem>>, vector<256x128xf32>
      %13 = arith.addf %12, %2 : vector<256x128xf32>
      %c0_9 = arith.constant 0 : index
      %c0_10 = arith.constant 0 : index
      %14 = vector.load %arg6[%c0_9, %c0_10] : memref<256x128xf32, #tpu.memory_space<vmem>>, vector<256x128xf32>
      tpu.vector_store %arg6[%c0_9, %c0_10], %13 {strides = array<i32>} : memref<256x128xf32, #tpu.memory_space<vmem>>, vector<256x128xf32>,
    } else {
    }
    %c3_i32 = arith.constant 3 : i32
    %9 = arith.cmpi eq, %arg2, %c3_i32 : i32
    %10 = arith.extui %9 : i1 to i32
    %c0_i32_6 = arith.constant 0 : i32
    %11 = arith.cmpi ne, %10, %c0_i32_6 : i32
    scf.if %11 {
      %c0_7 = arith.constant 0 : index
      %c0_8 = arith.constant 0 : index
      %12 = vector.load %arg6[%c0_7, %c0_8] : memref<256x128xf32, #tpu.memory_space<vmem>>, vector<256x128xf32>
      %c0_9 = arith.constant 0 : index
      %c0_10 = arith.constant 0 : index
      %13 = vector.load %arg5[%c0_9, %c0_10] : memref<1x128xf32, #tpu.memory_space<vmem>>, vector<1x128xf32>
      %14 = vector.broadcast %13 : vector<1x128xf32> to vector<256x128xf32>
      %15 = arith.addf %12, %14 : vector<256x128xf32>
      %cst_11 = arith.constant 0.000000e+00 : f32
      %16 = vector.broadcast %cst_11 : f32 to vector<256x128xf32>
      %17 = arith.maximumf %15, %16 : vector<256x128xf32>
      %c0_12 = arith.constant 0 : index
      %c0_13 = arith.constant 0 : index
      %18 = vector.load %arg6[%c0_12, %c0_13] : memref<256x128xf32, #tpu.memory_space<vmem>>, vector<256x128xf32>
      tpu.vector_store %arg6[%c0_12, %c0_13], %17 {strides = array<i32>} : memref<256x128xf32, #tpu.memory_space<vmem>>, vector<256x128xf32>,
    } else {
    }
    return
  }
  func.func @transform_0(%arg0: i32, %arg1: i32, %arg2: i32) -> (i32, i32) {
    %c0_i32 = arith.constant 0 : i32
    return %arg0, %arg2 : i32, i32
  }
  func.func @transform_1(%arg0: i32, %arg1: i32, %arg2: i32) -> (i32, i32) {
    %c0_i32 = arith.constant 0 : i32
    return %arg2, %arg1 : i32, i32
  }
  func.func @transform_2(%arg0: i32, %arg1: i32, %arg2: i32) -> (i32, i32) {
    %c0_i32 = arith.constant 0 : i32
    %c0_i32_0 = arith.constant 0 : i32
    return %c0_i32, %arg1 : i32, i32
  }
  func.func @transform_3(%arg0: i32, %arg1: i32, %arg2: i32) -> (i32, i32) {
    %c0_i32 = arith.constant 0 : i32
    return %arg0, %arg1 : i32, i32
  }
}

module attributes {stable_mosaic.version = 11 : i64} {
  func.func @_mm_bias_act_kernel(%arg0: i32, %arg1: i32, %arg2: i32, %arg3: memref<256x256xbf16, #tpu.memory_space<vmem>>, %arg4: memref<256x128xbf16, #tpu.memory_space<vmem>>, %arg5: memref<1x128xf32, #tpu.memory_space<vmem>>, %arg6: memref<256x128xf32, #tpu.memory_space<vmem>>) attributes {dimension_semantics = [#tpu.dimension_semantics<parallel>, #tpu.dimension_semantics<parallel>, #tpu.dimension_semantics<arbitrary>], iteration_bounds = array<i64: 2, 1, 7>, scalar_prefetch = 0 : i64, scratch_operands = 0 : i64, tpu.core_type = #tpu.core_type<tc>, window_params = [{transform_indices = @transform_0, window_bounds = array<i64: 256, 256>}, {transform_indices = @transform_1, window_bounds = array<i64: 256, 128>}, {transform_indices = @transform_2, window_bounds = array<i64: 1, 128>}, {transform_indices = @transform_3, window_bounds = array<i64: 256, 128>}]} {
    %c0 = arith.constant 0 : index
    %c0_0 = arith.constant 0 : index
    %0 = vector.load %arg3[%c0, %c0_0] : memref<256x256xbf16, #tpu.memory_space<vmem>>, vector<256x256xbf16>
    %c0_1 = arith.constant 0 : index
    %c0_2 = arith.constant 0 : index
    %1 = vector.load %arg4[%c0_1, %c0_2] : memref<256x128xbf16, #tpu.memory_space<vmem>>, vector<256x128xbf16>
    %cst = arith.constant dense<0.000000e+00> : vector<256x128xf32>
    %2 = tpu.matmul %0, %1, %cst {dimension_numbers = #tpu.dot_dimension_numbers<[1], [0], [0], [1], [0, 0, 1, 1], [], []>} : vector<256x256xbf16>, vector<256x128xbf16>, vector<256x128xf32> -> vector<256x128xf32>
    %c0_i32 = arith.constant 0 : i32
    %3 = arith.cmpi eq, %arg2, %c0_i32 : i32
    %4 = arith.extui %3 : i1 to i32
    %c0_i32_3 = arith.constant 0 : i32
    %5 = arith.cmpi ne, %4, %c0_i32_3 : i32
    scf.if %5 {
      %c0_7 = arith.constant 0 : index
      %c0_8 = arith.constant 0 : index
      %12 = vector.load %arg6[%c0_7, %c0_8] : memref<256x128xf32, #tpu.memory_space<vmem>>, vector<256x128xf32>
      tpu.vector_store %arg6[%c0_7, %c0_8], %2 {strides = array<i32>} : memref<256x128xf32, #tpu.memory_space<vmem>>, vector<256x128xf32>,
    } else {
    }
    %c0_i32_4 = arith.constant 0 : i32
    %6 = arith.cmpi sgt, %arg2, %c0_i32_4 : i32
    %7 = arith.extui %6 : i1 to i32
    %c0_i32_5 = arith.constant 0 : i32
    %8 = arith.cmpi ne, %7, %c0_i32_5 : i32
    scf.if %8 {
      %c0_7 = arith.constant 0 : index
      %c0_8 = arith.constant 0 : index
      %12 = vector.load %arg6[%c0_7, %c0_8] : memref<256x128xf32, #tpu.memory_space<vmem>>, vector<256x128xf32>
      %13 = arith.addf %12, %2 : vector<256x128xf32>
      %c0_9 = arith.constant 0 : index
      %c0_10 = arith.constant 0 : index
      %14 = vector.load %arg6[%c0_9, %c0_10] : memref<256x128xf32, #tpu.memory_space<vmem>>, vector<256x128xf32>
      tpu.vector_store %arg6[%c0_9, %c0_10], %13 {strides = array<i32>} : memref<256x128xf32, #tpu.memory_space<vmem>>, vector<256x128xf32>,
    } else {
    }
    %c6_i32 = arith.constant 6 : i32
    %9 = arith.cmpi eq, %arg2, %c6_i32 : i32
    %10 = arith.extui %9 : i1 to i32
    %c0_i32_6 = arith.constant 0 : i32
    %11 = arith.cmpi ne, %10, %c0_i32_6 : i32
    scf.if %11 {
      %c0_7 = arith.constant 0 : index
      %c0_8 = arith.constant 0 : index
      %12 = vector.load %arg6[%c0_7, %c0_8] : memref<256x128xf32, #tpu.memory_space<vmem>>, vector<256x128xf32>
      %c0_9 = arith.constant 0 : index
      %c0_10 = arith.constant 0 : index
      %13 = vector.load %arg5[%c0_9, %c0_10] : memref<1x128xf32, #tpu.memory_space<vmem>>, vector<1x128xf32>
      %14 = vector.broadcast %13 : vector<1x128xf32> to vector<256x128xf32>
      %15 = arith.addf %12, %14 : vector<256x128xf32>
      %c0_11 = arith.constant 0 : index
      %c0_12 = arith.constant 0 : index
      %16 = vector.load %arg6[%c0_11, %c0_12] : memref<256x128xf32, #tpu.memory_space<vmem>>, vector<256x128xf32>
      tpu.vector_store %arg6[%c0_11, %c0_12], %15 {strides = array<i32>} : memref<256x128xf32, #tpu.memory_space<vmem>>, vector<256x128xf32>,
    } else {
    }
    return
  }
  func.func @transform_0(%arg0: i32, %arg1: i32, %arg2: i32) -> (i32, i32) {
    %c0_i32 = arith.constant 0 : i32
    return %arg0, %arg2 : i32, i32
  }
  func.func @transform_1(%arg0: i32, %arg1: i32, %arg2: i32) -> (i32, i32) {
    %c0_i32 = arith.constant 0 : i32
    return %arg2, %arg1 : i32, i32
  }
  func.func @transform_2(%arg0: i32, %arg1: i32, %arg2: i32) -> (i32, i32) {
    %c0_i32 = arith.constant 0 : i32
    %c0_i32_0 = arith.constant 0 : i32
    return %c0_i32, %arg1 : i32, i32
  }
  func.func @transform_3(%arg0: i32, %arg1: i32, %arg2: i32) -> (i32, i32) {
    %c0_i32 = arith.constant 0 : i32
    return %arg0, %arg1 : i32, i32
  }
}

</mosaic_0001>

<bundles_post_ra>
// kernel: update_block3d_forward.11
= control target key start
LH: loop header
LB: loop body
LE: loop exit
PB: predicated region body
PF: predicated region fallthrough
CT: control target
= control target key end

     0   :  { %s1681_s12 = smov 0   ;;  %s1683_s13 = smov 0   ;;  %s2223_s0 = inlined_call_operand.vmem [shape: bf16[512,1280], index: 0, kind: input, shape index: {}]   ;;  %s2224_s1 = inlined_call_operand.vmem [shape: bf16[1280,128], index: 1, kind: input, shape index: {}]   ;;  %s2225_s2 = inlined_call_operand.vmem [shape: f32[1,128], index: 2, kind: input, shape index: {}]   ;;  %s2226_s3 = inlined_call_operand.vmem [shape: f32[512,128], index: 3, kind: output, shape index: {}]  }
   0x1   :  { %s1685_s14 = smov 0   ;;  %s1687_s15 = smov 0  }
   0x2   :  { %s1689_s16 = smov 0   ;;  %s1691_s17 = smov 0  }
   0x3   :  { %s1693_s18 = smov 0  }
   0x4 LB: > { %s25_s19 = sadd.s32 1, %s1651_s16  ;;  %s32_s20 = sadd.s32 1, %s1655_s17  ;;  %s1659_s18 = sphi %s1693_s18, %s13_s18   ;;  %s1655_s17 = sphi %s1691_s17, %s2232_s17   ;;  %s1651_s16 = sphi %s1689_s16, %s2231_s16   ;;  %s1647_s15 = sphi %s1687_s15, %s2230_s15   ;;  %s1643_s14 = sphi %s1685_s14, %s2229_s14   ;;  %s1639_s13 = sphi %s1683_s13, %s2228_s13   ;;  %s1635_s12 = sphi %s1681_s12, %s2227_s12  }
   0x5   : > { %p26_p0 = scmp.ge.s32.totalorder %s25_s19, 5  ;;  %p48_p1 = scmp.ne.s32.totalorder %s1639_s13, %s1635_s12 }
   0x6   : > { %p49_p2 = scmp.eq.s32.totalorder %s1659_s18, 0  ;;  %s41_s24 = sadd.s32 1, %s1639_s13 }
   0x7   : > { %s2234_s19 = smov (%p26_p0, %s25_s19), 0  ;;  %s2236_s20 = smov (!%p26_p0, %s32_s20), %s1655_s17 }
   0x8   : > { %p50_p3 = por %p49_p2, %p48_p1  ;;  %p34_p4 = scmp.ge.s32.totalorder %s2236_s20, 2 }
   0x9   : > { %s37_s21 = ssub.s32 %s1651_s16, %s2234_s19  ;;  %p1290_p6 = scmp.ge.s32.totalorder %s1659_s18, 10 }
   0xa   : > { %s2238_s20 = smov (%p34_p4, %s2236_s20), 0 }
   0xb   : > { %s36_s22 = ssub.s32 %s1655_s17, %s2238_s20  ;;  %162 = sbr.rel (%p1290_p6) target bundleno = 42 (0x2a), region = 20 }
   0xc   : > { %s38_s23 = sor.u32 %s37_s21, %s36_s22 }
   0xd   : > { %p39_p5 = scmp.eq.s32.totalorder %s38_s23, 0 }
   0xf   : > { %s1732_s25 = scalar_select %p39_p5, %s1639_s13, %s41_s24  }
  0x12   : > { %165 = sbr.rel (!%p50_p3) target bundleno = 42 (0x2a), region = 24  ;;  %s167_s26 = sand.u32 (%p50_p3), 1, %s1639_s13  }
  0x13   : > { %s1293_s27 = sshll.u32 (%p50_p3), %s1651_s16, 1  ;;  %s1291_s28 = sshll.u32 (%p50_p3), %s167_s26, 8 }
  0x14   : > { %s1484_s29 = smul.u32 (%p50_p3), 320, %s1655_s17  ;;  %s1746_s8 = scalar_lea.vmem (%p50_p3), [#allocation2], %s1291_s28 }
  0x16   : > { %s173_s30 = sadd.s32 (%p50_p3), %s1484_s29, %s1293_s27 }
  0x17   : > { %s1295_s4 = sshll.u32 (%p50_p3), %s173_s30, 2 }
  0x18   : > { %s1741_s7 = scalar_lea.vmem (%p50_p3), %s2223_s0, %s1295_s4 }
  0x19   : > { %v265_v0 = vld [vmem:[%s1741_s7] sm:$0xff]  ;;  %v267_v1 = vld [vmem:[%s1741_s7 + $0x28] sm:$0xff]  ;;  %v269_v2 = vld [vmem:[%s1741_s7 + $0x50] sm:$0xff] }
  0x1a   : > { %266 = vst [vmem:[%s1746_s8] sm:$0xff] %v265_v0  ;;  %268 = vst [vmem:[%s1746_s8 + $0x8] sm:$0xff] %v267_v1  ;;  %v271_v3 = vld [vmem:[%s1741_s7 + $0x78] sm:$0xff]  ;;  %v273_v4 = vld [vmem:[%s1741_s7 + $0xa0] sm:$0xff] }
  0x1b   : > { %270 = vst [vmem:[%s1746_s8 + $0x10] sm:$0xff] %v269_v2  ;;  %v275_v5 = vld [vmem:[%s1741_s7 + $0xc8] sm:$0xff]  ;;  %272 = vst [vmem:[%s1746_s8 + $0x18] sm:$0xff] %v271_v3  ;;  %v277_v6 = vld [vmem:[%s1741_s7 + $0xf0] sm:$0xff] }
  0x1c   : > { %274 = vst [vmem:[%s1746_s8 + $0x20] sm:$0xff] %v273_v4  ;;  %276 = vst [vmem:[%s1746_s8 + $0x28] sm:$0xff] %v275_v5  ;;  %v279_v7 = vld [vmem:[%s1741_s7 + $0x118] sm:$0xff]  ;;  %v281_v8 = vld [vmem:[%s1741_s7 + $0x140] sm:$0xff] }
  0x1d   : > { %278 = vst [vmem:[%s1746_s8 + $0x30] sm:$0xff] %v277_v6  ;;  %280 = vst [vmem:[%s1746_s8 + $0x38] sm:$0xff] %v279_v7  ;;  %v283_v9 = vld [vmem:[%s1741_s7 + $0x168] sm:$0xff]  ;;  %v285_v10 = vld [vmem:[%s1741_s7 + $0x190] sm:$0xff] }
  0x1e   : > { %282 = vst [vmem:[%s1746_s8 + $0x40] sm:$0xff] %v281_v8  ;;  %v287_v11 = vld [vmem:[%s1741_s7 + $0x1b8] sm:$0xff]  ;;  %284 = vst [vmem:[%s1746_s8 + $0x48] sm:$0xff] %v283_v9  ;;  %v289_v12 = vld [vmem:[%s1741_s7 + $0x1e0] sm:$0xff] }
  0x1f   : > { %286 = vst [vmem:[%s1746_s8 + $0x50] sm:$0xff] %v285_v10  ;;  %288 = vst [vmem:[%s1746_s8 + $0x58] sm:$0xff] %v287_v11  ;;  %v291_v13 = vld [vmem:[%s1741_s7 + $0x208] sm:$0xff]  ;;  %v293_v14 = vld [vmem:[%s1741_s7 + $0x230] sm:$0xff] }
  0x20   : > { %290 = vst [vmem:[%s1746_s8 + $0x60] sm:$0xff] %v289_v12  ;;  %292 = vst [vmem:[%s1746_s8 + $0x68] sm:$0xff] %v291_v13  ;;  %v295_v15 = vld [vmem:[%s1741_s7 + $0x258] sm:$0xff]  ;;  %v297_v16 = vld [vmem:[%s1741_s7 + $0x280] sm:$0xff] }
  0x21   : > { %294 = vst [vmem:[%s1746_s8 + $0x70] sm:$0xff] %v293_v14  ;;  %v299_v17 = vld [vmem:[%s1741_s7 + $0x2a8] sm:$0xff]  ;;  %296 = vst [vmem:[%s1746_s8 + $0x78] sm:$0xff] %v295_v15  ;;  %v301_v18 = vld [vmem:[%s1741_s7 + $0x2d0] sm:$0xff] }
  0x22   : > { %298 = vst [vmem:[%s1746_s8 + $0x80] sm:$0xff] %v297_v16  ;;  %300 = vst [vmem:[%s1746_s8 + $0x88] sm:$0xff] %v299_v17  ;;  %v303_v19 = vld [vmem:[%s1741_s7 + $0x2f8] sm:$0xff]  ;;  %v305_v20 = vld [vmem:[%s1741_s7 + $0x320] sm:$0xff] }
  0x23   : > { %302 = vst [vmem:[%s1746_s8 + $0x90] sm:$0xff] %v301_v18  ;;  %304 = vst [vmem:[%s1746_s8 + $0x98] sm:$0xff] %v303_v19  ;;  %v307_v21 = vld [vmem:[%s1741_s7 + $0x348] sm:$0xff]  ;;  %v309_v22 = vld [vmem:[%s1741_s7 + $0x370] sm:$0xff] }
  0x24   : > { %306 = vst [vmem:[%s1746_s8 + $0xa0] sm:$0xff] %v305_v20  ;;  %v311_v23 = vld [vmem:[%s1741_s7 + $0x398] sm:$0xff]  ;;  %308 = vst [vmem:[%s1746_s8 + $0xa8] sm:$0xff] %v307_v21  ;;  %v313_v24 = vld [vmem:[%s1741_s7 + $0x3c0] sm:$0xff] }
  0x25   : > { %310 = vst [vmem:[%s1746_s8 + $0xb0] sm:$0xff] %v309_v22  ;;  %312 = vst [vmem:[%s1746_s8 + $0xb8] sm:$0xff] %v311_v23  ;;  %v315_v25 = vld [vmem:[%s1741_s7 + $0x3e8] sm:$0xff]  ;;  %v317_v26 = vld [vmem:[%s1741_s7 + $0x410] sm:$0xff] }
  0x26   : > { %314 = vst [vmem:[%s1746_s8 + $0xc0] sm:$0xff] %v313_v24  ;;  %316 = vst [vmem:[%s1746_s8 + $0xc8] sm:$0xff] %v315_v25  ;;  %v319_v27 = vld [vmem:[%s1741_s7 + $0x438] sm:$0xff]  ;;  %v321_v28 = vld [vmem:[%s1741_s7 + $0x460] sm:$0xff] }
  0x27   : > { %318 = vst [vmem:[%s1746_s8 + $0xd0] sm:$0xff] %v317_v26  ;;  %v323_v29 = vld [vmem:[%s1741_s7 + $0x488] sm:$0xff]  ;;  %320 = vst [vmem:[%s1746_s8 + $0xd8] sm:$0xff] %v319_v27  ;;  %v325_v30 = vld [vmem:[%s1741_s7 + $0x4b0] sm:$0xff] }
  0x28   : > { %322 = vst [vmem:[%s1746_s8 + $0xe0] sm:$0xff] %v321_v28  ;;  %324 = vst [vmem:[%s1746_s8 + $0xe8] sm:$0xff] %v323_v29  ;;  %v327_v31 = vld [vmem:[%s1741_s7 + $0x4d8] sm:$0xff] }
  0x29   : > { %326 = vst [vmem:[%s1746_s8 + $0xf0] sm:$0xff] %v325_v30  ;;  %328 = vst [vmem:[%s1746_s8 + $0xf8] sm:$0xff] %v327_v31 }
  0x2a PF: > { %p1296_p7 = scmp.ge.s32.totalorder %s1659_s18, 1  ;;  %p345_p8 = scmp.lt.s32.totalorder %s1659_s18, 11 }
  0x2c   : > { %p346_p9 = pnand %p1296_p7, %p345_p8 }
  0x2d   : > { %s1298_s9 = sshll.u32 (!%p346_p9), %s1643_s14, 5  ;;  %s1300_s10 = sshll.u32 (!%p346_p9), %s1647_s15, 5 }
  0x2e   : > { %349 = sbr.rel (%p346_p9) target bundleno = 406 (0x196), region = 66  ;;  %p392_p10 = scmp.lt.s32.totalorder (!%p346_p9), %s1298_s9, 159 }
  0x2f   : > { %p404_p11 = scmp.lt.s32.totalorder (!%p346_p9), %s1300_s10, 63  ;;  %s352_s28 = sand.u32 (!%p346_p9), 1, %s1635_s12  }
  0x30   : > { %s1297_s29 = sshll.u32 (!%p346_p9), %s352_s28, 8  ;;  %p1350_p12 = scmp.ne.s32.totalorder (!%p346_p9), %s1643_s14, 0 }
  0x31   : > { %s1835_s30 = scalar_lea.vmem (!%p346_p9), [#allocation2], %s1297_s29 }
  0x32   : > { %v1559_v43 = vld [vmem:[%s1835_s30 + $0x4] ss:$8 sps:$4 sm:$0xff] (!%p346_p9)   ;;  %v1557_v50 = vld [vmem:[%s1835_s30] ss:$8 sps:$4 sm:$0xff] (!%p346_p9)   ;;  %v1563_v52 = vld [vmem:[%s1835_s30 + $0x14] ss:$8 sps:$4 sm:$0xff] (!%p346_p9)  }
  0x33   : > { %v1562_v44 = vld [vmem:[%s1835_s30 + $0x84] ss:$8 sps:$4 sm:$0xff] (!%p346_p9)   ;;  %765 = vmatprep.mubr.bf16.mxu0 (!%p346_p9), %v1559_v43  ;;  %v1560_v51 = vld [vmem:[%s1835_s30 + $0x80] ss:$8 sps:$4 sm:$0xff] (!%p346_p9)   ;;  %v1565_v53 = vld [vmem:[%s1835_s30 + $0x94] ss:$8 sps:$4 sm:$0xff] (!%p346_p9)  }
  0x34   : > { %829 = vmatprep.mubr.bf16.mxu1 (!%p346_p9), %v1562_v44  ;;  %v1567_v54 = vld [vmem:[%s1835_s30 + $0x10] ss:$8 sps:$4 sm:$0xff] (!%p346_p9)   ;;  %v1569_v56 = vld [vmem:[%s1835_s30 + $0x24] ss:$8 sps:$4 sm:$0xff] (!%p346_p9)   ;;  %v1573_v58 = vld [vmem:[%s1835_s30 + $0x20] ss:$8 sps:$4 sm:$0xff] (!%p346_p9)  }
  0x35   : > { %s2240_s9 = smov (!%p392_p10, %s1298_s9), 159  ;;  %s2242_s10 = smov (!%p404_p11, %s1300_s10), 63  ;;  %v1568_v55 = vld [vmem:[%s1835_s30 + $0x90] ss:$8 sps:$4 sm:$0xff]   ;;  %v1571_v57 = vld [vmem:[%s1835_s30 + $0xa4] ss:$8 sps:$4 sm:$0xff]  }
  0x36   : > { %s1299_s11 = sshll.u32 %s2240_s9, 2  ;;  %s1301_s24 = sshll.u32 %s2242_s10, 3  ;;  %v1574_v59 = vld [vmem:[%s1835_s30 + $0xa0] ss:$8 sps:$4 sm:$0xff]   ;;  %v1575_v60 = vld [vmem:[%s1835_s30 + $0x34] ss:$8 sps:$4 sm:$0xff]  }
  0x37   : > { %s1816_s23 = scalar_lea.vmem %s2224_s1, %s1299_s11  ;;  %s1821_s15 = scalar_lea.vmem %s2226_s3, %s1301_s24  ;;  %v1577_v61 = vld [vmem:[%s1835_s30 + $0xb4] ss:$8 sps:$4 sm:$0xff]   ;;  %v1579_v62 = vld [vmem:[%s1835_s30 + $0x30] ss:$8 sps:$4 sm:$0xff]   ;;  %v1581_v0 = vld [vmem:[%s1835_s30 + $0x44] ss:$8 sps:$4 sm:$0xff]  }
  0x38   : > { %v1541_v32 = vld [vmem:[%s1816_s23 + $0x40] sm:$0xff]   ;;  %v1543_v34 = vld [vmem:[%s1816_s23 + $0x48] sm:$0xff]   ;;  %v1545_v36 = vld [vmem:[%s1816_s23 + $0x50] sm:$0xff]  }
  0x39   : > { %v1542_v33 = vld [vmem:[%s1816_s23] sm:$0xff]   ;;  %1356 = vmatprep.subr.bf16.mxu0 %v1541_v32  ;;  %1468 = vmatprep.subr.bf16.mxu1 %v1541_v32  ;;  %v1544_v35 = vld [vmem:[%s1816_s23 + $0x8] sm:$0xff]   ;;  %v1546_v37 = vld [vmem:[%s1816_s23 + $0x10] sm:$0xff]  }
  0x3a   : > { %1357 = vmatpush3.bf16.msra.mxu0 %v1542_v33  ;;  %1476 = vmatpush3.bf16.msra.mxu1 %v1542_v33  ;;  %v1547_v38 = vld [vmem:[%s1816_s23 + $0x58] sm:$0xff]   ;;  %v1549_v40 = vld [vmem:[%s1816_s23 + $0x60] sm:$0xff]   ;;  %v1551_v42 = vld [vmem:[%s1816_s23 + $0x68] sm:$0xff]  }
  0x3b   : > { %1358 = vmatprep.subr.bf16.mxu0 %v1543_v34  ;;  %1469 = vmatprep.subr.bf16.mxu1 %v1543_v34  ;;  %v1548_v39 = vld [vmem:[%s1816_s23 + $0x18] sm:$0xff]   ;;  %v1550_v41 = vld [vmem:[%s1816_s23 + $0x20] sm:$0xff]   ;;  %v1552_v45 = vld [vmem:[%s1816_s23 + $0x28] sm:$0xff]  }
  0x3c   : > { %v1553_v46 = vld [vmem:[%s1816_s23 + $0x70] sm:$0xff]   ;;  %v1555_v48 = vld [vmem:[%s1816_s23 + $0x78] sm:$0xff]   ;;  %v1583_v1 = vld [vmem:[%s1835_s30 + $0xc4] ss:$8 sps:$4 sm:$0xff]  }
  0x3d   : > { %v1554_v47 = vld [vmem:[%s1816_s23 + $0x30] sm:$0xff]   ;;  %v1556_v49 = vld [vmem:[%s1816_s23 + $0x38] sm:$0xff]   ;;  %v1585_v2 = vld [vmem:[%s1835_s30 + $0x40] ss:$8 sps:$4 sm:$0xff]  }
  0x3e   : > { %1359 = vmatpush3.bf16.msra.mxu0 %v1544_v35  ;;  %1477 = vmatpush3.bf16.msra.mxu1 %v1544_v35  ;;  %v1580_v63 = vld [vmem:[%s1835_s30 + $0xb0] ss:$8 sps:$4 sm:$0xff]   ;;  %v1586_v3 = vld [vmem:[%s1835_s30 + $0xc0] ss:$8 sps:$4 sm:$0xff]   ;;  %v1587_v4 = vld [vmem:[%s1835_s30 + $0x54] ss:$8 sps:$4 sm:$0xff]  }
  0x3f   : > { %1360 = vmatprep.subr.bf16.mxu0 %v1545_v36  ;;  %1470 = vmatprep.subr.bf16.mxu1 %v1545_v36  ;;  %v1589_v5 = vld [vmem:[%s1835_s30 + $0xd4] ss:$8 sps:$4 sm:$0xff]   ;;  %v1591_v6 = vld [vmem:[%s1835_s30 + $0x50] ss:$8 sps:$4 sm:$0xff]   ;;  %v1593_v8 = vld [vmem:[%s1835_s30 + $0x64] ss:$8 sps:$4 sm:$0xff]  }
  0x40   : > { %v1592_v7 = vld [vmem:[%s1835_s30 + $0xd0] ss:$8 sps:$4 sm:$0xff]   ;;  %v1595_v9 = vld [vmem:[%s1835_s30 + $0xe4] ss:$8 sps:$4 sm:$0xff]   ;;  %v1597_v10 = vld [vmem:[%s1835_s30 + $0x60] ss:$8 sps:$4 sm:$0xff]  }
  0x41   : > { %v1598_v11 = vld [vmem:[%s1835_s30 + $0xe0] ss:$8 sps:$4 sm:$0xff]   ;;  %v1599_v12 = vld [vmem:[%s1835_s30 + $0x74] ss:$8 sps:$4 sm:$0xff]   ;;  %v1603_v14 = vld [vmem:[%s1835_s30 + $0x70] ss:$8 sps:$4 sm:$0xff]  }
  0x42   : > { %1361 = vmatpush3.bf16.msra.mxu0 %v1546_v37  ;;  %1478 = vmatpush3.bf16.msra.mxu1 %v1546_v37  ;;  %v1601_v13 = vld [vmem:[%s1835_s30 + $0xf4] ss:$8 sps:$4 sm:$0xff]   ;;  %v1604_v15 = vld [vmem:[%s1835_s30 + $0xf0] ss:$8 sps:$4 sm:$0xff]  }
  0x43   : > { %1362 = vmatprep.subr.bf16.mxu0 %v1547_v38  ;;  %1471 = vmatprep.subr.bf16.mxu1 %v1547_v38 }
  0x46   : > { %1363 = vmatpush3.bf16.msra.mxu0 %v1548_v39  ;;  %1479 = vmatpush3.bf16.msra.mxu1 %v1548_v39 }
  0x47   : > { %1364 = vmatprep.subr.bf16.mxu0 %v1549_v40  ;;  %1472 = vmatprep.subr.bf16.mxu1 %v1549_v40 }
  0x4a   : > { %1365 = vmatpush3.bf16.msra.mxu0 %v1550_v41  ;;  %1480 = vmatpush3.bf16.msra.mxu1 %v1550_v41 }
  0x4b   : > { %1366 = vmatprep.subr.bf16.mxu0 %v1551_v42  ;;  %1473 = vmatprep.subr.bf16.mxu1 %v1551_v42 }
  0x4e   : > { %1367 = vmatpush3.bf16.msra.mxu0 %v1552_v45  ;;  %1481 = vmatpush3.bf16.msra.mxu1 %v1552_v45 }
  0x4f   : > { %1368 = vmatprep.subr.bf16.mxu0 %v1553_v46  ;;  %1474 = vmatprep.subr.bf16.mxu1 %v1553_v46 }
  0x52   : > { %1369 = vmatpush3.bf16.msra.mxu0 %v1554_v47  ;;  %1482 = vmatpush3.bf16.msra.mxu1 %v1554_v47 }
  0x53   : > { %1370 = vmatprep.subr.bf16.mxu0 %v1555_v48  ;;  %1475 = vmatprep.subr.bf16.mxu1 %v1555_v48 }
  0x56   : > { %1371 = vmatpush3.bf16.msra.mxu0 %v1556_v49  ;;  %1483 = vmatpush3.bf16.msra.mxu1 %v1556_v49 }
  0x59   : > { %766 = vmatmul.mubr.bf16.vlgmr.msra.gmra.mrb[0].mxu0 %v1557_v50  ;;  %830 = vmatmul.mubr.bf16.vlgmr.msra.gmra.mrb[0].mxu1 %v1560_v51 }
  0x5a   : > { %773 = vmatprep.mubr.bf16.mxu0 %v1563_v52  ;;  %837 = vmatprep.mubr.bf16.mxu1 %v1565_v53 }
  0x61   : > { %774 = vmatmul.mubr.bf16.gmra.mrb[4].mxu0 %v1567_v54  ;;  %838 = vmatmul.mubr.bf16.gmra.mrb[4].mxu1 %v1568_v55 }
  0x62   : > { %781 = vmatprep.mubr.bf16.mxu0 %v1569_v56  ;;  %845 = vmatprep.mubr.bf16.mxu1 %v1571_v57 }
  0x69   : > { %782 = vmatmul.mubr.bf16.gmra.mrb[8].mxu0 %v1573_v58  ;;  %846 = vmatmul.mubr.bf16.gmra.mrb[8].mxu1 %v1574_v59 }
  0x6a   : > { %789 = vmatprep.mubr.bf16.mxu0 %v1575_v60  ;;  %853 = vmatprep.mubr.bf16.mxu1 %v1577_v61 }
  0x71   : > { %790 = vmatmul.mubr.bf16.gmra.mrb[12].mxu0 %v1579_v62  ;;  %854 = vmatmul.mubr.bf16.gmra.mrb[12].mxu1 %v1580_v63 }
  0x72   : > { %797 = vmatprep.mubr.bf16.mxu0 %v1581_v0  ;;  %861 = vmatprep.mubr.bf16.mxu1 %v1583_v1 }
  0x79   : > { %798 = vmatmul.mubr.bf16.gmra.mrb[16].mxu0 %v1585_v2  ;;  %862 = vmatmul.mubr.bf16.gmra.mrb[16].mxu1 %v1586_v3 }
  0x7a   : > { %805 = vmatprep.mubr.bf16.mxu0 %v1587_v4  ;;  %869 = vmatprep.mubr.bf16.mxu1 %v1589_v5 }
  0x81   : > { %806 = vmatmul.mubr.bf16.gmra.mrb[20].mxu0 %v1591_v6  ;;  %870 = vmatmul.mubr.bf16.gmra.mrb[20].mxu1 %v1592_v7 }
  0x82   : > { %813 = vmatprep.mubr.bf16.mxu0 %v1593_v8  ;;  %877 = vmatprep.mubr.bf16.mxu1 %v1595_v9 }
  0x89   : > { %814 = vmatmul.mubr.bf16.gmra.mrb[24].mxu0 %v1597_v10  ;;  %878 = vmatmul.mubr.bf16.gmra.mrb[24].mxu1 %v1598_v11 }
  0x8a   : > { %821 = vmatprep.mubr.bf16.mxu0 %v1599_v12  ;;  %885 = vmatprep.mubr.bf16.mxu1 %v1601_v13 }
  0x91   : > { %822 = vmatmul.mubr.bf16.gmra.mrb[28].mxu0 %v1603_v14  ;;  %886 = vmatmul.mubr.bf16.gmra.mrb[28].mxu1 %v1604_v15 }
 0x12c   : > { %v1372_v16 = vpop.f32.mrb[0].mxu0  ;;  %v1420_v17 = vpop.f32.mrb[0].mxu1 }
 0x12d   : > { %v1373_v18 = vpop.f32.mrb[1].mxu0  ;;  %v1421_v19 = vpop.f32.mrb[1].mxu1 }
 0x12e   : > { %v1874_v20 = vadd.f32 %v1373_v18, %v1372_v16  ;;  %v1876_v21 = vadd.f32 %v1421_v19, %v1420_v17  ;;  %v1375_v22 = vpop.f32.mrb[2].mxu0  ;;  %v1423_v23 = vpop.f32.mrb[2].mxu1 }
 0x12f   : > { %v1376_v24 = vpop.f32.mrb[3].mxu0  ;;  %v1424_v25 = vpop.f32.mrb[3].mxu1 }
 0x130   : > { %v1878_v26 = vadd.f32 %v1376_v24, %v1375_v22  ;;  %v1880_v27 = vadd.f32 %v1424_v25, %v1423_v23  ;;  %898 = vst [vmem:[%s1821_s15] sm:$0xff] (!%p1350_p12), %v1874_v20  ;;  %914 = vst [vmem:[%s1821_s15 + $0x80] sm:$0xff] (!%p1350_p12), %v1876_v21 }
 0x132   : > { %899 = vst [vmem:[%s1821_s15 + $0x8] sm:$0xff] (!%p1350_p12), %v1878_v26  ;;  %915 = vst [vmem:[%s1821_s15 + $0x88] sm:$0xff] (!%p1350_p12), %v1880_v27 }
 0x134   : > { %v1378_v28 = vpop.f32.mrb[4].mxu0  ;;  %v1426_v29 = vpop.f32.mrb[4].mxu1 }
 0x135   : > { %v1379_v30 = vpop.f32.mrb[5].mxu0  ;;  %v1427_v31 = vpop.f32.mrb[5].mxu1 }
 0x136   : > { %v1882_v32 = vadd.f32 %v1379_v30, %v1378_v28  ;;  %v1884_v33 = vadd.f32 %v1427_v31, %v1426_v29  ;;  %v1381_v34 = vpop.f32.mrb[6].mxu0  ;;  %v1429_v35 = vpop.f32.mrb[6].mxu1 }
 0x137   : > { %v1382_v36 = vpop.f32.mrb[7].mxu0  ;;  %v1430_v37 = vpop.f32.mrb[7].mxu1 }
 0x138   : > { %v1886_v38 = vadd.f32 %v1382_v36, %v1381_v34  ;;  %v1888_v39 = vadd.f32 %v1430_v37, %v1429_v35  ;;  %900 = vst [vmem:[%s1821_s15 + $0x10] sm:$0xff] (!%p1350_p12), %v1882_v32  ;;  %916 = vst [vmem:[%s1821_s15 + $0x90] sm:$0xff] (!%p1350_p12), %v1884_v33 }
 0x13a   : > { %901 = vst [vmem:[%s1821_s15 + $0x18] sm:$0xff] (!%p1350_p12), %v1886_v38  ;;  %917 = vst [vmem:[%s1821_s15 + $0x98] sm:$0xff] (!%p1350_p12), %v1888_v39 }
 0x13c   : > { %v1384_v40 = vpop.f32.mrb[8].mxu0  ;;  %v1432_v41 = vpop.f32.mrb[8].mxu1 }
 0x13d   : > { %v1385_v42 = vpop.f32.mrb[9].mxu0  ;;  %v1433_v43 = vpop.f32.mrb[9].mxu1 }
 0x13e   : > { %v1890_v44 = vadd.f32 %v1385_v42, %v1384_v40  ;;  %v1892_v45 = vadd.f32 %v1433_v43, %v1432_v41  ;;  %v1387_v46 = vpop.f32.mrb[10].mxu0  ;;  %v1435_v47 = vpop.f32.mrb[10].mxu1 }
 0x13f   : > { %v1388_v48 = vpop.f32.mrb[11].mxu0  ;;  %v1436_v49 = vpop.f32.mrb[11].mxu1 }
 0x140   : > { %v1894_v50 = vadd.f32 %v1388_v48, %v1387_v46  ;;  %v1896_v51 = vadd.f32 %v1436_v49, %v1435_v47  ;;  %902 = vst [vmem:[%s1821_s15 + $0x20] sm:$0xff] (!%p1350_p12), %v1890_v44  ;;  %918 = vst [vmem:[%s1821_s15 + $0xa0] sm:$0xff] (!%p1350_p12), %v1892_v45 }
 0x142   : > { %903 = vst [vmem:[%s1821_s15 + $0x28] sm:$0xff] (!%p1350_p12), %v1894_v50  ;;  %919 = vst [vmem:[%s1821_s15 + $0xa8] sm:$0xff] (!%p1350_p12), %v1896_v51 }
 0x144   : > { %v1390_v52 = vpop.f32.mrb[12].mxu0  ;;  %v1438_v53 = vpop.f32.mrb[12].mxu1 }
 0x145   : > { %v1391_v54 = vpop.f32.mrb[13].mxu0  ;;  %v1439_v55 = vpop.f32.mrb[13].mxu1 }
 0x146   : > { %v1898_v56 = vadd.f32 %v1391_v54, %v1390_v52  ;;  %v1900_v57 = vadd.f32 %v1439_v55, %v1438_v53  ;;  %v1393_v58 = vpop.f32.mrb[14].mxu0  ;;  %v1441_v59 = vpop.f32.mrb[14].mxu1 }
 0x147   : > { %v1394_v60 = vpop.f32.mrb[15].mxu0  ;;  %v1442_v61 = vpop.f32.mrb[15].mxu1 }
 0x148   : > { %v1902_v62 = vadd.f32 %v1394_v60, %v1393_v58  ;;  %v1904_v63 = vadd.f32 %v1442_v61, %v1441_v59  ;;  %904 = vst [vmem:[%s1821_s15 + $0x30] sm:$0xff] (!%p1350_p12), %v1898_v56  ;;  %920 = vst [vmem:[%s1821_s15 + $0xb0] sm:$0xff] (!%p1350_p12), %v1900_v57 }
 0x14a   : > { %905 = vst [vmem:[%s1821_s15 + $0x38] sm:$0xff] (!%p1350_p12), %v1902_v62  ;;  %921 = vst [vmem:[%s1821_s15 + $0xb8] sm:$0xff] (!%p1350_p12), %v1904_v63 }
 0x14c   : > { %v1396_v0 = vpop.f32.mrb[16].mxu0  ;;  %v1444_v1 = vpop.f32.mrb[16].mxu1 }
 0x14d   : > { %v1397_v2 = vpop.f32.mrb[17].mxu0  ;;  %v1445_v3 = vpop.f32.mrb[17].mxu1 }
 0x14e   : > { %v1906_v4 = vadd.f32 %v1397_v2, %v1396_v0  ;;  %v1908_v5 = vadd.f32 %v1445_v3, %v1444_v1  ;;  %v1399_v6 = vpop.f32.mrb[18].mxu0  ;;  %v1447_v7 = vpop.f32.mrb[18].mxu1 }
 0x14f   : > { %v1400_v8 = vpop.f32.mrb[19].mxu0  ;;  %v1448_v9 = vpop.f32.mrb[19].mxu1 }
 0x150   : > { %v1910_v10 = vadd.f32 %v1400_v8, %v1399_v6  ;;  %v1912_v11 = vadd.f32 %v1448_v9, %v1447_v7  ;;  %906 = vst [vmem:[%s1821_s15 + $0x40] sm:$0xff] (!%p1350_p12), %v1906_v4  ;;  %922 = vst [vmem:[%s1821_s15 + $0xc0] sm:$0xff] (!%p1350_p12), %v1908_v5 }
 0x152   : > { %907 = vst [vmem:[%s1821_s15 + $0x48] sm:$0xff] (!%p1350_p12), %v1910_v10  ;;  %923 = vst [vmem:[%s1821_s15 + $0xc8] sm:$0xff] (!%p1350_p12), %v1912_v11 }
 0x154   : > { %v1402_v12 = vpop.f32.mrb[20].mxu0  ;;  %v1450_v13 = vpop.f32.mrb[20].mxu1 }
 0x155   : > { %v1403_v14 = vpop.f32.mrb[21].mxu0  ;;  %v1451_v15 = vpop.f32.mrb[21].mxu1 }
 0x156   : > { %v1914_v16 = vadd.f32 %v1403_v14, %v1402_v12  ;;  %v1916_v17 = vadd.f32 %v1451_v15, %v1450_v13  ;;  %v1405_v18 = vpop.f32.mrb[22].mxu0  ;;  %v1453_v19 = vpop.f32.mrb[22].mxu1 }
 0x157   : > { %v1406_v22 = vpop.f32.mrb[23].mxu0  ;;  %v1454_v23 = vpop.f32.mrb[23].mxu1 }
 0x158   : > { %v1918_v24 = vadd.f32 %v1406_v22, %v1405_v18  ;;  %v1920_v25 = vadd.f32 %v1454_v23, %v1453_v19  ;;  %908 = vst [vmem:[%s1821_s15 + $0x50] sm:$0xff] (!%p1350_p12), %v1914_v16  ;;  %924 = vst [vmem:[%s1821_s15 + $0xd0] sm:$0xff] (!%p1350_p12), %v1916_v17 }
 0x15a   : > { %909 = vst [vmem:[%s1821_s15 + $0x58] sm:$0xff] (!%p1350_p12), %v1918_v24  ;;  %925 = vst [vmem:[%s1821_s15 + $0xd8] sm:$0xff] (!%p1350_p12), %v1920_v25 }
 0x15c   : > { %v1408_v28 = vpop.f32.mrb[24].mxu0  ;;  %v1456_v29 = vpop.f32.mrb[24].mxu1 }
 0x15d   : > { %v1409_v30 = vpop.f32.mrb[25].mxu0  ;;  %v1457_v31 = vpop.f32.mrb[25].mxu1 }
 0x15e   : > { %v1922_v34 = vadd.f32 %v1409_v30, %v1408_v28  ;;  %v1924_v35 = vadd.f32 %v1457_v31, %v1456_v29  ;;  %v1411_v36 = vpop.f32.mrb[26].mxu0  ;;  %v1459_v37 = vpop.f32.mrb[26].mxu1 }
 0x15f   : > { %v1412_v40 = vpop.f32.mrb[27].mxu0  ;;  %v1460_v41 = vpop.f32.mrb[27].mxu1 }
 0x160   : > { %v1926_v42 = vadd.f32 %v1412_v40, %v1411_v36  ;;  %v1928_v43 = vadd.f32 %v1460_v41, %v1459_v37  ;;  %910 = vst [vmem:[%s1821_s15 + $0x60] sm:$0xff] (!%p1350_p12), %v1922_v34  ;;  %926 = vst [vmem:[%s1821_s15 + $0xe0] sm:$0xff] (!%p1350_p12), %v1924_v35 }
 0x162   : > { %897 = sbr.rel (%p1350_p12) target bundleno = 363 (0x16b), region = 74  ;;  %911 = vst [vmem:[%s1821_s15 + $0x68] sm:$0xff] (!%p1350_p12), %v1926_v42  ;;  %927 = vst [vmem:[%s1821_s15 + $0xe8] sm:$0xff] (!%p1350_p12), %v1928_v43 }
 0x164   : > { %v1414_v46 = vpop.f32.mrb[28].mxu0  ;;  %v1462_v47 = vpop.f32.mrb[28].mxu1 }
 0x165   : > { %v1415_v48 = vpop.f32.mrb[29].mxu0  ;;  %v1463_v49 = vpop.f32.mrb[29].mxu1 }
 0x166   : > { %v1930_v52 = vadd.f32 %v1415_v48, %v1414_v46  ;;  %v1932_v53 = vadd.f32 %v1463_v49, %v1462_v47  ;;  %v1417_v54 = vpop.f32.mrb[30].mxu0  ;;  %v1465_v55 = vpop.f32.mrb[30].mxu1 }
 0x167   : > { %v1418_v58 = vpop.f32.mrb[31].mxu0  ;;  %v1466_v59 = vpop.f32.mrb[31].mxu1 }
 0x168   : > { %v1934_v60 = vadd.f32 %v1418_v58, %v1417_v54  ;;  %v1936_v61 = vadd.f32 %v1466_v59, %v1465_v55  ;;  %912 = vst [vmem:[%s1821_s15 + $0x70] sm:$0xff] (!%p1350_p12), %v1930_v52  ;;  %928 = vst [vmem:[%s1821_s15 + $0xf0] sm:$0xff] (!%p1350_p12), %v1932_v53 }
 0x16a   : > { %913 = vst [vmem:[%s1821_s15 + $0x78] sm:$0xff] %v1934_v60  ;;  %929 = vst [vmem:[%s1821_s15 + $0xf8] sm:$0xff] %v1936_v61 }
 0x16b PF: > { %p1351_p13 = scmp.le.s32.totalorder %s1643_s14, 0 }
 0x16c   : > { %v934_v0 = vld [vmem:[%s1821_s15] sm:$0xff] (!%p1351_p13)  ;;  %v935_v1 = vld [vmem:[%s1821_s15 + $0x8] sm:$0xff] (!%p1351_p13)  ;;  %v936_v2 = vld [vmem:[%s1821_s15 + $0x10] sm:$0xff] (!%p1351_p13) }
 0x16d   : > { %933 = sbr.rel (%p1351_p13) target bundleno = 383 (0x17f), region = 78  ;;  %v966_v3 = vadd.f32 (!%p1351_p13), %v1874_v20, %v934_v0  ;;  %v967_v6 = vadd.f32 (!%p1351_p13), %v1878_v26, %v935_v1  ;;  %v968_v7 = vadd.f32 (!%p1351_p13), %v1882_v32, %v936_v2  ;;  %v937_v8 = vld [vmem:[%s1821_s15 + $0x18] sm:$0xff] (!%p1351_p13)  ;;  %v938_v9 = vld [vmem:[%s1821_s15 + $0x20] sm:$0xff] (!%p1351_p13)  ;;  %v939_v12 = vld [vmem:[%s1821_s15 + $0x28] sm:$0xff] (!%p1351_p13) }
 0x16e   : > { %v969_v13 = vadd.f32 (!%p1351_p13), %v1886_v38, %v937_v8  ;;  %v970_v14 = vadd.f32 (!%p1351_p13), %v1890_v44, %v938_v9  ;;  %v971_v15 = vadd.f32 (!%p1351_p13), %v1894_v50, %v939_v12  ;;  %v940_v20 = vld [vmem:[%s1821_s15 + $0x30] sm:$0xff] (!%p1351_p13)  ;;  %v941_v18 = vld [vmem:[%s1821_s15 + $0x38] sm:$0xff] (!%p1351_p13)  ;;  %v942_v26 = vld [vmem:[%s1821_s15 + $0x40] sm:$0xff] (!%p1351_p13) }
 0x16f   : > { %998 = vst [vmem:[%s1821_s15] sm:$0xff] (!%p1351_p13), %v966_v3  ;;  %999 = vst [vmem:[%s1821_s15 + $0x8] sm:$0xff] (!%p1351_p13), %v967_v6  ;;  %v972_v32 = vadd.f32 (!%p1351_p13), %v1898_v56, %v940_v20  ;;  %v973_v38 = vadd.f32 (!%p1351_p13), %v1902_v62, %v941_v18  ;;  %v974_v44 = vadd.f32 (!%p1351_p13), %v1906_v4, %v942_v26  ;;  %v943_v19 = vld [vmem:[%s1821_s15 + $0x48] sm:$0xff] (!%p1351_p13)  ;;  %v944_v50 = vld [vmem:[%s1821_s15 + $0x50] sm:$0xff] (!%p1351_p13) }
 0x170   : > { %1000 = vst [vmem:[%s1821_s15 + $0x10] sm:$0xff] (!%p1351_p13), %v968_v7  ;;  %v945_v22 = vld [vmem:[%s1821_s15 + $0x58] sm:$0xff] (!%p1351_p13)  ;;  %1001 = vst [vmem:[%s1821_s15 + $0x18] sm:$0xff] (!%p1351_p13), %v969_v13  ;;  %v975_v23 = vadd.f32 (!%p1351_p13), %v1910_v10, %v943_v19  ;;  %v976_v56 = vadd.f32 (!%p1351_p13), %v1914_v16, %v944_v50  ;;  %v946_v28 = vld [vmem:[%s1821_s15 + $0x60] sm:$0xff] (!%p1351_p13) }
 0x171   : > { %1002 = vst [vmem:[%s1821_s15 + $0x20] sm:$0xff] (!%p1351_p13), %v970_v14  ;;  %1003 = vst [vmem:[%s1821_s15 + $0x28] sm:$0xff] (!%p1351_p13), %v971_v15  ;;  %v977_v62 = vadd.f32 (!%p1351_p13), %v1918_v24, %v945_v22  ;;  %v947_v4 = vld [vmem:[%s1821_s15 + $0x68] sm:$0xff] (!%p1351_p13)  ;;  %v948_v29 = vld [vmem:[%s1821_s15 + $0x70] sm:$0xff] (!%p1351_p13)  ;;  %v978_v30 = vadd.f32 (!%p1351_p13), %v1922_v34, %v946_v28 }
 0x172   : > { %1004 = vst [vmem:[%s1821_s15 + $0x30] sm:$0xff] (!%p1351_p13), %v972_v32  ;;  %1005 = vst [vmem:[%s1821_s15 + $0x38] sm:$0xff] (!%p1351_p13), %v973_v38  ;;  %v979_v10 = vadd.f32 (!%p1351_p13), %v1926_v42, %v947_v4  ;;  %v980_v16 = vadd.f32 (!%p1351_p13), %v1930_v52, %v948_v29  ;;  %v949_v31 = vld [vmem:[%s1821_s15 + $0x78] sm:$0xff] (!%p1351_p13)  ;;  %v950_v24 = vld [vmem:[%s1821_s15 + $0x80] sm:$0xff] (!%p1351_p13) }
 0x173   : > { %1006 = vst [vmem:[%s1821_s15 + $0x40] sm:$0xff] (!%p1351_p13), %v974_v44  ;;  %v951_v36 = vld [vmem:[%s1821_s15 + $0x88] sm:$0xff] (!%p1351_p13)  ;;  %1007 = vst [vmem:[%s1821_s15 + $0x48] sm:$0xff] (!%p1351_p13), %v975_v23  ;;  %v981_v37 = vadd.f32 (!%p1351_p13), %v1934_v60, %v949_v31  ;;  %v982_v34 = vadd.f32 (!%p1351_p13), %v1876_v21, %v950_v24  ;;  %v952_v41 = vld [vmem:[%s1821_s15 + $0x90] sm:$0xff] (!%p1351_p13) }
 0x174   : > { %1008 = vst [vmem:[%s1821_s15 + $0x50] sm:$0xff] %v976_v56  ;;  %1009 = vst [vmem:[%s1821_s15 + $0x58] sm:$0xff] %v977_v62  ;;  %v983_v40 = vadd.f32 %v1880_v27, %v951_v36  ;;  %v953_v42 = vld [vmem:[%s1821_s15 + $0x98] sm:$0xff]  ;;  %v954_v46 = vld [vmem:[%s1821_s15 + $0xa0] sm:$0xff]  ;;  %v984_v47 = vadd.f32 %v1884_v33, %v952_v41 }
 0x175   : > { %1010 = vst [vmem:[%s1821_s15 + $0x60] sm:$0xff] %v978_v30  ;;  %1011 = vst [vmem:[%s1821_s15 + $0x68] sm:$0xff] %v979_v10  ;;  %v985_v48 = vadd.f32 %v1888_v39, %v953_v42  ;;  %v986_v21 = vadd.f32 %v1892_v45, %v954_v46  ;;  %v955_v49 = vld [vmem:[%s1821_s15 + $0xa8] sm:$0xff]  ;;  %v956_v27 = vld [vmem:[%s1821_s15 + $0xb0] sm:$0xff] }
 0x176   : > { %1012 = vst [vmem:[%s1821_s15 + $0x70] sm:$0xff] %v980_v16  ;;  %v957_v52 = vld [vmem:[%s1821_s15 + $0xb8] sm:$0xff]  ;;  %1013 = vst [vmem:[%s1821_s15 + $0x78] sm:$0xff] %v981_v37  ;;  %v987_v54 = vadd.f32 %v1896_v51, %v955_v49  ;;  %v988_v33 = vadd.f32 %v1900_v57, %v956_v27  ;;  %v958_v55 = vld [vmem:[%s1821_s15 + $0xc0] sm:$0xff] }
 0x177   : > { %1014 = vst [vmem:[%s1821_s15 + $0x80] sm:$0xff] %v982_v34  ;;  %1015 = vst [vmem:[%s1821_s15 + $0x88] sm:$0xff] %v983_v40  ;;  %v989_v39 = vadd.f32 %v1904_v63, %v957_v52  ;;  %v959_v45 = vld [vmem:[%s1821_s15 + $0xc8] sm:$0xff]  ;;  %v960_v58 = vld [vmem:[%s1821_s15 + $0xd0] sm:$0xff]  ;;  %v990_v59 = vadd.f32 %v1908_v5, %v958_v55 }
 0x178   : > { %1016 = vst [vmem:[%s1821_s15 + $0x90] sm:$0xff] %v984_v47  ;;  %1017 = vst [vmem:[%s1821_s15 + $0x98] sm:$0xff] %v985_v48  ;;  %v991_v51 = vadd.f32 %v1912_v11, %v959_v45  ;;  %v992_v57 = vadd.f32 %v1916_v17, %v960_v58  ;;  %v961_v60 = vld [vmem:[%s1821_s15 + $0xd8] sm:$0xff]  ;;  %v962_v63 = vld [vmem:[%s1821_s15 + $0xe0] sm:$0xff] }
 0x179   : > { %1018 = vst [vmem:[%s1821_s15 + $0xa0] sm:$0xff] %v986_v21  ;;  %v963_v0 = vld [vmem:[%s1821_s15 + $0xe8] sm:$0xff]  ;;  %1019 = vst [vmem:[%s1821_s15 + $0xa8] sm:$0xff] %v987_v54  ;;  %v993_v1 = vadd.f32 %v1920_v25, %v961_v60  ;;  %v994_v5 = vadd.f32 %v1924_v35, %v962_v63  ;;  %v964_v11 = vld [vmem:[%s1821_s15 + $0xf0] sm:$0xff] }
 0x17a   : > { %1020 = vst [vmem:[%s1821_s15 + $0xb0] sm:$0xff] %v988_v33  ;;  %1021 = vst [vmem:[%s1821_s15 + $0xb8] sm:$0xff] %v989_v39  ;;  %v995_v2 = vadd.f32 %v1928_v43, %v963_v0  ;;  %v965_v3 = vld [vmem:[%s1821_s15 + $0xf8] sm:$0xff]  ;;  %v996_v17 = vadd.f32 %v1932_v53, %v964_v11 }
 0x17b   : > { %1022 = vst [vmem:[%s1821_s15 + $0xc0] sm:$0xff] %v990_v59  ;;  %1023 = vst [vmem:[%s1821_s15 + $0xc8] sm:$0xff] %v991_v51  ;;  %v997_v6 = vadd.f32 %v1936_v61, %v965_v3 }
 0x17c   : > { %1024 = vst [vmem:[%s1821_s15 + $0xd0] sm:$0xff] %v992_v57  ;;  %1025 = vst [vmem:[%s1821_s15 + $0xd8] sm:$0xff] %v993_v1 }
 0x17d   : > { %1026 = vst [vmem:[%s1821_s15 + $0xe0] sm:$0xff] %v994_v5  ;;  %1027 = vst [vmem:[%s1821_s15 + $0xe8] sm:$0xff] %v995_v2 }
 0x17e   : > { %1028 = vst [vmem:[%s1821_s15 + $0xf0] sm:$0xff] %v996_v17  ;;  %1029 = vst [vmem:[%s1821_s15 + $0xf8] sm:$0xff] %v997_v6 }
 0x17f PF: > { %p1352_p0 = scmp.ne.s32.totalorder %s1643_s14, 4 }
 0x180   : > { %v2105_v35 = vld [vmem:[%s2225_s2] ss:$0 sm:$0xff] (!%p1352_p0)  ;;  %v1047_v30 = vld [vmem:[%s1821_s15 + $0x68] sm:$0xff] (!%p1352_p0)  ;;  %v1048_v36 = vld [vmem:[%s1821_s15 + $0x70] sm:$0xff] (!%p1352_p0) }
 0x181   : > { %1033 = sbr.rel (%p1352_p0) target bundleno = 406 (0x196), region = 82  ;;  %v1034_v25 = vld [vmem:[%s1821_s15] sm:$0xff] (!%p1352_p0)  ;;  %v1035_v43 = vld [vmem:[%s1821_s15 + $0x8] sm:$0xff] (!%p1352_p0)  ;;  %v1049_v37 = vld [vmem:[%s1821_s15 + $0x78] sm:$0xff] (!%p1352_p0)  ;;  %v1086_v49 = vadd.f32 (!%p1352_p0), %v2105_v35, %v1047_v30  ;;  %v1087_v27 = vadd.f32 (!%p1352_p0), %v2105_v35, %v1048_v36 }
 0x182   : > { %v1073_v53 = vadd.f32 (!%p1352_p0), %v2105_v35, %v1034_v25  ;;  %v1074_v61 = vadd.f32 (!%p1352_p0), %v2105_v35, %v1035_v43  ;;  %v1036_v7 = vld [vmem:[%s1821_s15 + $0x10] sm:$0xff] (!%p1352_p0)  ;;  %v1037_v8 = vld [vmem:[%s1821_s15 + $0x18] sm:$0xff] (!%p1352_p0)  ;;  %v1046_v29 = vld [vmem:[%s1821_s15 + $0x60] sm:$0xff] (!%p1352_p0)  ;;  %v1088_v58 = vadd.f32 (!%p1352_p0), %v2105_v35, %v1049_v37 }
 0x183   : > { %v1038_v9 = vld [vmem:[%s1821_s15 + $0x20] sm:$0xff] (!%p1352_p0)  ;;  %v1075_v12 = vadd.f32 (!%p1352_p0), %v2105_v35, %v1036_v7  ;;  %v1076_v13 = vadd.f32 (!%p1352_p0), %v2105_v35, %v1037_v8  ;;  %v1039_v15 = vld [vmem:[%s1821_s15 + $0x28] sm:$0xff] (!%p1352_p0)  ;;  %v1085_v42 = vadd.f32 (!%p1352_p0), %v2105_v35, %v1046_v29  ;;  %v1052_v52 = vld [vmem:[%s1821_s15 + $0x90] sm:$0xff] (!%p1352_p0)  ;;  %v1118_v57 = vmax.f32 (!%p1352_p0), %v1086_v49, 0.0 }
 0x184   : > { %v1077_v14 = vadd.f32 (!%p1352_p0), %v2105_v35, %v1038_v9  ;;  %v1040_v20 = vld [vmem:[%s1821_s15 + $0x30] sm:$0xff] (!%p1352_p0)  ;;  %v1041_v18 = vld [vmem:[%s1821_s15 + $0x38] sm:$0xff] (!%p1352_p0)  ;;  %v1105_v26 = vmax.f32 (!%p1352_p0), %v1073_v53, 0.0  ;;  %v1106_v32 = vmax.f32 (!%p1352_p0), %v1074_v61, 0.0  ;;  %v1078_v38 = vadd.f32 (!%p1352_p0), %v2105_v35, %v1039_v15  ;;  %v1050_v46 = vld [vmem:[%s1821_s15 + $0x80] sm:$0xff] (!%p1352_p0) }
 0x185   : > { %v1079_v44 = vadd.f32 (!%p1352_p0), %v2105_v35, %v1040_v20  ;;  %v1042_v19 = vld [vmem:[%s1821_s15 + $0x40] sm:$0xff] (!%p1352_p0)  ;;  %v1043_v50 = vld [vmem:[%s1821_s15 + $0x48] sm:$0xff] (!%p1352_p0)  ;;  %v1107_v23 = vmax.f32 (!%p1352_p0), %v1075_v12, 0.0  ;;  %v1108_v56 = vmax.f32 (!%p1352_p0), %v1076_v13, 0.0  ;;  %v1080_v28 = vadd.f32 (!%p1352_p0), %v2105_v35, %v1041_v18  ;;  %v1053_v54 = vld [vmem:[%s1821_s15 + $0x98] sm:$0xff] (!%p1352_p0)  ;;  %1150 = vst [vmem:[%s1821_s15 + $0x68] sm:$0xff] (!%p1352_p0), %v1118_v57 }
 0x186   : > { %v1044_v22 = vld [vmem:[%s1821_s15 + $0x50] sm:$0xff] (!%p1352_p0)  ;;  %v1109_v62 = vmax.f32 (!%p1352_p0), %v1077_v14, 0.0  ;;  %v1045_v4 = vld [vmem:[%s1821_s15 + $0x58] sm:$0xff] (!%p1352_p0)  ;;  %1137 = vst [vmem:[%s1821_s15] sm:$0xff] (!%p1352_p0), %v1105_v26  ;;  %1138 = vst [vmem:[%s1821_s15 + $0x8] sm:$0xff] (!%p1352_p0), %v1106_v32  ;;  %v1110_v10 = vmax.f32 (!%p1352_p0), %v1078_v38, 0.0  ;;  %v1081_v31 = vadd.f32 (!%p1352_p0), %v2105_v35, %v1042_v19  ;;  %v1082_v24 = vadd.f32 (!%p1352_p0), %v2105_v35, %v1043_v50 }
 0x187   : > { %v1111_v16 = vmax.f32 (!%p1352_p0), %v1079_v44, 0.0  ;;  %1139 = vst [vmem:[%s1821_s15 + $0x10] sm:$0xff] (!%p1352_p0), %v1107_v23  ;;  %1140 = vst [vmem:[%s1821_s15 + $0x18] sm:$0xff] (!%p1352_p0), %v1108_v56  ;;  %v1112_v34 = vmax.f32 (!%p1352_p0), %v1080_v28, 0.0  ;;  %v1083_v40 = vadd.f32 (!%p1352_p0), %v2105_v35, %v1044_v22  ;;  %v1084_v41 = vadd.f32 (!%p1352_p0), %v2105_v35, %v1045_v4  ;;  %v1051_v47 = vld [vmem:[%s1821_s15 + $0x88] sm:$0xff] (!%p1352_p0)  ;;  %v1054_v33 = vld [vmem:[%s1821_s15 + $0xa0] sm:$0xff] (!%p1352_p0) }
 0x188   : > { %1141 = vst [vmem:[%s1821_s15 + $0x20] sm:$0xff] %v1109_v62  ;;  %1142 = vst [vmem:[%s1821_s15 + $0x28] sm:$0xff] %v1110_v10  ;;  %v1113_v48 = vmax.f32 %v1081_v31, 0.0  ;;  %v1114_v21 = vmax.f32 %v1082_v24, 0.0  ;;  %v1117_v45 = vmax.f32 %v1085_v42, 0.0  ;;  %v1055_v59 = vld [vmem:[%s1821_s15 + $0xa8] sm:$0xff]  ;;  %v1089_v63 = vadd.f32 %v2105_v35, %v1050_v46 }
 0x189   : > { %1143 = vst [vmem:[%s1821_s15 + $0x30] sm:$0xff] %v1111_v16  ;;  %1144 = vst [vmem:[%s1821_s15 + $0x38] sm:$0xff] %v1112_v34  ;;  %v1115_v39 = vmax.f32 %v1083_v40, 0.0  ;;  %v1116_v55 = vmax.f32 %v1084_v41, 0.0  ;;  %v1056_v51 = vld [vmem:[%s1821_s15 + $0xb0] sm:$0xff]  ;;  %v1119_v60 = vmax.f32 %v1087_v27, 0.0  ;;  %v1090_v0 = vadd.f32 %v2105_v35, %v1051_v47 }
 0x18a   : > { %1145 = vst [vmem:[%s1821_s15 + $0x40] sm:$0xff] %v1113_v48  ;;  %1146 = vst [vmem:[%s1821_s15 + $0x48] sm:$0xff] %v1114_v21  ;;  %v1057_v1 = vld [vmem:[%s1821_s15 + $0xb8] sm:$0xff]  ;;  %v1120_v5 = vmax.f32 %v1088_v58, 0.0  ;;  %v1091_v2 = vadd.f32 %v2105_v35, %v1052_v52  ;;  %v1092_v11 = vadd.f32 %v2105_v35, %v1053_v54  ;;  %v1093_v3 = vadd.f32 %v2105_v35, %v1054_v33  ;;  %v1058_v17 = vld [vmem:[%s1821_s15 + $0xc0] sm:$0xff] }
 0x18b   : > { %1147 = vst [vmem:[%s1821_s15 + $0x50] sm:$0xff] %v1115_v39  ;;  %1148 = vst [vmem:[%s1821_s15 + $0x58] sm:$0xff] %v1116_v55  ;;  %v1059_v6 = vld [vmem:[%s1821_s15 + $0xc8] sm:$0xff]  ;;  %v1121_v25 = vmax.f32 %v1089_v63, 0.0  ;;  %v1122_v43 = vmax.f32 %v1090_v0, 0.0  ;;  %v1094_v53 = vadd.f32 %v2105_v35, %v1055_v59  ;;  %v1095_v61 = vadd.f32 %v2105_v35, %v1056_v51  ;;  %v1060_v7 = vld [vmem:[%s1821_s15 + $0xd0] sm:$0xff] }
 0x18c   : > { %1149 = vst [vmem:[%s1821_s15 + $0x60] sm:$0xff] %v1117_v45  ;;  %1151 = vst [vmem:[%s1821_s15 + $0x70] sm:$0xff] %v1119_v60  ;;  %v1061_v8 = vld [vmem:[%s1821_s15 + $0xd8] sm:$0xff]  ;;  %v1062_v9 = vld [vmem:[%s1821_s15 + $0xe0] sm:$0xff]  ;;  %v1123_v12 = vmax.f32 %v1091_v2, 0.0  ;;  %v1124_v13 = vmax.f32 %v1092_v11, 0.0  ;;  %v1096_v15 = vadd.f32 %v2105_v35, %v1057_v1  ;;  %v1097_v38 = vadd.f32 %v2105_v35, %v1058_v17 }
 0x18d   : > { %1152 = vst [vmem:[%s1821_s15 + $0x78] sm:$0xff] %v1120_v5  ;;  %v1125_v14 = vmax.f32 %v1093_v3, 0.0  ;;  %v1063_v20 = vld [vmem:[%s1821_s15 + $0xe8] sm:$0xff]  ;;  %v1064_v18 = vld [vmem:[%s1821_s15 + $0xf0] sm:$0xff]  ;;  %1153 = vst [vmem:[%s1821_s15 + $0x80] sm:$0xff] %v1121_v25  ;;  %v1126_v26 = vmax.f32 %v1094_v53, 0.0  ;;  %v1098_v44 = vadd.f32 %v2105_v35, %v1059_v6  ;;  %v1099_v22 = vadd.f32 %v2105_v35, %v1060_v7 }
 0x18e   : > { %1154 = vst [vmem:[%s1821_s15 + $0x88] sm:$0xff] %v1122_v43  ;;  %v1127_v32 = vmax.f32 %v1095_v61, 0.0  ;;  %v1065_v19 = vld [vmem:[%s1821_s15 + $0xf8] sm:$0xff]  ;;  %1155 = vst [vmem:[%s1821_s15 + $0x90] sm:$0xff] %v1123_v12  ;;  %v1128_v50 = vmax.f32 %v1096_v15, 0.0  ;;  %v1100_v23 = vadd.f32 %v2105_v35, %v1061_v8  ;;  %v1101_v56 = vadd.f32 %v2105_v35, %v1062_v9 }
 0x18f   : > { %1156 = vst [vmem:[%s1821_s15 + $0x98] sm:$0xff] %v1124_v13  ;;  %1157 = vst [vmem:[%s1821_s15 + $0xa0] sm:$0xff] %v1125_v14  ;;  %v1129_v62 = vmax.f32 %v1097_v38, 0.0  ;;  %v1130_v28 = vmax.f32 %v1098_v44, 0.0  ;;  %v1102_v4 = vadd.f32 %v2105_v35, %v1063_v20  ;;  %v1103_v29 = vadd.f32 %v2105_v35, %v1064_v18 }
 0x190   : > { %1158 = vst [vmem:[%s1821_s15 + $0xa8] sm:$0xff] %v1126_v26  ;;  %1159 = vst [vmem:[%s1821_s15 + $0xb0] sm:$0xff] %v1127_v32  ;;  %v1131_v30 = vmax.f32 %v1099_v22, 0.0  ;;  %v1132_v10 = vmax.f32 %v1100_v23, 0.0  ;;  %v1133_v16 = vmax.f32 %v1101_v56, 0.0  ;;  %v1104_v31 = vadd.f32 %v2105_v35, %v1065_v19 }
 0x191   : > { %1160 = vst [vmem:[%s1821_s15 + $0xb8] sm:$0xff] %v1128_v50  ;;  %1161 = vst [vmem:[%s1821_s15 + $0xc0] sm:$0xff] %v1129_v62  ;;  %v1134_v24 = vmax.f32 %v1102_v4, 0.0  ;;  %v1135_v36 = vmax.f32 %v1103_v29, 0.0 }
 0x192   : > { %1162 = vst [vmem:[%s1821_s15 + $0xc8] sm:$0xff] %v1130_v28  ;;  %1163 = vst [vmem:[%s1821_s15 + $0xd0] sm:$0xff] %v1131_v30  ;;  %v1136_v37 = vmax.f32 %v1104_v31, 0.0 }
 0x193   : > { %1164 = vst [vmem:[%s1821_s15 + $0xd8] sm:$0xff] %v1132_v10  ;;  %1165 = vst [vmem:[%s1821_s15 + $0xe0] sm:$0xff] %v1133_v16 }
 0x194   : > { %1166 = vst [vmem:[%s1821_s15 + $0xe8] sm:$0xff] %v1134_v24  ;;  %1167 = vst [vmem:[%s1821_s15 + $0xf0] sm:$0xff] %v1135_v36 }
 0x195   : > { %1168 = vst [vmem:[%s1821_s15 + $0xf8] sm:$0xff] %v1136_v37 }
 0x196 PF: > { %s13_s18 = sadd.s32 1, %s1659_s18   ;;  %s2227_s12 = smov %s1639_s13 }
 0x197   : > { %p10_p1 = scmp.ge.s32.totalorder %s13_s18, 12   ;;  %s2228_s13 = smov %s1732_s25 }
 0x198   : > { %s2229_s14 = smov %s1651_s16  ;;  %s2230_s15 = smov %s1655_s17 }
 0x199   : > { %s2231_s16 = smov %s2234_s19  ;;  %s2232_s17 = smov %s2238_s20 }
 0x19a   :  { %12 = sbr.rel (!%p10_p1) target bundleno = 4 (0x4), region = 123 }

// kernel: update_block3d_forward.12
= control target key start
LH: loop header
LB: loop body
LE: loop exit
PB: predicated region body
PF: predicated region fallthrough
CT: control target
= control target key end

     0   :  { %s1681_s12 = smov 0   ;;  %s1683_s13 = smov 0   ;;  %s2223_s0 = inlined_call_operand.vmem [shape: bf16[512,3584], index: 0, kind: input, shape index: {}]   ;;  %s2224_s1 = inlined_call_operand.vmem [shape: bf16[3584,128], index: 1, kind: input, shape index: {}]   ;;  %s2225_s2 = inlined_call_operand.vmem [shape: f32[1,128], index: 2, kind: input, shape index: {}]   ;;  %s2226_s3 = inlined_call_operand.vmem [shape: f32[512,128], index: 3, kind: output, shape index: {}]  }
   0x1   :  { %s1685_s14 = smov 0   ;;  %s1687_s15 = smov 0  }
   0x2   :  { %s1689_s16 = smov 0   ;;  %s1691_s17 = smov 0  }
   0x3   :  { %s1693_s18 = smov 0  }
   0x4 LB: > { %s25_s19 = sadd.s32 1, %s1651_s16  ;;  %s32_s20 = sadd.s32 1, %s1655_s17  ;;  %s1659_s18 = sphi %s1693_s18, %s13_s18   ;;  %s1655_s17 = sphi %s1691_s17, %s2232_s17   ;;  %s1651_s16 = sphi %s1689_s16, %s2231_s16   ;;  %s1647_s15 = sphi %s1687_s15, %s2230_s15   ;;  %s1643_s14 = sphi %s1685_s14, %s2229_s14   ;;  %s1639_s13 = sphi %s1683_s13, %s2228_s13   ;;  %s1635_s12 = sphi %s1681_s12, %s2227_s12  }
   0x5   : > { %p26_p0 = scmp.ge.s32.totalorder %s25_s19, 14  ;;  %p48_p1 = scmp.ne.s32.totalorder %s1639_s13, %s1635_s12 }
   0x6   : > { %p49_p2 = scmp.eq.s32.totalorder %s1659_s18, 0  ;;  %s41_s24 = sadd.s32 1, %s1639_s13 }
   0x7   : > { %s2234_s19 = smov (%p26_p0, %s25_s19), 0  ;;  %s2236_s20 = smov (!%p26_p0, %s32_s20), %s1655_s17 }
   0x8   : > { %p50_p3 = por %p49_p2, %p48_p1  ;;  %p34_p4 = scmp.ge.s32.totalorder %s2236_s20, 2 }
   0x9   : > { %s37_s21 = ssub.s32 %s1651_s16, %s2234_s19  ;;  %p1290_p6 = scmp.ge.s32.totalorder %s1659_s18, 28 }
   0xa   : > { %s2238_s20 = smov (%p34_p4, %s2236_s20), 0 }
   0xb   : > { %s36_s22 = ssub.s32 %s1655_s17, %s2238_s20  ;;  %162 = sbr.rel (%p1290_p6) target bundleno = 42 (0x2a), region = 20 }
   0xc   : > { %s38_s23 = sor.u32 %s37_s21, %s36_s22 }
   0xd   : > { %p39_p5 = scmp.eq.s32.totalorder %s38_s23, 0 }
   0xf   : > { %s1732_s25 = scalar_select %p39_p5, %s1639_s13, %s41_s24  }
  0x12   : > { %165 = sbr.rel (!%p50_p3) target bundleno = 42 (0x2a), region = 24  ;;  %s167_s26 = sand.u32 (%p50_p3), 1, %s1639_s13  }
  0x13   : > { %s1293_s27 = sshll.u32 (%p50_p3), %s1651_s16, 1  ;;  %s1291_s28 = sshll.u32 (%p50_p3), %s167_s26, 8 }
  0x14   : > { %s1484_s29 = smul.u32 (%p50_p3), 896, %s1655_s17  ;;  %s1746_s8 = scalar_lea.vmem (%p50_p3), [#allocation2], %s1291_s28 }
  0x16   : > { %s173_s30 = sadd.s32 (%p50_p3), %s1484_s29, %s1293_s27 }
  0x17   : > { %s1295_s4 = sshll.u32 (%p50_p3), %s173_s30, 2 }
  0x18   : > { %s1741_s7 = scalar_lea.vmem (%p50_p3), %s2223_s0, %s1295_s4 }
  0x19   : > { %v265_v0 = vld [vmem:[%s1741_s7] sm:$0xff]  ;;  %v267_v1 = vld [vmem:[%s1741_s7 + $0x70] sm:$0xff] }
  0x1a   : > { %v269_v2 = vld [vmem:[%s1741_s7 + $0xe0] sm:$0xff]  ;;  %266 = vst [vmem:[%s1746_s8] sm:$0xff] %v265_v0  ;;  %268 = vst [vmem:[%s1746_s8 + $0x8] sm:$0xff] %v267_v1  ;;  %v271_v3 = vld [vmem:[%s1741_s7 + $0x150] sm:$0xff] }
  0x1b   : > { %270 = vst [vmem:[%s1746_s8 + $0x10] sm:$0xff] %v269_v2  ;;  %v273_v4 = vld [vmem:[%s1741_s7 + $0x1c0] sm:$0xff]  ;;  %v275_v5 = vld [vmem:[%s1741_s7 + $0x230] sm:$0xff]  ;;  %272 = vst [vmem:[%s1746_s8 + $0x18] sm:$0xff] %v271_v3 }
  0x1c   : > { %274 = vst [vmem:[%s1746_s8 + $0x20] sm:$0xff] %v273_v4  ;;  %276 = vst [vmem:[%s1746_s8 + $0x28] sm:$0xff] %v275_v5  ;;  %v277_v6 = vld [vmem:[%s1741_s7 + $0x2a0] sm:$0xff]  ;;  %v279_v7 = vld [vmem:[%s1741_s7 + $0x310] sm:$0xff] }
  0x1d   : > { %v281_v8 = vld [vmem:[%s1741_s7 + $0x380] sm:$0xff]  ;;  %278 = vst [vmem:[%s1746_s8 + $0x30] sm:$0xff] %v277_v6  ;;  %280 = vst [vmem:[%s1746_s8 + $0x38] sm:$0xff] %v279_v7  ;;  %v283_v9 = vld [vmem:[%s1741_s7 + $0x3f0] sm:$0xff] }
  0x1e   : > { %282 = vst [vmem:[%s1746_s8 + $0x40] sm:$0xff] %v281_v8  ;;  %v285_v10 = vld [vmem:[%s1741_s7 + $0x460] sm:$0xff]  ;;  %v287_v11 = vld [vmem:[%s1741_s7 + $0x4d0] sm:$0xff]  ;;  %284 = vst [vmem:[%s1746_s8 + $0x48] sm:$0xff] %v283_v9 }
  0x1f   : > { %286 = vst [vmem:[%s1746_s8 + $0x50] sm:$0xff] %v285_v10  ;;  %288 = vst [vmem:[%s1746_s8 + $0x58] sm:$0xff] %v287_v11  ;;  %v289_v12 = vld [vmem:[%s1741_s7 + $0x540] sm:$0xff]  ;;  %v291_v13 = vld [vmem:[%s1741_s7 + $0x5b0] sm:$0xff] }
  0x20   : > { %v293_v14 = vld [vmem:[%s1741_s7 + $0x620] sm:$0xff]  ;;  %290 = vst [vmem:[%s1746_s8 + $0x60] sm:$0xff] %v289_v12  ;;  %292 = vst [vmem:[%s1746_s8 + $0x68] sm:$0xff] %v291_v13  ;;  %v295_v15 = vld [vmem:[%s1741_s7 + $0x690] sm:$0xff] }
  0x21   : > { %294 = vst [vmem:[%s1746_s8 + $0x70] sm:$0xff] %v293_v14  ;;  %v297_v16 = vld [vmem:[%s1741_s7 + $0x700] sm:$0xff]  ;;  %v299_v17 = vld [vmem:[%s1741_s7 + $0x770] sm:$0xff]  ;;  %296 = vst [vmem:[%s1746_s8 + $0x78] sm:$0xff] %v295_v15 }
  0x22   : > { %298 = vst [vmem:[%s1746_s8 + $0x80] sm:$0xff] %v297_v16  ;;  %300 = vst [vmem:[%s1746_s8 + $0x88] sm:$0xff] %v299_v17  ;;  %v301_v18 = vld [vmem:[%s1741_s7 + $0x7e0] sm:$0xff]  ;;  %v303_v19 = vld [vmem:[%s1741_s7 + $0x850] sm:$0xff] }
  0x23   : > { %v305_v20 = vld [vmem:[%s1741_s7 + $0x8c0] sm:$0xff]  ;;  %302 = vst [vmem:[%s1746_s8 + $0x90] sm:$0xff] %v301_v18  ;;  %304 = vst [vmem:[%s1746_s8 + $0x98] sm:$0xff] %v303_v19  ;;  %v307_v21 = vld [vmem:[%s1741_s7 + $0x930] sm:$0xff] }
  0x24   : > { %306 = vst [vmem:[%s1746_s8 + $0xa0] sm:$0xff] %v305_v20  ;;  %v309_v22 = vld [vmem:[%s1741_s7 + $0x9a0] sm:$0xff]  ;;  %v311_v23 = vld [vmem:[%s1741_s7 + $0xa10] sm:$0xff]  ;;  %308 = vst [vmem:[%s1746_s8 + $0xa8] sm:$0xff] %v307_v21 }
  0x25   : > { %310 = vst [vmem:[%s1746_s8 + $0xb0] sm:$0xff] %v309_v22  ;;  %312 = vst [vmem:[%s1746_s8 + $0xb8] sm:$0xff] %v311_v23  ;;  %v313_v24 = vld [vmem:[%s1741_s7 + $0xa80] sm:$0xff]  ;;  %v315_v25 = vld [vmem:[%s1741_s7 + $0xaf0] sm:$0xff] }
  0x26   : > { %v317_v26 = vld [vmem:[%s1741_s7 + $0xb60] sm:$0xff]  ;;  %314 = vst [vmem:[%s1746_s8 + $0xc0] sm:$0xff] %v313_v24  ;;  %316 = vst [vmem:[%s1746_s8 + $0xc8] sm:$0xff] %v315_v25  ;;  %v319_v27 = vld [vmem:[%s1741_s7 + $0xbd0] sm:$0xff] }
  0x27   : > { %318 = vst [vmem:[%s1746_s8 + $0xd0] sm:$0xff] %v317_v26  ;;  %v321_v28 = vld [vmem:[%s1741_s7 + $0xc40] sm:$0xff]  ;;  %v323_v29 = vld [vmem:[%s1741_s7 + $0xcb0] sm:$0xff]  ;;  %320 = vst [vmem:[%s1746_s8 + $0xd8] sm:$0xff] %v319_v27 }
  0x28   : > { %322 = vst [vmem:[%s1746_s8 + $0xe0] sm:$0xff] %v321_v28  ;;  %324 = vst [vmem:[%s1746_s8 + $0xe8] sm:$0xff] %v323_v29  ;;  %v325_v30 = vld [vmem:[%s1741_s7 + $0xd20] sm:$0xff]  ;;  %v327_v31 = vld [vmem:[%s1741_s7 + $0xd90] sm:$0xff] }
  0x29   : > { %326 = vst [vmem:[%s1746_s8 + $0xf0] sm:$0xff] %v325_v30  ;;  %328 = vst [vmem:[%s1746_s8 + $0xf8] sm:$0xff] %v327_v31 }
  0x2a PF: > { %p1296_p7 = scmp.ge.s32.totalorder %s1659_s18, 1  ;;  %p345_p8 = scmp.lt.s32.totalorder %s1659_s18, 29 }
  0x2c   : > { %p346_p9 = pnand %p1296_p7, %p345_p8 }
  0x2d   : > { %s1298_s9 = sshll.u32 (!%p346_p9), %s1643_s14, 5  ;;  %s1300_s10 = sshll.u32 (!%p346_p9), %s1647_s15, 5 }
  0x2e   : > { %349 = sbr.rel (%p346_p9) target bundleno = 406 (0x196), region = 66  ;;  %p392_p10 = scmp.lt.s32.totalorder (!%p346_p9), %s1298_s9, 447 }
  0x2f   : > { %p404_p11 = scmp.lt.s32.totalorder (!%p346_p9), %s1300_s10, 63  ;;  %s352_s28 = sand.u32 (!%p346_p9), 1, %s1635_s12  }
  0x30   : > { %s1297_s29 = sshll.u32 (!%p346_p9), %s352_s28, 8  ;;  %p1350_p12 = scmp.ne.s32.totalorder (!%p346_p9), %s1643_s14, 0 }
  0x31   : > { %s1835_s30 = scalar_lea.vmem (!%p346_p9), [#allocation2], %s1297_s29 }
  0x32   : > { %v1559_v43 = vld [vmem:[%s1835_s30 + $0x4] ss:$8 sps:$4 sm:$0xff] (!%p346_p9)   ;;  %v1557_v50 = vld [vmem:[%s1835_s30] ss:$8 sps:$4 sm:$0xff] (!%p346_p9)   ;;  %v1563_v52 = vld [vmem:[%s1835_s30 + $0x14] ss:$8 sps:$4 sm:$0xff] (!%p346_p9)  }
  0x33   : > { %v1562_v44 = vld [vmem:[%s1835_s30 + $0x84] ss:$8 sps:$4 sm:$0xff] (!%p346_p9)   ;;  %765 = vmatprep.mubr.bf16.mxu0 (!%p346_p9), %v1559_v43  ;;  %v1560_v51 = vld [vmem:[%s1835_s30 + $0x80] ss:$8 sps:$4 sm:$0xff] (!%p346_p9)   ;;  %v1565_v53 = vld [vmem:[%s1835_s30 + $0x94] ss:$8 sps:$4 sm:$0xff] (!%p346_p9)  }
  0x34   : > { %829 = vmatprep.mubr.bf16.mxu1 (!%p346_p9), %v1562_v44  ;;  %v1567_v54 = vld [vmem:[%s1835_s30 + $0x10] ss:$8 sps:$4 sm:$0xff] (!%p346_p9)   ;;  %v1569_v56 = vld [vmem:[%s1835_s30 + $0x24] ss:$8 sps:$4 sm:$0xff] (!%p346_p9)   ;;  %v1573_v58 = vld [vmem:[%s1835_s30 + $0x20] ss:$8 sps:$4 sm:$0xff] (!%p346_p9)  }
  0x35   : > { %s2240_s9 = smov (!%p392_p10, %s1298_s9), 447  ;;  %s2242_s10 = smov (!%p404_p11, %s1300_s10), 63  ;;  %v1568_v55 = vld [vmem:[%s1835_s30 + $0x90] ss:$8 sps:$4 sm:$0xff]   ;;  %v1571_v57 = vld [vmem:[%s1835_s30 + $0xa4] ss:$8 sps:$4 sm:$0xff]  }
  0x36   : > { %s1299_s11 = sshll.u32 %s2240_s9, 2  ;;  %s1301_s24 = sshll.u32 %s2242_s10, 3  ;;  %v1574_v59 = vld [vmem:[%s1835_s30 + $0xa0] ss:$8 sps:$4 sm:$0xff]   ;;  %v1575_v60 = vld [vmem:[%s1835_s30 + $0x34] ss:$8 sps:$4 sm:$0xff]  }
  0x37   : > { %s1816_s23 = scalar_lea.vmem %s2224_s1, %s1299_s11  ;;  %s1821_s15 = scalar_lea.vmem %s2226_s3, %s1301_s24  ;;  %v1577_v61 = vld [vmem:[%s1835_s30 + $0xb4] ss:$8 sps:$4 sm:$0xff]   ;;  %v1579_v62 = vld [vmem:[%s1835_s30 + $0x30] ss:$8 sps:$4 sm:$0xff]   ;;  %v1581_v0 = vld [vmem:[%s1835_s30 + $0x44] ss:$8 sps:$4 sm:$0xff]  }
  0x38   : > { %v1541_v32 = vld [vmem:[%s1816_s23 + $0x40] sm:$0xff]   ;;  %v1543_v34 = vld [vmem:[%s1816_s23 + $0x48] sm:$0xff]   ;;  %v1545_v36 = vld [vmem:[%s1816_s23 + $0x50] sm:$0xff]  }
  0x39   : > { %v1542_v33 = vld [vmem:[%s1816_s23] sm:$0xff]   ;;  %1356 = vmatprep.subr.bf16.mxu0 %v1541_v32  ;;  %1468 = vmatprep.subr.bf16.mxu1 %v1541_v32  ;;  %v1544_v35 = vld [vmem:[%s1816_s23 + $0x8] sm:$0xff]   ;;  %v1546_v37 = vld [vmem:[%s1816_s23 + $0x10] sm:$0xff]  }
  0x3a   : > { %1357 = vmatpush3.bf16.msra.mxu0 %v1542_v33  ;;  %1476 = vmatpush3.bf16.msra.mxu1 %v1542_v33  ;;  %v1547_v38 = vld [vmem:[%s1816_s23 + $0x58] sm:$0xff]   ;;  %v1549_v40 = vld [vmem:[%s1816_s23 + $0x60] sm:$0xff]   ;;  %v1551_v42 = vld [vmem:[%s1816_s23 + $0x68] sm:$0xff]  }
  0x3b   : > { %1358 = vmatprep.subr.bf16.mxu0 %v1543_v34  ;;  %1469 = vmatprep.subr.bf16.mxu1 %v1543_v34  ;;  %v1548_v39 = vld [vmem:[%s1816_s23 + $0x18] sm:$0xff]   ;;  %v1550_v41 = vld [vmem:[%s1816_s23 + $0x20] sm:$0xff]   ;;  %v1552_v45 = vld [vmem:[%s1816_s23 + $0x28] sm:$0xff]  }
  0x3c   : > { %v1553_v46 = vld [vmem:[%s1816_s23 + $0x70] sm:$0xff]   ;;  %v1555_v48 = vld [vmem:[%s1816_s23 + $0x78] sm:$0xff]   ;;  %v1583_v1 = vld [vmem:[%s1835_s30 + $0xc4] ss:$8 sps:$4 sm:$0xff]  }
  0x3d   : > { %v1554_v47 = vld [vmem:[%s1816_s23 + $0x30] sm:$0xff]   ;;  %v1556_v49 = vld [vmem:[%s1816_s23 + $0x38] sm:$0xff]   ;;  %v1585_v2 = vld [vmem:[%s1835_s30 + $0x40] ss:$8 sps:$4 sm:$0xff]  }
  0x3e   : > { %1359 = vmatpush3.bf16.msra.mxu0 %v1544_v35  ;;  %1477 = vmatpush3.bf16.msra.mxu1 %v1544_v35  ;;  %v1580_v63 = vld [vmem:[%s1835_s30 + $0xb0] ss:$8 sps:$4 sm:$0xff]   ;;  %v1586_v3 = vld [vmem:[%s1835_s30 + $0xc0] ss:$8 sps:$4 sm:$0xff]   ;;  %v1587_v4 = vld [vmem:[%s1835_s30 + $0x54] ss:$8 sps:$4 sm:$0xff]  }
  0x3f   : > { %1360 = vmatprep.subr.bf16.mxu0 %v1545_v36  ;;  %1470 = vmatprep.subr.bf16.mxu1 %v1545_v36  ;;  %v1589_v5 = vld [vmem:[%s1835_s30 + $0xd4] ss:$8 sps:$4 sm:$0xff]   ;;  %v1591_v6 = vld [vmem:[%s1835_s30 + $0x50] ss:$8 sps:$4 sm:$0xff]   ;;  %v1593_v8 = vld [vmem:[%s1835_s30 + $0x64] ss:$8 sps:$4 sm:$0xff]  }
  0x40   : > { %v1592_v7 = vld [vmem:[%s1835_s30 + $0xd0] ss:$8 sps:$4 sm:$0xff]   ;;  %v1595_v9 = vld [vmem:[%s1835_s30 + $0xe4] ss:$8 sps:$4 sm:$0xff]   ;;  %v1597_v10 = vld [vmem:[%s1835_s30 + $0x60] ss:$8 sps:$4 sm:$0xff]  }
  0x41   : > { %v1598_v11 = vld [vmem:[%s1835_s30 + $0xe0] ss:$8 sps:$4 sm:$0xff]   ;;  %v1599_v12 = vld [vmem:[%s1835_s30 + $0x74] ss:$8 sps:$4 sm:$0xff]   ;;  %v1603_v14 = vld [vmem:[%s1835_s30 + $0x70] ss:$8 sps:$4 sm:$0xff]  }
  0x42   : > { %1361 = vmatpush3.bf16.msra.mxu0 %v1546_v37  ;;  %1478 = vmatpush3.bf16.msra.mxu1 %v1546_v37  ;;  %v1601_v13 = vld [vmem:[%s1835_s30 + $0xf4] ss:$8 sps:$4 sm:$0xff]   ;;  %v1604_v15 = vld [vmem:[%s1835_s30 + $0xf0] ss:$8 sps:$4 sm:$0xff]  }
  0x43   : > { %1362 = vmatprep.subr.bf16.mxu0 %v1547_v38  ;;  %1471 = vmatprep.subr.bf16.mxu1 %v1547_v38 }
  0x46   : > { %1363 = vmatpush3.bf16.msra.mxu0 %v1548_v39  ;;  %1479 = vmatpush3.bf16.msra.mxu1 %v1548_v39 }
  0x47   : > { %1364 = vmatprep.subr.bf16.mxu0 %v1549_v40  ;;  %1472 = vmatprep.subr.bf16.mxu1 %v1549_v40 }
  0x4a   : > { %1365 = vmatpush3.bf16.msra.mxu0 %v1550_v41  ;;  %1480 = vmatpush3.bf16.msra.mxu1 %v1550_v41 }
  0x4b   : > { %1366 = vmatprep.subr.bf16.mxu0 %v1551_v42  ;;  %1473 = vmatprep.subr.bf16.mxu1 %v1551_v42 }
  0x4e   : > { %1367 = vmatpush3.bf16.msra.mxu0 %v1552_v45  ;;  %1481 = vmatpush3.bf16.msra.mxu1 %v1552_v45 }
  0x4f   : > { %1368 = vmatprep.subr.bf16.mxu0 %v1553_v46  ;;  %1474 = vmatprep.subr.bf16.mxu1 %v1553_v46 }
  0x52   : > { %1369 = vmatpush3.bf16.msra.mxu0 %v1554_v47  ;;  %1482 = vmatpush3.bf16.msra.mxu1 %v1554_v47 }
  0x53   : > { %1370 = vmatprep.subr.bf16.mxu0 %v1555_v48  ;;  %1475 = vmatprep.subr.bf16.mxu1 %v1555_v48 }
  0x56   : > { %1371 = vmatpush3.bf16.msra.mxu0 %v1556_v49  ;;  %1483 = vmatpush3.bf16.msra.mxu1 %v1556_v49 }
  0x59   : > { %766 = vmatmul.mubr.bf16.vlgmr.msra.gmra.mrb[0].mxu0 %v1557_v50  ;;  %830 = vmatmul.mubr.bf16.vlgmr.msra.gmra.mrb[0].mxu1 %v1560_v51 }
  0x5a   : > { %773 = vmatprep.mubr.bf16.mxu0 %v1563_v52  ;;  %837 = vmatprep.mubr.bf16.mxu1 %v1565_v53 }
  0x61   : > { %774 = vmatmul.mubr.bf16.gmra.mrb[4].mxu0 %v1567_v54  ;;  %838 = vmatmul.mubr.bf16.gmra.mrb[4].mxu1 %v1568_v55 }
  0x62   : > { %781 = vmatprep.mubr.bf16.mxu0 %v1569_v56  ;;  %845 = vmatprep.mubr.bf16.mxu1 %v1571_v57 }
  0x69   : > { %782 = vmatmul.mubr.bf16.gmra.mrb[8].mxu0 %v1573_v58  ;;  %846 = vmatmul.mubr.bf16.gmra.mrb[8].mxu1 %v1574_v59 }
  0x6a   : > { %789 = vmatprep.mubr.bf16.mxu0 %v1575_v60  ;;  %853 = vmatprep.mubr.bf16.mxu1 %v1577_v61 }
  0x71   : > { %790 = vmatmul.mubr.bf16.gmra.mrb[12].mxu0 %v1579_v62  ;;  %854 = vmatmul.mubr.bf16.gmra.mrb[12].mxu1 %v1580_v63 }
  0x72   : > { %797 = vmatprep.mubr.bf16.mxu0 %v1581_v0  ;;  %861 = vmatprep.mubr.bf16.mxu1 %v1583_v1 }
  0x79   : > { %798 = vmatmul.mubr.bf16.gmra.mrb[16].mxu0 %v1585_v2  ;;  %862 = vmatmul.mubr.bf16.gmra.mrb[16].mxu1 %v1586_v3 }
  0x7a   : > { %805 = vmatprep.mubr.bf16.mxu0 %v1587_v4  ;;  %869 = vmatprep.mubr.bf16.mxu1 %v1589_v5 }
  0x81   : > { %806 = vmatmul.mubr.bf16.gmra.mrb[20].mxu0 %v1591_v6  ;;  %870 = vmatmul.mubr.bf16.gmra.mrb[20].mxu1 %v1592_v7 }
  0x82   : > { %813 = vmatprep.mubr.bf16.mxu0 %v1593_v8  ;;  %877 = vmatprep.mubr.bf16.mxu1 %v1595_v9 }
  0x89   : > { %814 = vmatmul.mubr.bf16.gmra.mrb[24].mxu0 %v1597_v10  ;;  %878 = vmatmul.mubr.bf16.gmra.mrb[24].mxu1 %v1598_v11 }
  0x8a   : > { %821 = vmatprep.mubr.bf16.mxu0 %v1599_v12  ;;  %885 = vmatprep.mubr.bf16.mxu1 %v1601_v13 }
  0x91   : > { %822 = vmatmul.mubr.bf16.gmra.mrb[28].mxu0 %v1603_v14  ;;  %886 = vmatmul.mubr.bf16.gmra.mrb[28].mxu1 %v1604_v15 }
 0x12c   : > { %v1372_v16 = vpop.f32.mrb[0].mxu0  ;;  %v1420_v17 = vpop.f32.mrb[0].mxu1 }
 0x12d   : > { %v1373_v18 = vpop.f32.mrb[1].mxu0  ;;  %v1421_v19 = vpop.f32.mrb[1].mxu1 }
 0x12e   : > { %v1874_v20 = vadd.f32 %v1373_v18, %v1372_v16  ;;  %v1876_v21 = vadd.f32 %v1421_v19, %v1420_v17  ;;  %v1375_v22 = vpop.f32.mrb[2].mxu0  ;;  %v1423_v23 = vpop.f32.mrb[2].mxu1 }
 0x12f   : > { %v1376_v24 = vpop.f32.mrb[3].mxu0  ;;  %v1424_v25 = vpop.f32.mrb[3].mxu1 }
 0x130   : > { %v1878_v26 = vadd.f32 %v1376_v24, %v1375_v22  ;;  %v1880_v27 = vadd.f32 %v1424_v25, %v1423_v23  ;;  %898 = vst [vmem:[%s1821_s15] sm:$0xff] (!%p1350_p12), %v1874_v20  ;;  %914 = vst [vmem:[%s1821_s15 + $0x80] sm:$0xff] (!%p1350_p12), %v1876_v21 }
 0x132   : > { %899 = vst [vmem:[%s1821_s15 + $0x8] sm:$0xff] (!%p1350_p12), %v1878_v26  ;;  %915 = vst [vmem:[%s1821_s15 + $0x88] sm:$0xff] (!%p1350_p12), %v1880_v27 }
 0x134   : > { %v1378_v28 = vpop.f32.mrb[4].mxu0  ;;  %v1426_v29 = vpop.f32.mrb[4].mxu1 }
 0x135   : > { %v1379_v30 = vpop.f32.mrb[5].mxu0  ;;  %v1427_v31 = vpop.f32.mrb[5].mxu1 }
 0x136   : > { %v1882_v32 = vadd.f32 %v1379_v30, %v1378_v28  ;;  %v1884_v33 = vadd.f32 %v1427_v31, %v1426_v29  ;;  %v1381_v34 = vpop.f32.mrb[6].mxu0  ;;  %v1429_v35 = vpop.f32.mrb[6].mxu1 }
 0x137   : > { %v1382_v36 = vpop.f32.mrb[7].mxu0  ;;  %v1430_v37 = vpop.f32.mrb[7].mxu1 }
 0x138   : > { %v1886_v38 = vadd.f32 %v1382_v36, %v1381_v34  ;;  %v1888_v39 = vadd.f32 %v1430_v37, %v1429_v35  ;;  %900 = vst [vmem:[%s1821_s15 + $0x10] sm:$0xff] (!%p1350_p12), %v1882_v32  ;;  %916 = vst [vmem:[%s1821_s15 + $0x90] sm:$0xff] (!%p1350_p12), %v1884_v33 }
 0x13a   : > { %901 = vst [vmem:[%s1821_s15 + $0x18] sm:$0xff] (!%p1350_p12), %v1886_v38  ;;  %917 = vst [vmem:[%s1821_s15 + $0x98] sm:$0xff] (!%p1350_p12), %v1888_v39 }
 0x13c   : > { %v1384_v40 = vpop.f32.mrb[8].mxu0  ;;  %v1432_v41 = vpop.f32.mrb[8].mxu1 }
 0x13d   : > { %v1385_v42 = vpop.f32.mrb[9].mxu0  ;;  %v1433_v43 = vpop.f32.mrb[9].mxu1 }
 0x13e   : > { %v1890_v44 = vadd.f32 %v1385_v42, %v1384_v40  ;;  %v1892_v45 = vadd.f32 %v1433_v43, %v1432_v41  ;;  %v1387_v46 = vpop.f32.mrb[10].mxu0  ;;  %v1435_v47 = vpop.f32.mrb[10].mxu1 }
 0x13f   : > { %v1388_v48 = vpop.f32.mrb[11].mxu0  ;;  %v1436_v49 = vpop.f32.mrb[11].mxu1 }
 0x140   : > { %v1894_v50 = vadd.f32 %v1388_v48, %v1387_v46  ;;  %v1896_v51 = vadd.f32 %v1436_v49, %v1435_v47  ;;  %902 = vst [vmem:[%s1821_s15 + $0x20] sm:$0xff] (!%p1350_p12), %v1890_v44  ;;  %918 = vst [vmem:[%s1821_s15 + $0xa0] sm:$0xff] (!%p1350_p12), %v1892_v45 }
 0x142   : > { %903 = vst [vmem:[%s1821_s15 + $0x28] sm:$0xff] (!%p1350_p12), %v1894_v50  ;;  %919 = vst [vmem:[%s1821_s15 + $0xa8] sm:$0xff] (!%p1350_p12), %v1896_v51 }
 0x144   : > { %v1390_v52 = vpop.f32.mrb[12].mxu0  ;;  %v1438_v53 = vpop.f32.mrb[12].mxu1 }
 0x145   : > { %v1391_v54 = vpop.f32.mrb[13].mxu0  ;;  %v1439_v55 = vpop.f32.mrb[13].mxu1 }
 0x146   : > { %v1898_v56 = vadd.f32 %v1391_v54, %v1390_v52  ;;  %v1900_v57 = vadd.f32 %v1439_v55, %v1438_v53  ;;  %v1393_v58 = vpop.f32.mrb[14].mxu0  ;;  %v1441_v59 = vpop.f32.mrb[14].mxu1 }
 0x147   : > { %v1394_v60 = vpop.f32.mrb[15].mxu0  ;;  %v1442_v61 = vpop.f32.mrb[15].mxu1 }
 0x148   : > { %v1902_v62 = vadd.f32 %v1394_v60, %v1393_v58  ;;  %v1904_v63 = vadd.f32 %v1442_v61, %v1441_v59  ;;  %904 = vst [vmem:[%s1821_s15 + $0x30] sm:$0xff] (!%p1350_p12), %v1898_v56  ;;  %920 = vst [vmem:[%s1821_s15 + $0xb0] sm:$0xff] (!%p1350_p12), %v1900_v57 }
 0x14a   : > { %905 = vst [vmem:[%s1821_s15 + $0x38] sm:$0xff] (!%p1350_p12), %v1902_v62  ;;  %921 = vst [vmem:[%s1821_s15 + $0xb8] sm:$0xff] (!%p1350_p12), %v1904_v63 }
 0x14c   : > { %v1396_v0 = vpop.f32.mrb[16].mxu0  ;;  %v1444_v1 = vpop.f32.mrb[16].mxu1 }
 0x14d   : > { %v1397_v2 = vpop.f32.mrb[17].mxu0  ;;  %v1445_v3 = vpop.f32.mrb[17].mxu1 }
 0x14e   : > { %v1906_v4 = vadd.f32 %v1397_v2, %v1396_v0  ;;  %v1908_v5 = vadd.f32 %v1445_v3, %v1444_v1  ;;  %v1399_v6 = vpop.f32.mrb[18].mxu0  ;;  %v1447_v7 = vpop.f32.mrb[18].mxu1 }
 0x14f   : > { %v1400_v8 = vpop.f32.mrb[19].mxu0  ;;  %v1448_v9 = vpop.f32.mrb[19].mxu1 }
 0x150   : > { %v1910_v10 = vadd.f32 %v1400_v8, %v1399_v6  ;;  %v1912_v11 = vadd.f32 %v1448_v9, %v1447_v7  ;;  %906 = vst [vmem:[%s1821_s15 + $0x40] sm:$0xff] (!%p1350_p12), %v1906_v4  ;;  %922 = vst [vmem:[%s1821_s15 + $0xc0] sm:$0xff] (!%p1350_p12), %v1908_v5 }
 0x152   : > { %907 = vst [vmem:[%s1821_s15 + $0x48] sm:$0xff] (!%p1350_p12), %v1910_v10  ;;  %923 = vst [vmem:[%s1821_s15 + $0xc8] sm:$0xff] (!%p1350_p12), %v1912_v11 }
 0x154   : > { %v1402_v12 = vpop.f32.mrb[20].mxu0  ;;  %v1450_v13 = vpop.f32.mrb[20].mxu1 }
 0x155   : > { %v1403_v14 = vpop.f32.mrb[21].mxu0  ;;  %v1451_v15 = vpop.f32.mrb[21].mxu1 }
 0x156   : > { %v1914_v16 = vadd.f32 %v1403_v14, %v1402_v12  ;;  %v1916_v17 = vadd.f32 %v1451_v15, %v1450_v13  ;;  %v1405_v18 = vpop.f32.mrb[22].mxu0  ;;  %v1453_v19 = vpop.f32.mrb[22].mxu1 }
 0x157   : > { %v1406_v22 = vpop.f32.mrb[23].mxu0  ;;  %v1454_v23 = vpop.f32.mrb[23].mxu1 }
 0x158   : > { %v1918_v24 = vadd.f32 %v1406_v22, %v1405_v18  ;;  %v1920_v25 = vadd.f32 %v1454_v23, %v1453_v19  ;;  %908 = vst [vmem:[%s1821_s15 + $0x50] sm:$0xff] (!%p1350_p12), %v1914_v16  ;;  %924 = vst [vmem:[%s1821_s15 + $0xd0] sm:$0xff] (!%p1350_p12), %v1916_v17 }
 0x15a   : > { %909 = vst [vmem:[%s1821_s15 + $0x58] sm:$0xff] (!%p1350_p12), %v1918_v24  ;;  %925 = vst [vmem:[%s1821_s15 + $0xd8] sm:$0xff] (!%p1350_p12), %v1920_v25 }
 0x15c   : > { %v1408_v28 = vpop.f32.mrb[24].mxu0  ;;  %v1456_v29 = vpop.f32.mrb[24].mxu1 }
 0x15d   : > { %v1409_v30 = vpop.f32.mrb[25].mxu0  ;;  %v1457_v31 = vpop.f32.mrb[25].mxu1 }
 0x15e   : > { %v1922_v34 = vadd.f32 %v1409_v30, %v1408_v28  ;;  %v1924_v35 = vadd.f32 %v1457_v31, %v1456_v29  ;;  %v1411_v36 = vpop.f32.mrb[26].mxu0  ;;  %v1459_v37 = vpop.f32.mrb[26].mxu1 }
 0x15f   : > { %v1412_v40 = vpop.f32.mrb[27].mxu0  ;;  %v1460_v41 = vpop.f32.mrb[27].mxu1 }
 0x160   : > { %v1926_v42 = vadd.f32 %v1412_v40, %v1411_v36  ;;  %v1928_v43 = vadd.f32 %v1460_v41, %v1459_v37  ;;  %910 = vst [vmem:[%s1821_s15 + $0x60] sm:$0xff] (!%p1350_p12), %v1922_v34  ;;  %926 = vst [vmem:[%s1821_s15 + $0xe0] sm:$0xff] (!%p1350_p12), %v1924_v35 }
 0x162   : > { %897 = sbr.rel (%p1350_p12) target bundleno = 363 (0x16b), region = 74  ;;  %911 = vst [vmem:[%s1821_s15 + $0x68] sm:$0xff] (!%p1350_p12), %v1926_v42  ;;  %927 = vst [vmem:[%s1821_s15 + $0xe8] sm:$0xff] (!%p1350_p12), %v1928_v43 }
 0x164   : > { %v1414_v46 = vpop.f32.mrb[28].mxu0  ;;  %v1462_v47 = vpop.f32.mrb[28].mxu1 }
 0x165   : > { %v1415_v48 = vpop.f32.mrb[29].mxu0  ;;  %v1463_v49 = vpop.f32.mrb[29].mxu1 }
 0x166   : > { %v1930_v52 = vadd.f32 %v1415_v48, %v1414_v46  ;;  %v1932_v53 = vadd.f32 %v1463_v49, %v1462_v47  ;;  %v1417_v54 = vpop.f32.mrb[30].mxu0  ;;  %v1465_v55 = vpop.f32.mrb[30].mxu1 }
 0x167   : > { %v1418_v58 = vpop.f32.mrb[31].mxu0  ;;  %v1466_v59 = vpop.f32.mrb[31].mxu1 }
 0x168   : > { %v1934_v60 = vadd.f32 %v1418_v58, %v1417_v54  ;;  %v1936_v61 = vadd.f32 %v1466_v59, %v1465_v55  ;;  %912 = vst [vmem:[%s1821_s15 + $0x70] sm:$0xff] (!%p1350_p12), %v1930_v52  ;;  %928 = vst [vmem:[%s1821_s15 + $0xf0] sm:$0xff] (!%p1350_p12), %v1932_v53 }
 0x16a   : > { %913 = vst [vmem:[%s1821_s15 + $0x78] sm:$0xff] %v1934_v60  ;;  %929 = vst [vmem:[%s1821_s15 + $0xf8] sm:$0xff] %v1936_v61 }
 0x16b PF: > { %p1351_p13 = scmp.le.s32.totalorder %s1643_s14, 0 }
 0x16c   : > { %v934_v0 = vld [vmem:[%s1821_s15] sm:$0xff] (!%p1351_p13)  ;;  %v935_v1 = vld [vmem:[%s1821_s15 + $0x8] sm:$0xff] (!%p1351_p13)  ;;  %v936_v2 = vld [vmem:[%s1821_s15 + $0x10] sm:$0xff] (!%p1351_p13) }
 0x16d   : > { %933 = sbr.rel (%p1351_p13) target bundleno = 383 (0x17f), region = 78  ;;  %v966_v3 = vadd.f32 (!%p1351_p13), %v1874_v20, %v934_v0  ;;  %v967_v6 = vadd.f32 (!%p1351_p13), %v1878_v26, %v935_v1  ;;  %v968_v7 = vadd.f32 (!%p1351_p13), %v1882_v32, %v936_v2  ;;  %v937_v8 = vld [vmem:[%s1821_s15 + $0x18] sm:$0xff] (!%p1351_p13)  ;;  %v938_v9 = vld [vmem:[%s1821_s15 + $0x20] sm:$0xff] (!%p1351_p13)  ;;  %v939_v12 = vld [vmem:[%s1821_s15 + $0x28] sm:$0xff] (!%p1351_p13) }
 0x16e   : > { %v969_v13 = vadd.f32 (!%p1351_p13), %v1886_v38, %v937_v8  ;;  %v970_v14 = vadd.f32 (!%p1351_p13), %v1890_v44, %v938_v9  ;;  %v971_v15 = vadd.f32 (!%p1351_p13), %v1894_v50, %v939_v12  ;;  %v940_v20 = vld [vmem:[%s1821_s15 + $0x30] sm:$0xff] (!%p1351_p13)  ;;  %v941_v18 = vld [vmem:[%s1821_s15 + $0x38] sm:$0xff] (!%p1351_p13)  ;;  %v942_v26 = vld [vmem:[%s1821_s15 + $0x40] sm:$0xff] (!%p1351_p13) }
 0x16f   : > { %998 = vst [vmem:[%s1821_s15] sm:$0xff] (!%p1351_p13), %v966_v3  ;;  %999 = vst [vmem:[%s1821_s15 + $0x8] sm:$0xff] (!%p1351_p13), %v967_v6  ;;  %v972_v32 = vadd.f32 (!%p1351_p13), %v1898_v56, %v940_v20  ;;  %v973_v38 = vadd.f32 (!%p1351_p13), %v1902_v62, %v941_v18  ;;  %v974_v44 = vadd.f32 (!%p1351_p13), %v1906_v4, %v942_v26  ;;  %v943_v19 = vld [vmem:[%s1821_s15 + $0x48] sm:$0xff] (!%p1351_p13)  ;;  %v944_v50 = vld [vmem:[%s1821_s15 + $0x50] sm:$0xff] (!%p1351_p13) }
 0x170   : > { %1000 = vst [vmem:[%s1821_s15 + $0x10] sm:$0xff] (!%p1351_p13), %v968_v7  ;;  %v945_v22 = vld [vmem:[%s1821_s15 + $0x58] sm:$0xff] (!%p1351_p13)  ;;  %1001 = vst [vmem:[%s1821_s15 + $0x18] sm:$0xff] (!%p1351_p13), %v969_v13  ;;  %v975_v23 = vadd.f32 (!%p1351_p13), %v1910_v10, %v943_v19  ;;  %v976_v56 = vadd.f32 (!%p1351_p13), %v1914_v16, %v944_v50  ;;  %v946_v28 = vld [vmem:[%s1821_s15 + $0x60] sm:$0xff] (!%p1351_p13) }
 0x171   : > { %1002 = vst [vmem:[%s1821_s15 + $0x20] sm:$0xff] (!%p1351_p13), %v970_v14  ;;  %1003 = vst [vmem:[%s1821_s15 + $0x28] sm:$0xff] (!%p1351_p13), %v971_v15  ;;  %v977_v62 = vadd.f32 (!%p1351_p13), %v1918_v24, %v945_v22  ;;  %v947_v4 = vld [vmem:[%s1821_s15 + $0x68] sm:$0xff] (!%p1351_p13)  ;;  %v948_v29 = vld [vmem:[%s1821_s15 + $0x70] sm:$0xff] (!%p1351_p13)  ;;  %v978_v30 = vadd.f32 (!%p1351_p13), %v1922_v34, %v946_v28 }
 0x172   : > { %1004 = vst [vmem:[%s1821_s15 + $0x30] sm:$0xff] (!%p1351_p13), %v972_v32  ;;  %1005 = vst [vmem:[%s1821_s15 + $0x38] sm:$0xff] (!%p1351_p13), %v973_v38  ;;  %v979_v10 = vadd.f32 (!%p1351_p13), %v1926_v42, %v947_v4  ;;  %v980_v16 = vadd.f32 (!%p1351_p13), %v1930_v52, %v948_v29  ;;  %v949_v31 = vld [vmem:[%s1821_s15 + $0x78] sm:$0xff] (!%p1351_p13)  ;;  %v950_v24 = vld [vmem:[%s1821_s15 + $0x80] sm:$0xff] (!%p1351_p13) }
 0x173   : > { %1006 = vst [vmem:[%s1821_s15 + $0x40] sm:$0xff] (!%p1351_p13), %v974_v44  ;;  %v951_v36 = vld [vmem:[%s1821_s15 + $0x88] sm:$0xff] (!%p1351_p13)  ;;  %1007 = vst [vmem:[%s1821_s15 + $0x48] sm:$0xff] (!%p1351_p13), %v975_v23  ;;  %v981_v37 = vadd.f32 (!%p1351_p13), %v1934_v60, %v949_v31  ;;  %v982_v34 = vadd.f32 (!%p1351_p13), %v1876_v21, %v950_v24  ;;  %v952_v41 = vld [vmem:[%s1821_s15 + $0x90] sm:$0xff] (!%p1351_p13) }
 0x174   : > { %1008 = vst [vmem:[%s1821_s15 + $0x50] sm:$0xff] %v976_v56  ;;  %1009 = vst [vmem:[%s1821_s15 + $0x58] sm:$0xff] %v977_v62  ;;  %v983_v40 = vadd.f32 %v1880_v27, %v951_v36  ;;  %v953_v42 = vld [vmem:[%s1821_s15 + $0x98] sm:$0xff]  ;;  %v954_v46 = vld [vmem:[%s1821_s15 + $0xa0] sm:$0xff]  ;;  %v984_v47 = vadd.f32 %v1884_v33, %v952_v41 }
 0x175   : > { %1010 = vst [vmem:[%s1821_s15 + $0x60] sm:$0xff] %v978_v30  ;;  %1011 = vst [vmem:[%s1821_s15 + $0x68] sm:$0xff] %v979_v10  ;;  %v985_v48 = vadd.f32 %v1888_v39, %v953_v42  ;;  %v986_v21 = vadd.f32 %v1892_v45, %v954_v46  ;;  %v955_v49 = vld [vmem:[%s1821_s15 + $0xa8] sm:$0xff]  ;;  %v956_v27 = vld [vmem:[%s1821_s15 + $0xb0] sm:$0xff] }
 0x176   : > { %1012 = vst [vmem:[%s1821_s15 + $0x70] sm:$0xff] %v980_v16  ;;  %v957_v52 = vld [vmem:[%s1821_s15 + $0xb8] sm:$0xff]  ;;  %1013 = vst [vmem:[%s1821_s15 + $0x78] sm:$0xff] %v981_v37  ;;  %v987_v54 = vadd.f32 %v1896_v51, %v955_v49  ;;  %v988_v33 = vadd.f32 %v1900_v57, %v956_v27  ;;  %v958_v55 = vld [vmem:[%s1821_s15 + $0xc0] sm:$0xff] }
 0x177   : > { %1014 = vst [vmem:[%s1821_s15 + $0x80] sm:$0xff] %v982_v34  ;;  %1015 = vst [vmem:[%s1821_s15 + $0x88] sm:$0xff] %v983_v40  ;;  %v989_v39 = vadd.f32 %v1904_v63, %v957_v52  ;;  %v959_v45 = vld [vmem:[%s1821_s15 + $0xc8] sm:$0xff]  ;;  %v960_v58 = vld [vmem:[%s1821_s15 + $0xd0] sm:$0xff]  ;;  %v990_v59 = vadd.f32 %v1908_v5, %v958_v55 }
 0x178   : > { %1016 = vst [vmem:[%s1821_s15 + $0x90] sm:$0xff] %v984_v47  ;;  %1017 = vst [vmem:[%s1821_s15 + $0x98] sm:$0xff] %v985_v48  ;;  %v991_v51 = vadd.f32 %v1912_v11, %v959_v45  ;;  %v992_v57 = vadd.f32 %v1916_v17, %v960_v58  ;;  %v961_v60 = vld [vmem:[%s1821_s15 + $0xd8] sm:$0xff]  ;;  %v962_v63 = vld [vmem:[%s1821_s15 + $0xe0] sm:$0xff] }
 0x179   : > { %1018 = vst [vmem:[%s1821_s15 + $0xa0] sm:$0xff] %v986_v21  ;;  %v963_v0 = vld [vmem:[%s1821_s15 + $0xe8] sm:$0xff]  ;;  %1019 = vst [vmem:[%s1821_s15 + $0xa8] sm:$0xff] %v987_v54  ;;  %v993_v1 = vadd.f32 %v1920_v25, %v961_v60  ;;  %v994_v5 = vadd.f32 %v1924_v35, %v962_v63  ;;  %v964_v11 = vld [vmem:[%s1821_s15 + $0xf0] sm:$0xff] }
 0x17a   : > { %1020 = vst [vmem:[%s1821_s15 + $0xb0] sm:$0xff] %v988_v33  ;;  %1021 = vst [vmem:[%s1821_s15 + $0xb8] sm:$0xff] %v989_v39  ;;  %v995_v2 = vadd.f32 %v1928_v43, %v963_v0  ;;  %v965_v3 = vld [vmem:[%s1821_s15 + $0xf8] sm:$0xff]  ;;  %v996_v17 = vadd.f32 %v1932_v53, %v964_v11 }
 0x17b   : > { %1022 = vst [vmem:[%s1821_s15 + $0xc0] sm:$0xff] %v990_v59  ;;  %1023 = vst [vmem:[%s1821_s15 + $0xc8] sm:$0xff] %v991_v51  ;;  %v997_v6 = vadd.f32 %v1936_v61, %v965_v3 }
 0x17c   : > { %1024 = vst [vmem:[%s1821_s15 + $0xd0] sm:$0xff] %v992_v57  ;;  %1025 = vst [vmem:[%s1821_s15 + $0xd8] sm:$0xff] %v993_v1 }
 0x17d   : > { %1026 = vst [vmem:[%s1821_s15 + $0xe0] sm:$0xff] %v994_v5  ;;  %1027 = vst [vmem:[%s1821_s15 + $0xe8] sm:$0xff] %v995_v2 }
 0x17e   : > { %1028 = vst [vmem:[%s1821_s15 + $0xf0] sm:$0xff] %v996_v17  ;;  %1029 = vst [vmem:[%s1821_s15 + $0xf8] sm:$0xff] %v997_v6 }
 0x17f PF: > { %p1352_p0 = scmp.ne.s32.totalorder %s1643_s14, 13 }
 0x180   : > { %v2105_v35 = vld [vmem:[%s2225_s2] ss:$0 sm:$0xff] (!%p1352_p0)  ;;  %v1047_v30 = vld [vmem:[%s1821_s15 + $0x68] sm:$0xff] (!%p1352_p0)  ;;  %v1048_v36 = vld [vmem:[%s1821_s15 + $0x70] sm:$0xff] (!%p1352_p0) }
 0x181   : > { %1033 = sbr.rel (%p1352_p0) target bundleno = 406 (0x196), region = 82  ;;  %v1034_v25 = vld [vmem:[%s1821_s15] sm:$0xff] (!%p1352_p0)  ;;  %v1035_v43 = vld [vmem:[%s1821_s15 + $0x8] sm:$0xff] (!%p1352_p0)  ;;  %v1049_v37 = vld [vmem:[%s1821_s15 + $0x78] sm:$0xff] (!%p1352_p0)  ;;  %v1086_v49 = vadd.f32 (!%p1352_p0), %v2105_v35, %v1047_v30  ;;  %v1087_v27 = vadd.f32 (!%p1352_p0), %v2105_v35, %v1048_v36 }
 0x182   : > { %v1073_v53 = vadd.f32 (!%p1352_p0), %v2105_v35, %v1034_v25  ;;  %v1074_v61 = vadd.f32 (!%p1352_p0), %v2105_v35, %v1035_v43  ;;  %v1036_v7 = vld [vmem:[%s1821_s15 + $0x10] sm:$0xff] (!%p1352_p0)  ;;  %v1037_v8 = vld [vmem:[%s1821_s15 + $0x18] sm:$0xff] (!%p1352_p0)  ;;  %v1046_v29 = vld [vmem:[%s1821_s15 + $0x60] sm:$0xff] (!%p1352_p0)  ;;  %v1088_v58 = vadd.f32 (!%p1352_p0), %v2105_v35, %v1049_v37 }
 0x183   : > { %v1038_v9 = vld [vmem:[%s1821_s15 + $0x20] sm:$0xff] (!%p1352_p0)  ;;  %v1075_v12 = vadd.f32 (!%p1352_p0), %v2105_v35, %v1036_v7  ;;  %v1076_v13 = vadd.f32 (!%p1352_p0), %v2105_v35, %v1037_v8  ;;  %v1039_v15 = vld [vmem:[%s1821_s15 + $0x28] sm:$0xff] (!%p1352_p0)  ;;  %v1085_v42 = vadd.f32 (!%p1352_p0), %v2105_v35, %v1046_v29  ;;  %v1052_v52 = vld [vmem:[%s1821_s15 + $0x90] sm:$0xff] (!%p1352_p0)  ;;  %v1118_v57 = vmax.f32 (!%p1352_p0), %v1086_v49, 0.0 }
 0x184   : > { %v1077_v14 = vadd.f32 (!%p1352_p0), %v2105_v35, %v1038_v9  ;;  %v1040_v20 = vld [vmem:[%s1821_s15 + $0x30] sm:$0xff] (!%p1352_p0)  ;;  %v1041_v18 = vld [vmem:[%s1821_s15 + $0x38] sm:$0xff] (!%p1352_p0)  ;;  %v1105_v26 = vmax.f32 (!%p1352_p0), %v1073_v53, 0.0  ;;  %v1106_v32 = vmax.f32 (!%p1352_p0), %v1074_v61, 0.0  ;;  %v1078_v38 = vadd.f32 (!%p1352_p0), %v2105_v35, %v1039_v15  ;;  %v1050_v46 = vld [vmem:[%s1821_s15 + $0x80] sm:$0xff] (!%p1352_p0) }
 0x185   : > { %v1079_v44 = vadd.f32 (!%p1352_p0), %v2105_v35, %v1040_v20  ;;  %v1042_v19 = vld [vmem:[%s1821_s15 + $0x40] sm:$0xff] (!%p1352_p0)  ;;  %v1043_v50 = vld [vmem:[%s1821_s15 + $0x48] sm:$0xff] (!%p1352_p0)  ;;  %v1107_v23 = vmax.f32 (!%p1352_p0), %v1075_v12, 0.0  ;;  %v1108_v56 = vmax.f32 (!%p1352_p0), %v1076_v13, 0.0  ;;  %v1080_v28 = vadd.f32 (!%p1352_p0), %v2105_v35, %v1041_v18  ;;  %v1053_v54 = vld [vmem:[%s1821_s15 + $0x98] sm:$0xff] (!%p1352_p0)  ;;  %1150 = vst [vmem:[%s1821_s15 + $0x68] sm:$0xff] (!%p1352_p0), %v1118_v57 }
 0x186   : > { %v1044_v22 = vld [vmem:[%s1821_s15 + $0x50] sm:$0xff] (!%p1352_p0)  ;;  %v1109_v62 = vmax.f32 (!%p1352_p0), %v1077_v14, 0.0  ;;  %v1045_v4 = vld [vmem:[%s1821_s15 + $0x58] sm:$0xff] (!%p1352_p0)  ;;  %1137 = vst [vmem:[%s1821_s15] sm:$0xff] (!%p1352_p0), %v1105_v26  ;;  %1138 = vst [vmem:[%s1821_s15 + $0x8] sm:$0xff] (!%p1352_p0), %v1106_v32  ;;  %v1110_v10 = vmax.f32 (!%p1352_p0), %v1078_v38, 0.0  ;;  %v1081_v31 = vadd.f32 (!%p1352_p0), %v2105_v35, %v1042_v19  ;;  %v1082_v24 = vadd.f32 (!%p1352_p0), %v2105_v35, %v1043_v50 }
 0x187   : > { %v1111_v16 = vmax.f32 (!%p1352_p0), %v1079_v44, 0.0  ;;  %1139 = vst [vmem:[%s1821_s15 + $0x10] sm:$0xff] (!%p1352_p0), %v1107_v23  ;;  %1140 = vst [vmem:[%s1821_s15 + $0x18] sm:$0xff] (!%p1352_p0), %v1108_v56  ;;  %v1112_v34 = vmax.f32 (!%p1352_p0), %v1080_v28, 0.0  ;;  %v1083_v40 = vadd.f32 (!%p1352_p0), %v2105_v35, %v1044_v22  ;;  %v1084_v41 = vadd.f32 (!%p1352_p0), %v2105_v35, %v1045_v4  ;;  %v1051_v47 = vld [vmem:[%s1821_s15 + $0x88] sm:$0xff] (!%p1352_p0)  ;;  %v1054_v33 = vld [vmem:[%s1821_s15 + $0xa0] sm:$0xff] (!%p1352_p0) }
 0x188   : > { %1141 = vst [vmem:[%s1821_s15 + $0x20] sm:$0xff] %v1109_v62  ;;  %1142 = vst [vmem:[%s1821_s15 + $0x28] sm:$0xff] %v1110_v10  ;;  %v1113_v48 = vmax.f32 %v1081_v31, 0.0  ;;  %v1114_v21 = vmax.f32 %v1082_v24, 0.0  ;;  %v1117_v45 = vmax.f32 %v1085_v42, 0.0  ;;  %v1055_v59 = vld [vmem:[%s1821_s15 + $0xa8] sm:$0xff]  ;;  %v1089_v63 = vadd.f32 %v2105_v35, %v1050_v46 }
 0x189   : > { %1143 = vst [vmem:[%s1821_s15 + $0x30] sm:$0xff] %v1111_v16  ;;  %1144 = vst [vmem:[%s1821_s15 + $0x38] sm:$0xff] %v1112_v34  ;;  %v1115_v39 = vmax.f32 %v1083_v40, 0.0  ;;  %v1116_v55 = vmax.f32 %v1084_v41, 0.0  ;;  %v1056_v51 = vld [vmem:[%s1821_s15 + $0xb0] sm:$0xff]  ;;  %v1119_v60 = vmax.f32 %v1087_v27, 0.0  ;;  %v1090_v0 = vadd.f32 %v2105_v35, %v1051_v47 }
 0x18a   : > { %1145 = vst [vmem:[%s1821_s15 + $0x40] sm:$0xff] %v1113_v48  ;;  %1146 = vst [vmem:[%s1821_s15 + $0x48] sm:$0xff] %v1114_v21  ;;  %v1057_v1 = vld [vmem:[%s1821_s15 + $0xb8] sm:$0xff]  ;;  %v1120_v5 = vmax.f32 %v1088_v58, 0.0  ;;  %v1091_v2 = vadd.f32 %v2105_v35, %v1052_v52  ;;  %v1092_v11 = vadd.f32 %v2105_v35, %v1053_v54  ;;  %v1093_v3 = vadd.f32 %v2105_v35, %v1054_v33  ;;  %v1058_v17 = vld [vmem:[%s1821_s15 + $0xc0] sm:$0xff] }
 0x18b   : > { %1147 = vst [vmem:[%s1821_s15 + $0x50] sm:$0xff] %v1115_v39  ;;  %1148 = vst [vmem:[%s1821_s15 + $0x58] sm:$0xff] %v1116_v55  ;;  %v1059_v6 = vld [vmem:[%s1821_s15 + $0xc8] sm:$0xff]  ;;  %v1121_v25 = vmax.f32 %v1089_v63, 0.0  ;;  %v1122_v43 = vmax.f32 %v1090_v0, 0.0  ;;  %v1094_v53 = vadd.f32 %v2105_v35, %v1055_v59  ;;  %v1095_v61 = vadd.f32 %v2105_v35, %v1056_v51  ;;  %v1060_v7 = vld [vmem:[%s1821_s15 + $0xd0] sm:$0xff] }
 0x18c   : > { %1149 = vst [vmem:[%s1821_s15 + $0x60] sm:$0xff] %v1117_v45  ;;  %1151 = vst [vmem:[%s1821_s15 + $0x70] sm:$0xff] %v1119_v60  ;;  %v1061_v8 = vld [vmem:[%s1821_s15 + $0xd8] sm:$0xff]  ;;  %v1062_v9 = vld [vmem:[%s1821_s15 + $0xe0] sm:$0xff]  ;;  %v1123_v12 = vmax.f32 %v1091_v2, 0.0  ;;  %v1124_v13 = vmax.f32 %v1092_v11, 0.0  ;;  %v1096_v15 = vadd.f32 %v2105_v35, %v1057_v1  ;;  %v1097_v38 = vadd.f32 %v2105_v35, %v1058_v17 }
 0x18d   : > { %1152 = vst [vmem:[%s1821_s15 + $0x78] sm:$0xff] %v1120_v5  ;;  %v1125_v14 = vmax.f32 %v1093_v3, 0.0  ;;  %v1063_v20 = vld [vmem:[%s1821_s15 + $0xe8] sm:$0xff]  ;;  %v1064_v18 = vld [vmem:[%s1821_s15 + $0xf0] sm:$0xff]  ;;  %1153 = vst [vmem:[%s1821_s15 + $0x80] sm:$0xff] %v1121_v25  ;;  %v1126_v26 = vmax.f32 %v1094_v53, 0.0  ;;  %v1098_v44 = vadd.f32 %v2105_v35, %v1059_v6  ;;  %v1099_v22 = vadd.f32 %v2105_v35, %v1060_v7 }
 0x18e   : > { %1154 = vst [vmem:[%s1821_s15 + $0x88] sm:$0xff] %v1122_v43  ;;  %v1127_v32 = vmax.f32 %v1095_v61, 0.0  ;;  %v1065_v19 = vld [vmem:[%s1821_s15 + $0xf8] sm:$0xff]  ;;  %1155 = vst [vmem:[%s1821_s15 + $0x90] sm:$0xff] %v1123_v12  ;;  %v1128_v50 = vmax.f32 %v1096_v15, 0.0  ;;  %v1100_v23 = vadd.f32 %v2105_v35, %v1061_v8  ;;  %v1101_v56 = vadd.f32 %v2105_v35, %v1062_v9 }
 0x18f   : > { %1156 = vst [vmem:[%s1821_s15 + $0x98] sm:$0xff] %v1124_v13  ;;  %1157 = vst [vmem:[%s1821_s15 + $0xa0] sm:$0xff] %v1125_v14  ;;  %v1129_v62 = vmax.f32 %v1097_v38, 0.0  ;;  %v1130_v28 = vmax.f32 %v1098_v44, 0.0  ;;  %v1102_v4 = vadd.f32 %v2105_v35, %v1063_v20  ;;  %v1103_v29 = vadd.f32 %v2105_v35, %v1064_v18 }
 0x190   : > { %1158 = vst [vmem:[%s1821_s15 + $0xa8] sm:$0xff] %v1126_v26  ;;  %1159 = vst [vmem:[%s1821_s15 + $0xb0] sm:$0xff] %v1127_v32  ;;  %v1131_v30 = vmax.f32 %v1099_v22, 0.0  ;;  %v1132_v10 = vmax.f32 %v1100_v23, 0.0  ;;  %v1133_v16 = vmax.f32 %v1101_v56, 0.0  ;;  %v1104_v31 = vadd.f32 %v2105_v35, %v1065_v19 }
 0x191   : > { %1160 = vst [vmem:[%s1821_s15 + $0xb8] sm:$0xff] %v1128_v50  ;;  %1161 = vst [vmem:[%s1821_s15 + $0xc0] sm:$0xff] %v1129_v62  ;;  %v1134_v24 = vmax.f32 %v1102_v4, 0.0  ;;  %v1135_v36 = vmax.f32 %v1103_v29, 0.0 }
 0x192   : > { %1162 = vst [vmem:[%s1821_s15 + $0xc8] sm:$0xff] %v1130_v28  ;;  %1163 = vst [vmem:[%s1821_s15 + $0xd0] sm:$0xff] %v1131_v30  ;;  %v1136_v37 = vmax.f32 %v1104_v31, 0.0 }
 0x193   : > { %1164 = vst [vmem:[%s1821_s15 + $0xd8] sm:$0xff] %v1132_v10  ;;  %1165 = vst [vmem:[%s1821_s15 + $0xe0] sm:$0xff] %v1133_v16 }
 0x194   : > { %1166 = vst [vmem:[%s1821_s15 + $0xe8] sm:$0xff] %v1134_v24  ;;  %1167 = vst [vmem:[%s1821_s15 + $0xf0] sm:$0xff] %v1135_v36 }
 0x195   : > { %1168 = vst [vmem:[%s1821_s15 + $0xf8] sm:$0xff] %v1136_v37 }
 0x196 PF: > { %s13_s18 = sadd.s32 1, %s1659_s18   ;;  %s2227_s12 = smov %s1639_s13 }
 0x197   : > { %p10_p1 = scmp.ge.s32.totalorder %s13_s18, 30   ;;  %s2228_s13 = smov %s1732_s25 }
 0x198   : > { %s2229_s14 = smov %s1651_s16  ;;  %s2230_s15 = smov %s1655_s17 }
 0x199   : > { %s2231_s16 = smov %s2234_s19  ;;  %s2232_s17 = smov %s2238_s20 }
 0x19a   :  { %12 = sbr.rel (!%p10_p1) target bundleno = 4 (0x4), region = 123 }

// kernel: update_block3d_forward.9
= control target key start
LH: loop header
LB: loop body
LE: loop exit
PB: predicated region body
PF: predicated region fallthrough
CT: control target
= control target key end

     0   :  { %s1555_s12 = smov 0   ;;  %s1557_s13 = smov 0   ;;  %s1862_s0 = inlined_call_operand.vmem [shape: bf16[512,128], index: 0, kind: input, shape index: {}]   ;;  %s1863_s1 = inlined_call_operand.vmem [shape: bf16[128,256], index: 1, kind: input, shape index: {}]   ;;  %s1864_s2 = inlined_call_operand.vmem [shape: f32[1,256], index: 2, kind: input, shape index: {}]   ;;  %s1865_s3 = inlined_call_operand.vmem [shape: f32[512,256], index: 3, kind: output, shape index: {}]  }
   0x1   :  { %s1559_s14 = smov 0   ;;  %s1561_s15 = smov 0  }
   0x2   :  { %s1563_s16 = smov 0   ;;  %s1565_s17 = smov 0  }
   0x3   :  { %s1567_s18 = smov 0   ;;  %s1569_s19 = smov 0  }
   0x4   :  { %s1571_s20 = smov 0  }
   0x5 LB: > { %s1236_s21 = sadd.s32 4294967295, %s1533_s20   ;;  %s28_s22 = sadd.s32 1, %s1525_s18  ;;  %s1533_s20 = sphi %s1571_s20, %s13_s20   ;;  %s1529_s19 = sphi %s1569_s19, %s1874_s19   ;;  %s1525_s18 = sphi %s1567_s18, %s1873_s18   ;;  %s1521_s17 = sphi %s1565_s17, %s1872_s17   ;;  %s1517_s16 = sphi %s1563_s16, %s1871_s16   ;;  %s1513_s15 = sphi %s1561_s15, %s1870_s15   ;;  %s1509_s14 = sphi %s1559_s14, %s1869_s14   ;;  %s1505_s13 = sphi %s1557_s13, %s1868_s13   ;;  %s1501_s12 = sphi %s1555_s12, %s1867_s12  }
   0x6   : > { %p30_p0 = scmp.ge.s32.totalorder %s28_s22, 2  ;;  %s32_s23 = sadd.s32 1, %s1529_s19 }
   0x7   : > { %s69_s24 = sadd.s32 1, %s1513_s15  ;;  %p76_p1 = scmp.ne.s32.totalorder %s1513_s15, %s1509_s14 }
   0x8   : > { %s1876_s22 = smov (%p30_p0, %s28_s22), 0  ;;  %s1878_s23 = smov (!%p30_p0, %s32_s23), %s1529_s19 }
   0x9   : > { %s65_s25 = ssub.s32 %s1525_s18, %s1876_s22  ;;  %p77_p2 = scmp.eq.s32.totalorder %s1533_s20, 0 }
   0xa   : > { %p34_p3 = scmp.ge.s32.totalorder %s1878_s23, 2  ;;  %p67_p4 = scmp.eq.s32.totalorder %s65_s25, 0 }
   0xb   : > { %p78_p5 = por %p77_p2, %p76_p1  ;;  %s123_s26 = sadd.s32 1, %s1505_s13 }
   0xc   : > { %s1880_s23 = smov (%p34_p3, %s1878_s23), 0  ;;  %p133_p6 = scmp.ne.s32.totalorder %s1505_s13, %s1501_s12 }
   0xd   : > { %s1616_s27 = scalar_select %p67_p4, %s1513_s15, %s69_s24  }
   0xe   : > { %s118_s28 = ssub.s32 %s1529_s19, %s1880_s23  ;;  %p134_p7 = scmp.eq.s32.totalorder %s1236_s21, 3 }
   0xf   : > { %s120_s29 = sor.u32 %s118_s28, %s65_s25  ;;  %p1239_p10 = scmp.ge.s32.totalorder %s1533_s20, 4 }
  0x10   : > { %p121_p8 = scmp.eq.s32.totalorder %s120_s29, 0  ;;  %p1622_p9 = por %p134_p7, %p133_p6 }
  0x11   : > { %156 = sbr.rel (%p1239_p10) target bundleno = 38 (0x26), region = 16 }
  0x12   : > { %s1627_s4 = scalar_select %p121_p8, %s1505_s13, %s123_s26  }
  0x18   : > { %171 = sbr.rel (!%p78_p5) target bundleno = 38 (0x26), region = 24  ;;  %s173_s5 = sand.u32 (%p78_p5), 1, %s1513_s15  }
  0x19   : > { %s1241_s6 = sshll.u32 (%p78_p5), %s1525_s18, 2  ;;  %s1240_s7 = sshll.u32 (%p78_p5), %s173_s5, 6 }
  0x1a   : > { %s1635_s10 = scalar_lea.vmem (%p78_p5), %s1863_s1, %s1241_s6  ;;  %s175_s11 = scalar_lea.vmem (%p78_p5), [#allocation2], %s1240_s7 }
  0x1b   : > { %v196_v0 = vld [vmem:[%s1635_s10] sm:$0xf] (%p78_p5)  ;;  %v198_v1 = vld [vmem:[%s1635_s10 + $0x8] sm:$0xf] (%p78_p5)  ;;  %v200_v2 = vld [vmem:[%s1635_s10 + $0x10] sm:$0xf] (%p78_p5) }
  0x1c   : > { %197 = vst [vmem:[%s175_s11] sm:$0xf] (%p78_p5), %v196_v0  ;;  %199 = vst [vmem:[%s175_s11 + $0x4] sm:$0xf] (%p78_p5), %v198_v1  ;;  %v202_v3 = vld [vmem:[%s1635_s10 + $0x18] sm:$0xf] (%p78_p5) }
  0x1d   : > { %v204_v4 = vld [vmem:[%s1635_s10 + $0x20] sm:$0xf] (%p78_p5)  ;;  %201 = vst [vmem:[%s175_s11 + $0x8] sm:$0xf] (%p78_p5), %v200_v2  ;;  %203 = vst [vmem:[%s175_s11 + $0xc] sm:$0xf] (%p78_p5), %v202_v3 }
  0x1e   : > { %205 = vst [vmem:[%s175_s11 + $0x10] sm:$0xf] (%p78_p5), %v204_v4  ;;  %v206_v5 = vld [vmem:[%s1635_s10 + $0x28] sm:$0xf] (%p78_p5)  ;;  %v208_v6 = vld [vmem:[%s1635_s10 + $0x30] sm:$0xf] (%p78_p5) }
  0x1f   : > { %v210_v7 = vld [vmem:[%s1635_s10 + $0x38] sm:$0xf]  ;;  %207 = vst [vmem:[%s175_s11 + $0x14] sm:$0xf] %v206_v5  ;;  %209 = vst [vmem:[%s175_s11 + $0x18] sm:$0xf] %v208_v6 }
  0x20   : > { %211 = vst [vmem:[%s175_s11 + $0x1c] sm:$0xf] %v210_v7  ;;  %v212_v8 = vld [vmem:[%s1635_s10 + $0x40] sm:$0xf]  ;;  %v214_v9 = vld [vmem:[%s1635_s10 + $0x48] sm:$0xf] }
  0x21   : > { %v216_v10 = vld [vmem:[%s1635_s10 + $0x50] sm:$0xf]  ;;  %213 = vst [vmem:[%s175_s11 + $0x20] sm:$0xf] %v212_v8  ;;  %215 = vst [vmem:[%s175_s11 + $0x24] sm:$0xf] %v214_v9 }
  0x22   : > { %217 = vst [vmem:[%s175_s11 + $0x28] sm:$0xf] %v216_v10  ;;  %v218_v11 = vld [vmem:[%s1635_s10 + $0x58] sm:$0xf]  ;;  %v220_v12 = vld [vmem:[%s1635_s10 + $0x60] sm:$0xf] }
  0x23   : > { %v222_v13 = vld [vmem:[%s1635_s10 + $0x68] sm:$0xf]  ;;  %219 = vst [vmem:[%s175_s11 + $0x2c] sm:$0xf] %v218_v11  ;;  %221 = vst [vmem:[%s175_s11 + $0x30] sm:$0xf] %v220_v12 }
  0x24   : > { %223 = vst [vmem:[%s175_s11 + $0x34] sm:$0xf] %v222_v13  ;;  %v224_v14 = vld [vmem:[%s1635_s10 + $0x70] sm:$0xf]  ;;  %v226_v15 = vld [vmem:[%s1635_s10 + $0x78] sm:$0xf] }
  0x25   : > { %225 = vst [vmem:[%s175_s11 + $0x38] sm:$0xf] %v224_v14  ;;  %227 = vst [vmem:[%s175_s11 + $0x3c] sm:$0xf] %v226_v15 }
  0x26 PF: > { %p1242_p11 = scmp.ge.s32.totalorder %s1533_s20, 1  ;;  %p287_p12 = scmp.lt.s32.totalorder %s1533_s20, 5 }
  0x28   : > { %p288_p13 = pnand %p1242_p11, %p287_p12 }
  0x29   : > { %s294_s21 = sand.u32 (!%p288_p13), 1, %s1509_s14   ;;  %s1245_s24 = sshll.u32 (!%p288_p13), %s1521_s17, 5 }
  0x2a   : > { %291 = sbr.rel (%p288_p13) target bundleno = 330 (0x14a), region = 69  ;;  %s1243_s25 = sshll.u32 (!%p288_p13), %s294_s21, 6 }
  0x2b   : > { %p328_p0 = scmp.lt.s32.totalorder (!%p288_p13), %s1245_s24, 63  ;;  %s1657_s26 = scalar_lea.vmem (!%p288_p13), [#allocation2], %s1243_s25 }
  0x2c   : > { %v1439_v16 = vld [vmem:[%s1657_s26] sm:$0xff] (!%p288_p13)   ;;  %v1440_v17 = vld [vmem:[%s1657_s26 + $0x8] sm:$0xff] (!%p288_p13)   ;;  %v1441_v18 = vld [vmem:[%s1657_s26 + $0x10] sm:$0xff] (!%p288_p13)   ;;  %p337_p1 = scmp.lt.s32.totalorder (!%p288_p13), %s1517_s16, 1  ;;  %s324_s10 = sand.u32 (!%p288_p13), 1, %s1501_s12  }
  0x2d   : > { %1303 = vmatprep.subr.bf16.mxu0 (!%p288_p13), %v1439_v16  ;;  %1351 = vmatprep.subr.bf16.mxu1 (!%p288_p13), %v1439_v16  ;;  %v1442_v19 = vld [vmem:[%s1657_s26 + $0x18] sm:$0xff] (!%p288_p13)   ;;  %v1443_v22 = vld [vmem:[%s1657_s26 + $0x20] sm:$0xff] (!%p288_p13)   ;;  %v1444_v23 = vld [vmem:[%s1657_s26 + $0x28] sm:$0xff] (!%p288_p13)   ;;  %s1244_s11 = sshll.u32 (!%p288_p13), %s324_s10, 8 }
  0x2e   : > { %1304 = vmatpush3.bf16.msra.mxu0 (!%p288_p13), %v1439_v16  ;;  %1359 = vmatpush3.bf16.msra.mxu1 (!%p288_p13), %v1439_v16  ;;  %v1445_v24 = vld [vmem:[%s1657_s26 + $0x30] sm:$0xff] (!%p288_p13)   ;;  %v1446_v25 = vld [vmem:[%s1657_s26 + $0x38] sm:$0xff] (!%p288_p13)   ;;  %s1704_s12 = scalar_lea.vmem (!%p288_p13), [#allocation3], %s1244_s11 }
  0x2f   : > { %1305 = vmatprep.subr.bf16.mxu0 (!%p288_p13), %v1440_v17  ;;  %1352 = vmatprep.subr.bf16.mxu1 (!%p288_p13), %v1440_v17 }
  0x31   : > { %s1882_s24 = smov (!%p328_p0, %s1245_s24), 63  ;;  %s1278_s21 = sshll.u32 (%p1622_p9), %s1521_s17, 6 }
  0x32   : > { %s1246_s28 = sshll.u32 %s1882_s24, 2  ;;  %1306 = vmatpush3.bf16.msra.mxu0 %v1440_v17  ;;  %1360 = vmatpush3.bf16.msra.mxu1 %v1440_v17  ;;  %s978_s30 = sadd.s32 (%p1622_p9), %s1517_s16, %s1278_s21 }
  0x33   : > { %s1665_s5 = scalar_lea.vmem %s1862_s0, %s1246_s28  ;;  %1307 = vmatprep.subr.bf16.mxu0 %v1441_v18  ;;  %1353 = vmatprep.subr.bf16.mxu1 %v1441_v18  ;;  %s1275_s24 = sshll.u32 (%p1622_p9), %s978_s30, 3 }
  0x34   : > { %v1447_v20 = vld [vmem:[%s1665_s5] sm:$0xff]   ;;  %v1449_v26 = vld [vmem:[%s1665_s5 + $0x8] sm:$0xff]   ;;  %v1451_v28 = vld [vmem:[%s1665_s5 + $0x10] sm:$0xff]   ;;  %s338_s6 = scalar_select %p337_p1, %s1517_s16, 1 }
  0x35   : > { %v1448_v21 = vld [vmem:[%s1665_s5 + $0x40] sm:$0xff]   ;;  %1319 = vmatprep.mubr.bf16.mxu0 %v1447_v20  ;;  %v1450_v27 = vld [vmem:[%s1665_s5 + $0x48] sm:$0xff]   ;;  %v1452_v29 = vld [vmem:[%s1665_s5 + $0x50] sm:$0xff]   ;;  %s1778_s28 = scalar_lea.vmem (%p1622_p9), %s1865_s3, %s1275_s24 }
  0x36   : > { %1308 = vmatpush3.bf16.msra.mxu0 %v1441_v18  ;;  %1361 = vmatpush3.bf16.msra.mxu1 %v1441_v18  ;;  %v1453_v30 = vld [vmem:[%s1665_s5 + $0x18] sm:$0xff]   ;;  %v1455_v32 = vld [vmem:[%s1665_s5 + $0x20] sm:$0xff]   ;;  %v1457_v34 = vld [vmem:[%s1665_s5 + $0x28] sm:$0xff]   ;;  %s339_s9 = scalar_lea.vmem %s1864_s2, %s338_s6 }
  0x37   : > { %1309 = vmatprep.subr.bf16.mxu0 %v1442_v19  ;;  %1354 = vmatprep.subr.bf16.mxu1 %v1442_v19  ;;  %v1454_v31 = vld [vmem:[%s1665_s5 + $0x58] sm:$0xff]   ;;  %v1456_v33 = vld [vmem:[%s1665_s5 + $0x60] sm:$0xff]   ;;  %v1458_v35 = vld [vmem:[%s1665_s5 + $0x68] sm:$0xff]  }
  0x38   : > { %1335 = vmatprep.mubr.bf16.mxu1 %v1448_v21  ;;  %v1459_v36 = vld [vmem:[%s1665_s5 + $0x30] sm:$0xff]   ;;  %v1461_v38 = vld [vmem:[%s1665_s5 + $0x38] sm:$0xff]   ;;  %v1694_v40 = vld [vmem:[%s339_s9] ss:$0 sm:$0xff] }
  0x39   : > { %v1460_v37 = vld [vmem:[%s1665_s5 + $0x70] sm:$0xff]   ;;  %v1462_v39 = vld [vmem:[%s1665_s5 + $0x78] sm:$0xff]  }
  0x3a   : > { %1310 = vmatpush3.bf16.msra.mxu0 %v1442_v19  ;;  %1362 = vmatpush3.bf16.msra.mxu1 %v1442_v19 }
  0x3b   : > { %1311 = vmatprep.subr.bf16.mxu0 %v1443_v22  ;;  %1355 = vmatprep.subr.bf16.mxu1 %v1443_v22 }
  0x3e   : > { %1312 = vmatpush3.bf16.msra.mxu0 %v1443_v22  ;;  %1363 = vmatpush3.bf16.msra.mxu1 %v1443_v22 }
  0x3f   : > { %1313 = vmatprep.subr.bf16.mxu0 %v1444_v23  ;;  %1356 = vmatprep.subr.bf16.mxu1 %v1444_v23 }
  0x42   : > { %1314 = vmatpush3.bf16.msra.mxu0 %v1444_v23  ;;  %1364 = vmatpush3.bf16.msra.mxu1 %v1444_v23 }
  0x43   : > { %1315 = vmatprep.subr.bf16.mxu0 %v1445_v24  ;;  %1357 = vmatprep.subr.bf16.mxu1 %v1445_v24 }
  0x46   : > { %1316 = vmatpush3.bf16.msra.mxu0 %v1445_v24  ;;  %1365 = vmatpush3.bf16.msra.mxu1 %v1445_v24 }
  0x47   : > { %1317 = vmatprep.subr.bf16.mxu0 %v1446_v25  ;;  %1358 = vmatprep.subr.bf16.mxu1 %v1446_v25 }
  0x4a   : > { %1318 = vmatpush3.bf16.msra.mxu0 %v1446_v25  ;;  %1366 = vmatpush3.bf16.msra.mxu1 %v1446_v25 }
  0x4d   : > { %1320 = vmatmul.mubr.bf16.vlgmr.msra.gmra.mrb[0].mxu0 %v1449_v26  ;;  %1336 = vmatmul.mubr.bf16.vlgmr.msra.gmra.mrb[0].mxu1 %v1450_v27 }
  0x4e   : > { %1323 = vmatprep.mubr.bf16.mxu0 %v1451_v28  ;;  %1339 = vmatprep.mubr.bf16.mxu1 %v1452_v29 }
  0x55   : > { %1324 = vmatmul.mubr.bf16.gmra.mrb[4].mxu0 %v1453_v30  ;;  %1340 = vmatmul.mubr.bf16.gmra.mrb[4].mxu1 %v1454_v31 }
  0x56   : > { %1327 = vmatprep.mubr.bf16.mxu0 %v1455_v32  ;;  %1343 = vmatprep.mubr.bf16.mxu1 %v1456_v33 }
  0x5d   : > { %1328 = vmatmul.mubr.bf16.gmra.mrb[8].mxu0 %v1457_v34  ;;  %1344 = vmatmul.mubr.bf16.gmra.mrb[8].mxu1 %v1458_v35 }
  0x5e   : > { %1331 = vmatprep.mubr.bf16.mxu0 %v1459_v36  ;;  %1347 = vmatprep.mubr.bf16.mxu1 %v1460_v37 }
  0x65   : > { %1332 = vmatmul.mubr.bf16.gmra.mrb[12].mxu0 %v1461_v38  ;;  %1348 = vmatmul.mubr.bf16.gmra.mrb[12].mxu1 %v1462_v39 }
 0x120   : > { %v1321_v41 = vpop.f32.mrb[0].mxu0  ;;  %v1337_v42 = vpop.f32.mrb[0].mxu1 }
 0x121   : > { %v875_v43 = vadd.f32 %v1321_v41, %v1694_v40  ;;  %v891_v44 = vadd.f32 %v1337_v42, %v1694_v40  ;;  %v568_v45 = vpop.f32.mrb[1].mxu0  ;;  %v632_v46 = vpop.f32.mrb[1].mxu1 }
 0x122   : > { %v873_v47 = vadd.f32 %v1694_v40, %v568_v45  ;;  %v889_v48 = vadd.f32 %v1694_v40, %v632_v46  ;;  %v1322_v49 = vpop.f32.mrb[2].mxu0  ;;  %v1338_v50 = vpop.f32.mrb[2].mxu1 }
 0x123   : > { %v907_v51 = vmax.f32 %v875_v43, 0.0  ;;  %v923_v52 = vmax.f32 %v891_v44, 0.0  ;;  %v876_v53 = vadd.f32 %v1322_v49, %v1694_v40  ;;  %v892_v54 = vadd.f32 %v1338_v50, %v1694_v40  ;;  %v571_v55 = vpop.f32.mrb[3].mxu0  ;;  %v635_v56 = vpop.f32.mrb[3].mxu1 }
 0x124   : > { %v905_v57 = vmax.f32 %v873_v47, 0.0  ;;  %v921_v58 = vmax.f32 %v889_v48, 0.0  ;;  %v874_v59 = vadd.f32 %v1694_v40, %v571_v55  ;;  %v890_v60 = vadd.f32 %v1694_v40, %v635_v56 }
 0x125   : > { %939 = vst [vmem:[%s1704_s12 + $0x10] sm:$0xff] %v907_v51  ;;  %955 = vst [vmem:[%s1704_s12 + $0x90] sm:$0xff] %v923_v52  ;;  %v908_v61 = vmax.f32 %v876_v53, 0.0  ;;  %v924_v62 = vmax.f32 %v892_v54, 0.0 }
 0x126   : > { %937 = vst [vmem:[%s1704_s12] sm:$0xff] %v905_v57  ;;  %953 = vst [vmem:[%s1704_s12 + $0x80] sm:$0xff] %v921_v58  ;;  %v906_v63 = vmax.f32 %v874_v59, 0.0  ;;  %v922_v0 = vmax.f32 %v890_v60, 0.0 }
 0x127   : > { %940 = vst [vmem:[%s1704_s12 + $0x18] sm:$0xff] %v908_v61  ;;  %956 = vst [vmem:[%s1704_s12 + $0x98] sm:$0xff] %v924_v62 }
 0x128   : > { %938 = vst [vmem:[%s1704_s12 + $0x8] sm:$0xff] %v906_v63  ;;  %954 = vst [vmem:[%s1704_s12 + $0x88] sm:$0xff] %v922_v0  ;;  %v1325_v1 = vpop.f32.mrb[4].mxu0  ;;  %v1341_v2 = vpop.f32.mrb[4].mxu1 }
 0x129   : > { %v879_v3 = vadd.f32 %v1325_v1, %v1694_v40  ;;  %v895_v4 = vadd.f32 %v1341_v2, %v1694_v40  ;;  %v584_v5 = vpop.f32.mrb[5].mxu0  ;;  %v648_v6 = vpop.f32.mrb[5].mxu1 }
 0x12a   : > { %v877_v7 = vadd.f32 %v1694_v40, %v584_v5  ;;  %v893_v8 = vadd.f32 %v1694_v40, %v648_v6  ;;  %v1326_v9 = vpop.f32.mrb[6].mxu0  ;;  %v1342_v10 = vpop.f32.mrb[6].mxu1 }
 0x12b   : > { %v911_v11 = vmax.f32 %v879_v3, 0.0  ;;  %v927_v12 = vmax.f32 %v895_v4, 0.0  ;;  %v880_v13 = vadd.f32 %v1326_v9, %v1694_v40  ;;  %v896_v14 = vadd.f32 %v1342_v10, %v1694_v40  ;;  %v587_v15 = vpop.f32.mrb[7].mxu0  ;;  %v651_v16 = vpop.f32.mrb[7].mxu1 }
 0x12c   : > { %v909_v17 = vmax.f32 %v877_v7, 0.0  ;;  %v925_v18 = vmax.f32 %v893_v8, 0.0  ;;  %v878_v19 = vadd.f32 %v1694_v40, %v587_v15  ;;  %v894_v20 = vadd.f32 %v1694_v40, %v651_v16 }
 0x12d   : > { %943 = vst [vmem:[%s1704_s12 + $0x30] sm:$0xff] %v911_v11  ;;  %959 = vst [vmem:[%s1704_s12 + $0xb0] sm:$0xff] %v927_v12  ;;  %v912_v21 = vmax.f32 %v880_v13, 0.0  ;;  %v928_v22 = vmax.f32 %v896_v14, 0.0  ;;  %v1074_v11 = vld [vmem:[%s1704_s12 + $0x10] sm:$0xff] (%p1622_p9) }
 0x12e   : > { %941 = vst [vmem:[%s1704_s12 + $0x20] sm:$0xff] %v909_v17  ;;  %957 = vst [vmem:[%s1704_s12 + $0xa0] sm:$0xff] %v925_v18  ;;  %v910_v23 = vmax.f32 %v878_v19, 0.0  ;;  %v926_v24 = vmax.f32 %v894_v20, 0.0  ;;  %v1076_v12 = vld [vmem:[%s1704_s12 + $0x18] sm:$0xff] (%p1622_p9) }
 0x12f   : > { %944 = vst [vmem:[%s1704_s12 + $0x38] sm:$0xff] %v912_v21  ;;  %960 = vst [vmem:[%s1704_s12 + $0xb8] sm:$0xff] %v928_v22  ;;  %v1072_v10 = vld [vmem:[%s1704_s12 + $0x8] sm:$0xff] (%p1622_p9) }
 0x130   : > { %942 = vst [vmem:[%s1704_s12 + $0x28] sm:$0xff] %v910_v23  ;;  %958 = vst [vmem:[%s1704_s12 + $0xa8] sm:$0xff] %v926_v24  ;;  %v1329_v25 = vpop.f32.mrb[8].mxu0  ;;  %v1345_v26 = vpop.f32.mrb[8].mxu1 }
 0x131   : > { %v883_v27 = vadd.f32 %v1329_v25, %v1694_v40  ;;  %v899_v28 = vadd.f32 %v1345_v26, %v1694_v40  ;;  %v600_v29 = vpop.f32.mrb[9].mxu0  ;;  %v664_v30 = vpop.f32.mrb[9].mxu1  ;;  %1073 = vst [vmem:[%s1778_s28 + $0x10] sm:$0xff] (%p1622_p9), %v1072_v10  ;;  %1075 = vst [vmem:[%s1778_s28 + $0x20] sm:$0xff] (%p1622_p9), %v1074_v11  ;;  %v1102_v25 = vld [vmem:[%s1704_s12 + $0x80] sm:$0xff] (%p1622_p9)  ;;  %v1104_v26 = vld [vmem:[%s1704_s12 + $0x88] sm:$0xff] (%p1622_p9) }
 0x132   : > { %v881_v31 = vadd.f32 %v1694_v40, %v600_v29  ;;  %v897_v32 = vadd.f32 %v1694_v40, %v664_v30  ;;  %v1330_v33 = vpop.f32.mrb[10].mxu0  ;;  %v1346_v34 = vpop.f32.mrb[10].mxu1  ;;  %1077 = vst [vmem:[%s1778_s28 + $0x30] sm:$0xff] (%p1622_p9), %v1076_v12  ;;  %1103 = vst [vmem:[%s1778_s28 + $0x100] sm:$0xff] (%p1622_p9), %v1102_v25 }
 0x133   : > { %v915_v35 = vmax.f32 %v883_v27, 0.0  ;;  %v931_v36 = vmax.f32 %v899_v28, 0.0  ;;  %v884_v37 = vadd.f32 %v1330_v33, %v1694_v40  ;;  %v900_v38 = vadd.f32 %v1346_v34, %v1694_v40  ;;  %v603_v39 = vpop.f32.mrb[11].mxu0  ;;  %v667_v41 = vpop.f32.mrb[11].mxu1  ;;  %1105 = vst [vmem:[%s1778_s28 + $0x110] sm:$0xff] (%p1622_p9), %v1104_v26  ;;  %v1106_v27 = vld [vmem:[%s1704_s12 + $0x90] sm:$0xff] (%p1622_p9) }
 0x134   : > { %v913_v42 = vmax.f32 %v881_v31, 0.0  ;;  %v929_v43 = vmax.f32 %v897_v32, 0.0  ;;  %v882_v44 = vadd.f32 %v1694_v40, %v603_v39  ;;  %v898_v45 = vadd.f32 %v1694_v40, %v667_v41  ;;  %v1082_v15 = vld [vmem:[%s1704_s12 + $0x30] sm:$0xff] (%p1622_p9)  ;;  %v1108_v28 = vld [vmem:[%s1704_s12 + $0x98] sm:$0xff] (%p1622_p9)  ;;  %1107 = vst [vmem:[%s1778_s28 + $0x120] sm:$0xff] (%p1622_p9), %v1106_v27 }
 0x135   : > { %947 = vst [vmem:[%s1704_s12 + $0x50] sm:$0xff] %v915_v35  ;;  %963 = vst [vmem:[%s1704_s12 + $0xd0] sm:$0xff] %v931_v36  ;;  %v916_v46 = vmax.f32 %v884_v37, 0.0  ;;  %v932_v47 = vmax.f32 %v900_v38, 0.0  ;;  %v1078_v13 = vld [vmem:[%s1704_s12 + $0x20] sm:$0xff] (%p1622_p9)  ;;  %v1114_v31 = vld [vmem:[%s1704_s12 + $0xb0] sm:$0xff] (%p1622_p9) }
 0x136   : > { %945 = vst [vmem:[%s1704_s12 + $0x40] sm:$0xff] %v913_v42  ;;  %961 = vst [vmem:[%s1704_s12 + $0xc0] sm:$0xff] %v929_v43  ;;  %v914_v48 = vmax.f32 %v882_v44, 0.0  ;;  %v930_v49 = vmax.f32 %v898_v45, 0.0  ;;  %v1084_v16 = vld [vmem:[%s1704_s12 + $0x38] sm:$0xff] (%p1622_p9)  ;;  %v1110_v29 = vld [vmem:[%s1704_s12 + $0xa0] sm:$0xff] (%p1622_p9) }
 0x137   : > { %948 = vst [vmem:[%s1704_s12 + $0x58] sm:$0xff] %v916_v46  ;;  %964 = vst [vmem:[%s1704_s12 + $0xd8] sm:$0xff] %v932_v47  ;;  %v1080_v14 = vld [vmem:[%s1704_s12 + $0x28] sm:$0xff] (%p1622_p9)  ;;  %v1116_v32 = vld [vmem:[%s1704_s12 + $0xb8] sm:$0xff] (%p1622_p9) }
 0x138   : > { %946 = vst [vmem:[%s1704_s12 + $0x48] sm:$0xff] %v914_v48  ;;  %962 = vst [vmem:[%s1704_s12 + $0xc8] sm:$0xff] %v930_v49  ;;  %v1333_v50 = vpop.f32.mrb[12].mxu0  ;;  %v1349_v51 = vpop.f32.mrb[12].mxu1  ;;  %v1112_v30 = vld [vmem:[%s1704_s12 + $0xa8] sm:$0xff] (%p1622_p9) }
 0x139   : > { %v887_v52 = vadd.f32 %v1333_v50, %v1694_v40  ;;  %v903_v53 = vadd.f32 %v1349_v51, %v1694_v40  ;;  %v616_v54 = vpop.f32.mrb[13].mxu0  ;;  %v680_v55 = vpop.f32.mrb[13].mxu1  ;;  %1079 = vst [vmem:[%s1778_s28 + $0x40] sm:$0xff] (%p1622_p9), %v1078_v13  ;;  %1081 = vst [vmem:[%s1778_s28 + $0x50] sm:$0xff] (%p1622_p9), %v1080_v14 }
 0x13a   : > { %v885_v56 = vadd.f32 %v1694_v40, %v616_v54  ;;  %v901_v57 = vadd.f32 %v1694_v40, %v680_v55  ;;  %v1334_v58 = vpop.f32.mrb[14].mxu0  ;;  %v1350_v59 = vpop.f32.mrb[14].mxu1  ;;  %975 = sbr.rel (!%p1622_p9) target bundleno = 330 (0x14a), region = 89  ;;  %1083 = vst [vmem:[%s1778_s28 + $0x60] sm:$0xff] (%p1622_p9), %v1082_v15  ;;  %1085 = vst [vmem:[%s1778_s28 + $0x70] sm:$0xff] (%p1622_p9), %v1084_v16 }
 0x13b   : > { %v919_v60 = vmax.f32 %v887_v52, 0.0  ;;  %v935_v61 = vmax.f32 %v903_v53, 0.0  ;;  %v888_v62 = vadd.f32 %v1334_v58, %v1694_v40  ;;  %v904_v63 = vadd.f32 %v1350_v59, %v1694_v40  ;;  %v619_v0 = vpop.f32.mrb[15].mxu0  ;;  %v683_v1 = vpop.f32.mrb[15].mxu1  ;;  %1109 = vst [vmem:[%s1778_s28 + $0x130] sm:$0xff] (%p1622_p9), %v1108_v28  ;;  %1111 = vst [vmem:[%s1778_s28 + $0x140] sm:$0xff] (%p1622_p9), %v1110_v29 }
 0x13c   : > { %v917_v2 = vmax.f32 %v885_v56, 0.0  ;;  %v933_v3 = vmax.f32 %v901_v57, 0.0  ;;  %v886_v4 = vadd.f32 %v1694_v40, %v619_v0  ;;  %v902_v5 = vadd.f32 %v1694_v40, %v683_v1  ;;  %v1070_v40 = vld [vmem:[%s1704_s12] sm:$0xff] (%p1622_p9)  ;;  %v1090_v19 = vld [vmem:[%s1704_s12 + $0x50] sm:$0xff] (%p1622_p9)  ;;  %1113 = vst [vmem:[%s1778_s28 + $0x150] sm:$0xff] (%p1622_p9), %v1112_v30  ;;  %1115 = vst [vmem:[%s1778_s28 + $0x160] sm:$0xff] (%p1622_p9), %v1114_v31 }
 0x13d   : > { %951 = vst [vmem:[%s1704_s12 + $0x70] sm:$0xff] %v919_v60  ;;  %967 = vst [vmem:[%s1704_s12 + $0xf0] sm:$0xff] %v935_v61  ;;  %v920_v6 = vmax.f32 %v888_v62, 0.0  ;;  %v936_v7 = vmax.f32 %v904_v63, 0.0  ;;  %v1086_v17 = vld [vmem:[%s1704_s12 + $0x40] sm:$0xff] (%p1622_p9)  ;;  %v1122_v35 = vld [vmem:[%s1704_s12 + $0xd0] sm:$0xff] (%p1622_p9) }
 0x13e   : > { %949 = vst [vmem:[%s1704_s12 + $0x60] sm:$0xff] %v917_v2  ;;  %965 = vst [vmem:[%s1704_s12 + $0xe0] sm:$0xff] %v933_v3  ;;  %v918_v8 = vmax.f32 %v886_v4, 0.0  ;;  %v934_v9 = vmax.f32 %v902_v5, 0.0  ;;  %v1092_v20 = vld [vmem:[%s1704_s12 + $0x58] sm:$0xff] (%p1622_p9)  ;;  %v1118_v33 = vld [vmem:[%s1704_s12 + $0xc0] sm:$0xff] (%p1622_p9) }
 0x13f   : > { %952 = vst [vmem:[%s1704_s12 + $0x78] sm:$0xff] %v920_v6  ;;  %968 = vst [vmem:[%s1704_s12 + $0xf8] sm:$0xff] %v936_v7  ;;  %v1088_v18 = vld [vmem:[%s1704_s12 + $0x48] sm:$0xff] (%p1622_p9)  ;;  %v1124_v36 = vld [vmem:[%s1704_s12 + $0xd8] sm:$0xff] (%p1622_p9) }
 0x140   : > { %950 = vst [vmem:[%s1704_s12 + $0x68] sm:$0xff] %v918_v8  ;;  %966 = vst [vmem:[%s1704_s12 + $0xe8] sm:$0xff] %v934_v9  ;;  %v1120_v34 = vld [vmem:[%s1704_s12 + $0xc8] sm:$0xff] (%p1622_p9) }
 0x141   : > { %1071 = vst [vmem:[%s1778_s28] sm:$0xff] %v1070_v40  ;;  %1087 = vst [vmem:[%s1778_s28 + $0x80] sm:$0xff] %v1086_v17 }
 0x142   : > { %1089 = vst [vmem:[%s1778_s28 + $0x90] sm:$0xff] %v1088_v18  ;;  %1091 = vst [vmem:[%s1778_s28 + $0xa0] sm:$0xff] %v1090_v19 }
 0x143   : > { %1093 = vst [vmem:[%s1778_s28 + $0xb0] sm:$0xff] %v1092_v20  ;;  %1117 = vst [vmem:[%s1778_s28 + $0x170] sm:$0xff] %v1116_v32 }
 0x144   : > { %v1098_v23 = vld [vmem:[%s1704_s12 + $0x70] sm:$0xff]  ;;  %1119 = vst [vmem:[%s1778_s28 + $0x180] sm:$0xff] %v1118_v33  ;;  %1121 = vst [vmem:[%s1778_s28 + $0x190] sm:$0xff] %v1120_v34 }
 0x145   : > { %v1094_v21 = vld [vmem:[%s1704_s12 + $0x60] sm:$0xff]  ;;  %1099 = vst [vmem:[%s1778_s28 + $0xe0] sm:$0xff] %v1098_v23  ;;  %1123 = vst [vmem:[%s1778_s28 + $0x1a0] sm:$0xff] %v1122_v35  ;;  %v1130_v39 = vld [vmem:[%s1704_s12 + $0xf0] sm:$0xff] }
 0x146   : > { %1095 = vst [vmem:[%s1778_s28 + $0xc0] sm:$0xff] %v1094_v21  ;;  %v1100_v24 = vld [vmem:[%s1704_s12 + $0x78] sm:$0xff]  ;;  %v1126_v37 = vld [vmem:[%s1704_s12 + $0xe0] sm:$0xff]  ;;  %1125 = vst [vmem:[%s1778_s28 + $0x1b0] sm:$0xff] %v1124_v36 }
 0x147   : > { %v1096_v22 = vld [vmem:[%s1704_s12 + $0x68] sm:$0xff]  ;;  %1101 = vst [vmem:[%s1778_s28 + $0xf0] sm:$0xff] %v1100_v24  ;;  %1127 = vst [vmem:[%s1778_s28 + $0x1c0] sm:$0xff] %v1126_v37  ;;  %v1132_v41 = vld [vmem:[%s1704_s12 + $0xf8] sm:$0xff] }
 0x148   : > { %1097 = vst [vmem:[%s1778_s28 + $0xd0] sm:$0xff] %v1096_v22  ;;  %v1128_v38 = vld [vmem:[%s1704_s12 + $0xe8] sm:$0xff]  ;;  %1131 = vst [vmem:[%s1778_s28 + $0x1e0] sm:$0xff] %v1130_v39 }
 0x149   : > { %1129 = vst [vmem:[%s1778_s28 + $0x1d0] sm:$0xff] %v1128_v38  ;;  %1133 = vst [vmem:[%s1778_s28 + $0x1f0] sm:$0xff] %v1132_v41 }
 0x14a PF: > { %s13_s20 = sadd.s32 1, %s1533_s20   ;;  %s1867_s12 = smov %s1505_s13 }
 0x14b   : > { %p10_p2 = scmp.ge.s32.totalorder %s13_s20, 6   ;;  %s1868_s13 = smov %s1627_s4 }
 0x14c   : > { %s1869_s14 = smov %s1513_s15  ;;  %s1870_s15 = smov %s1616_s27 }
 0x14d   : > { %s1871_s16 = smov %s1525_s18  ;;  %s1872_s17 = smov %s1529_s19 }
 0x14e   : > { %s1873_s18 = smov %s1876_s22  ;;  %s1874_s19 = smov %s1880_s23 }
 0x14f   :  { %12 = sbr.rel (!%p10_p2) target bundleno = 5 (0x5), region = 164 }

// kernel: update_block3d_forward.10
= control target key start
LH: loop header
LB: loop body
LE: loop exit
PB: predicated region body
PF: predicated region fallthrough
CT: control target
= control target key end

     0   :  { %s1681_s12 = smov 0   ;;  %s1683_s13 = smov 0   ;;  %s2223_s0 = inlined_call_operand.vmem [shape: bf16[512,6912], index: 0, kind: input, shape index: {}]   ;;  %s2224_s1 = inlined_call_operand.vmem [shape: bf16[6912,128], index: 1, kind: input, shape index: {}]   ;;  %s2225_s2 = inlined_call_operand.vmem [shape: f32[1,128], index: 2, kind: input, shape index: {}]   ;;  %s2226_s3 = inlined_call_operand.vmem [shape: f32[512,128], index: 3, kind: output, shape index: {}]  }
   0x1   :  { %s1685_s14 = smov 0   ;;  %s1687_s15 = smov 0  }
   0x2   :  { %s1689_s16 = smov 0   ;;  %s1691_s17 = smov 0  }
   0x3   :  { %s1693_s18 = smov 0  }
   0x4 LB: > { %s25_s19 = sadd.s32 1, %s1651_s16  ;;  %s32_s20 = sadd.s32 1, %s1655_s17  ;;  %s1659_s18 = sphi %s1693_s18, %s13_s18   ;;  %s1655_s17 = sphi %s1691_s17, %s2232_s17   ;;  %s1651_s16 = sphi %s1689_s16, %s2231_s16   ;;  %s1647_s15 = sphi %s1687_s15, %s2230_s15   ;;  %s1643_s14 = sphi %s1685_s14, %s2229_s14   ;;  %s1639_s13 = sphi %s1683_s13, %s2228_s13   ;;  %s1635_s12 = sphi %s1681_s12, %s2227_s12  }
   0x5   : > { %p26_p0 = scmp.ge.s32.totalorder %s25_s19, 27  ;;  %p48_p1 = scmp.ne.s32.totalorder %s1639_s13, %s1635_s12 }
   0x6   : > { %p49_p2 = scmp.eq.s32.totalorder %s1659_s18, 0  ;;  %s41_s24 = sadd.s32 1, %s1639_s13 }
   0x7   : > { %s2234_s19 = smov (%p26_p0, %s25_s19), 0  ;;  %s2236_s20 = smov (!%p26_p0, %s32_s20), %s1655_s17 }
   0x8   : > { %p50_p3 = por %p49_p2, %p48_p1  ;;  %p34_p4 = scmp.ge.s32.totalorder %s2236_s20, 2 }
   0x9   : > { %s37_s21 = ssub.s32 %s1651_s16, %s2234_s19  ;;  %p1290_p6 = scmp.ge.s32.totalorder %s1659_s18, 54 }
   0xa   : > { %s2238_s20 = smov (%p34_p4, %s2236_s20), 0 }
   0xb   : > { %s36_s22 = ssub.s32 %s1655_s17, %s2238_s20  ;;  %162 = sbr.rel (%p1290_p6) target bundleno = 42 (0x2a), region = 20 }
   0xc   : > { %s38_s23 = sor.u32 %s37_s21, %s36_s22 }
   0xd   : > { %p39_p5 = scmp.eq.s32.totalorder %s38_s23, 0 }
   0xf   : > { %s1732_s25 = scalar_select %p39_p5, %s1639_s13, %s41_s24  }
  0x12   : > { %165 = sbr.rel (!%p50_p3) target bundleno = 42 (0x2a), region = 24  ;;  %s167_s26 = sand.u32 (%p50_p3), 1, %s1639_s13  }
  0x13   : > { %s1293_s27 = sshll.u32 (%p50_p3), %s1651_s16, 1  ;;  %s1291_s28 = sshll.u32 (%p50_p3), %s167_s26, 8 }
  0x14   : > { %s1484_s29 = smul.u32 (%p50_p3), 1728, %s1655_s17  ;;  %s1746_s8 = scalar_lea.vmem (%p50_p3), [#allocation2], %s1291_s28 }
  0x16   : > { %s173_s30 = sadd.s32 (%p50_p3), %s1484_s29, %s1293_s27 }
  0x17   : > { %s1295_s4 = sshll.u32 (%p50_p3), %s173_s30, 2 }
  0x18   : > { %s1741_s7 = scalar_lea.vmem (%p50_p3), %s2223_s0, %s1295_s4 }
  0x19   : > { %v265_v0 = vld [vmem:[%s1741_s7] sm:$0xff]  ;;  %v267_v1 = vld [vmem:[%s1741_s7 + $0xd8] sm:$0xff]  ;;  %v269_v2 = vld [vmem:[%s1741_s7 + $0x1b0] sm:$0xff] }
  0x1a   : > { %266 = vst [vmem:[%s1746_s8] sm:$0xff] %v265_v0  ;;  %268 = vst [vmem:[%s1746_s8 + $0x8] sm:$0xff] %v267_v1  ;;  %v271_v3 = vld [vmem:[%s1741_s7 + $0x288] sm:$0xff]  ;;  %v273_v4 = vld [vmem:[%s1741_s7 + $0x360] sm:$0xff] }
  0x1b   : > { %270 = vst [vmem:[%s1746_s8 + $0x10] sm:$0xff] %v269_v2  ;;  %v275_v5 = vld [vmem:[%s1741_s7 + $0x438] sm:$0xff]  ;;  %272 = vst [vmem:[%s1746_s8 + $0x18] sm:$0xff] %v271_v3  ;;  %v277_v6 = vld [vmem:[%s1741_s7 + $0x510] sm:$0xff] }
  0x1c   : > { %274 = vst [vmem:[%s1746_s8 + $0x20] sm:$0xff] %v273_v4  ;;  %276 = vst [vmem:[%s1746_s8 + $0x28] sm:$0xff] %v275_v5  ;;  %v279_v7 = vld [vmem:[%s1741_s7 + $0x5e8] sm:$0xff]  ;;  %v281_v8 = vld [vmem:[%s1741_s7 + $0x6c0] sm:$0xff] }
  0x1d   : > { %278 = vst [vmem:[%s1746_s8 + $0x30] sm:$0xff] %v277_v6  ;;  %280 = vst [vmem:[%s1746_s8 + $0x38] sm:$0xff] %v279_v7  ;;  %v283_v9 = vld [vmem:[%s1741_s7 + $0x798] sm:$0xff]  ;;  %v285_v10 = vld [vmem:[%s1741_s7 + $0x870] sm:$0xff] }
  0x1e   : > { %282 = vst [vmem:[%s1746_s8 + $0x40] sm:$0xff] %v281_v8  ;;  %v287_v11 = vld [vmem:[%s1741_s7 + $0x948] sm:$0xff]  ;;  %284 = vst [vmem:[%s1746_s8 + $0x48] sm:$0xff] %v283_v9  ;;  %v289_v12 = vld [vmem:[%s1741_s7 + $0xa20] sm:$0xff] }
  0x1f   : > { %286 = vst [vmem:[%s1746_s8 + $0x50] sm:$0xff] %v285_v10  ;;  %288 = vst [vmem:[%s1746_s8 + $0x58] sm:$0xff] %v287_v11  ;;  %v291_v13 = vld [vmem:[%s1741_s7 + $0xaf8] sm:$0xff]  ;;  %v293_v14 = vld [vmem:[%s1741_s7 + $0xbd0] sm:$0xff] }
  0x20   : > { %290 = vst [vmem:[%s1746_s8 + $0x60] sm:$0xff] %v289_v12  ;;  %292 = vst [vmem:[%s1746_s8 + $0x68] sm:$0xff] %v291_v13  ;;  %v295_v15 = vld [vmem:[%s1741_s7 + $0xca8] sm:$0xff]  ;;  %v297_v16 = vld [vmem:[%s1741_s7 + $0xd80] sm:$0xff] }
  0x21   : > { %294 = vst [vmem:[%s1746_s8 + $0x70] sm:$0xff] %v293_v14  ;;  %v299_v17 = vld [vmem:[%s1741_s7 + $0xe58] sm:$0xff]  ;;  %296 = vst [vmem:[%s1746_s8 + $0x78] sm:$0xff] %v295_v15  ;;  %v301_v18 = vld [vmem:[%s1741_s7 + $0xf30] sm:$0xff] }
  0x22   : > { %298 = vst [vmem:[%s1746_s8 + $0x80] sm:$0xff] %v297_v16  ;;  %300 = vst [vmem:[%s1746_s8 + $0x88] sm:$0xff] %v299_v17  ;;  %v303_v19 = vld [vmem:[%s1741_s7 + $0x1008] sm:$0xff]  ;;  %v305_v20 = vld [vmem:[%s1741_s7 + $0x10e0] sm:$0xff] }
  0x23   : > { %302 = vst [vmem:[%s1746_s8 + $0x90] sm:$0xff] %v301_v18  ;;  %304 = vst [vmem:[%s1746_s8 + $0x98] sm:$0xff] %v303_v19  ;;  %v307_v21 = vld [vmem:[%s1741_s7 + $0x11b8] sm:$0xff]  ;;  %v309_v22 = vld [vmem:[%s1741_s7 + $0x1290] sm:$0xff] }
  0x24   : > { %306 = vst [vmem:[%s1746_s8 + $0xa0] sm:$0xff] %v305_v20  ;;  %v311_v23 = vld [vmem:[%s1741_s7 + $0x1368] sm:$0xff]  ;;  %308 = vst [vmem:[%s1746_s8 + $0xa8] sm:$0xff] %v307_v21  ;;  %v313_v24 = vld [vmem:[%s1741_s7 + $0x1440] sm:$0xff] }
  0x25   : > { %310 = vst [vmem:[%s1746_s8 + $0xb0] sm:$0xff] %v309_v22  ;;  %312 = vst [vmem:[%s1746_s8 + $0xb8] sm:$0xff] %v311_v23  ;;  %v315_v25 = vld [vmem:[%s1741_s7 + $0x1518] sm:$0xff]  ;;  %v317_v26 = vld [vmem:[%s1741_s7 + $0x15f0] sm:$0xff] }
  0x26   : > { %314 = vst [vmem:[%s1746_s8 + $0xc0] sm:$0xff] %v313_v24  ;;  %316 = vst [vmem:[%s1746_s8 + $0xc8] sm:$0xff] %v315_v25  ;;  %v319_v27 = vld [vmem:[%s1741_s7 + $0x16c8] sm:$0xff]  ;;  %v321_v28 = vld [vmem:[%s1741_s7 + $0x17a0] sm:$0xff] }
  0x27   : > { %318 = vst [vmem:[%s1746_s8 + $0xd0] sm:$0xff] %v317_v26  ;;  %v323_v29 = vld [vmem:[%s1741_s7 + $0x1878] sm:$0xff]  ;;  %320 = vst [vmem:[%s1746_s8 + $0xd8] sm:$0xff] %v319_v27  ;;  %v325_v30 = vld [vmem:[%s1741_s7 + $0x1950] sm:$0xff] }
  0x28   : > { %322 = vst [vmem:[%s1746_s8 + $0xe0] sm:$0xff] %v321_v28  ;;  %324 = vst [vmem:[%s1746_s8 + $0xe8] sm:$0xff] %v323_v29  ;;  %v327_v31 = vld [vmem:[%s1741_s7 + $0x1a28] sm:$0xff] }
  0x29   : > { %326 = vst [vmem:[%s1746_s8 + $0xf0] sm:$0xff] %v325_v30  ;;  %328 = vst [vmem:[%s1746_s8 + $0xf8] sm:$0xff] %v327_v31 }
  0x2a PF: > { %p1296_p7 = scmp.ge.s32.totalorder %s1659_s18, 1  ;;  %p345_p8 = scmp.lt.s32.totalorder %s1659_s18, 55 }
  0x2c   : > { %p346_p9 = pnand %p1296_p7, %p345_p8 }
  0x2d   : > { %s1298_s9 = sshll.u32 (!%p346_p9), %s1643_s14, 5  ;;  %s1300_s10 = sshll.u32 (!%p346_p9), %s1647_s15, 5 }
  0x2e   : > { %349 = sbr.rel (%p346_p9) target bundleno = 406 (0x196), region = 66  ;;  %p392_p10 = scmp.lt.s32.totalorder (!%p346_p9), %s1298_s9, 863 }
  0x2f   : > { %p404_p11 = scmp.lt.s32.totalorder (!%p346_p9), %s1300_s10, 63  ;;  %s352_s28 = sand.u32 (!%p346_p9), 1, %s1635_s12  }
  0x30   : > { %s1297_s29 = sshll.u32 (!%p346_p9), %s352_s28, 8  ;;  %p1350_p12 = scmp.ne.s32.totalorder (!%p346_p9), %s1643_s14, 0 }
  0x31   : > { %s1835_s30 = scalar_lea.vmem (!%p346_p9), [#allocation2], %s1297_s29 }
  0x32   : > { %v1559_v43 = vld [vmem:[%s1835_s30 + $0x4] ss:$8 sps:$4 sm:$0xff] (!%p346_p9)   ;;  %v1557_v50 = vld [vmem:[%s1835_s30] ss:$8 sps:$4 sm:$0xff] (!%p346_p9)   ;;  %v1563_v52 = vld [vmem:[%s1835_s30 + $0x14] ss:$8 sps:$4 sm:$0xff] (!%p346_p9)  }
  0x33   : > { %v1562_v44 = vld [vmem:[%s1835_s30 + $0x84] ss:$8 sps:$4 sm:$0xff] (!%p346_p9)   ;;  %765 = vmatprep.mubr.bf16.mxu0 (!%p346_p9), %v1559_v43  ;;  %v1560_v51 = vld [vmem:[%s1835_s30 + $0x80] ss:$8 sps:$4 sm:$0xff] (!%p346_p9)   ;;  %v1565_v53 = vld [vmem:[%s1835_s30 + $0x94] ss:$8 sps:$4 sm:$0xff] (!%p346_p9)  }
  0x34   : > { %829 = vmatprep.mubr.bf16.mxu1 (!%p346_p9), %v1562_v44  ;;  %v1567_v54 = vld [vmem:[%s1835_s30 + $0x10] ss:$8 sps:$4 sm:$0xff] (!%p346_p9)   ;;  %v1569_v56 = vld [vmem:[%s1835_s30 + $0x24] ss:$8 sps:$4 sm:$0xff] (!%p346_p9)   ;;  %v1573_v58 = vld [vmem:[%s1835_s30 + $0x20] ss:$8 sps:$4 sm:$0xff] (!%p346_p9)  }
  0x35   : > { %s2240_s9 = smov (!%p392_p10, %s1298_s9), 863  ;;  %s2242_s10 = smov (!%p404_p11, %s1300_s10), 63  ;;  %v1568_v55 = vld [vmem:[%s1835_s30 + $0x90] ss:$8 sps:$4 sm:$0xff]   ;;  %v1571_v57 = vld [vmem:[%s1835_s30 + $0xa4] ss:$8 sps:$4 sm:$0xff]  }
  0x36   : > { %s1299_s11 = sshll.u32 %s2240_s9, 2  ;;  %s1301_s24 = sshll.u32 %s2242_s10, 3  ;;  %v1574_v59 = vld [vmem:[%s1835_s30 + $0xa0] ss:$8 sps:$4 sm:$0xff]   ;;  %v1575_v60 = vld [vmem:[%s1835_s30 + $0x34] ss:$8 sps:$4 sm:$0xff]  }
  0x37   : > { %s1816_s23 = scalar_lea.vmem %s2224_s1, %s1299_s11  ;;  %s1821_s15 = scalar_lea.vmem %s2226_s3, %s1301_s24  ;;  %v1577_v61 = vld [vmem:[%s1835_s30 + $0xb4] ss:$8 sps:$4 sm:$0xff]   ;;  %v1579_v62 = vld [vmem:[%s1835_s30 + $0x30] ss:$8 sps:$4 sm:$0xff]   ;;  %v1581_v0 = vld [vmem:[%s1835_s30 + $0x44] ss:$8 sps:$4 sm:$0xff]  }
  0x38   : > { %v1541_v32 = vld [vmem:[%s1816_s23 + $0x40] sm:$0xff]   ;;  %v1543_v34 = vld [vmem:[%s1816_s23 + $0x48] sm:$0xff]   ;;  %v1545_v36 = vld [vmem:[%s1816_s23 + $0x50] sm:$0xff]  }
  0x39   : > { %v1542_v33 = vld [vmem:[%s1816_s23] sm:$0xff]   ;;  %1356 = vmatprep.subr.bf16.mxu0 %v1541_v32  ;;  %1468 = vmatprep.subr.bf16.mxu1 %v1541_v32  ;;  %v1544_v35 = vld [vmem:[%s1816_s23 + $0x8] sm:$0xff]   ;;  %v1546_v37 = vld [vmem:[%s1816_s23 + $0x10] sm:$0xff]  }
  0x3a   : > { %1357 = vmatpush3.bf16.msra.mxu0 %v1542_v33  ;;  %1476 = vmatpush3.bf16.msra.mxu1 %v1542_v33  ;;  %v1547_v38 = vld [vmem:[%s1816_s23 + $0x58] sm:$0xff]   ;;  %v1549_v40 = vld [vmem:[%s1816_s23 + $0x60] sm:$0xff]   ;;  %v1551_v42 = vld [vmem:[%s1816_s23 + $0x68] sm:$0xff]  }
  0x3b   : > { %1358 = vmatprep.subr.bf16.mxu0 %v1543_v34  ;;  %1469 = vmatprep.subr.bf16.mxu1 %v1543_v34  ;;  %v1548_v39 = vld [vmem:[%s1816_s23 + $0x18] sm:$0xff]   ;;  %v1550_v41 = vld [vmem:[%s1816_s23 + $0x20] sm:$0xff]   ;;  %v1552_v45 = vld [vmem:[%s1816_s23 + $0x28] sm:$0xff]  }
  0x3c   : > { %v1553_v46 = vld [vmem:[%s1816_s23 + $0x70] sm:$0xff]   ;;  %v1555_v48 = vld [vmem:[%s1816_s23 + $0x78] sm:$0xff]   ;;  %v1583_v1 = vld [vmem:[%s1835_s30 + $0xc4] ss:$8 sps:$4 sm:$0xff]  }
  0x3d   : > { %v1554_v47 = vld [vmem:[%s1816_s23 + $0x30] sm:$0xff]   ;;  %v1556_v49 = vld [vmem:[%s1816_s23 + $0x38] sm:$0xff]   ;;  %v1585_v2 = vld [vmem:[%s1835_s30 + $0x40] ss:$8 sps:$4 sm:$0xff]  }
  0x3e   : > { %1359 = vmatpush3.bf16.msra.mxu0 %v1544_v35  ;;  %1477 = vmatpush3.bf16.msra.mxu1 %v1544_v35  ;;  %v1580_v63 = vld [vmem:[%s1835_s30 + $0xb0] ss:$8 sps:$4 sm:$0xff]   ;;  %v1586_v3 = vld [vmem:[%s1835_s30 + $0xc0] ss:$8 sps:$4 sm:$0xff]   ;;  %v1587_v4 = vld [vmem:[%s1835_s30 + $0x54] ss:$8 sps:$4 sm:$0xff]  }
  0x3f   : > { %1360 = vmatprep.subr.bf16.mxu0 %v1545_v36  ;;  %1470 = vmatprep.subr.bf16.mxu1 %v1545_v36  ;;  %v1589_v5 = vld [vmem:[%s1835_s30 + $0xd4] ss:$8 sps:$4 sm:$0xff]   ;;  %v1591_v6 = vld [vmem:[%s1835_s30 + $0x50] ss:$8 sps:$4 sm:$0xff]   ;;  %v1593_v8 = vld [vmem:[%s1835_s30 + $0x64] ss:$8 sps:$4 sm:$0xff]  }
  0x40   : > { %v1592_v7 = vld [vmem:[%s1835_s30 + $0xd0] ss:$8 sps:$4 sm:$0xff]   ;;  %v1595_v9 = vld [vmem:[%s1835_s30 + $0xe4] ss:$8 sps:$4 sm:$0xff]   ;;  %v1597_v10 = vld [vmem:[%s1835_s30 + $0x60] ss:$8 sps:$4 sm:$0xff]  }
  0x41   : > { %v1598_v11 = vld [vmem:[%s1835_s30 + $0xe0] ss:$8 sps:$4 sm:$0xff]   ;;  %v1599_v12 = vld [vmem:[%s1835_s30 + $0x74] ss:$8 sps:$4 sm:$0xff]   ;;  %v1603_v14 = vld [vmem:[%s1835_s30 + $0x70] ss:$8 sps:$4 sm:$0xff]  }
  0x42   : > { %1361 = vmatpush3.bf16.msra.mxu0 %v1546_v37  ;;  %1478 = vmatpush3.bf16.msra.mxu1 %v1546_v37  ;;  %v1601_v13 = vld [vmem:[%s1835_s30 + $0xf4] ss:$8 sps:$4 sm:$0xff]   ;;  %v1604_v15 = vld [vmem:[%s1835_s30 + $0xf0] ss:$8 sps:$4 sm:$0xff]  }
  0x43   : > { %1362 = vmatprep.subr.bf16.mxu0 %v1547_v38  ;;  %1471 = vmatprep.subr.bf16.mxu1 %v1547_v38 }
  0x46   : > { %1363 = vmatpush3.bf16.msra.mxu0 %v1548_v39  ;;  %1479 = vmatpush3.bf16.msra.mxu1 %v1548_v39 }
  0x47   : > { %1364 = vmatprep.subr.bf16.mxu0 %v1549_v40  ;;  %1472 = vmatprep.subr.bf16.mxu1 %v1549_v40 }
  0x4a   : > { %1365 = vmatpush3.bf16.msra.mxu0 %v1550_v41  ;;  %1480 = vmatpush3.bf16.msra.mxu1 %v1550_v41 }
  0x4b   : > { %1366 = vmatprep.subr.bf16.mxu0 %v1551_v42  ;;  %1473 = vmatprep.subr.bf16.mxu1 %v1551_v42 }
  0x4e   : > { %1367 = vmatpush3.bf16.msra.mxu0 %v1552_v45  ;;  %1481 = vmatpush3.bf16.msra.mxu1 %v1552_v45 }
  0x4f   : > { %1368 = vmatprep.subr.bf16.mxu0 %v1553_v46  ;;  %1474 = vmatprep.subr.bf16.mxu1 %v1553_v46 }
  0x52   : > { %1369 = vmatpush3.bf16.msra.mxu0 %v1554_v47  ;;  %1482 = vmatpush3.bf16.msra.mxu1 %v1554_v47 }
  0x53   : > { %1370 = vmatprep.subr.bf16.mxu0 %v1555_v48  ;;  %1475 = vmatprep.subr.bf16.mxu1 %v1555_v48 }
  0x56   : > { %1371 = vmatpush3.bf16.msra.mxu0 %v1556_v49  ;;  %1483 = vmatpush3.bf16.msra.mxu1 %v1556_v49 }
  0x59   : > { %766 = vmatmul.mubr.bf16.vlgmr.msra.gmra.mrb[0].mxu0 %v1557_v50  ;;  %830 = vmatmul.mubr.bf16.vlgmr.msra.gmra.mrb[0].mxu1 %v1560_v51 }
  0x5a   : > { %773 = vmatprep.mubr.bf16.mxu0 %v1563_v52  ;;  %837 = vmatprep.mubr.bf16.mxu1 %v1565_v53 }
  0x61   : > { %774 = vmatmul.mubr.bf16.gmra.mrb[4].mxu0 %v1567_v54  ;;  %838 = vmatmul.mubr.bf16.gmra.mrb[4].mxu1 %v1568_v55 }
  0x62   : > { %781 = vmatprep.mubr.bf16.mxu0 %v1569_v56  ;;  %845 = vmatprep.mubr.bf16.mxu1 %v1571_v57 }
  0x69   : > { %782 = vmatmul.mubr.bf16.gmra.mrb[8].mxu0 %v1573_v58  ;;  %846 = vmatmul.mubr.bf16.gmra.mrb[8].mxu1 %v1574_v59 }
  0x6a   : > { %789 = vmatprep.mubr.bf16.mxu0 %v1575_v60  ;;  %853 = vmatprep.mubr.bf16.mxu1 %v1577_v61 }
  0x71   : > { %790 = vmatmul.mubr.bf16.gmra.mrb[12].mxu0 %v1579_v62  ;;  %854 = vmatmul.mubr.bf16.gmra.mrb[12].mxu1 %v1580_v63 }
  0x72   : > { %797 = vmatprep.mubr.bf16.mxu0 %v1581_v0  ;;  %861 = vmatprep.mubr.bf16.mxu1 %v1583_v1 }
  0x79   : > { %798 = vmatmul.mubr.bf16.gmra.mrb[16].mxu0 %v1585_v2  ;;  %862 = vmatmul.mubr.bf16.gmra.mrb[16].mxu1 %v1586_v3 }
  0x7a   : > { %805 = vmatprep.mubr.bf16.mxu0 %v1587_v4  ;;  %869 = vmatprep.mubr.bf16.mxu1 %v1589_v5 }
  0x81   : > { %806 = vmatmul.mubr.bf16.gmra.mrb[20].mxu0 %v1591_v6  ;;  %870 = vmatmul.mubr.bf16.gmra.mrb[20].mxu1 %v1592_v7 }
  0x82   : > { %813 = vmatprep.mubr.bf16.mxu0 %v1593_v8  ;;  %877 = vmatprep.mubr.bf16.mxu1 %v1595_v9 }
  0x89   : > { %814 = vmatmul.mubr.bf16.gmra.mrb[24].mxu0 %v1597_v10  ;;  %878 = vmatmul.mubr.bf16.gmra.mrb[24].mxu1 %v1598_v11 }
  0x8a   : > { %821 = vmatprep.mubr.bf16.mxu0 %v1599_v12  ;;  %885 = vmatprep.mubr.bf16.mxu1 %v1601_v13 }
  0x91   : > { %822 = vmatmul.mubr.bf16.gmra.mrb[28].mxu0 %v1603_v14  ;;  %886 = vmatmul.mubr.bf16.gmra.mrb[28].mxu1 %v1604_v15 }
 0x12c   : > { %v1372_v16 = vpop.f32.mrb[0].mxu0  ;;  %v1420_v17 = vpop.f32.mrb[0].mxu1 }
 0x12d   : > { %v1373_v18 = vpop.f32.mrb[1].mxu0  ;;  %v1421_v19 = vpop.f32.mrb[1].mxu1 }
 0x12e   : > { %v1874_v20 = vadd.f32 %v1373_v18, %v1372_v16  ;;  %v1876_v21 = vadd.f32 %v1421_v19, %v1420_v17  ;;  %v1375_v22 = vpop.f32.mrb[2].mxu0  ;;  %v1423_v23 = vpop.f32.mrb[2].mxu1 }
 0x12f   : > { %v1376_v24 = vpop.f32.mrb[3].mxu0  ;;  %v1424_v25 = vpop.f32.mrb[3].mxu1 }
 0x130   : > { %v1878_v26 = vadd.f32 %v1376_v24, %v1375_v22  ;;  %v1880_v27 = vadd.f32 %v1424_v25, %v1423_v23  ;;  %898 = vst [vmem:[%s1821_s15] sm:$0xff] (!%p1350_p12), %v1874_v20  ;;  %914 = vst [vmem:[%s1821_s15 + $0x80] sm:$0xff] (!%p1350_p12), %v1876_v21 }
 0x132   : > { %899 = vst [vmem:[%s1821_s15 + $0x8] sm:$0xff] (!%p1350_p12), %v1878_v26  ;;  %915 = vst [vmem:[%s1821_s15 + $0x88] sm:$0xff] (!%p1350_p12), %v1880_v27 }
 0x134   : > { %v1378_v28 = vpop.f32.mrb[4].mxu0  ;;  %v1426_v29 = vpop.f32.mrb[4].mxu1 }
 0x135   : > { %v1379_v30 = vpop.f32.mrb[5].mxu0  ;;  %v1427_v31 = vpop.f32.mrb[5].mxu1 }
 0x136   : > { %v1882_v32 = vadd.f32 %v1379_v30, %v1378_v28  ;;  %v1884_v33 = vadd.f32 %v1427_v31, %v1426_v29  ;;  %v1381_v34 = vpop.f32.mrb[6].mxu0  ;;  %v1429_v35 = vpop.f32.mrb[6].mxu1 }
 0x137   : > { %v1382_v36 = vpop.f32.mrb[7].mxu0  ;;  %v1430_v37 = vpop.f32.mrb[7].mxu1 }
 0x138   : > { %v1886_v38 = vadd.f32 %v1382_v36, %v1381_v34  ;;  %v1888_v39 = vadd.f32 %v1430_v37, %v1429_v35  ;;  %900 = vst [vmem:[%s1821_s15 + $0x10] sm:$0xff] (!%p1350_p12), %v1882_v32  ;;  %916 = vst [vmem:[%s1821_s15 + $0x90] sm:$0xff] (!%p1350_p12), %v1884_v33 }
 0x13a   : > { %901 = vst [vmem:[%s1821_s15 + $0x18] sm:$0xff] (!%p1350_p12), %v1886_v38  ;;  %917 = vst [vmem:[%s1821_s15 + $0x98] sm:$0xff] (!%p1350_p12), %v1888_v39 }
 0x13c   : > { %v1384_v40 = vpop.f32.mrb[8].mxu0  ;;  %v1432_v41 = vpop.f32.mrb[8].mxu1 }
 0x13d   : > { %v1385_v42 = vpop.f32.mrb[9].mxu0  ;;  %v1433_v43 = vpop.f32.mrb[9].mxu1 }
 0x13e   : > { %v1890_v44 = vadd.f32 %v1385_v42, %v1384_v40  ;;  %v1892_v45 = vadd.f32 %v1433_v43, %v1432_v41  ;;  %v1387_v46 = vpop.f32.mrb[10].mxu0  ;;  %v1435_v47 = vpop.f32.mrb[10].mxu1 }
 0x13f   : > { %v1388_v48 = vpop.f32.mrb[11].mxu0  ;;  %v1436_v49 = vpop.f32.mrb[11].mxu1 }
 0x140   : > { %v1894_v50 = vadd.f32 %v1388_v48, %v1387_v46  ;;  %v1896_v51 = vadd.f32 %v1436_v49, %v1435_v47  ;;  %902 = vst [vmem:[%s1821_s15 + $0x20] sm:$0xff] (!%p1350_p12), %v1890_v44  ;;  %918 = vst [vmem:[%s1821_s15 + $0xa0] sm:$0xff] (!%p1350_p12), %v1892_v45 }
 0x142   : > { %903 = vst [vmem:[%s1821_s15 + $0x28] sm:$0xff] (!%p1350_p12), %v1894_v50  ;;  %919 = vst [vmem:[%s1821_s15 + $0xa8] sm:$0xff] (!%p1350_p12), %v1896_v51 }
 0x144   : > { %v1390_v52 = vpop.f32.mrb[12].mxu0  ;;  %v1438_v53 = vpop.f32.mrb[12].mxu1 }
 0x145   : > { %v1391_v54 = vpop.f32.mrb[13].mxu0  ;;  %v1439_v55 = vpop.f32.mrb[13].mxu1 }
 0x146   : > { %v1898_v56 = vadd.f32 %v1391_v54, %v1390_v52  ;;  %v1900_v57 = vadd.f32 %v1439_v55, %v1438_v53  ;;  %v1393_v58 = vpop.f32.mrb[14].mxu0  ;;  %v1441_v59 = vpop.f32.mrb[14].mxu1 }
 0x147   : > { %v1394_v60 = vpop.f32.mrb[15].mxu0  ;;  %v1442_v61 = vpop.f32.mrb[15].mxu1 }
 0x148   : > { %v1902_v62 = vadd.f32 %v1394_v60, %v1393_v58  ;;  %v1904_v63 = vadd.f32 %v1442_v61, %v1441_v59  ;;  %904 = vst [vmem:[%s1821_s15 + $0x30] sm:$0xff] (!%p1350_p12), %v1898_v56  ;;  %920 = vst [vmem:[%s1821_s15 + $0xb0] sm:$0xff] (!%p1350_p12), %v1900_v57 }
 0x14a   : > { %905 = vst [vmem:[%s1821_s15 + $0x38] sm:$0xff] (!%p1350_p12), %v1902_v62  ;;  %921 = vst [vmem:[%s1821_s15 + $0xb8] sm:$0xff] (!%p1350_p12), %v1904_v63 }
 0x14c   : > { %v1396_v0 = vpop.f32.mrb[16].mxu0  ;;  %v1444_v1 = vpop.f32.mrb[16].mxu1 }
 0x14d   : > { %v1397_v2 = vpop.f32.mrb[17].mxu0  ;;  %v1445_v3 = vpop.f32.mrb[17].mxu1 }
 0x14e   : > { %v1906_v4 = vadd.f32 %v1397_v2, %v1396_v0  ;;  %v1908_v5 = vadd.f32 %v1445_v3, %v1444_v1  ;;  %v1399_v6 = vpop.f32.mrb[18].mxu0  ;;  %v1447_v7 = vpop.f32.mrb[18].mxu1 }
 0x14f   : > { %v1400_v8 = vpop.f32.mrb[19].mxu0  ;;  %v1448_v9 = vpop.f32.mrb[19].mxu1 }
 0x150   : > { %v1910_v10 = vadd.f32 %v1400_v8, %v1399_v6  ;;  %v1912_v11 = vadd.f32 %v1448_v9, %v1447_v7  ;;  %906 = vst [vmem:[%s1821_s15 + $0x40] sm:$0xff] (!%p1350_p12), %v1906_v4  ;;  %922 = vst [vmem:[%s1821_s15 + $0xc0] sm:$0xff] (!%p1350_p12), %v1908_v5 }
 0x152   : > { %907 = vst [vmem:[%s1821_s15 + $0x48] sm:$0xff] (!%p1350_p12), %v1910_v10  ;;  %923 = vst [vmem:[%s1821_s15 + $0xc8] sm:$0xff] (!%p1350_p12), %v1912_v11 }
 0x154   : > { %v1402_v12 = vpop.f32.mrb[20].mxu0  ;;  %v1450_v13 = vpop.f32.mrb[20].mxu1 }
 0x155   : > { %v1403_v14 = vpop.f32.mrb[21].mxu0  ;;  %v1451_v15 = vpop.f32.mrb[21].mxu1 }
 0x156   : > { %v1914_v16 = vadd.f32 %v1403_v14, %v1402_v12  ;;  %v1916_v17 = vadd.f32 %v1451_v15, %v1450_v13  ;;  %v1405_v18 = vpop.f32.mrb[22].mxu0  ;;  %v1453_v19 = vpop.f32.mrb[22].mxu1 }
 0x157   : > { %v1406_v22 = vpop.f32.mrb[23].mxu0  ;;  %v1454_v23 = vpop.f32.mrb[23].mxu1 }
 0x158   : > { %v1918_v24 = vadd.f32 %v1406_v22, %v1405_v18  ;;  %v1920_v25 = vadd.f32 %v1454_v23, %v1453_v19  ;;  %908 = vst [vmem:[%s1821_s15 + $0x50] sm:$0xff] (!%p1350_p12), %v1914_v16  ;;  %924 = vst [vmem:[%s1821_s15 + $0xd0] sm:$0xff] (!%p1350_p12), %v1916_v17 }
 0x15a   : > { %909 = vst [vmem:[%s1821_s15 + $0x58] sm:$0xff] (!%p1350_p12), %v1918_v24  ;;  %925 = vst [vmem:[%s1821_s15 + $0xd8] sm:$0xff] (!%p1350_p12), %v1920_v25 }
 0x15c   : > { %v1408_v28 = vpop.f32.mrb[24].mxu0  ;;  %v1456_v29 = vpop.f32.mrb[24].mxu1 }
 0x15d   : > { %v1409_v30 = vpop.f32.mrb[25].mxu0  ;;  %v1457_v31 = vpop.f32.mrb[25].mxu1 }
 0x15e   : > { %v1922_v34 = vadd.f32 %v1409_v30, %v1408_v28  ;;  %v1924_v35 = vadd.f32 %v1457_v31, %v1456_v29  ;;  %v1411_v36 = vpop.f32.mrb[26].mxu0  ;;  %v1459_v37 = vpop.f32.mrb[26].mxu1 }
 0x15f   : > { %v1412_v40 = vpop.f32.mrb[27].mxu0  ;;  %v1460_v41 = vpop.f32.mrb[27].mxu1 }
 0x160   : > { %v1926_v42 = vadd.f32 %v1412_v40, %v1411_v36  ;;  %v1928_v43 = vadd.f32 %v1460_v41, %v1459_v37  ;;  %910 = vst [vmem:[%s1821_s15 + $0x60] sm:$0xff] (!%p1350_p12), %v1922_v34  ;;  %926 = vst [vmem:[%s1821_s15 + $0xe0] sm:$0xff] (!%p1350_p12), %v1924_v35 }
 0x162   : > { %897 = sbr.rel (%p1350_p12) target bundleno = 363 (0x16b), region = 74  ;;  %911 = vst [vmem:[%s1821_s15 + $0x68] sm:$0xff] (!%p1350_p12), %v1926_v42  ;;  %927 = vst [vmem:[%s1821_s15 + $0xe8] sm:$0xff] (!%p1350_p12), %v1928_v43 }
 0x164   : > { %v1414_v46 = vpop.f32.mrb[28].mxu0  ;;  %v1462_v47 = vpop.f32.mrb[28].mxu1 }
 0x165   : > { %v1415_v48 = vpop.f32.mrb[29].mxu0  ;;  %v1463_v49 = vpop.f32.mrb[29].mxu1 }
 0x166   : > { %v1930_v52 = vadd.f32 %v1415_v48, %v1414_v46  ;;  %v1932_v53 = vadd.f32 %v1463_v49, %v1462_v47  ;;  %v1417_v54 = vpop.f32.mrb[30].mxu0  ;;  %v1465_v55 = vpop.f32.mrb[30].mxu1 }
 0x167   : > { %v1418_v58 = vpop.f32.mrb[31].mxu0  ;;  %v1466_v59 = vpop.f32.mrb[31].mxu1 }
 0x168   : > { %v1934_v60 = vadd.f32 %v1418_v58, %v1417_v54  ;;  %v1936_v61 = vadd.f32 %v1466_v59, %v1465_v55  ;;  %912 = vst [vmem:[%s1821_s15 + $0x70] sm:$0xff] (!%p1350_p12), %v1930_v52  ;;  %928 = vst [vmem:[%s1821_s15 + $0xf0] sm:$0xff] (!%p1350_p12), %v1932_v53 }
 0x16a   : > { %913 = vst [vmem:[%s1821_s15 + $0x78] sm:$0xff] %v1934_v60  ;;  %929 = vst [vmem:[%s1821_s15 + $0xf8] sm:$0xff] %v1936_v61 }
 0x16b PF: > { %p1351_p13 = scmp.le.s32.totalorder %s1643_s14, 0 }
 0x16c   : > { %v934_v0 = vld [vmem:[%s1821_s15] sm:$0xff] (!%p1351_p13)  ;;  %v935_v1 = vld [vmem:[%s1821_s15 + $0x8] sm:$0xff] (!%p1351_p13)  ;;  %v936_v2 = vld [vmem:[%s1821_s15 + $0x10] sm:$0xff] (!%p1351_p13) }
 0x16d   : > { %933 = sbr.rel (%p1351_p13) target bundleno = 383 (0x17f), region = 78  ;;  %v966_v3 = vadd.f32 (!%p1351_p13), %v1874_v20, %v934_v0  ;;  %v967_v6 = vadd.f32 (!%p1351_p13), %v1878_v26, %v935_v1  ;;  %v968_v7 = vadd.f32 (!%p1351_p13), %v1882_v32, %v936_v2  ;;  %v937_v8 = vld [vmem:[%s1821_s15 + $0x18] sm:$0xff] (!%p1351_p13)  ;;  %v938_v9 = vld [vmem:[%s1821_s15 + $0x20] sm:$0xff] (!%p1351_p13)  ;;  %v939_v12 = vld [vmem:[%s1821_s15 + $0x28] sm:$0xff] (!%p1351_p13) }
 0x16e   : > { %v969_v13 = vadd.f32 (!%p1351_p13), %v1886_v38, %v937_v8  ;;  %v970_v14 = vadd.f32 (!%p1351_p13), %v1890_v44, %v938_v9  ;;  %v971_v15 = vadd.f32 (!%p1351_p13), %v1894_v50, %v939_v12  ;;  %v940_v20 = vld [vmem:[%s1821_s15 + $0x30] sm:$0xff] (!%p1351_p13)  ;;  %v941_v18 = vld [vmem:[%s1821_s15 + $0x38] sm:$0xff] (!%p1351_p13)  ;;  %v942_v26 = vld [vmem:[%s1821_s15 + $0x40] sm:$0xff] (!%p1351_p13) }
 0x16f   : > { %998 = vst [vmem:[%s1821_s15] sm:$0xff] (!%p1351_p13), %v966_v3  ;;  %999 = vst [vmem:[%s1821_s15 + $0x8] sm:$0xff] (!%p1351_p13), %v967_v6  ;;  %v972_v32 = vadd.f32 (!%p1351_p13), %v1898_v56, %v940_v20  ;;  %v973_v38 = vadd.f32 (!%p1351_p13), %v1902_v62, %v941_v18  ;;  %v974_v44 = vadd.f32 (!%p1351_p13), %v1906_v4, %v942_v26  ;;  %v943_v19 = vld [vmem:[%s1821_s15 + $0x48] sm:$0xff] (!%p1351_p13)  ;;  %v944_v50 = vld [vmem:[%s1821_s15 + $0x50] sm:$0xff] (!%p1351_p13) }
 0x170   : > { %1000 = vst [vmem:[%s1821_s15 + $0x10] sm:$0xff] (!%p1351_p13), %v968_v7  ;;  %v945_v22 = vld [vmem:[%s1821_s15 + $0x58] sm:$0xff] (!%p1351_p13)  ;;  %1001 = vst [vmem:[%s1821_s15 + $0x18] sm:$0xff] (!%p1351_p13), %v969_v13  ;;  %v975_v23 = vadd.f32 (!%p1351_p13), %v1910_v10, %v943_v19  ;;  %v976_v56 = vadd.f32 (!%p1351_p13), %v1914_v16, %v944_v50  ;;  %v946_v28 = vld [vmem:[%s1821_s15 + $0x60] sm:$0xff] (!%p1351_p13) }
 0x171   : > { %1002 = vst [vmem:[%s1821_s15 + $0x20] sm:$0xff] (!%p1351_p13), %v970_v14  ;;  %1003 = vst [vmem:[%s1821_s15 + $0x28] sm:$0xff] (!%p1351_p13), %v971_v15  ;;  %v977_v62 = vadd.f32 (!%p1351_p13), %v1918_v24, %v945_v22  ;;  %v947_v4 = vld [vmem:[%s1821_s15 + $0x68] sm:$0xff] (!%p1351_p13)  ;;  %v948_v29 = vld [vmem:[%s1821_s15 + $0x70] sm:$0xff] (!%p1351_p13)  ;;  %v978_v30 = vadd.f32 (!%p1351_p13), %v1922_v34, %v946_v28 }
 0x172   : > { %1004 = vst [vmem:[%s1821_s15 + $0x30] sm:$0xff] (!%p1351_p13), %v972_v32  ;;  %1005 = vst [vmem:[%s1821_s15 + $0x38] sm:$0xff] (!%p1351_p13), %v973_v38  ;;  %v979_v10 = vadd.f32 (!%p1351_p13), %v1926_v42, %v947_v4  ;;  %v980_v16 = vadd.f32 (!%p1351_p13), %v1930_v52, %v948_v29  ;;  %v949_v31 = vld [vmem:[%s1821_s15 + $0x78] sm:$0xff] (!%p1351_p13)  ;;  %v950_v24 = vld [vmem:[%s1821_s15 + $0x80] sm:$0xff] (!%p1351_p13) }
 0x173   : > { %1006 = vst [vmem:[%s1821_s15 + $0x40] sm:$0xff] (!%p1351_p13), %v974_v44  ;;  %v951_v36 = vld [vmem:[%s1821_s15 + $0x88] sm:$0xff] (!%p1351_p13)  ;;  %1007 = vst [vmem:[%s1821_s15 + $0x48] sm:$0xff] (!%p1351_p13), %v975_v23  ;;  %v981_v37 = vadd.f32 (!%p1351_p13), %v1934_v60, %v949_v31  ;;  %v982_v34 = vadd.f32 (!%p1351_p13), %v1876_v21, %v950_v24  ;;  %v952_v41 = vld [vmem:[%s1821_s15 + $0x90] sm:$0xff] (!%p1351_p13) }
 0x174   : > { %1008 = vst [vmem:[%s1821_s15 + $0x50] sm:$0xff] %v976_v56  ;;  %1009 = vst [vmem:[%s1821_s15 + $0x58] sm:$0xff] %v977_v62  ;;  %v983_v40 = vadd.f32 %v1880_v27, %v951_v36  ;;  %v953_v42 = vld [vmem:[%s1821_s15 + $0x98] sm:$0xff]  ;;  %v954_v46 = vld [vmem:[%s1821_s15 + $0xa0] sm:$0xff]  ;;  %v984_v47 = vadd.f32 %v1884_v33, %v952_v41 }
 0x175   : > { %1010 = vst [vmem:[%s1821_s15 + $0x60] sm:$0xff] %v978_v30  ;;  %1011 = vst [vmem:[%s1821_s15 + $0x68] sm:$0xff] %v979_v10  ;;  %v985_v48 = vadd.f32 %v1888_v39, %v953_v42  ;;  %v986_v21 = vadd.f32 %v1892_v45, %v954_v46  ;;  %v955_v49 = vld [vmem:[%s1821_s15 + $0xa8] sm:$0xff]  ;;  %v956_v27 = vld [vmem:[%s1821_s15 + $0xb0] sm:$0xff] }
 0x176   : > { %1012 = vst [vmem:[%s1821_s15 + $0x70] sm:$0xff] %v980_v16  ;;  %v957_v52 = vld [vmem:[%s1821_s15 + $0xb8] sm:$0xff]  ;;  %1013 = vst [vmem:[%s1821_s15 + $0x78] sm:$0xff] %v981_v37  ;;  %v987_v54 = vadd.f32 %v1896_v51, %v955_v49  ;;  %v988_v33 = vadd.f32 %v1900_v57, %v956_v27  ;;  %v958_v55 = vld [vmem:[%s1821_s15 + $0xc0] sm:$0xff] }
 0x177   : > { %1014 = vst [vmem:[%s1821_s15 + $0x80] sm:$0xff] %v982_v34  ;;  %1015 = vst [vmem:[%s1821_s15 + $0x88] sm:$0xff] %v983_v40  ;;  %v989_v39 = vadd.f32 %v1904_v63, %v957_v52  ;;  %v959_v45 = vld [vmem:[%s1821_s15 + $0xc8] sm:$0xff]  ;;  %v960_v58 = vld [vmem:[%s1821_s15 + $0xd0] sm:$0xff]  ;;  %v990_v59 = vadd.f32 %v1908_v5, %v958_v55 }
 0x178   : > { %1016 = vst [vmem:[%s1821_s15 + $0x90] sm:$0xff] %v984_v47  ;;  %1017 = vst [vmem:[%s1821_s15 + $0x98] sm:$0xff] %v985_v48  ;;  %v991_v51 = vadd.f32 %v1912_v11, %v959_v45  ;;  %v992_v57 = vadd.f32 %v1916_v17, %v960_v58  ;;  %v961_v60 = vld [vmem:[%s1821_s15 + $0xd8] sm:$0xff]  ;;  %v962_v63 = vld [vmem:[%s1821_s15 + $0xe0] sm:$0xff] }
 0x179   : > { %1018 = vst [vmem:[%s1821_s15 + $0xa0] sm:$0xff] %v986_v21  ;;  %v963_v0 = vld [vmem:[%s1821_s15 + $0xe8] sm:$0xff]  ;;  %1019 = vst [vmem:[%s1821_s15 + $0xa8] sm:$0xff] %v987_v54  ;;  %v993_v1 = vadd.f32 %v1920_v25, %v961_v60  ;;  %v994_v5 = vadd.f32 %v1924_v35, %v962_v63  ;;  %v964_v11 = vld [vmem:[%s1821_s15 + $0xf0] sm:$0xff] }
 0x17a   : > { %1020 = vst [vmem:[%s1821_s15 + $0xb0] sm:$0xff] %v988_v33  ;;  %1021 = vst [vmem:[%s1821_s15 + $0xb8] sm:$0xff] %v989_v39  ;;  %v995_v2 = vadd.f32 %v1928_v43, %v963_v0  ;;  %v965_v3 = vld [vmem:[%s1821_s15 + $0xf8] sm:$0xff]  ;;  %v996_v17 = vadd.f32 %v1932_v53, %v964_v11 }
 0x17b   : > { %1022 = vst [vmem:[%s1821_s15 + $0xc0] sm:$0xff] %v990_v59  ;;  %1023 = vst [vmem:[%s1821_s15 + $0xc8] sm:$0xff] %v991_v51  ;;  %v997_v6 = vadd.f32 %v1936_v61, %v965_v3 }
 0x17c   : > { %1024 = vst [vmem:[%s1821_s15 + $0xd0] sm:$0xff] %v992_v57  ;;  %1025 = vst [vmem:[%s1821_s15 + $0xd8] sm:$0xff] %v993_v1 }
 0x17d   : > { %1026 = vst [vmem:[%s1821_s15 + $0xe0] sm:$0xff] %v994_v5  ;;  %1027 = vst [vmem:[%s1821_s15 + $0xe8] sm:$0xff] %v995_v2 }
 0x17e   : > { %1028 = vst [vmem:[%s1821_s15 + $0xf0] sm:$0xff] %v996_v17  ;;  %1029 = vst [vmem:[%s1821_s15 + $0xf8] sm:$0xff] %v997_v6 }
 0x17f PF: > { %p1352_p0 = scmp.ne.s32.totalorder %s1643_s14, 26 }
 0x180   : > { %v2105_v35 = vld [vmem:[%s2225_s2] ss:$0 sm:$0xff] (!%p1352_p0)  ;;  %v1047_v30 = vld [vmem:[%s1821_s15 + $0x68] sm:$0xff] (!%p1352_p0)  ;;  %v1048_v36 = vld [vmem:[%s1821_s15 + $0x70] sm:$0xff] (!%p1352_p0) }
 0x181   : > { %1033 = sbr.rel (%p1352_p0) target bundleno = 406 (0x196), region = 82  ;;  %v1034_v25 = vld [vmem:[%s1821_s15] sm:$0xff] (!%p1352_p0)  ;;  %v1035_v43 = vld [vmem:[%s1821_s15 + $0x8] sm:$0xff] (!%p1352_p0)  ;;  %v1049_v37 = vld [vmem:[%s1821_s15 + $0x78] sm:$0xff] (!%p1352_p0)  ;;  %v1086_v49 = vadd.f32 (!%p1352_p0), %v2105_v35, %v1047_v30  ;;  %v1087_v27 = vadd.f32 (!%p1352_p0), %v2105_v35, %v1048_v36 }
 0x182   : > { %v1073_v53 = vadd.f32 (!%p1352_p0), %v2105_v35, %v1034_v25  ;;  %v1074_v61 = vadd.f32 (!%p1352_p0), %v2105_v35, %v1035_v43  ;;  %v1036_v7 = vld [vmem:[%s1821_s15 + $0x10] sm:$0xff] (!%p1352_p0)  ;;  %v1037_v8 = vld [vmem:[%s1821_s15 + $0x18] sm:$0xff] (!%p1352_p0)  ;;  %v1046_v29 = vld [vmem:[%s1821_s15 + $0x60] sm:$0xff] (!%p1352_p0)  ;;  %v1088_v58 = vadd.f32 (!%p1352_p0), %v2105_v35, %v1049_v37 }
 0x183   : > { %v1038_v9 = vld [vmem:[%s1821_s15 + $0x20] sm:$0xff] (!%p1352_p0)  ;;  %v1075_v12 = vadd.f32 (!%p1352_p0), %v2105_v35, %v1036_v7  ;;  %v1076_v13 = vadd.f32 (!%p1352_p0), %v2105_v35, %v1037_v8  ;;  %v1039_v15 = vld [vmem:[%s1821_s15 + $0x28] sm:$0xff] (!%p1352_p0)  ;;  %v1085_v42 = vadd.f32 (!%p1352_p0), %v2105_v35, %v1046_v29  ;;  %v1052_v52 = vld [vmem:[%s1821_s15 + $0x90] sm:$0xff] (!%p1352_p0)  ;;  %v1118_v57 = vmax.f32 (!%p1352_p0), %v1086_v49, 0.0 }
 0x184   : > { %v1077_v14 = vadd.f32 (!%p1352_p0), %v2105_v35, %v1038_v9  ;;  %v1040_v20 = vld [vmem:[%s1821_s15 + $0x30] sm:$0xff] (!%p1352_p0)  ;;  %v1041_v18 = vld [vmem:[%s1821_s15 + $0x38] sm:$0xff] (!%p1352_p0)  ;;  %v1105_v26 = vmax.f32 (!%p1352_p0), %v1073_v53, 0.0  ;;  %v1106_v32 = vmax.f32 (!%p1352_p0), %v1074_v61, 0.0  ;;  %v1078_v38 = vadd.f32 (!%p1352_p0), %v2105_v35, %v1039_v15  ;;  %v1050_v46 = vld [vmem:[%s1821_s15 + $0x80] sm:$0xff] (!%p1352_p0) }
 0x185   : > { %v1079_v44 = vadd.f32 (!%p1352_p0), %v2105_v35, %v1040_v20  ;;  %v1042_v19 = vld [vmem:[%s1821_s15 + $0x40] sm:$0xff] (!%p1352_p0)  ;;  %v1043_v50 = vld [vmem:[%s1821_s15 + $0x48] sm:$0xff] (!%p1352_p0)  ;;  %v1107_v23 = vmax.f32 (!%p1352_p0), %v1075_v12, 0.0  ;;  %v1108_v56 = vmax.f32 (!%p1352_p0), %v1076_v13, 0.0  ;;  %v1080_v28 = vadd.f32 (!%p1352_p0), %v2105_v35, %v1041_v18  ;;  %v1053_v54 = vld [vmem:[%s1821_s15 + $0x98] sm:$0xff] (!%p1352_p0)  ;;  %1150 = vst [vmem:[%s1821_s15 + $0x68] sm:$0xff] (!%p1352_p0), %v1118_v57 }
 0x186   : > { %v1044_v22 = vld [vmem:[%s1821_s15 + $0x50] sm:$0xff] (!%p1352_p0)  ;;  %v1109_v62 = vmax.f32 (!%p1352_p0), %v1077_v14, 0.0  ;;  %v1045_v4 = vld [vmem:[%s1821_s15 + $0x58] sm:$0xff] (!%p1352_p0)  ;;  %1137 = vst [vmem:[%s1821_s15] sm:$0xff] (!%p1352_p0), %v1105_v26  ;;  %1138 = vst [vmem:[%s1821_s15 + $0x8] sm:$0xff] (!%p1352_p0), %v1106_v32  ;;  %v1110_v10 = vmax.f32 (!%p1352_p0), %v1078_v38, 0.0  ;;  %v1081_v31 = vadd.f32 (!%p1352_p0), %v2105_v35, %v1042_v19  ;;  %v1082_v24 = vadd.f32 (!%p1352_p0), %v2105_v35, %v1043_v50 }
 0x187   : > { %v1111_v16 = vmax.f32 (!%p1352_p0), %v1079_v44, 0.0  ;;  %1139 = vst [vmem:[%s1821_s15 + $0x10] sm:$0xff] (!%p1352_p0), %v1107_v23  ;;  %1140 = vst [vmem:[%s1821_s15 + $0x18] sm:$0xff] (!%p1352_p0), %v1108_v56  ;;  %v1112_v34 = vmax.f32 (!%p1352_p0), %v1080_v28, 0.0  ;;  %v1083_v40 = vadd.f32 (!%p1352_p0), %v2105_v35, %v1044_v22  ;;  %v1084_v41 = vadd.f32 (!%p1352_p0), %v2105_v35, %v1045_v4  ;;  %v1051_v47 = vld [vmem:[%s1821_s15 + $0x88] sm:$0xff] (!%p1352_p0)  ;;  %v1054_v33 = vld [vmem:[%s1821_s15 + $0xa0] sm:$0xff] (!%p1352_p0) }
 0x188   : > { %1141 = vst [vmem:[%s1821_s15 + $0x20] sm:$0xff] %v1109_v62  ;;  %1142 = vst [vmem:[%s1821_s15 + $0x28] sm:$0xff] %v1110_v10  ;;  %v1113_v48 = vmax.f32 %v1081_v31, 0.0  ;;  %v1114_v21 = vmax.f32 %v1082_v24, 0.0  ;;  %v1117_v45 = vmax.f32 %v1085_v42, 0.0  ;;  %v1055_v59 = vld [vmem:[%s1821_s15 + $0xa8] sm:$0xff]  ;;  %v1089_v63 = vadd.f32 %v2105_v35, %v1050_v46 }
 0x189   : > { %1143 = vst [vmem:[%s1821_s15 + $0x30] sm:$0xff] %v1111_v16  ;;  %1144 = vst [vmem:[%s1821_s15 + $0x38] sm:$0xff] %v1112_v34  ;;  %v1115_v39 = vmax.f32 %v1083_v40, 0.0  ;;  %v1116_v55 = vmax.f32 %v1084_v41, 0.0  ;;  %v1056_v51 = vld [vmem:[%s1821_s15 + $0xb0] sm:$0xff]  ;;  %v1119_v60 = vmax.f32 %v1087_v27, 0.0  ;;  %v1090_v0 = vadd.f32 %v2105_v35, %v1051_v47 }
 0x18a   : > { %1145 = vst [vmem:[%s1821_s15 + $0x40] sm:$0xff] %v1113_v48  ;;  %1146 = vst [vmem:[%s1821_s15 + $0x48] sm:$0xff] %v1114_v21  ;;  %v1057_v1 = vld [vmem:[%s1821_s15 + $0xb8] sm:$0xff]  ;;  %v1120_v5 = vmax.f32 %v1088_v58, 0.0  ;;  %v1091_v2 = vadd.f32 %v2105_v35, %v1052_v52  ;;  %v1092_v11 = vadd.f32 %v2105_v35, %v1053_v54  ;;  %v1093_v3 = vadd.f32 %v2105_v35, %v1054_v33  ;;  %v1058_v17 = vld [vmem:[%s1821_s15 + $0xc0] sm:$0xff] }
 0x18b   : > { %1147 = vst [vmem:[%s1821_s15 + $0x50] sm:$0xff] %v1115_v39  ;;  %1148 = vst [vmem:[%s1821_s15 + $0x58] sm:$0xff] %v1116_v55  ;;  %v1059_v6 = vld [vmem:[%s1821_s15 + $0xc8] sm:$0xff]  ;;  %v1121_v25 = vmax.f32 %v1089_v63, 0.0  ;;  %v1122_v43 = vmax.f32 %v1090_v0, 0.0  ;;  %v1094_v53 = vadd.f32 %v2105_v35, %v1055_v59  ;;  %v1095_v61 = vadd.f32 %v2105_v35, %v1056_v51  ;;  %v1060_v7 = vld [vmem:[%s1821_s15 + $0xd0] sm:$0xff] }
 0x18c   : > { %1149 = vst [vmem:[%s1821_s15 + $0x60] sm:$0xff] %v1117_v45  ;;  %1151 = vst [vmem:[%s1821_s15 + $0x70] sm:$0xff] %v1119_v60  ;;  %v1061_v8 = vld [vmem:[%s1821_s15 + $0xd8] sm:$0xff]  ;;  %v1062_v9 = vld [vmem:[%s1821_s15 + $0xe0] sm:$0xff]  ;;  %v1123_v12 = vmax.f32 %v1091_v2, 0.0  ;;  %v1124_v13 = vmax.f32 %v1092_v11, 0.0  ;;  %v1096_v15 = vadd.f32 %v2105_v35, %v1057_v1  ;;  %v1097_v38 = vadd.f32 %v2105_v35, %v1058_v17 }
 0x18d   : > { %1152 = vst [vmem:[%s1821_s15 + $0x78] sm:$0xff] %v1120_v5  ;;  %v1125_v14 = vmax.f32 %v1093_v3, 0.0  ;;  %v1063_v20 = vld [vmem:[%s1821_s15 + $0xe8] sm:$0xff]  ;;  %v1064_v18 = vld [vmem:[%s1821_s15 + $0xf0] sm:$0xff]  ;;  %1153 = vst [vmem:[%s1821_s15 + $0x80] sm:$0xff] %v1121_v25  ;;  %v1126_v26 = vmax.f32 %v1094_v53, 0.0  ;;  %v1098_v44 = vadd.f32 %v2105_v35, %v1059_v6  ;;  %v1099_v22 = vadd.f32 %v2105_v35, %v1060_v7 }
 0x18e   : > { %1154 = vst [vmem:[%s1821_s15 + $0x88] sm:$0xff] %v1122_v43  ;;  %v1127_v32 = vmax.f32 %v1095_v61, 0.0  ;;  %v1065_v19 = vld [vmem:[%s1821_s15 + $0xf8] sm:$0xff]  ;;  %1155 = vst [vmem:[%s1821_s15 + $0x90] sm:$0xff] %v1123_v12  ;;  %v1128_v50 = vmax.f32 %v1096_v15, 0.0  ;;  %v1100_v23 = vadd.f32 %v2105_v35, %v1061_v8  ;;  %v1101_v56 = vadd.f32 %v2105_v35, %v1062_v9 }
 0x18f   : > { %1156 = vst [vmem:[%s1821_s15 + $0x98] sm:$0xff] %v1124_v13  ;;  %1157 = vst [vmem:[%s1821_s15 + $0xa0] sm:$0xff] %v1125_v14  ;;  %v1129_v62 = vmax.f32 %v1097_v38, 0.0  ;;  %v1130_v28 = vmax.f32 %v1098_v44, 0.0  ;;  %v1102_v4 = vadd.f32 %v2105_v35, %v1063_v20  ;;  %v1103_v29 = vadd.f32 %v2105_v35, %v1064_v18 }
 0x190   : > { %1158 = vst [vmem:[%s1821_s15 + $0xa8] sm:$0xff] %v1126_v26  ;;  %1159 = vst [vmem:[%s1821_s15 + $0xb0] sm:$0xff] %v1127_v32  ;;  %v1131_v30 = vmax.f32 %v1099_v22, 0.0  ;;  %v1132_v10 = vmax.f32 %v1100_v23, 0.0  ;;  %v1133_v16 = vmax.f32 %v1101_v56, 0.0  ;;  %v1104_v31 = vadd.f32 %v2105_v35, %v1065_v19 }
 0x191   : > { %1160 = vst [vmem:[%s1821_s15 + $0xb8] sm:$0xff] %v1128_v50  ;;  %1161 = vst [vmem:[%s1821_s15 + $0xc0] sm:$0xff] %v1129_v62  ;;  %v1134_v24 = vmax.f32 %v1102_v4, 0.0  ;;  %v1135_v36 = vmax.f32 %v1103_v29, 0.0 }
 0x192   : > { %1162 = vst [vmem:[%s1821_s15 + $0xc8] sm:$0xff] %v1130_v28  ;;  %1163 = vst [vmem:[%s1821_s15 + $0xd0] sm:$0xff] %v1131_v30  ;;  %v1136_v37 = vmax.f32 %v1104_v31, 0.0 }
 0x193   : > { %1164 = vst [vmem:[%s1821_s15 + $0xd8] sm:$0xff] %v1132_v10  ;;  %1165 = vst [vmem:[%s1821_s15 + $0xe0] sm:$0xff] %v1133_v16 }
 0x194   : > { %1166 = vst [vmem:[%s1821_s15 + $0xe8] sm:$0xff] %v1134_v24  ;;  %1167 = vst [vmem:[%s1821_s15 + $0xf0] sm:$0xff] %v1135_v36 }
 0x195   : > { %1168 = vst [vmem:[%s1821_s15 + $0xf8] sm:$0xff] %v1136_v37 }
 0x196 PF: > { %s13_s18 = sadd.s32 1, %s1659_s18   ;;  %s2227_s12 = smov %s1639_s13 }
 0x197   : > { %p10_p1 = scmp.ge.s32.totalorder %s13_s18, 56   ;;  %s2228_s13 = smov %s1732_s25 }
 0x198   : > { %s2229_s14 = smov %s1651_s16  ;;  %s2230_s15 = smov %s1655_s17 }
 0x199   : > { %s2231_s16 = smov %s2234_s19  ;;  %s2232_s17 = smov %s2238_s20 }
 0x19a   :  { %12 = sbr.rel (!%p10_p1) target bundleno = 4 (0x4), region = 123 }

// kernel: update_block3d_forward.13
= control target key start
LH: loop header
LB: loop body
LE: loop exit
PB: predicated region body
PF: predicated region fallthrough
CT: control target
= control target key end

     0   :  { %s1681_s12 = smov 0   ;;  %s1683_s13 = smov 0   ;;  %s2223_s0 = inlined_call_operand.vmem [shape: bf16[512,5376], index: 0, kind: input, shape index: {}]   ;;  %s2224_s1 = inlined_call_operand.vmem [shape: bf16[5376,128], index: 1, kind: input, shape index: {}]   ;;  %s2225_s2 = inlined_call_operand.vmem [shape: f32[1,128], index: 2, kind: input, shape index: {}]   ;;  %s2226_s3 = inlined_call_operand.vmem [shape: f32[512,128], index: 3, kind: output, shape index: {}]  }
   0x1   :  { %s1685_s14 = smov 0   ;;  %s1687_s15 = smov 0  }
   0x2   :  { %s1689_s16 = smov 0   ;;  %s1691_s17 = smov 0  }
   0x3   :  { %s1693_s18 = smov 0  }
   0x4 LB: > { %s25_s19 = sadd.s32 1, %s1651_s16  ;;  %s32_s20 = sadd.s32 1, %s1655_s17  ;;  %s1659_s18 = sphi %s1693_s18, %s13_s18   ;;  %s1655_s17 = sphi %s1691_s17, %s2232_s17   ;;  %s1651_s16 = sphi %s1689_s16, %s2231_s16   ;;  %s1647_s15 = sphi %s1687_s15, %s2230_s15   ;;  %s1643_s14 = sphi %s1685_s14, %s2229_s14   ;;  %s1639_s13 = sphi %s1683_s13, %s2228_s13   ;;  %s1635_s12 = sphi %s1681_s12, %s2227_s12  }
   0x5   : > { %p26_p0 = scmp.ge.s32.totalorder %s25_s19, 21  ;;  %p48_p1 = scmp.ne.s32.totalorder %s1639_s13, %s1635_s12 }
   0x6   : > { %p49_p2 = scmp.eq.s32.totalorder %s1659_s18, 0  ;;  %s41_s24 = sadd.s32 1, %s1639_s13 }
   0x7   : > { %s2234_s19 = smov (%p26_p0, %s25_s19), 0  ;;  %s2236_s20 = smov (!%p26_p0, %s32_s20), %s1655_s17 }
   0x8   : > { %p50_p3 = por %p49_p2, %p48_p1  ;;  %p34_p4 = scmp.ge.s32.totalorder %s2236_s20, 2 }
   0x9   : > { %s37_s21 = ssub.s32 %s1651_s16, %s2234_s19  ;;  %p1290_p6 = scmp.ge.s32.totalorder %s1659_s18, 42 }
   0xa   : > { %s2238_s20 = smov (%p34_p4, %s2236_s20), 0 }
   0xb   : > { %s36_s22 = ssub.s32 %s1655_s17, %s2238_s20  ;;  %162 = sbr.rel (%p1290_p6) target bundleno = 42 (0x2a), region = 20 }
   0xc   : > { %s38_s23 = sor.u32 %s37_s21, %s36_s22 }
   0xd   : > { %p39_p5 = scmp.eq.s32.totalorder %s38_s23, 0 }
   0xf   : > { %s1732_s25 = scalar_select %p39_p5, %s1639_s13, %s41_s24  }
  0x12   : > { %165 = sbr.rel (!%p50_p3) target bundleno = 42 (0x2a), region = 24  ;;  %s167_s26 = sand.u32 (%p50_p3), 1, %s1639_s13  }
  0x13   : > { %s1293_s27 = sshll.u32 (%p50_p3), %s1651_s16, 1  ;;  %s1291_s28 = sshll.u32 (%p50_p3), %s167_s26, 8 }
  0x14   : > { %s1484_s29 = smul.u32 (%p50_p3), 1344, %s1655_s17  ;;  %s1746_s8 = scalar_lea.vmem (%p50_p3), [#allocation2], %s1291_s28 }
  0x16   : > { %s173_s30 = sadd.s32 (%p50_p3), %s1484_s29, %s1293_s27 }
  0x17   : > { %s1295_s4 = sshll.u32 (%p50_p3), %s173_s30, 2 }
  0x18   : > { %s1741_s7 = scalar_lea.vmem (%p50_p3), %s2223_s0, %s1295_s4 }
  0x19   : > { %v265_v0 = vld [vmem:[%s1741_s7] sm:$0xff]  ;;  %v267_v1 = vld [vmem:[%s1741_s7 + $0xa8] sm:$0xff]  ;;  %v269_v2 = vld [vmem:[%s1741_s7 + $0x150] sm:$0xff] }
  0x1a   : > { %266 = vst [vmem:[%s1746_s8] sm:$0xff] %v265_v0  ;;  %268 = vst [vmem:[%s1746_s8 + $0x8] sm:$0xff] %v267_v1  ;;  %v271_v3 = vld [vmem:[%s1741_s7 + $0x1f8] sm:$0xff]  ;;  %v273_v4 = vld [vmem:[%s1741_s7 + $0x2a0] sm:$0xff] }
  0x1b   : > { %270 = vst [vmem:[%s1746_s8 + $0x10] sm:$0xff] %v269_v2  ;;  %v275_v5 = vld [vmem:[%s1741_s7 + $0x348] sm:$0xff]  ;;  %272 = vst [vmem:[%s1746_s8 + $0x18] sm:$0xff] %v271_v3  ;;  %v277_v6 = vld [vmem:[%s1741_s7 + $0x3f0] sm:$0xff] }
  0x1c   : > { %274 = vst [vmem:[%s1746_s8 + $0x20] sm:$0xff] %v273_v4  ;;  %276 = vst [vmem:[%s1746_s8 + $0x28] sm:$0xff] %v275_v5  ;;  %v279_v7 = vld [vmem:[%s1741_s7 + $0x498] sm:$0xff]  ;;  %v281_v8 = vld [vmem:[%s1741_s7 + $0x540] sm:$0xff] }
  0x1d   : > { %278 = vst [vmem:[%s1746_s8 + $0x30] sm:$0xff] %v277_v6  ;;  %280 = vst [vmem:[%s1746_s8 + $0x38] sm:$0xff] %v279_v7  ;;  %v283_v9 = vld [vmem:[%s1741_s7 + $0x5e8] sm:$0xff]  ;;  %v285_v10 = vld [vmem:[%s1741_s7 + $0x690] sm:$0xff] }
  0x1e   : > { %282 = vst [vmem:[%s1746_s8 + $0x40] sm:$0xff] %v281_v8  ;;  %v287_v11 = vld [vmem:[%s1741_s7 + $0x738] sm:$0xff]  ;;  %284 = vst [vmem:[%s1746_s8 + $0x48] sm:$0xff] %v283_v9  ;;  %v289_v12 = vld [vmem:[%s1741_s7 + $0x7e0] sm:$0xff] }
  0x1f   : > { %286 = vst [vmem:[%s1746_s8 + $0x50] sm:$0xff] %v285_v10  ;;  %288 = vst [vmem:[%s1746_s8 + $0x58] sm:$0xff] %v287_v11  ;;  %v291_v13 = vld [vmem:[%s1741_s7 + $0x888] sm:$0xff]  ;;  %v293_v14 = vld [vmem:[%s1741_s7 + $0x930] sm:$0xff] }
  0x20   : > { %290 = vst [vmem:[%s1746_s8 + $0x60] sm:$0xff] %v289_v12  ;;  %292 = vst [vmem:[%s1746_s8 + $0x68] sm:$0xff] %v291_v13  ;;  %v295_v15 = vld [vmem:[%s1741_s7 + $0x9d8] sm:$0xff]  ;;  %v297_v16 = vld [vmem:[%s1741_s7 + $0xa80] sm:$0xff] }
  0x21   : > { %294 = vst [vmem:[%s1746_s8 + $0x70] sm:$0xff] %v293_v14  ;;  %v299_v17 = vld [vmem:[%s1741_s7 + $0xb28] sm:$0xff]  ;;  %296 = vst [vmem:[%s1746_s8 + $0x78] sm:$0xff] %v295_v15  ;;  %v301_v18 = vld [vmem:[%s1741_s7 + $0xbd0] sm:$0xff] }
  0x22   : > { %298 = vst [vmem:[%s1746_s8 + $0x80] sm:$0xff] %v297_v16  ;;  %300 = vst [vmem:[%s1746_s8 + $0x88] sm:$0xff] %v299_v17  ;;  %v303_v19 = vld [vmem:[%s1741_s7 + $0xc78] sm:$0xff]  ;;  %v305_v20 = vld [vmem:[%s1741_s7 + $0xd20] sm:$0xff] }
  0x23   : > { %302 = vst [vmem:[%s1746_s8 + $0x90] sm:$0xff] %v301_v18  ;;  %304 = vst [vmem:[%s1746_s8 + $0x98] sm:$0xff] %v303_v19  ;;  %v307_v21 = vld [vmem:[%s1741_s7 + $0xdc8] sm:$0xff]  ;;  %v309_v22 = vld [vmem:[%s1741_s7 + $0xe70] sm:$0xff] }
  0x24   : > { %306 = vst [vmem:[%s1746_s8 + $0xa0] sm:$0xff] %v305_v20  ;;  %v311_v23 = vld [vmem:[%s1741_s7 + $0xf18] sm:$0xff]  ;;  %308 = vst [vmem:[%s1746_s8 + $0xa8] sm:$0xff] %v307_v21  ;;  %v313_v24 = vld [vmem:[%s1741_s7 + $0xfc0] sm:$0xff] }
  0x25   : > { %310 = vst [vmem:[%s1746_s8 + $0xb0] sm:$0xff] %v309_v22  ;;  %312 = vst [vmem:[%s1746_s8 + $0xb8] sm:$0xff] %v311_v23  ;;  %v315_v25 = vld [vmem:[%s1741_s7 + $0x1068] sm:$0xff]  ;;  %v317_v26 = vld [vmem:[%s1741_s7 + $0x1110] sm:$0xff] }
  0x26   : > { %314 = vst [vmem:[%s1746_s8 + $0xc0] sm:$0xff] %v313_v24  ;;  %316 = vst [vmem:[%s1746_s8 + $0xc8] sm:$0xff] %v315_v25  ;;  %v319_v27 = vld [vmem:[%s1741_s7 + $0x11b8] sm:$0xff]  ;;  %v321_v28 = vld [vmem:[%s1741_s7 + $0x1260] sm:$0xff] }
  0x27   : > { %318 = vst [vmem:[%s1746_s8 + $0xd0] sm:$0xff] %v317_v26  ;;  %v323_v29 = vld [vmem:[%s1741_s7 + $0x1308] sm:$0xff]  ;;  %320 = vst [vmem:[%s1746_s8 + $0xd8] sm:$0xff] %v319_v27  ;;  %v325_v30 = vld [vmem:[%s1741_s7 + $0x13b0] sm:$0xff] }
  0x28   : > { %322 = vst [vmem:[%s1746_s8 + $0xe0] sm:$0xff] %v321_v28  ;;  %324 = vst [vmem:[%s1746_s8 + $0xe8] sm:$0xff] %v323_v29  ;;  %v327_v31 = vld [vmem:[%s1741_s7 + $0x1458] sm:$0xff] }
  0x29   : > { %326 = vst [vmem:[%s1746_s8 + $0xf0] sm:$0xff] %v325_v30  ;;  %328 = vst [vmem:[%s1746_s8 + $0xf8] sm:$0xff] %v327_v31 }
  0x2a PF: > { %p1296_p7 = scmp.ge.s32.totalorder %s1659_s18, 1  ;;  %p345_p8 = scmp.lt.s32.totalorder %s1659_s18, 43 }
  0x2c   : > { %p346_p9 = pnand %p1296_p7, %p345_p8 }
  0x2d   : > { %s1298_s9 = sshll.u32 (!%p346_p9), %s1643_s14, 5  ;;  %s1300_s10 = sshll.u32 (!%p346_p9), %s1647_s15, 5 }
  0x2e   : > { %349 = sbr.rel (%p346_p9) target bundleno = 406 (0x196), region = 66  ;;  %p392_p10 = scmp.lt.s32.totalorder (!%p346_p9), %s1298_s9, 671 }
  0x2f   : > { %p404_p11 = scmp.lt.s32.totalorder (!%p346_p9), %s1300_s10, 63  ;;  %s352_s28 = sand.u32 (!%p346_p9), 1, %s1635_s12  }
  0x30   : > { %s1297_s29 = sshll.u32 (!%p346_p9), %s352_s28, 8  ;;  %p1350_p12 = scmp.ne.s32.totalorder (!%p346_p9), %s1643_s14, 0 }
  0x31   : > { %s1835_s30 = scalar_lea.vmem (!%p346_p9), [#allocation2], %s1297_s29 }
  0x32   : > { %v1559_v43 = vld [vmem:[%s1835_s30 + $0x4] ss:$8 sps:$4 sm:$0xff] (!%p346_p9)   ;;  %v1557_v50 = vld [vmem:[%s1835_s30] ss:$8 sps:$4 sm:$0xff] (!%p346_p9)   ;;  %v1563_v52 = vld [vmem:[%s1835_s30 + $0x14] ss:$8 sps:$4 sm:$0xff] (!%p346_p9)  }
  0x33   : > { %v1562_v44 = vld [vmem:[%s1835_s30 + $0x84] ss:$8 sps:$4 sm:$0xff] (!%p346_p9)   ;;  %765 = vmatprep.mubr.bf16.mxu0 (!%p346_p9), %v1559_v43  ;;  %v1560_v51 = vld [vmem:[%s1835_s30 + $0x80] ss:$8 sps:$4 sm:$0xff] (!%p346_p9)   ;;  %v1565_v53 = vld [vmem:[%s1835_s30 + $0x94] ss:$8 sps:$4 sm:$0xff] (!%p346_p9)  }
  0x34   : > { %829 = vmatprep.mubr.bf16.mxu1 (!%p346_p9), %v1562_v44  ;;  %v1567_v54 = vld [vmem:[%s1835_s30 + $0x10] ss:$8 sps:$4 sm:$0xff] (!%p346_p9)   ;;  %v1569_v56 = vld [vmem:[%s1835_s30 + $0x24] ss:$8 sps:$4 sm:$0xff] (!%p346_p9)   ;;  %v1573_v58 = vld [vmem:[%s1835_s30 + $0x20] ss:$8 sps:$4 sm:$0xff] (!%p346_p9)  }
  0x35   : > { %s2240_s9 = smov (!%p392_p10, %s1298_s9), 671  ;;  %s2242_s10 = smov (!%p404_p11, %s1300_s10), 63  ;;  %v1568_v55 = vld [vmem:[%s1835_s30 + $0x90] ss:$8 sps:$4 sm:$0xff]   ;;  %v1571_v57 = vld [vmem:[%s1835_s30 + $0xa4] ss:$8 sps:$4 sm:$0xff]  }
  0x36   : > { %s1299_s11 = sshll.u32 %s2240_s9, 2  ;;  %s1301_s24 = sshll.u32 %s2242_s10, 3  ;;  %v1574_v59 = vld [vmem:[%s1835_s30 + $0xa0] ss:$8 sps:$4 sm:$0xff]   ;;  %v1575_v60 = vld [vmem:[%s1835_s30 + $0x34] ss:$8 sps:$4 sm:$0xff]  }
  0x37   : > { %s1816_s23 = scalar_lea.vmem %s2224_s1, %s1299_s11  ;;  %s1821_s15 = scalar_lea.vmem %s2226_s3, %s1301_s24  ;;  %v1577_v61 = vld [vmem:[%s1835_s30 + $0xb4] ss:$8 sps:$4 sm:$0xff]   ;;  %v1579_v62 = vld [vmem:[%s1835_s30 + $0x30] ss:$8 sps:$4 sm:$0xff]   ;;  %v1581_v0 = vld [vmem:[%s1835_s30 + $0x44] ss:$8 sps:$4 sm:$0xff]  }
  0x38   : > { %v1541_v32 = vld [vmem:[%s1816_s23 + $0x40] sm:$0xff]   ;;  %v1543_v34 = vld [vmem:[%s1816_s23 + $0x48] sm:$0xff]   ;;  %v1545_v36 = vld [vmem:[%s1816_s23 + $0x50] sm:$0xff]  }
  0x39   : > { %v1542_v33 = vld [vmem:[%s1816_s23] sm:$0xff]   ;;  %1356 = vmatprep.subr.bf16.mxu0 %v1541_v32  ;;  %1468 = vmatprep.subr.bf16.mxu1 %v1541_v32  ;;  %v1544_v35 = vld [vmem:[%s1816_s23 + $0x8] sm:$0xff]   ;;  %v1546_v37 = vld [vmem:[%s1816_s23 + $0x10] sm:$0xff]  }
  0x3a   : > { %1357 = vmatpush3.bf16.msra.mxu0 %v1542_v33  ;;  %1476 = vmatpush3.bf16.msra.mxu1 %v1542_v33  ;;  %v1547_v38 = vld [vmem:[%s1816_s23 + $0x58] sm:$0xff]   ;;  %v1549_v40 = vld [vmem:[%s1816_s23 + $0x60] sm:$0xff]   ;;  %v1551_v42 = vld [vmem:[%s1816_s23 + $0x68] sm:$0xff]  }
  0x3b   : > { %1358 = vmatprep.subr.bf16.mxu0 %v1543_v34  ;;  %1469 = vmatprep.subr.bf16.mxu1 %v1543_v34  ;;  %v1548_v39 = vld [vmem:[%s1816_s23 + $0x18] sm:$0xff]   ;;  %v1550_v41 = vld [vmem:[%s1816_s23 + $0x20] sm:$0xff]   ;;  %v1552_v45 = vld [vmem:[%s1816_s23 + $0x28] sm:$0xff]  }
  0x3c   : > { %v1553_v46 = vld [vmem:[%s1816_s23 + $0x70] sm:$0xff]   ;;  %v1555_v48 = vld [vmem:[%s1816_s23 + $0x78] sm:$0xff]   ;;  %v1583_v1 = vld [vmem:[%s1835_s30 + $0xc4] ss:$8 sps:$4 sm:$0xff]  }
  0x3d   : > { %v1554_v47 = vld [vmem:[%s1816_s23 + $0x30] sm:$0xff]   ;;  %v1556_v49 = vld [vmem:[%s1816_s23 + $0x38] sm:$0xff]   ;;  %v1585_v2 = vld [vmem:[%s1835_s30 + $0x40] ss:$8 sps:$4 sm:$0xff]  }
  0x3e   : > { %1359 = vmatpush3.bf16.msra.mxu0 %v1544_v35  ;;  %1477 = vmatpush3.bf16.msra.mxu1 %v1544_v35  ;;  %v1580_v63 = vld [vmem:[%s1835_s30 + $0xb0] ss:$8 sps:$4 sm:$0xff]   ;;  %v1586_v3 = vld [vmem:[%s1835_s30 + $0xc0] ss:$8 sps:$4 sm:$0xff]   ;;  %v1587_v4 = vld [vmem:[%s1835_s30 + $0x54] ss:$8 sps:$4 sm:$0xff]  }
  0x3f   : > { %1360 = vmatprep.subr.bf16.mxu0 %v1545_v36  ;;  %1470 = vmatprep.subr.bf16.mxu1 %v1545_v36  ;;  %v1589_v5 = vld [vmem:[%s1835_s30 + $0xd4] ss:$8 sps:$4 sm:$0xff]   ;;  %v1591_v6 = vld [vmem:[%s1835_s30 + $0x50] ss:$8 sps:$4 sm:$0xff]   ;;  %v1593_v8 = vld [vmem:[%s1835_s30 + $0x64] ss:$8 sps:$4 sm:$0xff]  }
  0x40   : > { %v1592_v7 = vld [vmem:[%s1835_s30 + $0xd0] ss:$8 sps:$4 sm:$0xff]   ;;  %v1595_v9 = vld [vmem:[%s1835_s30 + $0xe4] ss:$8 sps:$4 sm:$0xff]   ;;  %v1597_v10 = vld [vmem:[%s1835_s30 + $0x60] ss:$8 sps:$4 sm:$0xff]  }
  0x41   : > { %v1598_v11 = vld [vmem:[%s1835_s30 + $0xe0] ss:$8 sps:$4 sm:$0xff]   ;;  %v1599_v12 = vld [vmem:[%s1835_s30 + $0x74] ss:$8 sps:$4 sm:$0xff]   ;;  %v1603_v14 = vld [vmem:[%s1835_s30 + $0x70] ss:$8 sps:$4 sm:$0xff]  }
  0x42   : > { %1361 = vmatpush3.bf16.msra.mxu0 %v1546_v37  ;;  %1478 = vmatpush3.bf16.msra.mxu1 %v1546_v37  ;;  %v1601_v13 = vld [vmem:[%s1835_s30 + $0xf4] ss:$8 sps:$4 sm:$0xff]   ;;  %v1604_v15 = vld [vmem:[%s1835_s30 + $0xf0] ss:$8 sps:$4 sm:$0xff]  }
  0x43   : > { %1362 = vmatprep.subr.bf16.mxu0 %v1547_v38  ;;  %1471 = vmatprep.subr.bf16.mxu1 %v1547_v38 }
  0x46   : > { %1363 = vmatpush3.bf16.msra.mxu0 %v1548_v39  ;;  %1479 = vmatpush3.bf16.msra.mxu1 %v1548_v39 }
  0x47   : > { %1364 = vmatprep.subr.bf16.mxu0 %v1549_v40  ;;  %1472 = vmatprep.subr.bf16.mxu1 %v1549_v40 }
  0x4a   : > { %1365 = vmatpush3.bf16.msra.mxu0 %v1550_v41  ;;  %1480 = vmatpush3.bf16.msra.mxu1 %v1550_v41 }
  0x4b   : > { %1366 = vmatprep.subr.bf16.mxu0 %v1551_v42  ;;  %1473 = vmatprep.subr.bf16.mxu1 %v1551_v42 }
  0x4e   : > { %1367 = vmatpush3.bf16.msra.mxu0 %v1552_v45  ;;  %1481 = vmatpush3.bf16.msra.mxu1 %v1552_v45 }
  0x4f   : > { %1368 = vmatprep.subr.bf16.mxu0 %v1553_v46  ;;  %1474 = vmatprep.subr.bf16.mxu1 %v1553_v46 }
  0x52   : > { %1369 = vmatpush3.bf16.msra.mxu0 %v1554_v47  ;;  %1482 = vmatpush3.bf16.msra.mxu1 %v1554_v47 }
  0x53   : > { %1370 = vmatprep.subr.bf16.mxu0 %v1555_v48  ;;  %1475 = vmatprep.subr.bf16.mxu1 %v1555_v48 }
  0x56   : > { %1371 = vmatpush3.bf16.msra.mxu0 %v1556_v49  ;;  %1483 = vmatpush3.bf16.msra.mxu1 %v1556_v49 }
  0x59   : > { %766 = vmatmul.mubr.bf16.vlgmr.msra.gmra.mrb[0].mxu0 %v1557_v50  ;;  %830 = vmatmul.mubr.bf16.vlgmr.msra.gmra.mrb[0].mxu1 %v1560_v51 }
  0x5a   : > { %773 = vmatprep.mubr.bf16.mxu0 %v1563_v52  ;;  %837 = vmatprep.mubr.bf16.mxu1 %v1565_v53 }
  0x61   : > { %774 = vmatmul.mubr.bf16.gmra.mrb[4].mxu0 %v1567_v54  ;;  %838 = vmatmul.mubr.bf16.gmra.mrb[4].mxu1 %v1568_v55 }
  0x62   : > { %781 = vmatprep.mubr.bf16.mxu0 %v1569_v56  ;;  %845 = vmatprep.mubr.bf16.mxu1 %v1571_v57 }
  0x69   : > { %782 = vmatmul.mubr.bf16.gmra.mrb[8].mxu0 %v1573_v58  ;;  %846 = vmatmul.mubr.bf16.gmra.mrb[8].mxu1 %v1574_v59 }
  0x6a   : > { %789 = vmatprep.mubr.bf16.mxu0 %v1575_v60  ;;  %853 = vmatprep.mubr.bf16.mxu1 %v1577_v61 }
  0x71   : > { %790 = vmatmul.mubr.bf16.gmra.mrb[12].mxu0 %v1579_v62  ;;  %854 = vmatmul.mubr.bf16.gmra.mrb[12].mxu1 %v1580_v63 }
  0x72   : > { %797 = vmatprep.mubr.bf16.mxu0 %v1581_v0  ;;  %861 = vmatprep.mubr.bf16.mxu1 %v1583_v1 }
  0x79   : > { %798 = vmatmul.mubr.bf16.gmra.mrb[16].mxu0 %v1585_v2  ;;  %862 = vmatmul.mubr.bf16.gmra.mrb[16].mxu1 %v1586_v3 }
  0x7a   : > { %805 = vmatprep.mubr.bf16.mxu0 %v1587_v4  ;;  %869 = vmatprep.mubr.bf16.mxu1 %v1589_v5 }
  0x81   : > { %806 = vmatmul.mubr.bf16.gmra.mrb[20].mxu0 %v1591_v6  ;;  %870 = vmatmul.mubr.bf16.gmra.mrb[20].mxu1 %v1592_v7 }
  0x82   : > { %813 = vmatprep.mubr.bf16.mxu0 %v1593_v8  ;;  %877 = vmatprep.mubr.bf16.mxu1 %v1595_v9 }
  0x89   : > { %814 = vmatmul.mubr.bf16.gmra.mrb[24].mxu0 %v1597_v10  ;;  %878 = vmatmul.mubr.bf16.gmra.mrb[24].mxu1 %v1598_v11 }
  0x8a   : > { %821 = vmatprep.mubr.bf16.mxu0 %v1599_v12  ;;  %885 = vmatprep.mubr.bf16.mxu1 %v1601_v13 }
  0x91   : > { %822 = vmatmul.mubr.bf16.gmra.mrb[28].mxu0 %v1603_v14  ;;  %886 = vmatmul.mubr.bf16.gmra.mrb[28].mxu1 %v1604_v15 }
 0x12c   : > { %v1372_v16 = vpop.f32.mrb[0].mxu0  ;;  %v1420_v17 = vpop.f32.mrb[0].mxu1 }
 0x12d   : > { %v1373_v18 = vpop.f32.mrb[1].mxu0  ;;  %v1421_v19 = vpop.f32.mrb[1].mxu1 }
 0x12e   : > { %v1874_v20 = vadd.f32 %v1373_v18, %v1372_v16  ;;  %v1876_v21 = vadd.f32 %v1421_v19, %v1420_v17  ;;  %v1375_v22 = vpop.f32.mrb[2].mxu0  ;;  %v1423_v23 = vpop.f32.mrb[2].mxu1 }
 0x12f   : > { %v1376_v24 = vpop.f32.mrb[3].mxu0  ;;  %v1424_v25 = vpop.f32.mrb[3].mxu1 }
 0x130   : > { %v1878_v26 = vadd.f32 %v1376_v24, %v1375_v22  ;;  %v1880_v27 = vadd.f32 %v1424_v25, %v1423_v23  ;;  %898 = vst [vmem:[%s1821_s15] sm:$0xff] (!%p1350_p12), %v1874_v20  ;;  %914 = vst [vmem:[%s1821_s15 + $0x80] sm:$0xff] (!%p1350_p12), %v1876_v21 }
 0x132   : > { %899 = vst [vmem:[%s1821_s15 + $0x8] sm:$0xff] (!%p1350_p12), %v1878_v26  ;;  %915 = vst [vmem:[%s1821_s15 + $0x88] sm:$0xff] (!%p1350_p12), %v1880_v27 }
 0x134   : > { %v1378_v28 = vpop.f32.mrb[4].mxu0  ;;  %v1426_v29 = vpop.f32.mrb[4].mxu1 }
 0x135   : > { %v1379_v30 = vpop.f32.mrb[5].mxu0  ;;  %v1427_v31 = vpop.f32.mrb[5].mxu1 }
 0x136   : > { %v1882_v32 = vadd.f32 %v1379_v30, %v1378_v28  ;;  %v1884_v33 = vadd.f32 %v1427_v31, %v1426_v29  ;;  %v1381_v34 = vpop.f32.mrb[6].mxu0  ;;  %v1429_v35 = vpop.f32.mrb[6].mxu1 }
 0x137   : > { %v1382_v36 = vpop.f32.mrb[7].mxu0  ;;  %v1430_v37 = vpop.f32.mrb[7].mxu1 }
 0x138   : > { %v1886_v38 = vadd.f32 %v1382_v36, %v1381_v34  ;;  %v1888_v39 = vadd.f32 %v1430_v37, %v1429_v35  ;;  %900 = vst [vmem:[%s1821_s15 + $0x10] sm:$0xff] (!%p1350_p12), %v1882_v32  ;;  %916 = vst [vmem:[%s1821_s15 + $0x90] sm:$0xff] (!%p1350_p12), %v1884_v33 }
 0x13a   : > { %901 = vst [vmem:[%s1821_s15 + $0x18] sm:$0xff] (!%p1350_p12), %v1886_v38  ;;  %917 = vst [vmem:[%s1821_s15 + $0x98] sm:$0xff] (!%p1350_p12), %v1888_v39 }
 0x13c   : > { %v1384_v40 = vpop.f32.mrb[8].mxu0  ;;  %v1432_v41 = vpop.f32.mrb[8].mxu1 }
 0x13d   : > { %v1385_v42 = vpop.f32.mrb[9].mxu0  ;;  %v1433_v43 = vpop.f32.mrb[9].mxu1 }
 0x13e   : > { %v1890_v44 = vadd.f32 %v1385_v42, %v1384_v40  ;;  %v1892_v45 = vadd.f32 %v1433_v43, %v1432_v41  ;;  %v1387_v46 = vpop.f32.mrb[10].mxu0  ;;  %v1435_v47 = vpop.f32.mrb[10].mxu1 }
 0x13f   : > { %v1388_v48 = vpop.f32.mrb[11].mxu0  ;;  %v1436_v49 = vpop.f32.mrb[11].mxu1 }
 0x140   : > { %v1894_v50 = vadd.f32 %v1388_v48, %v1387_v46  ;;  %v1896_v51 = vadd.f32 %v1436_v49, %v1435_v47  ;;  %902 = vst [vmem:[%s1821_s15 + $0x20] sm:$0xff] (!%p1350_p12), %v1890_v44  ;;  %918 = vst [vmem:[%s1821_s15 + $0xa0] sm:$0xff] (!%p1350_p12), %v1892_v45 }
 0x142   : > { %903 = vst [vmem:[%s1821_s15 + $0x28] sm:$0xff] (!%p1350_p12), %v1894_v50  ;;  %919 = vst [vmem:[%s1821_s15 + $0xa8] sm:$0xff] (!%p1350_p12), %v1896_v51 }
 0x144   : > { %v1390_v52 = vpop.f32.mrb[12].mxu0  ;;  %v1438_v53 = vpop.f32.mrb[12].mxu1 }
 0x145   : > { %v1391_v54 = vpop.f32.mrb[13].mxu0  ;;  %v1439_v55 = vpop.f32.mrb[13].mxu1 }
 0x146   : > { %v1898_v56 = vadd.f32 %v1391_v54, %v1390_v52  ;;  %v1900_v57 = vadd.f32 %v1439_v55, %v1438_v53  ;;  %v1393_v58 = vpop.f32.mrb[14].mxu0  ;;  %v1441_v59 = vpop.f32.mrb[14].mxu1 }
 0x147   : > { %v1394_v60 = vpop.f32.mrb[15].mxu0  ;;  %v1442_v61 = vpop.f32.mrb[15].mxu1 }
 0x148   : > { %v1902_v62 = vadd.f32 %v1394_v60, %v1393_v58  ;;  %v1904_v63 = vadd.f32 %v1442_v61, %v1441_v59  ;;  %904 = vst [vmem:[%s1821_s15 + $0x30] sm:$0xff] (!%p1350_p12), %v1898_v56  ;;  %920 = vst [vmem:[%s1821_s15 + $0xb0] sm:$0xff] (!%p1350_p12), %v1900_v57 }
 0x14a   : > { %905 = vst [vmem:[%s1821_s15 + $0x38] sm:$0xff] (!%p1350_p12), %v1902_v62  ;;  %921 = vst [vmem:[%s1821_s15 + $0xb8] sm:$0xff] (!%p1350_p12), %v1904_v63 }
 0x14c   : > { %v1396_v0 = vpop.f32.mrb[16].mxu0  ;;  %v1444_v1 = vpop.f32.mrb[16].mxu1 }
 0x14d   : > { %v1397_v2 = vpop.f32.mrb[17].mxu0  ;;  %v1445_v3 = vpop.f32.mrb[17].mxu1 }
 0x14e   : > { %v1906_v4 = vadd.f32 %v1397_v2, %v1396_v0  ;;  %v1908_v5 = vadd.f32 %v1445_v3, %v1444_v1  ;;  %v1399_v6 = vpop.f32.mrb[18].mxu0  ;;  %v1447_v7 = vpop.f32.mrb[18].mxu1 }
 0x14f   : > { %v1400_v8 = vpop.f32.mrb[19].mxu0  ;;  %v1448_v9 = vpop.f32.mrb[19].mxu1 }
 0x150   : > { %v1910_v10 = vadd.f32 %v1400_v8, %v1399_v6  ;;  %v1912_v11 = vadd.f32 %v1448_v9, %v1447_v7  ;;  %906 = vst [vmem:[%s1821_s15 + $0x40] sm:$0xff] (!%p1350_p12), %v1906_v4  ;;  %922 = vst [vmem:[%s1821_s15 + $0xc0] sm:$0xff] (!%p1350_p12), %v1908_v5 }
 0x152   : > { %907 = vst [vmem:[%s1821_s15 + $0x48] sm:$0xff] (!%p1350_p12), %v1910_v10  ;;  %923 = vst [vmem:[%s1821_s15 + $0xc8] sm:$0xff] (!%p1350_p12), %v1912_v11 }
 0x154   : > { %v1402_v12 = vpop.f32.mrb[20].mxu0  ;;  %v1450_v13 = vpop.f32.mrb[20].mxu1 }
 0x155   : > { %v1403_v14 = vpop.f32.mrb[21].mxu0  ;;  %v1451_v15 = vpop.f32.mrb[21].mxu1 }
 0x156   : > { %v1914_v16 = vadd.f32 %v1403_v14, %v1402_v12  ;;  %v1916_v17 = vadd.f32 %v1451_v15, %v1450_v13  ;;  %v1405_v18 = vpop.f32.mrb[22].mxu0  ;;  %v1453_v19 = vpop.f32.mrb[22].mxu1 }
 0x157   : > { %v1406_v22 = vpop.f32.mrb[23].mxu0  ;;  %v1454_v23 = vpop.f32.mrb[23].mxu1 }
 0x158   : > { %v1918_v24 = vadd.f32 %v1406_v22, %v1405_v18  ;;  %v1920_v25 = vadd.f32 %v1454_v23, %v1453_v19  ;;  %908 = vst [vmem:[%s1821_s15 + $0x50] sm:$0xff] (!%p1350_p12), %v1914_v16  ;;  %924 = vst [vmem:[%s1821_s15 + $0xd0] sm:$0xff] (!%p1350_p12), %v1916_v17 }
 0x15a   : > { %909 = vst [vmem:[%s1821_s15 + $0x58] sm:$0xff] (!%p1350_p12), %v1918_v24  ;;  %925 = vst [vmem:[%s1821_s15 + $0xd8] sm:$0xff] (!%p1350_p12), %v1920_v25 }
 0x15c   : > { %v1408_v28 = vpop.f32.mrb[24].mxu0  ;;  %v1456_v29 = vpop.f32.mrb[24].mxu1 }
 0x15d   : > { %v1409_v30 = vpop.f32.mrb[25].mxu0  ;;  %v1457_v31 = vpop.f32.mrb[25].mxu1 }
 0x15e   : > { %v1922_v34 = vadd.f32 %v1409_v30, %v1408_v28  ;;  %v1924_v35 = vadd.f32 %v1457_v31, %v1456_v29  ;;  %v1411_v36 = vpop.f32.mrb[26].mxu0  ;;  %v1459_v37 = vpop.f32.mrb[26].mxu1 }
 0x15f   : > { %v1412_v40 = vpop.f32.mrb[27].mxu0  ;;  %v1460_v41 = vpop.f32.mrb[27].mxu1 }
 0x160   : > { %v1926_v42 = vadd.f32 %v1412_v40, %v1411_v36  ;;  %v1928_v43 = vadd.f32 %v1460_v41, %v1459_v37  ;;  %910 = vst [vmem:[%s1821_s15 + $0x60] sm:$0xff] (!%p1350_p12), %v1922_v34  ;;  %926 = vst [vmem:[%s1821_s15 + $0xe0] sm:$0xff] (!%p1350_p12), %v1924_v35 }
 0x162   : > { %897 = sbr.rel (%p1350_p12) target bundleno = 363 (0x16b), region = 74  ;;  %911 = vst [vmem:[%s1821_s15 + $0x68] sm:$0xff] (!%p1350_p12), %v1926_v42  ;;  %927 = vst [vmem:[%s1821_s15 + $0xe8] sm:$0xff] (!%p1350_p12), %v1928_v43 }
 0x164   : > { %v1414_v46 = vpop.f32.mrb[28].mxu0  ;;  %v1462_v47 = vpop.f32.mrb[28].mxu1 }
 0x165   : > { %v1415_v48 = vpop.f32.mrb[29].mxu0  ;;  %v1463_v49 = vpop.f32.mrb[29].mxu1 }
 0x166   : > { %v1930_v52 = vadd.f32 %v1415_v48, %v1414_v46  ;;  %v1932_v53 = vadd.f32 %v1463_v49, %v1462_v47  ;;  %v1417_v54 = vpop.f32.mrb[30].mxu0  ;;  %v1465_v55 = vpop.f32.mrb[30].mxu1 }
 0x167   : > { %v1418_v58 = vpop.f32.mrb[31].mxu0  ;;  %v1466_v59 = vpop.f32.mrb[31].mxu1 }
 0x168   : > { %v1934_v60 = vadd.f32 %v1418_v58, %v1417_v54  ;;  %v1936_v61 = vadd.f32 %v1466_v59, %v1465_v55  ;;  %912 = vst [vmem:[%s1821_s15 + $0x70] sm:$0xff] (!%p1350_p12), %v1930_v52  ;;  %928 = vst [vmem:[%s1821_s15 + $0xf0] sm:$0xff] (!%p1350_p12), %v1932_v53 }
 0x16a   : > { %913 = vst [vmem:[%s1821_s15 + $0x78] sm:$0xff] %v1934_v60  ;;  %929 = vst [vmem:[%s1821_s15 + $0xf8] sm:$0xff] %v1936_v61 }
 0x16b PF: > { %p1351_p13 = scmp.le.s32.totalorder %s1643_s14, 0 }
 0x16c   : > { %v934_v0 = vld [vmem:[%s1821_s15] sm:$0xff] (!%p1351_p13)  ;;  %v935_v1 = vld [vmem:[%s1821_s15 + $0x8] sm:$0xff] (!%p1351_p13)  ;;  %v936_v2 = vld [vmem:[%s1821_s15 + $0x10] sm:$0xff] (!%p1351_p13) }
 0x16d   : > { %933 = sbr.rel (%p1351_p13) target bundleno = 383 (0x17f), region = 78  ;;  %v966_v3 = vadd.f32 (!%p1351_p13), %v1874_v20, %v934_v0  ;;  %v967_v6 = vadd.f32 (!%p1351_p13), %v1878_v26, %v935_v1  ;;  %v968_v7 = vadd.f32 (!%p1351_p13), %v1882_v32, %v936_v2  ;;  %v937_v8 = vld [vmem:[%s1821_s15 + $0x18] sm:$0xff] (!%p1351_p13)  ;;  %v938_v9 = vld [vmem:[%s1821_s15 + $0x20] sm:$0xff] (!%p1351_p13)  ;;  %v939_v12 = vld [vmem:[%s1821_s15 + $0x28] sm:$0xff] (!%p1351_p13) }
 0x16e   : > { %v969_v13 = vadd.f32 (!%p1351_p13), %v1886_v38, %v937_v8  ;;  %v970_v14 = vadd.f32 (!%p1351_p13), %v1890_v44, %v938_v9  ;;  %v971_v15 = vadd.f32 (!%p1351_p13), %v1894_v50, %v939_v12  ;;  %v940_v20 = vld [vmem:[%s1821_s15 + $0x30] sm:$0xff] (!%p1351_p13)  ;;  %v941_v18 = vld [vmem:[%s1821_s15 + $0x38] sm:$0xff] (!%p1351_p13)  ;;  %v942_v26 = vld [vmem:[%s1821_s15 + $0x40] sm:$0xff] (!%p1351_p13) }
 0x16f   : > { %998 = vst [vmem:[%s1821_s15] sm:$0xff] (!%p1351_p13), %v966_v3  ;;  %999 = vst [vmem:[%s1821_s15 + $0x8] sm:$0xff] (!%p1351_p13), %v967_v6  ;;  %v972_v32 = vadd.f32 (!%p1351_p13), %v1898_v56, %v940_v20  ;;  %v973_v38 = vadd.f32 (!%p1351_p13), %v1902_v62, %v941_v18  ;;  %v974_v44 = vadd.f32 (!%p1351_p13), %v1906_v4, %v942_v26  ;;  %v943_v19 = vld [vmem:[%s1821_s15 + $0x48] sm:$0xff] (!%p1351_p13)  ;;  %v944_v50 = vld [vmem:[%s1821_s15 + $0x50] sm:$0xff] (!%p1351_p13) }
 0x170   : > { %1000 = vst [vmem:[%s1821_s15 + $0x10] sm:$0xff] (!%p1351_p13), %v968_v7  ;;  %v945_v22 = vld [vmem:[%s1821_s15 + $0x58] sm:$0xff] (!%p1351_p13)  ;;  %1001 = vst [vmem:[%s1821_s15 + $0x18] sm:$0xff] (!%p1351_p13), %v969_v13  ;;  %v975_v23 = vadd.f32 (!%p1351_p13), %v1910_v10, %v943_v19  ;;  %v976_v56 = vadd.f32 (!%p1351_p13), %v1914_v16, %v944_v50  ;;  %v946_v28 = vld [vmem:[%s1821_s15 + $0x60] sm:$0xff] (!%p1351_p13) }
 0x171   : > { %1002 = vst [vmem:[%s1821_s15 + $0x20] sm:$0xff] (!%p1351_p13), %v970_v14  ;;  %1003 = vst [vmem:[%s1821_s15 + $0x28] sm:$0xff] (!%p1351_p13), %v971_v15  ;;  %v977_v62 = vadd.f32 (!%p1351_p13), %v1918_v24, %v945_v22  ;;  %v947_v4 = vld [vmem:[%s1821_s15 + $0x68] sm:$0xff] (!%p1351_p13)  ;;  %v948_v29 = vld [vmem:[%s1821_s15 + $0x70] sm:$0xff] (!%p1351_p13)  ;;  %v978_v30 = vadd.f32 (!%p1351_p13), %v1922_v34, %v946_v28 }
 0x172   : > { %1004 = vst [vmem:[%s1821_s15 + $0x30] sm:$0xff] (!%p1351_p13), %v972_v32  ;;  %1005 = vst [vmem:[%s1821_s15 + $0x38] sm:$0xff] (!%p1351_p13), %v973_v38  ;;  %v979_v10 = vadd.f32 (!%p1351_p13), %v1926_v42, %v947_v4  ;;  %v980_v16 = vadd.f32 (!%p1351_p13), %v1930_v52, %v948_v29  ;;  %v949_v31 = vld [vmem:[%s1821_s15 + $0x78] sm:$0xff] (!%p1351_p13)  ;;  %v950_v24 = vld [vmem:[%s1821_s15 + $0x80] sm:$0xff] (!%p1351_p13) }
 0x173   : > { %1006 = vst [vmem:[%s1821_s15 + $0x40] sm:$0xff] (!%p1351_p13), %v974_v44  ;;  %v951_v36 = vld [vmem:[%s1821_s15 + $0x88] sm:$0xff] (!%p1351_p13)  ;;  %1007 = vst [vmem:[%s1821_s15 + $0x48] sm:$0xff] (!%p1351_p13), %v975_v23  ;;  %v981_v37 = vadd.f32 (!%p1351_p13), %v1934_v60, %v949_v31  ;;  %v982_v34 = vadd.f32 (!%p1351_p13), %v1876_v21, %v950_v24  ;;  %v952_v41 = vld [vmem:[%s1821_s15 + $0x90] sm:$0xff] (!%p1351_p13) }
 0x174   : > { %1008 = vst [vmem:[%s1821_s15 + $0x50] sm:$0xff] %v976_v56  ;;  %1009 = vst [vmem:[%s1821_s15 + $0x58] sm:$0xff] %v977_v62  ;;  %v983_v40 = vadd.f32 %v1880_v27, %v951_v36  ;;  %v953_v42 = vld [vmem:[%s1821_s15 + $0x98] sm:$0xff]  ;;  %v954_v46 = vld [vmem:[%s1821_s15 + $0xa0] sm:$0xff]  ;;  %v984_v47 = vadd.f32 %v1884_v33, %v952_v41 }
 0x175   : > { %1010 = vst [vmem:[%s1821_s15 + $0x60] sm:$0xff] %v978_v30  ;;  %1011 = vst [vmem:[%s1821_s15 + $0x68] sm:$0xff] %v979_v10  ;;  %v985_v48 = vadd.f32 %v1888_v39, %v953_v42  ;;  %v986_v21 = vadd.f32 %v1892_v45, %v954_v46  ;;  %v955_v49 = vld [vmem:[%s1821_s15 + $0xa8] sm:$0xff]  ;;  %v956_v27 = vld [vmem:[%s1821_s15 + $0xb0] sm:$0xff] }
 0x176   : > { %1012 = vst [vmem:[%s1821_s15 + $0x70] sm:$0xff] %v980_v16  ;;  %v957_v52 = vld [vmem:[%s1821_s15 + $0xb8] sm:$0xff]  ;;  %1013 = vst [vmem:[%s1821_s15 + $0x78] sm:$0xff] %v981_v37  ;;  %v987_v54 = vadd.f32 %v1896_v51, %v955_v49  ;;  %v988_v33 = vadd.f32 %v1900_v57, %v956_v27  ;;  %v958_v55 = vld [vmem:[%s1821_s15 + $0xc0] sm:$0xff] }
 0x177   : > { %1014 = vst [vmem:[%s1821_s15 + $0x80] sm:$0xff] %v982_v34  ;;  %1015 = vst [vmem:[%s1821_s15 + $0x88] sm:$0xff] %v983_v40  ;;  %v989_v39 = vadd.f32 %v1904_v63, %v957_v52  ;;  %v959_v45 = vld [vmem:[%s1821_s15 + $0xc8] sm:$0xff]  ;;  %v960_v58 = vld [vmem:[%s1821_s15 + $0xd0] sm:$0xff]  ;;  %v990_v59 = vadd.f32 %v1908_v5, %v958_v55 }
 0x178   : > { %1016 = vst [vmem:[%s1821_s15 + $0x90] sm:$0xff] %v984_v47  ;;  %1017 = vst [vmem:[%s1821_s15 + $0x98] sm:$0xff] %v985_v48  ;;  %v991_v51 = vadd.f32 %v1912_v11, %v959_v45  ;;  %v992_v57 = vadd.f32 %v1916_v17, %v960_v58  ;;  %v961_v60 = vld [vmem:[%s1821_s15 + $0xd8] sm:$0xff]  ;;  %v962_v63 = vld [vmem:[%s1821_s15 + $0xe0] sm:$0xff] }
 0x179   : > { %1018 = vst [vmem:[%s1821_s15 + $0xa0] sm:$0xff] %v986_v21  ;;  %v963_v0 = vld [vmem:[%s1821_s15 + $0xe8] sm:$0xff]  ;;  %1019 = vst [vmem:[%s1821_s15 + $0xa8] sm:$0xff] %v987_v54  ;;  %v993_v1 = vadd.f32 %v1920_v25, %v961_v60  ;;  %v994_v5 = vadd.f32 %v1924_v35, %v962_v63  ;;  %v964_v11 = vld [vmem:[%s1821_s15 + $0xf0] sm:$0xff] }
 0x17a   : > { %1020 = vst [vmem:[%s1821_s15 + $0xb0] sm:$0xff] %v988_v33  ;;  %1021 = vst [vmem:[%s1821_s15 + $0xb8] sm:$0xff] %v989_v39  ;;  %v995_v2 = vadd.f32 %v1928_v43, %v963_v0  ;;  %v965_v3 = vld [vmem:[%s1821_s15 + $0xf8] sm:$0xff]  ;;  %v996_v17 = vadd.f32 %v1932_v53, %v964_v11 }
 0x17b   : > { %1022 = vst [vmem:[%s1821_s15 + $0xc0] sm:$0xff] %v990_v59  ;;  %1023 = vst [vmem:[%s1821_s15 + $0xc8] sm:$0xff] %v991_v51  ;;  %v997_v6 = vadd.f32 %v1936_v61, %v965_v3 }
 0x17c   : > { %1024 = vst [vmem:[%s1821_s15 + $0xd0] sm:$0xff] %v992_v57  ;;  %1025 = vst [vmem:[%s1821_s15 + $0xd8] sm:$0xff] %v993_v1 }
 0x17d   : > { %1026 = vst [vmem:[%s1821_s15 + $0xe0] sm:$0xff] %v994_v5  ;;  %1027 = vst [vmem:[%s1821_s15 + $0xe8] sm:$0xff] %v995_v2 }
 0x17e   : > { %1028 = vst [vmem:[%s1821_s15 + $0xf0] sm:$0xff] %v996_v17  ;;  %1029 = vst [vmem:[%s1821_s15 + $0xf8] sm:$0xff] %v997_v6 }
 0x17f PF: > { %p1352_p0 = scmp.ne.s32.totalorder %s1643_s14, 20 }
 0x180   : > { %v2105_v35 = vld [vmem:[%s2225_s2] ss:$0 sm:$0xff] (!%p1352_p0)  ;;  %v1047_v30 = vld [vmem:[%s1821_s15 + $0x68] sm:$0xff] (!%p1352_p0)  ;;  %v1048_v36 = vld [vmem:[%s1821_s15 + $0x70] sm:$0xff] (!%p1352_p0) }
 0x181   : > { %1033 = sbr.rel (%p1352_p0) target bundleno = 406 (0x196), region = 82  ;;  %v1034_v25 = vld [vmem:[%s1821_s15] sm:$0xff] (!%p1352_p0)  ;;  %v1035_v43 = vld [vmem:[%s1821_s15 + $0x8] sm:$0xff] (!%p1352_p0)  ;;  %v1049_v37 = vld [vmem:[%s1821_s15 + $0x78] sm:$0xff] (!%p1352_p0)  ;;  %v1086_v49 = vadd.f32 (!%p1352_p0), %v2105_v35, %v1047_v30  ;;  %v1087_v27 = vadd.f32 (!%p1352_p0), %v2105_v35, %v1048_v36 }
 0x182   : > { %v1073_v53 = vadd.f32 (!%p1352_p0), %v2105_v35, %v1034_v25  ;;  %v1074_v61 = vadd.f32 (!%p1352_p0), %v2105_v35, %v1035_v43  ;;  %v1036_v7 = vld [vmem:[%s1821_s15 + $0x10] sm:$0xff] (!%p1352_p0)  ;;  %v1037_v8 = vld [vmem:[%s1821_s15 + $0x18] sm:$0xff] (!%p1352_p0)  ;;  %v1046_v29 = vld [vmem:[%s1821_s15 + $0x60] sm:$0xff] (!%p1352_p0)  ;;  %v1088_v58 = vadd.f32 (!%p1352_p0), %v2105_v35, %v1049_v37 }
 0x183   : > { %v1038_v9 = vld [vmem:[%s1821_s15 + $0x20] sm:$0xff] (!%p1352_p0)  ;;  %v1075_v12 = vadd.f32 (!%p1352_p0), %v2105_v35, %v1036_v7  ;;  %v1076_v13 = vadd.f32 (!%p1352_p0), %v2105_v35, %v1037_v8  ;;  %v1039_v15 = vld [vmem:[%s1821_s15 + $0x28] sm:$0xff] (!%p1352_p0)  ;;  %v1085_v42 = vadd.f32 (!%p1352_p0), %v2105_v35, %v1046_v29  ;;  %v1052_v52 = vld [vmem:[%s1821_s15 + $0x90] sm:$0xff] (!%p1352_p0)  ;;  %v1118_v57 = vmax.f32 (!%p1352_p0), %v1086_v49, 0.0 }
 0x184   : > { %v1077_v14 = vadd.f32 (!%p1352_p0), %v2105_v35, %v1038_v9  ;;  %v1040_v20 = vld [vmem:[%s1821_s15 + $0x30] sm:$0xff] (!%p1352_p0)  ;;  %v1041_v18 = vld [vmem:[%s1821_s15 + $0x38] sm:$0xff] (!%p1352_p0)  ;;  %v1105_v26 = vmax.f32 (!%p1352_p0), %v1073_v53, 0.0  ;;  %v1106_v32 = vmax.f32 (!%p1352_p0), %v1074_v61, 0.0  ;;  %v1078_v38 = vadd.f32 (!%p1352_p0), %v2105_v35, %v1039_v15  ;;  %v1050_v46 = vld [vmem:[%s1821_s15 + $0x80] sm:$0xff] (!%p1352_p0) }
 0x185   : > { %v1079_v44 = vadd.f32 (!%p1352_p0), %v2105_v35, %v1040_v20  ;;  %v1042_v19 = vld [vmem:[%s1821_s15 + $0x40] sm:$0xff] (!%p1352_p0)  ;;  %v1043_v50 = vld [vmem:[%s1821_s15 + $0x48] sm:$0xff] (!%p1352_p0)  ;;  %v1107_v23 = vmax.f32 (!%p1352_p0), %v1075_v12, 0.0  ;;  %v1108_v56 = vmax.f32 (!%p1352_p0), %v1076_v13, 0.0  ;;  %v1080_v28 = vadd.f32 (!%p1352_p0), %v2105_v35, %v1041_v18  ;;  %v1053_v54 = vld [vmem:[%s1821_s15 + $0x98] sm:$0xff] (!%p1352_p0)  ;;  %1150 = vst [vmem:[%s1821_s15 + $0x68] sm:$0xff] (!%p1352_p0), %v1118_v57 }
 0x186   : > { %v1044_v22 = vld [vmem:[%s1821_s15 + $0x50] sm:$0xff] (!%p1352_p0)  ;;  %v1109_v62 = vmax.f32 (!%p1352_p0), %v1077_v14, 0.0  ;;  %v1045_v4 = vld [vmem:[%s1821_s15 + $0x58] sm:$0xff] (!%p1352_p0)  ;;  %1137 = vst [vmem:[%s1821_s15] sm:$0xff] (!%p1352_p0), %v1105_v26  ;;  %1138 = vst [vmem:[%s1821_s15 + $0x8] sm:$0xff] (!%p1352_p0), %v1106_v32  ;;  %v1110_v10 = vmax.f32 (!%p1352_p0), %v1078_v38, 0.0  ;;  %v1081_v31 = vadd.f32 (!%p1352_p0), %v2105_v35, %v1042_v19  ;;  %v1082_v24 = vadd.f32 (!%p1352_p0), %v2105_v35, %v1043_v50 }
 0x187   : > { %v1111_v16 = vmax.f32 (!%p1352_p0), %v1079_v44, 0.0  ;;  %1139 = vst [vmem:[%s1821_s15 + $0x10] sm:$0xff] (!%p1352_p0), %v1107_v23  ;;  %1140 = vst [vmem:[%s1821_s15 + $0x18] sm:$0xff] (!%p1352_p0), %v1108_v56  ;;  %v1112_v34 = vmax.f32 (!%p1352_p0), %v1080_v28, 0.0  ;;  %v1083_v40 = vadd.f32 (!%p1352_p0), %v2105_v35, %v1044_v22  ;;  %v1084_v41 = vadd.f32 (!%p1352_p0), %v2105_v35, %v1045_v4  ;;  %v1051_v47 = vld [vmem:[%s1821_s15 + $0x88] sm:$0xff] (!%p1352_p0)  ;;  %v1054_v33 = vld [vmem:[%s1821_s15 + $0xa0] sm:$0xff] (!%p1352_p0) }
 0x188   : > { %1141 = vst [vmem:[%s1821_s15 + $0x20] sm:$0xff] %v1109_v62  ;;  %1142 = vst [vmem:[%s1821_s15 + $0x28] sm:$0xff] %v1110_v10  ;;  %v1113_v48 = vmax.f32 %v1081_v31, 0.0  ;;  %v1114_v21 = vmax.f32 %v1082_v24, 0.0  ;;  %v1117_v45 = vmax.f32 %v1085_v42, 0.0  ;;  %v1055_v59 = vld [vmem:[%s1821_s15 + $0xa8] sm:$0xff]  ;;  %v1089_v63 = vadd.f32 %v2105_v35, %v1050_v46 }
 0x189   : > { %1143 = vst [vmem:[%s1821_s15 + $0x30] sm:$0xff] %v1111_v16  ;;  %1144 = vst [vmem:[%s1821_s15 + $0x38] sm:$0xff] %v1112_v34  ;;  %v1115_v39 = vmax.f32 %v1083_v40, 0.0  ;;  %v1116_v55 = vmax.f32 %v1084_v41, 0.0  ;;  %v1056_v51 = vld [vmem:[%s1821_s15 + $0xb0] sm:$0xff]  ;;  %v1119_v60 = vmax.f32 %v1087_v27, 0.0  ;;  %v1090_v0 = vadd.f32 %v2105_v35, %v1051_v47 }
 0x18a   : > { %1145 = vst [vmem:[%s1821_s15 + $0x40] sm:$0xff] %v1113_v48  ;;  %1146 = vst [vmem:[%s1821_s15 + $0x48] sm:$0xff] %v1114_v21  ;;  %v1057_v1 = vld [vmem:[%s1821_s15 + $0xb8] sm:$0xff]  ;;  %v1120_v5 = vmax.f32 %v1088_v58, 0.0  ;;  %v1091_v2 = vadd.f32 %v2105_v35, %v1052_v52  ;;  %v1092_v11 = vadd.f32 %v2105_v35, %v1053_v54  ;;  %v1093_v3 = vadd.f32 %v2105_v35, %v1054_v33  ;;  %v1058_v17 = vld [vmem:[%s1821_s15 + $0xc0] sm:$0xff] }
 0x18b   : > { %1147 = vst [vmem:[%s1821_s15 + $0x50] sm:$0xff] %v1115_v39  ;;  %1148 = vst [vmem:[%s1821_s15 + $0x58] sm:$0xff] %v1116_v55  ;;  %v1059_v6 = vld [vmem:[%s1821_s15 + $0xc8] sm:$0xff]  ;;  %v1121_v25 = vmax.f32 %v1089_v63, 0.0  ;;  %v1122_v43 = vmax.f32 %v1090_v0, 0.0  ;;  %v1094_v53 = vadd.f32 %v2105_v35, %v1055_v59  ;;  %v1095_v61 = vadd.f32 %v2105_v35, %v1056_v51  ;;  %v1060_v7 = vld [vmem:[%s1821_s15 + $0xd0] sm:$0xff] }
 0x18c   : > { %1149 = vst [vmem:[%s1821_s15 + $0x60] sm:$0xff] %v1117_v45  ;;  %1151 = vst [vmem:[%s1821_s15 + $0x70] sm:$0xff] %v1119_v60  ;;  %v1061_v8 = vld [vmem:[%s1821_s15 + $0xd8] sm:$0xff]  ;;  %v1062_v9 = vld [vmem:[%s1821_s15 + $0xe0] sm:$0xff]  ;;  %v1123_v12 = vmax.f32 %v1091_v2, 0.0  ;;  %v1124_v13 = vmax.f32 %v1092_v11, 0.0  ;;  %v1096_v15 = vadd.f32 %v2105_v35, %v1057_v1  ;;  %v1097_v38 = vadd.f32 %v2105_v35, %v1058_v17 }
 0x18d   : > { %1152 = vst [vmem:[%s1821_s15 + $0x78] sm:$0xff] %v1120_v5  ;;  %v1125_v14 = vmax.f32 %v1093_v3, 0.0  ;;  %v1063_v20 = vld [vmem:[%s1821_s15 + $0xe8] sm:$0xff]  ;;  %v1064_v18 = vld [vmem:[%s1821_s15 + $0xf0] sm:$0xff]  ;;  %1153 = vst [vmem:[%s1821_s15 + $0x80] sm:$0xff] %v1121_v25  ;;  %v1126_v26 = vmax.f32 %v1094_v53, 0.0  ;;  %v1098_v44 = vadd.f32 %v2105_v35, %v1059_v6  ;;  %v1099_v22 = vadd.f32 %v2105_v35, %v1060_v7 }
 0x18e   : > { %1154 = vst [vmem:[%s1821_s15 + $0x88] sm:$0xff] %v1122_v43  ;;  %v1127_v32 = vmax.f32 %v1095_v61, 0.0  ;;  %v1065_v19 = vld [vmem:[%s1821_s15 + $0xf8] sm:$0xff]  ;;  %1155 = vst [vmem:[%s1821_s15 + $0x90] sm:$0xff] %v1123_v12  ;;  %v1128_v50 = vmax.f32 %v1096_v15, 0.0  ;;  %v1100_v23 = vadd.f32 %v2105_v35, %v1061_v8  ;;  %v1101_v56 = vadd.f32 %v2105_v35, %v1062_v9 }
 0x18f   : > { %1156 = vst [vmem:[%s1821_s15 + $0x98] sm:$0xff] %v1124_v13  ;;  %1157 = vst [vmem:[%s1821_s15 + $0xa0] sm:$0xff] %v1125_v14  ;;  %v1129_v62 = vmax.f32 %v1097_v38, 0.0  ;;  %v1130_v28 = vmax.f32 %v1098_v44, 0.0  ;;  %v1102_v4 = vadd.f32 %v2105_v35, %v1063_v20  ;;  %v1103_v29 = vadd.f32 %v2105_v35, %v1064_v18 }
 0x190   : > { %1158 = vst [vmem:[%s1821_s15 + $0xa8] sm:$0xff] %v1126_v26  ;;  %1159 = vst [vmem:[%s1821_s15 + $0xb0] sm:$0xff] %v1127_v32  ;;  %v1131_v30 = vmax.f32 %v1099_v22, 0.0  ;;  %v1132_v10 = vmax.f32 %v1100_v23, 0.0  ;;  %v1133_v16 = vmax.f32 %v1101_v56, 0.0  ;;  %v1104_v31 = vadd.f32 %v2105_v35, %v1065_v19 }
 0x191   : > { %1160 = vst [vmem:[%s1821_s15 + $0xb8] sm:$0xff] %v1128_v50  ;;  %1161 = vst [vmem:[%s1821_s15 + $0xc0] sm:$0xff] %v1129_v62  ;;  %v1134_v24 = vmax.f32 %v1102_v4, 0.0  ;;  %v1135_v36 = vmax.f32 %v1103_v29, 0.0 }
 0x192   : > { %1162 = vst [vmem:[%s1821_s15 + $0xc8] sm:$0xff] %v1130_v28  ;;  %1163 = vst [vmem:[%s1821_s15 + $0xd0] sm:$0xff] %v1131_v30  ;;  %v1136_v37 = vmax.f32 %v1104_v31, 0.0 }
 0x193   : > { %1164 = vst [vmem:[%s1821_s15 + $0xd8] sm:$0xff] %v1132_v10  ;;  %1165 = vst [vmem:[%s1821_s15 + $0xe0] sm:$0xff] %v1133_v16 }
 0x194   : > { %1166 = vst [vmem:[%s1821_s15 + $0xe8] sm:$0xff] %v1134_v24  ;;  %1167 = vst [vmem:[%s1821_s15 + $0xf0] sm:$0xff] %v1135_v36 }
 0x195   : > { %1168 = vst [vmem:[%s1821_s15 + $0xf8] sm:$0xff] %v1136_v37 }
 0x196 PF: > { %s13_s18 = sadd.s32 1, %s1659_s18   ;;  %s2227_s12 = smov %s1639_s13 }
 0x197   : > { %p10_p1 = scmp.ge.s32.totalorder %s13_s18, 44   ;;  %s2228_s13 = smov %s1732_s25 }
 0x198   : > { %s2229_s14 = smov %s1651_s16  ;;  %s2230_s15 = smov %s1655_s17 }
 0x199   : > { %s2231_s16 = smov %s2234_s19  ;;  %s2232_s17 = smov %s2238_s20 }
 0x19a   :  { %12 = sbr.rel (!%p10_p1) target bundleno = 4 (0x4), region = 123 }

// kernel: update_block3d_forward.14
= control target key start
LH: loop header
LB: loop body
LE: loop exit
PB: predicated region body
PF: predicated region fallthrough
CT: control target
= control target key end

     0   :  { %s2001_s12 = smov 0   ;;  %s2003_s13 = smov 0   ;;  %s2543_s0 = inlined_call_operand.vmem [shape: bf16[512,3584], index: 0, kind: input, shape index: {}]   ;;  %s2544_s1 = inlined_call_operand.vmem [shape: bf16[3584,128], index: 1, kind: input, shape index: {}]   ;;  %s2545_s2 = inlined_call_operand.vmem [shape: f32[1,128], index: 2, kind: input, shape index: {}]   ;;  %s2546_s3 = inlined_call_operand.vmem [shape: f32[512,128], index: 3, kind: output, shape index: {}]  }
   0x1   :  { %s2005_s14 = smov 0   ;;  %s2007_s15 = smov 0  }
   0x2   :  { %s2009_s16 = smov 0   ;;  %s2011_s17 = smov 0  }
   0x3   :  { %s2013_s18 = smov 0  }
   0x4 LB: > { %s25_s19 = sadd.s32 1, %s1971_s16  ;;  %s32_s20 = sadd.s32 1, %s1975_s17  ;;  %s1979_s18 = sphi %s2013_s18, %s13_s18   ;;  %s1975_s17 = sphi %s2011_s17, %s2552_s17   ;;  %s1971_s16 = sphi %s2009_s16, %s2551_s16   ;;  %s1967_s15 = sphi %s2007_s15, %s2550_s15   ;;  %s1963_s14 = sphi %s2005_s14, %s2549_s14   ;;  %s1959_s13 = sphi %s2003_s13, %s2548_s13   ;;  %s1955_s12 = sphi %s2001_s12, %s2547_s12  }
   0x5   : > { %p26_p0 = scmp.ge.s32.totalorder %s25_s19, 14  ;;  %p48_p1 = scmp.ne.s32.totalorder %s1959_s13, %s1955_s12 }
   0x6   : > { %p49_p2 = scmp.eq.s32.totalorder %s1979_s18, 0  ;;  %s41_s24 = sadd.s32 1, %s1959_s13 }
   0x7   : > { %s2554_s19 = smov (%p26_p0, %s25_s19), 0  ;;  %s2556_s20 = smov (!%p26_p0, %s32_s20), %s1975_s17 }
   0x8   : > { %p50_p3 = por %p49_p2, %p48_p1  ;;  %p34_p4 = scmp.ge.s32.totalorder %s2556_s20, 2 }
   0x9   : > { %s37_s21 = ssub.s32 %s1971_s16, %s2554_s19  ;;  %p1450_p6 = scmp.ge.s32.totalorder %s1979_s18, 28 }
   0xa   : > { %s2558_s20 = smov (%p34_p4, %s2556_s20), 0 }
   0xb   : > { %s36_s22 = ssub.s32 %s1975_s17, %s2558_s20  ;;  %162 = sbr.rel (%p1450_p6) target bundleno = 42 (0x2a), region = 20 }
   0xc   : > { %s38_s23 = sor.u32 %s37_s21, %s36_s22 }
   0xd   : > { %p39_p5 = scmp.eq.s32.totalorder %s38_s23, 0 }
   0xf   : > { %s2052_s25 = scalar_select %p39_p5, %s1959_s13, %s41_s24  }
  0x12   : > { %165 = sbr.rel (!%p50_p3) target bundleno = 42 (0x2a), region = 24  ;;  %s167_s26 = sand.u32 (%p50_p3), 1, %s1959_s13  }
  0x13   : > { %s1453_s27 = sshll.u32 (%p50_p3), %s1971_s16, 1  ;;  %s1451_s28 = sshll.u32 (%p50_p3), %s167_s26, 8 }
  0x14   : > { %s1676_s29 = smul.u32 (%p50_p3), 896, %s1975_s17  ;;  %s2066_s8 = scalar_lea.vmem (%p50_p3), [#allocation2], %s1451_s28 }
  0x16   : > { %s173_s30 = sadd.s32 (%p50_p3), %s1676_s29, %s1453_s27 }
  0x17   : > { %s1455_s4 = sshll.u32 (%p50_p3), %s173_s30, 2 }
  0x18   : > { %s2061_s7 = scalar_lea.vmem (%p50_p3), %s2543_s0, %s1455_s4 }
  0x19   : > { %v265_v0 = vld [vmem:[%s2061_s7] sm:$0xff]  ;;  %v267_v1 = vld [vmem:[%s2061_s7 + $0x70] sm:$0xff] }
  0x1a   : > { %v269_v2 = vld [vmem:[%s2061_s7 + $0xe0] sm:$0xff]  ;;  %266 = vst [vmem:[%s2066_s8] sm:$0xff] %v265_v0  ;;  %268 = vst [vmem:[%s2066_s8 + $0x8] sm:$0xff] %v267_v1  ;;  %v271_v3 = vld [vmem:[%s2061_s7 + $0x150] sm:$0xff] }
  0x1b   : > { %270 = vst [vmem:[%s2066_s8 + $0x10] sm:$0xff] %v269_v2  ;;  %v273_v4 = vld [vmem:[%s2061_s7 + $0x1c0] sm:$0xff]  ;;  %v275_v5 = vld [vmem:[%s2061_s7 + $0x230] sm:$0xff]  ;;  %272 = vst [vmem:[%s2066_s8 + $0x18] sm:$0xff] %v271_v3 }
  0x1c   : > { %274 = vst [vmem:[%s2066_s8 + $0x20] sm:$0xff] %v273_v4  ;;  %276 = vst [vmem:[%s2066_s8 + $0x28] sm:$0xff] %v275_v5  ;;  %v277_v6 = vld [vmem:[%s2061_s7 + $0x2a0] sm:$0xff]  ;;  %v279_v7 = vld [vmem:[%s2061_s7 + $0x310] sm:$0xff] }
  0x1d   : > { %v281_v8 = vld [vmem:[%s2061_s7 + $0x380] sm:$0xff]  ;;  %278 = vst [vmem:[%s2066_s8 + $0x30] sm:$0xff] %v277_v6  ;;  %280 = vst [vmem:[%s2066_s8 + $0x38] sm:$0xff] %v279_v7  ;;  %v283_v9 = vld [vmem:[%s2061_s7 + $0x3f0] sm:$0xff] }
  0x1e   : > { %282 = vst [vmem:[%s2066_s8 + $0x40] sm:$0xff] %v281_v8  ;;  %v285_v10 = vld [vmem:[%s2061_s7 + $0x460] sm:$0xff]  ;;  %v287_v11 = vld [vmem:[%s2061_s7 + $0x4d0] sm:$0xff]  ;;  %284 = vst [vmem:[%s2066_s8 + $0x48] sm:$0xff] %v283_v9 }
  0x1f   : > { %286 = vst [vmem:[%s2066_s8 + $0x50] sm:$0xff] %v285_v10  ;;  %288 = vst [vmem:[%s2066_s8 + $0x58] sm:$0xff] %v287_v11  ;;  %v289_v12 = vld [vmem:[%s2061_s7 + $0x540] sm:$0xff]  ;;  %v291_v13 = vld [vmem:[%s2061_s7 + $0x5b0] sm:$0xff] }
  0x20   : > { %v293_v14 = vld [vmem:[%s2061_s7 + $0x620] sm:$0xff]  ;;  %290 = vst [vmem:[%s2066_s8 + $0x60] sm:$0xff] %v289_v12  ;;  %292 = vst [vmem:[%s2066_s8 + $0x68] sm:$0xff] %v291_v13  ;;  %v295_v15 = vld [vmem:[%s2061_s7 + $0x690] sm:$0xff] }
  0x21   : > { %294 = vst [vmem:[%s2066_s8 + $0x70] sm:$0xff] %v293_v14  ;;  %v297_v16 = vld [vmem:[%s2061_s7 + $0x700] sm:$0xff]  ;;  %v299_v17 = vld [vmem:[%s2061_s7 + $0x770] sm:$0xff]  ;;  %296 = vst [vmem:[%s2066_s8 + $0x78] sm:$0xff] %v295_v15 }
  0x22   : > { %298 = vst [vmem:[%s2066_s8 + $0x80] sm:$0xff] %v297_v16  ;;  %300 = vst [vmem:[%s2066_s8 + $0x88] sm:$0xff] %v299_v17  ;;  %v301_v18 = vld [vmem:[%s2061_s7 + $0x7e0] sm:$0xff]  ;;  %v303_v19 = vld [vmem:[%s2061_s7 + $0x850] sm:$0xff] }
  0x23   : > { %v305_v20 = vld [vmem:[%s2061_s7 + $0x8c0] sm:$0xff]  ;;  %302 = vst [vmem:[%s2066_s8 + $0x90] sm:$0xff] %v301_v18  ;;  %304 = vst [vmem:[%s2066_s8 + $0x98] sm:$0xff] %v303_v19  ;;  %v307_v21 = vld [vmem:[%s2061_s7 + $0x930] sm:$0xff] }
  0x24   : > { %306 = vst [vmem:[%s2066_s8 + $0xa0] sm:$0xff] %v305_v20  ;;  %v309_v22 = vld [vmem:[%s2061_s7 + $0x9a0] sm:$0xff]  ;;  %v311_v23 = vld [vmem:[%s2061_s7 + $0xa10] sm:$0xff]  ;;  %308 = vst [vmem:[%s2066_s8 + $0xa8] sm:$0xff] %v307_v21 }
  0x25   : > { %310 = vst [vmem:[%s2066_s8 + $0xb0] sm:$0xff] %v309_v22  ;;  %312 = vst [vmem:[%s2066_s8 + $0xb8] sm:$0xff] %v311_v23  ;;  %v313_v24 = vld [vmem:[%s2061_s7 + $0xa80] sm:$0xff]  ;;  %v315_v25 = vld [vmem:[%s2061_s7 + $0xaf0] sm:$0xff] }
  0x26   : > { %v317_v26 = vld [vmem:[%s2061_s7 + $0xb60] sm:$0xff]  ;;  %314 = vst [vmem:[%s2066_s8 + $0xc0] sm:$0xff] %v313_v24  ;;  %316 = vst [vmem:[%s2066_s8 + $0xc8] sm:$0xff] %v315_v25  ;;  %v319_v27 = vld [vmem:[%s2061_s7 + $0xbd0] sm:$0xff] }
  0x27   : > { %318 = vst [vmem:[%s2066_s8 + $0xd0] sm:$0xff] %v317_v26  ;;  %v321_v28 = vld [vmem:[%s2061_s7 + $0xc40] sm:$0xff]  ;;  %v323_v29 = vld [vmem:[%s2061_s7 + $0xcb0] sm:$0xff]  ;;  %320 = vst [vmem:[%s2066_s8 + $0xd8] sm:$0xff] %v319_v27 }
  0x28   : > { %322 = vst [vmem:[%s2066_s8 + $0xe0] sm:$0xff] %v321_v28  ;;  %324 = vst [vmem:[%s2066_s8 + $0xe8] sm:$0xff] %v323_v29  ;;  %v325_v30 = vld [vmem:[%s2061_s7 + $0xd20] sm:$0xff]  ;;  %v327_v31 = vld [vmem:[%s2061_s7 + $0xd90] sm:$0xff] }
  0x29   : > { %326 = vst [vmem:[%s2066_s8 + $0xf0] sm:$0xff] %v325_v30  ;;  %328 = vst [vmem:[%s2066_s8 + $0xf8] sm:$0xff] %v327_v31 }
  0x2a PF: > { %p1456_p7 = scmp.ge.s32.totalorder %s1979_s18, 1  ;;  %p345_p8 = scmp.lt.s32.totalorder %s1979_s18, 29 }
  0x2c   : > { %p346_p9 = pnand %p1456_p7, %p345_p8 }
  0x2d   : > { %s1458_s9 = sshll.u32 (!%p346_p9), %s1963_s14, 5  ;;  %s1460_s10 = sshll.u32 (!%p346_p9), %s1967_s15, 5 }
  0x2e   : > { %349 = sbr.rel (%p346_p9) target bundleno = 472 (0x1d8), region = 66  ;;  %p392_p10 = scmp.lt.s32.totalorder (!%p346_p9), %s1458_s9, 447 }
  0x2f   : > { %p404_p11 = scmp.lt.s32.totalorder (!%p346_p9), %s1460_s10, 63  ;;  %s352_s28 = sand.u32 (!%p346_p9), 1, %s1955_s12  }
  0x30   : > { %s1457_s29 = sshll.u32 (!%p346_p9), %s352_s28, 8  ;;  %p1510_p12 = scmp.ne.s32.totalorder (!%p346_p9), %s1963_s14, 0 }
  0x31   : > { %s2155_s30 = scalar_lea.vmem (!%p346_p9), [#allocation2], %s1457_s29 }
  0x32   : > { %v1751_v43 = vld [vmem:[%s2155_s30 + $0x4] ss:$8 sps:$4 sm:$0xff] (!%p346_p9)   ;;  %v1749_v50 = vld [vmem:[%s2155_s30] ss:$8 sps:$4 sm:$0xff] (!%p346_p9)   ;;  %v1755_v52 = vld [vmem:[%s2155_s30 + $0x14] ss:$8 sps:$4 sm:$0xff] (!%p346_p9)  }
  0x33   : > { %v1754_v44 = vld [vmem:[%s2155_s30 + $0x84] ss:$8 sps:$4 sm:$0xff] (!%p346_p9)   ;;  %765 = vmatprep.mubr.bf16.mxu0 (!%p346_p9), %v1751_v43  ;;  %v1752_v51 = vld [vmem:[%s2155_s30 + $0x80] ss:$8 sps:$4 sm:$0xff] (!%p346_p9)   ;;  %v1757_v53 = vld [vmem:[%s2155_s30 + $0x94] ss:$8 sps:$4 sm:$0xff] (!%p346_p9)  }
  0x34   : > { %829 = vmatprep.mubr.bf16.mxu1 (!%p346_p9), %v1754_v44  ;;  %v1759_v54 = vld [vmem:[%s2155_s30 + $0x10] ss:$8 sps:$4 sm:$0xff] (!%p346_p9)   ;;  %v1761_v56 = vld [vmem:[%s2155_s30 + $0x24] ss:$8 sps:$4 sm:$0xff] (!%p346_p9)   ;;  %v1765_v58 = vld [vmem:[%s2155_s30 + $0x20] ss:$8 sps:$4 sm:$0xff] (!%p346_p9)  }
  0x35   : > { %s2560_s9 = smov (!%p392_p10, %s1458_s9), 447  ;;  %s2562_s10 = smov (!%p404_p11, %s1460_s10), 63  ;;  %v1760_v55 = vld [vmem:[%s2155_s30 + $0x90] ss:$8 sps:$4 sm:$0xff]   ;;  %v1763_v57 = vld [vmem:[%s2155_s30 + $0xa4] ss:$8 sps:$4 sm:$0xff]  }
  0x36   : > { %s1459_s11 = sshll.u32 %s2560_s9, 2  ;;  %s1461_s24 = sshll.u32 %s2562_s10, 3  ;;  %v1766_v59 = vld [vmem:[%s2155_s30 + $0xa0] ss:$8 sps:$4 sm:$0xff]   ;;  %v1767_v60 = vld [vmem:[%s2155_s30 + $0x34] ss:$8 sps:$4 sm:$0xff]  }
  0x37   : > { %s2136_s23 = scalar_lea.vmem %s2544_s1, %s1459_s11  ;;  %s2141_s15 = scalar_lea.vmem %s2546_s3, %s1461_s24  ;;  %v1769_v61 = vld [vmem:[%s2155_s30 + $0xb4] ss:$8 sps:$4 sm:$0xff]   ;;  %v1771_v62 = vld [vmem:[%s2155_s30 + $0x30] ss:$8 sps:$4 sm:$0xff]   ;;  %v1773_v0 = vld [vmem:[%s2155_s30 + $0x44] ss:$8 sps:$4 sm:$0xff]  }
  0x38   : > { %v1733_v32 = vld [vmem:[%s2136_s23 + $0x40] sm:$0xff]   ;;  %v1735_v34 = vld [vmem:[%s2136_s23 + $0x48] sm:$0xff]   ;;  %v1737_v36 = vld [vmem:[%s2136_s23 + $0x50] sm:$0xff]  }
  0x39   : > { %v1734_v33 = vld [vmem:[%s2136_s23] sm:$0xff]   ;;  %1548 = vmatprep.subr.bf16.mxu0 %v1733_v32  ;;  %1660 = vmatprep.subr.bf16.mxu1 %v1733_v32  ;;  %v1736_v35 = vld [vmem:[%s2136_s23 + $0x8] sm:$0xff]   ;;  %v1738_v37 = vld [vmem:[%s2136_s23 + $0x10] sm:$0xff]  }
  0x3a   : > { %1549 = vmatpush3.bf16.msra.mxu0 %v1734_v33  ;;  %1668 = vmatpush3.bf16.msra.mxu1 %v1734_v33  ;;  %v1739_v38 = vld [vmem:[%s2136_s23 + $0x58] sm:$0xff]   ;;  %v1741_v40 = vld [vmem:[%s2136_s23 + $0x60] sm:$0xff]   ;;  %v1743_v42 = vld [vmem:[%s2136_s23 + $0x68] sm:$0xff]  }
  0x3b   : > { %1550 = vmatprep.subr.bf16.mxu0 %v1735_v34  ;;  %1661 = vmatprep.subr.bf16.mxu1 %v1735_v34  ;;  %v1740_v39 = vld [vmem:[%s2136_s23 + $0x18] sm:$0xff]   ;;  %v1742_v41 = vld [vmem:[%s2136_s23 + $0x20] sm:$0xff]   ;;  %v1744_v45 = vld [vmem:[%s2136_s23 + $0x28] sm:$0xff]  }
  0x3c   : > { %v1745_v46 = vld [vmem:[%s2136_s23 + $0x70] sm:$0xff]   ;;  %v1747_v48 = vld [vmem:[%s2136_s23 + $0x78] sm:$0xff]   ;;  %v1775_v1 = vld [vmem:[%s2155_s30 + $0xc4] ss:$8 sps:$4 sm:$0xff]  }
  0x3d   : > { %v1746_v47 = vld [vmem:[%s2136_s23 + $0x30] sm:$0xff]   ;;  %v1748_v49 = vld [vmem:[%s2136_s23 + $0x38] sm:$0xff]   ;;  %v1777_v2 = vld [vmem:[%s2155_s30 + $0x40] ss:$8 sps:$4 sm:$0xff]  }
  0x3e   : > { %1551 = vmatpush3.bf16.msra.mxu0 %v1736_v35  ;;  %1669 = vmatpush3.bf16.msra.mxu1 %v1736_v35  ;;  %v1772_v63 = vld [vmem:[%s2155_s30 + $0xb0] ss:$8 sps:$4 sm:$0xff]   ;;  %v1778_v3 = vld [vmem:[%s2155_s30 + $0xc0] ss:$8 sps:$4 sm:$0xff]   ;;  %v1779_v4 = vld [vmem:[%s2155_s30 + $0x54] ss:$8 sps:$4 sm:$0xff]  }
  0x3f   : > { %1552 = vmatprep.subr.bf16.mxu0 %v1737_v36  ;;  %1662 = vmatprep.subr.bf16.mxu1 %v1737_v36  ;;  %v1781_v5 = vld [vmem:[%s2155_s30 + $0xd4] ss:$8 sps:$4 sm:$0xff]   ;;  %v1783_v6 = vld [vmem:[%s2155_s30 + $0x50] ss:$8 sps:$4 sm:$0xff]   ;;  %v1785_v8 = vld [vmem:[%s2155_s30 + $0x64] ss:$8 sps:$4 sm:$0xff]  }
  0x40   : > { %v1784_v7 = vld [vmem:[%s2155_s30 + $0xd0] ss:$8 sps:$4 sm:$0xff]   ;;  %v1787_v9 = vld [vmem:[%s2155_s30 + $0xe4] ss:$8 sps:$4 sm:$0xff]   ;;  %v1789_v10 = vld [vmem:[%s2155_s30 + $0x60] ss:$8 sps:$4 sm:$0xff]  }
  0x41   : > { %v1790_v11 = vld [vmem:[%s2155_s30 + $0xe0] ss:$8 sps:$4 sm:$0xff]   ;;  %v1791_v12 = vld [vmem:[%s2155_s30 + $0x74] ss:$8 sps:$4 sm:$0xff]   ;;  %v1795_v14 = vld [vmem:[%s2155_s30 + $0x70] ss:$8 sps:$4 sm:$0xff]  }
  0x42   : > { %1553 = vmatpush3.bf16.msra.mxu0 %v1738_v37  ;;  %1670 = vmatpush3.bf16.msra.mxu1 %v1738_v37  ;;  %v1793_v13 = vld [vmem:[%s2155_s30 + $0xf4] ss:$8 sps:$4 sm:$0xff]   ;;  %v1796_v15 = vld [vmem:[%s2155_s30 + $0xf0] ss:$8 sps:$4 sm:$0xff]  }
  0x43   : > { %1554 = vmatprep.subr.bf16.mxu0 %v1739_v38  ;;  %1663 = vmatprep.subr.bf16.mxu1 %v1739_v38 }
  0x46   : > { %1555 = vmatpush3.bf16.msra.mxu0 %v1740_v39  ;;  %1671 = vmatpush3.bf16.msra.mxu1 %v1740_v39 }
  0x47   : > { %1556 = vmatprep.subr.bf16.mxu0 %v1741_v40  ;;  %1664 = vmatprep.subr.bf16.mxu1 %v1741_v40 }
  0x4a   : > { %1557 = vmatpush3.bf16.msra.mxu0 %v1742_v41  ;;  %1672 = vmatpush3.bf16.msra.mxu1 %v1742_v41 }
  0x4b   : > { %1558 = vmatprep.subr.bf16.mxu0 %v1743_v42  ;;  %1665 = vmatprep.subr.bf16.mxu1 %v1743_v42 }
  0x4e   : > { %1559 = vmatpush3.bf16.msra.mxu0 %v1744_v45  ;;  %1673 = vmatpush3.bf16.msra.mxu1 %v1744_v45 }
  0x4f   : > { %1560 = vmatprep.subr.bf16.mxu0 %v1745_v46  ;;  %1666 = vmatprep.subr.bf16.mxu1 %v1745_v46 }
  0x52   : > { %1561 = vmatpush3.bf16.msra.mxu0 %v1746_v47  ;;  %1674 = vmatpush3.bf16.msra.mxu1 %v1746_v47 }
  0x53   : > { %1562 = vmatprep.subr.bf16.mxu0 %v1747_v48  ;;  %1667 = vmatprep.subr.bf16.mxu1 %v1747_v48 }
  0x56   : > { %1563 = vmatpush3.bf16.msra.mxu0 %v1748_v49  ;;  %1675 = vmatpush3.bf16.msra.mxu1 %v1748_v49 }
  0x59   : > { %766 = vmatmul.mubr.bf16.vlgmr.msra.gmra.mrb[0].mxu0 %v1749_v50  ;;  %830 = vmatmul.mubr.bf16.vlgmr.msra.gmra.mrb[0].mxu1 %v1752_v51 }
  0x5a   : > { %773 = vmatprep.mubr.bf16.mxu0 %v1755_v52  ;;  %837 = vmatprep.mubr.bf16.mxu1 %v1757_v53 }
  0x61   : > { %774 = vmatmul.mubr.bf16.gmra.mrb[4].mxu0 %v1759_v54  ;;  %838 = vmatmul.mubr.bf16.gmra.mrb[4].mxu1 %v1760_v55 }
  0x62   : > { %781 = vmatprep.mubr.bf16.mxu0 %v1761_v56  ;;  %845 = vmatprep.mubr.bf16.mxu1 %v1763_v57 }
  0x69   : > { %782 = vmatmul.mubr.bf16.gmra.mrb[8].mxu0 %v1765_v58  ;;  %846 = vmatmul.mubr.bf16.gmra.mrb[8].mxu1 %v1766_v59 }
  0x6a   : > { %789 = vmatprep.mubr.bf16.mxu0 %v1767_v60  ;;  %853 = vmatprep.mubr.bf16.mxu1 %v1769_v61 }
  0x71   : > { %790 = vmatmul.mubr.bf16.gmra.mrb[12].mxu0 %v1771_v62  ;;  %854 = vmatmul.mubr.bf16.gmra.mrb[12].mxu1 %v1772_v63 }
  0x72   : > { %797 = vmatprep.mubr.bf16.mxu0 %v1773_v0  ;;  %861 = vmatprep.mubr.bf16.mxu1 %v1775_v1 }
  0x79   : > { %798 = vmatmul.mubr.bf16.gmra.mrb[16].mxu0 %v1777_v2  ;;  %862 = vmatmul.mubr.bf16.gmra.mrb[16].mxu1 %v1778_v3 }
  0x7a   : > { %805 = vmatprep.mubr.bf16.mxu0 %v1779_v4  ;;  %869 = vmatprep.mubr.bf16.mxu1 %v1781_v5 }
  0x81   : > { %806 = vmatmul.mubr.bf16.gmra.mrb[20].mxu0 %v1783_v6  ;;  %870 = vmatmul.mubr.bf16.gmra.mrb[20].mxu1 %v1784_v7 }
  0x82   : > { %813 = vmatprep.mubr.bf16.mxu0 %v1785_v8  ;;  %877 = vmatprep.mubr.bf16.mxu1 %v1787_v9 }
  0x89   : > { %814 = vmatmul.mubr.bf16.gmra.mrb[24].mxu0 %v1789_v10  ;;  %878 = vmatmul.mubr.bf16.gmra.mrb[24].mxu1 %v1790_v11 }
  0x8a   : > { %821 = vmatprep.mubr.bf16.mxu0 %v1791_v12  ;;  %885 = vmatprep.mubr.bf16.mxu1 %v1793_v13 }
  0x91   : > { %822 = vmatmul.mubr.bf16.gmra.mrb[28].mxu0 %v1795_v14  ;;  %886 = vmatmul.mubr.bf16.gmra.mrb[28].mxu1 %v1796_v15 }
 0x12c   : > { %v1564_v16 = vpop.f32.mrb[0].mxu0  ;;  %v1612_v17 = vpop.f32.mrb[0].mxu1 }
 0x12d   : > { %v1565_v18 = vpop.f32.mrb[1].mxu0  ;;  %v1613_v19 = vpop.f32.mrb[1].mxu1 }
 0x12e   : > { %v2194_v20 = vadd.f32 %v1565_v18, %v1564_v16  ;;  %v2196_v21 = vadd.f32 %v1613_v19, %v1612_v17  ;;  %v1567_v22 = vpop.f32.mrb[2].mxu0  ;;  %v1615_v23 = vpop.f32.mrb[2].mxu1 }
 0x12f   : > { %v1568_v24 = vpop.f32.mrb[3].mxu0  ;;  %v1616_v25 = vpop.f32.mrb[3].mxu1 }
 0x130   : > { %v2198_v26 = vadd.f32 %v1568_v24, %v1567_v22  ;;  %v2200_v27 = vadd.f32 %v1616_v25, %v1615_v23  ;;  %898 = vst [vmem:[%s2141_s15] sm:$0xff] (!%p1510_p12), %v2194_v20  ;;  %914 = vst [vmem:[%s2141_s15 + $0x80] sm:$0xff] (!%p1510_p12), %v2196_v21 }
 0x132   : > { %899 = vst [vmem:[%s2141_s15 + $0x8] sm:$0xff] (!%p1510_p12), %v2198_v26  ;;  %915 = vst [vmem:[%s2141_s15 + $0x88] sm:$0xff] (!%p1510_p12), %v2200_v27 }
 0x134   : > { %v1570_v28 = vpop.f32.mrb[4].mxu0  ;;  %v1618_v29 = vpop.f32.mrb[4].mxu1 }
 0x135   : > { %v1571_v30 = vpop.f32.mrb[5].mxu0  ;;  %v1619_v31 = vpop.f32.mrb[5].mxu1 }
 0x136   : > { %v2202_v32 = vadd.f32 %v1571_v30, %v1570_v28  ;;  %v2204_v33 = vadd.f32 %v1619_v31, %v1618_v29  ;;  %v1573_v34 = vpop.f32.mrb[6].mxu0  ;;  %v1621_v35 = vpop.f32.mrb[6].mxu1 }
 0x137   : > { %v1574_v36 = vpop.f32.mrb[7].mxu0  ;;  %v1622_v37 = vpop.f32.mrb[7].mxu1 }
 0x138   : > { %v2206_v38 = vadd.f32 %v1574_v36, %v1573_v34  ;;  %v2208_v39 = vadd.f32 %v1622_v37, %v1621_v35  ;;  %900 = vst [vmem:[%s2141_s15 + $0x10] sm:$0xff] (!%p1510_p12), %v2202_v32  ;;  %916 = vst [vmem:[%s2141_s15 + $0x90] sm:$0xff] (!%p1510_p12), %v2204_v33 }
 0x13a   : > { %901 = vst [vmem:[%s2141_s15 + $0x18] sm:$0xff] (!%p1510_p12), %v2206_v38  ;;  %917 = vst [vmem:[%s2141_s15 + $0x98] sm:$0xff] (!%p1510_p12), %v2208_v39 }
 0x13c   : > { %v1576_v40 = vpop.f32.mrb[8].mxu0  ;;  %v1624_v41 = vpop.f32.mrb[8].mxu1 }
 0x13d   : > { %v1577_v42 = vpop.f32.mrb[9].mxu0  ;;  %v1625_v43 = vpop.f32.mrb[9].mxu1 }
 0x13e   : > { %v2210_v44 = vadd.f32 %v1577_v42, %v1576_v40  ;;  %v2212_v45 = vadd.f32 %v1625_v43, %v1624_v41  ;;  %v1579_v46 = vpop.f32.mrb[10].mxu0  ;;  %v1627_v47 = vpop.f32.mrb[10].mxu1 }
 0x13f   : > { %v1580_v48 = vpop.f32.mrb[11].mxu0  ;;  %v1628_v49 = vpop.f32.mrb[11].mxu1 }
 0x140   : > { %v2214_v50 = vadd.f32 %v1580_v48, %v1579_v46  ;;  %v2216_v51 = vadd.f32 %v1628_v49, %v1627_v47  ;;  %902 = vst [vmem:[%s2141_s15 + $0x20] sm:$0xff] (!%p1510_p12), %v2210_v44  ;;  %918 = vst [vmem:[%s2141_s15 + $0xa0] sm:$0xff] (!%p1510_p12), %v2212_v45 }
 0x142   : > { %903 = vst [vmem:[%s2141_s15 + $0x28] sm:$0xff] (!%p1510_p12), %v2214_v50  ;;  %919 = vst [vmem:[%s2141_s15 + $0xa8] sm:$0xff] (!%p1510_p12), %v2216_v51 }
 0x144   : > { %v1582_v52 = vpop.f32.mrb[12].mxu0  ;;  %v1630_v53 = vpop.f32.mrb[12].mxu1 }
 0x145   : > { %v1583_v54 = vpop.f32.mrb[13].mxu0  ;;  %v1631_v55 = vpop.f32.mrb[13].mxu1 }
 0x146   : > { %v2218_v56 = vadd.f32 %v1583_v54, %v1582_v52  ;;  %v2220_v57 = vadd.f32 %v1631_v55, %v1630_v53  ;;  %v1585_v58 = vpop.f32.mrb[14].mxu0  ;;  %v1633_v59 = vpop.f32.mrb[14].mxu1 }
 0x147   : > { %v1586_v60 = vpop.f32.mrb[15].mxu0  ;;  %v1634_v61 = vpop.f32.mrb[15].mxu1 }
 0x148   : > { %v2222_v62 = vadd.f32 %v1586_v60, %v1585_v58  ;;  %v2224_v63 = vadd.f32 %v1634_v61, %v1633_v59  ;;  %904 = vst [vmem:[%s2141_s15 + $0x30] sm:$0xff] (!%p1510_p12), %v2218_v56  ;;  %920 = vst [vmem:[%s2141_s15 + $0xb0] sm:$0xff] (!%p1510_p12), %v2220_v57 }
 0x14a   : > { %905 = vst [vmem:[%s2141_s15 + $0x38] sm:$0xff] (!%p1510_p12), %v2222_v62  ;;  %921 = vst [vmem:[%s2141_s15 + $0xb8] sm:$0xff] (!%p1510_p12), %v2224_v63 }
 0x14c   : > { %v1588_v0 = vpop.f32.mrb[16].mxu0  ;;  %v1636_v1 = vpop.f32.mrb[16].mxu1 }
 0x14d   : > { %v1589_v2 = vpop.f32.mrb[17].mxu0  ;;  %v1637_v3 = vpop.f32.mrb[17].mxu1 }
 0x14e   : > { %v2226_v4 = vadd.f32 %v1589_v2, %v1588_v0  ;;  %v2228_v5 = vadd.f32 %v1637_v3, %v1636_v1  ;;  %v1591_v6 = vpop.f32.mrb[18].mxu0  ;;  %v1639_v7 = vpop.f32.mrb[18].mxu1 }
 0x14f   : > { %v1592_v8 = vpop.f32.mrb[19].mxu0  ;;  %v1640_v9 = vpop.f32.mrb[19].mxu1 }
 0x150   : > { %v2230_v10 = vadd.f32 %v1592_v8, %v1591_v6  ;;  %v2232_v11 = vadd.f32 %v1640_v9, %v1639_v7  ;;  %906 = vst [vmem:[%s2141_s15 + $0x40] sm:$0xff] (!%p1510_p12), %v2226_v4  ;;  %922 = vst [vmem:[%s2141_s15 + $0xc0] sm:$0xff] (!%p1510_p12), %v2228_v5 }
 0x152   : > { %907 = vst [vmem:[%s2141_s15 + $0x48] sm:$0xff] (!%p1510_p12), %v2230_v10  ;;  %923 = vst [vmem:[%s2141_s15 + $0xc8] sm:$0xff] (!%p1510_p12), %v2232_v11 }
 0x154   : > { %v1594_v12 = vpop.f32.mrb[20].mxu0  ;;  %v1642_v13 = vpop.f32.mrb[20].mxu1 }
 0x155   : > { %v1595_v14 = vpop.f32.mrb[21].mxu0  ;;  %v1643_v15 = vpop.f32.mrb[21].mxu1 }
 0x156   : > { %v2234_v16 = vadd.f32 %v1595_v14, %v1594_v12  ;;  %v2236_v17 = vadd.f32 %v1643_v15, %v1642_v13  ;;  %v1597_v18 = vpop.f32.mrb[22].mxu0  ;;  %v1645_v19 = vpop.f32.mrb[22].mxu1 }
 0x157   : > { %v1598_v22 = vpop.f32.mrb[23].mxu0  ;;  %v1646_v23 = vpop.f32.mrb[23].mxu1 }
 0x158   : > { %v2238_v24 = vadd.f32 %v1598_v22, %v1597_v18  ;;  %v2240_v25 = vadd.f32 %v1646_v23, %v1645_v19  ;;  %908 = vst [vmem:[%s2141_s15 + $0x50] sm:$0xff] (!%p1510_p12), %v2234_v16  ;;  %924 = vst [vmem:[%s2141_s15 + $0xd0] sm:$0xff] (!%p1510_p12), %v2236_v17 }
 0x15a   : > { %909 = vst [vmem:[%s2141_s15 + $0x58] sm:$0xff] (!%p1510_p12), %v2238_v24  ;;  %925 = vst [vmem:[%s2141_s15 + $0xd8] sm:$0xff] (!%p1510_p12), %v2240_v25 }
 0x15c   : > { %v1600_v28 = vpop.f32.mrb[24].mxu0  ;;  %v1648_v29 = vpop.f32.mrb[24].mxu1 }
 0x15d   : > { %v1601_v30 = vpop.f32.mrb[25].mxu0  ;;  %v1649_v31 = vpop.f32.mrb[25].mxu1 }
 0x15e   : > { %v2242_v34 = vadd.f32 %v1601_v30, %v1600_v28  ;;  %v2244_v35 = vadd.f32 %v1649_v31, %v1648_v29  ;;  %v1603_v36 = vpop.f32.mrb[26].mxu0  ;;  %v1651_v37 = vpop.f32.mrb[26].mxu1 }
 0x15f   : > { %v1604_v40 = vpop.f32.mrb[27].mxu0  ;;  %v1652_v41 = vpop.f32.mrb[27].mxu1 }
 0x160   : > { %v2246_v42 = vadd.f32 %v1604_v40, %v1603_v36  ;;  %v2248_v43 = vadd.f32 %v1652_v41, %v1651_v37  ;;  %910 = vst [vmem:[%s2141_s15 + $0x60] sm:$0xff] (!%p1510_p12), %v2242_v34  ;;  %926 = vst [vmem:[%s2141_s15 + $0xe0] sm:$0xff] (!%p1510_p12), %v2244_v35 }
 0x162   : > { %897 = sbr.rel (%p1510_p12) target bundleno = 363 (0x16b), region = 74  ;;  %911 = vst [vmem:[%s2141_s15 + $0x68] sm:$0xff] (!%p1510_p12), %v2246_v42  ;;  %927 = vst [vmem:[%s2141_s15 + $0xe8] sm:$0xff] (!%p1510_p12), %v2248_v43 }
 0x164   : > { %v1606_v46 = vpop.f32.mrb[28].mxu0  ;;  %v1654_v47 = vpop.f32.mrb[28].mxu1 }
 0x165   : > { %v1607_v48 = vpop.f32.mrb[29].mxu0  ;;  %v1655_v49 = vpop.f32.mrb[29].mxu1 }
 0x166   : > { %v2250_v52 = vadd.f32 %v1607_v48, %v1606_v46  ;;  %v2252_v53 = vadd.f32 %v1655_v49, %v1654_v47  ;;  %v1609_v54 = vpop.f32.mrb[30].mxu0  ;;  %v1657_v55 = vpop.f32.mrb[30].mxu1 }
 0x167   : > { %v1610_v58 = vpop.f32.mrb[31].mxu0  ;;  %v1658_v59 = vpop.f32.mrb[31].mxu1 }
 0x168   : > { %v2254_v60 = vadd.f32 %v1610_v58, %v1609_v54  ;;  %v2256_v61 = vadd.f32 %v1658_v59, %v1657_v55  ;;  %912 = vst [vmem:[%s2141_s15 + $0x70] sm:$0xff] (!%p1510_p12), %v2250_v52  ;;  %928 = vst [vmem:[%s2141_s15 + $0xf0] sm:$0xff] (!%p1510_p12), %v2252_v53 }
 0x16a   : > { %913 = vst [vmem:[%s2141_s15 + $0x78] sm:$0xff] %v2254_v60  ;;  %929 = vst [vmem:[%s2141_s15 + $0xf8] sm:$0xff] %v2256_v61 }
 0x16b PF: > { %p1511_p13 = scmp.le.s32.totalorder %s1963_s14, 0 }
 0x16c   : > { %v934_v0 = vld [vmem:[%s2141_s15] sm:$0xff] (!%p1511_p13)  ;;  %v935_v1 = vld [vmem:[%s2141_s15 + $0x8] sm:$0xff] (!%p1511_p13)  ;;  %v936_v2 = vld [vmem:[%s2141_s15 + $0x10] sm:$0xff] (!%p1511_p13) }
 0x16d   : > { %933 = sbr.rel (%p1511_p13) target bundleno = 383 (0x17f), region = 78  ;;  %v966_v3 = vadd.f32 (!%p1511_p13), %v2194_v20, %v934_v0  ;;  %v967_v6 = vadd.f32 (!%p1511_p13), %v2198_v26, %v935_v1  ;;  %v968_v7 = vadd.f32 (!%p1511_p13), %v2202_v32, %v936_v2  ;;  %v937_v8 = vld [vmem:[%s2141_s15 + $0x18] sm:$0xff] (!%p1511_p13)  ;;  %v938_v9 = vld [vmem:[%s2141_s15 + $0x20] sm:$0xff] (!%p1511_p13)  ;;  %v939_v12 = vld [vmem:[%s2141_s15 + $0x28] sm:$0xff] (!%p1511_p13) }
 0x16e   : > { %v969_v13 = vadd.f32 (!%p1511_p13), %v2206_v38, %v937_v8  ;;  %v970_v14 = vadd.f32 (!%p1511_p13), %v2210_v44, %v938_v9  ;;  %v971_v15 = vadd.f32 (!%p1511_p13), %v2214_v50, %v939_v12  ;;  %v940_v20 = vld [vmem:[%s2141_s15 + $0x30] sm:$0xff] (!%p1511_p13)  ;;  %v941_v18 = vld [vmem:[%s2141_s15 + $0x38] sm:$0xff] (!%p1511_p13)  ;;  %v942_v26 = vld [vmem:[%s2141_s15 + $0x40] sm:$0xff] (!%p1511_p13) }
 0x16f   : > { %998 = vst [vmem:[%s2141_s15] sm:$0xff] (!%p1511_p13), %v966_v3  ;;  %999 = vst [vmem:[%s2141_s15 + $0x8] sm:$0xff] (!%p1511_p13), %v967_v6  ;;  %v972_v32 = vadd.f32 (!%p1511_p13), %v2218_v56, %v940_v20  ;;  %v973_v38 = vadd.f32 (!%p1511_p13), %v2222_v62, %v941_v18  ;;  %v974_v44 = vadd.f32 (!%p1511_p13), %v2226_v4, %v942_v26  ;;  %v943_v19 = vld [vmem:[%s2141_s15 + $0x48] sm:$0xff] (!%p1511_p13)  ;;  %v944_v50 = vld [vmem:[%s2141_s15 + $0x50] sm:$0xff] (!%p1511_p13) }
 0x170   : > { %1000 = vst [vmem:[%s2141_s15 + $0x10] sm:$0xff] (!%p1511_p13), %v968_v7  ;;  %v945_v22 = vld [vmem:[%s2141_s15 + $0x58] sm:$0xff] (!%p1511_p13)  ;;  %1001 = vst [vmem:[%s2141_s15 + $0x18] sm:$0xff] (!%p1511_p13), %v969_v13  ;;  %v975_v23 = vadd.f32 (!%p1511_p13), %v2230_v10, %v943_v19  ;;  %v976_v56 = vadd.f32 (!%p1511_p13), %v2234_v16, %v944_v50  ;;  %v946_v28 = vld [vmem:[%s2141_s15 + $0x60] sm:$0xff] (!%p1511_p13) }
 0x171   : > { %1002 = vst [vmem:[%s2141_s15 + $0x20] sm:$0xff] (!%p1511_p13), %v970_v14  ;;  %1003 = vst [vmem:[%s2141_s15 + $0x28] sm:$0xff] (!%p1511_p13), %v971_v15  ;;  %v977_v62 = vadd.f32 (!%p1511_p13), %v2238_v24, %v945_v22  ;;  %v947_v4 = vld [vmem:[%s2141_s15 + $0x68] sm:$0xff] (!%p1511_p13)  ;;  %v948_v29 = vld [vmem:[%s2141_s15 + $0x70] sm:$0xff] (!%p1511_p13)  ;;  %v978_v30 = vadd.f32 (!%p1511_p13), %v2242_v34, %v946_v28 }
 0x172   : > { %1004 = vst [vmem:[%s2141_s15 + $0x30] sm:$0xff] (!%p1511_p13), %v972_v32  ;;  %1005 = vst [vmem:[%s2141_s15 + $0x38] sm:$0xff] (!%p1511_p13), %v973_v38  ;;  %v979_v10 = vadd.f32 (!%p1511_p13), %v2246_v42, %v947_v4  ;;  %v980_v16 = vadd.f32 (!%p1511_p13), %v2250_v52, %v948_v29  ;;  %v949_v31 = vld [vmem:[%s2141_s15 + $0x78] sm:$0xff] (!%p1511_p13)  ;;  %v950_v24 = vld [vmem:[%s2141_s15 + $0x80] sm:$0xff] (!%p1511_p13) }
 0x173   : > { %1006 = vst [vmem:[%s2141_s15 + $0x40] sm:$0xff] (!%p1511_p13), %v974_v44  ;;  %v951_v36 = vld [vmem:[%s2141_s15 + $0x88] sm:$0xff] (!%p1511_p13)  ;;  %1007 = vst [vmem:[%s2141_s15 + $0x48] sm:$0xff] (!%p1511_p13), %v975_v23  ;;  %v981_v37 = vadd.f32 (!%p1511_p13), %v2254_v60, %v949_v31  ;;  %v982_v34 = vadd.f32 (!%p1511_p13), %v2196_v21, %v950_v24  ;;  %v952_v41 = vld [vmem:[%s2141_s15 + $0x90] sm:$0xff] (!%p1511_p13) }
 0x174   : > { %1008 = vst [vmem:[%s2141_s15 + $0x50] sm:$0xff] %v976_v56  ;;  %1009 = vst [vmem:[%s2141_s15 + $0x58] sm:$0xff] %v977_v62  ;;  %v983_v40 = vadd.f32 %v2200_v27, %v951_v36  ;;  %v953_v42 = vld [vmem:[%s2141_s15 + $0x98] sm:$0xff]  ;;  %v954_v46 = vld [vmem:[%s2141_s15 + $0xa0] sm:$0xff]  ;;  %v984_v47 = vadd.f32 %v2204_v33, %v952_v41 }
 0x175   : > { %1010 = vst [vmem:[%s2141_s15 + $0x60] sm:$0xff] %v978_v30  ;;  %1011 = vst [vmem:[%s2141_s15 + $0x68] sm:$0xff] %v979_v10  ;;  %v985_v48 = vadd.f32 %v2208_v39, %v953_v42  ;;  %v986_v21 = vadd.f32 %v2212_v45, %v954_v46  ;;  %v955_v49 = vld [vmem:[%s2141_s15 + $0xa8] sm:$0xff]  ;;  %v956_v27 = vld [vmem:[%s2141_s15 + $0xb0] sm:$0xff] }
 0x176   : > { %1012 = vst [vmem:[%s2141_s15 + $0x70] sm:$0xff] %v980_v16  ;;  %v957_v52 = vld [vmem:[%s2141_s15 + $0xb8] sm:$0xff]  ;;  %1013 = vst [vmem:[%s2141_s15 + $0x78] sm:$0xff] %v981_v37  ;;  %v987_v54 = vadd.f32 %v2216_v51, %v955_v49  ;;  %v988_v33 = vadd.f32 %v2220_v57, %v956_v27  ;;  %v958_v55 = vld [vmem:[%s2141_s15 + $0xc0] sm:$0xff] }
 0x177   : > { %1014 = vst [vmem:[%s2141_s15 + $0x80] sm:$0xff] %v982_v34  ;;  %1015 = vst [vmem:[%s2141_s15 + $0x88] sm:$0xff] %v983_v40  ;;  %v989_v39 = vadd.f32 %v2224_v63, %v957_v52  ;;  %v959_v45 = vld [vmem:[%s2141_s15 + $0xc8] sm:$0xff]  ;;  %v960_v58 = vld [vmem:[%s2141_s15 + $0xd0] sm:$0xff]  ;;  %v990_v59 = vadd.f32 %v2228_v5, %v958_v55 }
 0x178   : > { %1016 = vst [vmem:[%s2141_s15 + $0x90] sm:$0xff] %v984_v47  ;;  %1017 = vst [vmem:[%s2141_s15 + $0x98] sm:$0xff] %v985_v48  ;;  %v991_v51 = vadd.f32 %v2232_v11, %v959_v45  ;;  %v992_v57 = vadd.f32 %v2236_v17, %v960_v58  ;;  %v961_v60 = vld [vmem:[%s2141_s15 + $0xd8] sm:$0xff]  ;;  %v962_v63 = vld [vmem:[%s2141_s15 + $0xe0] sm:$0xff] }
 0x179   : > { %1018 = vst [vmem:[%s2141_s15 + $0xa0] sm:$0xff] %v986_v21  ;;  %v963_v0 = vld [vmem:[%s2141_s15 + $0xe8] sm:$0xff]  ;;  %1019 = vst [vmem:[%s2141_s15 + $0xa8] sm:$0xff] %v987_v54  ;;  %v993_v1 = vadd.f32 %v2240_v25, %v961_v60  ;;  %v994_v5 = vadd.f32 %v2244_v35, %v962_v63  ;;  %v964_v11 = vld [vmem:[%s2141_s15 + $0xf0] sm:$0xff] }
 0x17a   : > { %1020 = vst [vmem:[%s2141_s15 + $0xb0] sm:$0xff] %v988_v33  ;;  %1021 = vst [vmem:[%s2141_s15 + $0xb8] sm:$0xff] %v989_v39  ;;  %v995_v2 = vadd.f32 %v2248_v43, %v963_v0  ;;  %v965_v3 = vld [vmem:[%s2141_s15 + $0xf8] sm:$0xff]  ;;  %v996_v17 = vadd.f32 %v2252_v53, %v964_v11 }
 0x17b   : > { %1022 = vst [vmem:[%s2141_s15 + $0xc0] sm:$0xff] %v990_v59  ;;  %1023 = vst [vmem:[%s2141_s15 + $0xc8] sm:$0xff] %v991_v51  ;;  %v997_v6 = vadd.f32 %v2256_v61, %v965_v3 }
 0x17c   : > { %1024 = vst [vmem:[%s2141_s15 + $0xd0] sm:$0xff] %v992_v57  ;;  %1025 = vst [vmem:[%s2141_s15 + $0xd8] sm:$0xff] %v993_v1 }
 0x17d   : > { %1026 = vst [vmem:[%s2141_s15 + $0xe0] sm:$0xff] %v994_v5  ;;  %1027 = vst [vmem:[%s2141_s15 + $0xe8] sm:$0xff] %v995_v2 }
 0x17e   : > { %1028 = vst [vmem:[%s2141_s15 + $0xf0] sm:$0xff] %v996_v17  ;;  %1029 = vst [vmem:[%s2141_s15 + $0xf8] sm:$0xff] %v997_v6 }
 0x17f PF: > { %p1512_p0 = scmp.ne.s32.totalorder %s1963_s14, 13 }
 0x180   : > { %v2425_v35 = vld [vmem:[%s2545_s2] ss:$0 sm:$0xff] (!%p1512_p0)  ;;  %v1047_v59 = vld [vmem:[%s2141_s15 + $0x68] sm:$0xff] (!%p1512_p0)  ;;  %v1048_v60 = vld [vmem:[%s2141_s15 + $0x70] sm:$0xff] (!%p1512_p0) }
 0x181   : > { %1033 = sbr.rel (%p1512_p0) target bundleno = 472 (0x1d8), region = 82  ;;  %v1034_v25 = vld [vmem:[%s2141_s15] sm:$0xff] (!%p1512_p0)  ;;  %v1035_v43 = vld [vmem:[%s2141_s15 + $0x8] sm:$0xff] (!%p1512_p0)  ;;  %v1049_v1 = vld [vmem:[%s2141_s15 + $0x78] sm:$0xff] (!%p1512_p0)  ;;  %v1086_v11 = vadd.f32 (!%p1512_p0), %v2425_v35, %v1047_v59 }
 0x182   : > { %v1073_v53 = vadd.f32 (!%p1512_p0), %v2425_v35, %v1034_v25  ;;  %v1074_v61 = vadd.f32 (!%p1512_p0), %v2425_v35, %v1035_v43  ;;  %v1036_v7 = vld [vmem:[%s2141_s15 + $0x10] sm:$0xff] (!%p1512_p0)  ;;  %v1037_v8 = vld [vmem:[%s2141_s15 + $0x18] sm:$0xff] (!%p1512_p0)  ;;  %v1046_v16 = vld [vmem:[%s2141_s15 + $0x60] sm:$0xff] (!%p1512_p0)  ;;  %v1087_v25 = vadd.f32 (!%p1512_p0), %v2425_v35, %v1048_v60 }
 0x183   : > { %v1038_v9 = vld [vmem:[%s2141_s15 + $0x20] sm:$0xff] (!%p1512_p0)  ;;  %v1075_v12 = vadd.f32 (!%p1512_p0), %v2425_v35, %v1036_v7  ;;  %v1076_v13 = vadd.f32 (!%p1512_p0), %v2425_v35, %v1037_v8  ;;  %v1039_v15 = vld [vmem:[%s2141_s15 + $0x28] sm:$0xff] (!%p1512_p0)  ;;  %v1085_v40 = vadd.f32 (!%p1512_p0), %v2425_v35, %v1046_v16  ;;  %v1088_v7 = vadd.f32 (!%p1512_p0), %v2425_v35, %v1049_v1  ;;  %v1052_v8 = vld [vmem:[%s2141_s15 + $0x90] sm:$0xff] (!%p1512_p0) }
 0x184   : > { %v1077_v14 = vadd.f32 (!%p1512_p0), %v2425_v35, %v1038_v9  ;;  %v1040_v20 = vld [vmem:[%s2141_s15 + $0x30] sm:$0xff] (!%p1512_p0)  ;;  %v1041_v18 = vld [vmem:[%s2141_s15 + $0x38] sm:$0xff] (!%p1512_p0)  ;;  %v1514_v26 = vmul.f32 (!%p1512_p0), -1.442695, %v1073_v53  ;;  %v1515_v32 = vmul.f32 (!%p1512_p0), -1.442695, %v1074_v61  ;;  %v1078_v38 = vadd.f32 (!%p1512_p0), %v2425_v35, %v1039_v15 }
 0x185   : > { %v1079_v44 = vadd.f32 (!%p1512_p0), %v2425_v35, %v1040_v20  ;;  %v1042_v19 = vld [vmem:[%s2141_s15 + $0x40] sm:$0xff] (!%p1512_p0)  ;;  %v1043_v50 = vld [vmem:[%s2141_s15 + $0x48] sm:$0xff] (!%p1512_p0)  ;;  %v1516_v22 = vmul.f32 (!%p1512_p0), -1.442695, %v1075_v12  ;;  %v1517_v23 = vmul.f32 (!%p1512_p0), -1.442695, %v1076_v13  ;;  %v1080_v56 = vadd.f32 (!%p1512_p0), %v2425_v35, %v1041_v18 }
 0x186   : > { %1797 = vpow2.f32 (!%p1512_p0), %v1514_v26  ;;  %v1518_v62 = vmul.f32 (!%p1512_p0), -1.442695, %v1077_v14  ;;  %v1081_v28 = vadd.f32 (!%p1512_p0), %v2425_v35, %v1042_v19  ;;  %v1044_v4 = vld [vmem:[%s2141_s15 + $0x50] sm:$0xff] (!%p1512_p0)  ;;  %v1045_v29 = vld [vmem:[%s2141_s15 + $0x58] sm:$0xff] (!%p1512_p0)  ;;  %v1519_v30 = vmul.f32 (!%p1512_p0), -1.442695, %v1078_v38 }
 0x187   : > { %1799 = vpow2.f32 (!%p1512_p0), %v1515_v32  ;;  %v1082_v10 = vadd.f32 (!%p1512_p0), %v2425_v35, %v1043_v50  ;;  %v1520_v31 = vmul.f32 (!%p1512_p0), -1.442695, %v1079_v44  ;;  %v1083_v24 = vadd.f32 (!%p1512_p0), %v2425_v35, %v1044_v4  ;;  %v1050_v3 = vld [vmem:[%s2141_s15 + $0x80] sm:$0xff] (!%p1512_p0)  ;;  %v1051_v43 = vld [vmem:[%s2141_s15 + $0x88] sm:$0xff] (!%p1512_p0)  ;;  %v1053_v14 = vld [vmem:[%s2141_s15 + $0x98] sm:$0xff] (!%p1512_p0) }
 0x188   : > { %1801 = vpow2.f32 %v1516_v22  ;;  %v1521_v36 = vmul.f32 -1.442695, %v1080_v56  ;;  %v1084_v37 = vadd.f32 %v2425_v35, %v1045_v29  ;;  %v1522_v34 = vmul.f32 -1.442695, %v1081_v28  ;;  %v1054_v32 = vld [vmem:[%s2141_s15 + $0xa0] sm:$0xff]  ;;  %v1055_v22 = vld [vmem:[%s2141_s15 + $0xa8] sm:$0xff] }
 0x189   : > { %1803 = vpow2.f32 %v1517_v23  ;;  %v1523_v41 = vmul.f32 -1.442695, %v1082_v10  ;;  %v1524_v42 = vmul.f32 -1.442695, %v1083_v24  ;;  %v1526_v47 = vmul.f32 -1.442695, %v1085_v40 }
 0x18a   : > { %1805 = vpow2.f32 %v1518_v62  ;;  %v1525_v46 = vmul.f32 -1.442695, %v1084_v37  ;;  %v1089_v13 = vadd.f32 %v2425_v35, %v1050_v3  ;;  %v1527_v18 = vmul.f32 -1.442695, %v1086_v11  ;;  %v1056_v28 = vld [vmem:[%s2141_s15 + $0xb0] sm:$0xff]  ;;  %v1057_v10 = vld [vmem:[%s2141_s15 + $0xb8] sm:$0xff] }
 0x18b   : > { %1807 = vpow2.f32 %v1519_v30  ;;  %v1090_v26 = vadd.f32 %v2425_v35, %v1051_v43  ;;  %v1528_v19 = vmul.f32 -1.442695, %v1087_v25  ;;  %v1091_v50 = vadd.f32 %v2425_v35, %v1052_v8  ;;  %v1061_v8 = vld [vmem:[%s2141_s15 + $0xd8] sm:$0xff] }
 0x18c   : > { %1809 = vpow2.f32 %v1520_v31  ;;  %v1529_v56 = vmul.f32 -1.442695, %v1088_v7  ;;  %v1092_v62 = vadd.f32 %v2425_v35, %v1053_v14  ;;  %v1530_v29 = vmul.f32 -1.442695, %v1089_v13  ;;  %v1062_v13 = vld [vmem:[%s2141_s15 + $0xe0] sm:$0xff] }
 0x18d   : > { %1811 = vpow2.f32 %v1521_v36  ;;  %v1093_v30 = vadd.f32 %v2425_v35, %v1054_v32  ;;  %v1531_v31 = vmul.f32 -1.442695, %v1090_v26  ;;  %v1094_v24 = vadd.f32 %v2425_v35, %v1055_v22  ;;  %v1058_v36 = vld [vmem:[%s2141_s15 + $0xc0] sm:$0xff] }
 0x18e   : > { %1813 = vpow2.f32 %v1522_v34  ;;  %v1532_v34 = vmul.f32 -1.442695, %v1091_v50  ;;  %v1095_v40 = vadd.f32 %v2425_v35, %v1056_v28  ;;  %v1101_v22 = vadd.f32 %v2425_v35, %v1062_v13 }
 0x18f   : > { %1815 = vpow2.f32 %v1523_v41  ;;  %v1059_v41 = vld [vmem:[%s2141_s15 + $0xc8] sm:$0xff] }
 0x190   : > { %v1798_v48 = vpop.eup %1797  ;;  %1817 = vpow2.f32 %v1524_v42 }
 0x191   : > { %v1800_v21 = vpop.eup %1799  ;;  %v1201_v49 = vadd.f32 1.0, %v1798_v48  ;;  %1819 = vpow2.f32 %v1525_v46  ;;  %v1533_v46 = vmul.f32 -1.442695, %v1092_v62 }
 0x192   : > { %v1802_v27 = vpop.eup %1801  ;;  %v1202_v52 = vadd.f32 1.0, %v1800_v21  ;;  %1821 = vpow2.f32 %v1526_v47  ;;  %v1096_v47 = vadd.f32 %v2425_v35, %v1057_v10  ;;  %v1534_v21 = vmul.f32 -1.442695, %v1093_v30 }
 0x193   : > { %v1804_v54 = vpop.eup %1803  ;;  %1823 = vrcp.f32 %v1201_v49  ;;  %v1203_v33 = vadd.f32 1.0, %v1802_v27  ;;  %v1097_v49 = vadd.f32 %v2425_v35, %v1058_v36 }
 0x194   : > { %v1806_v39 = vpop.eup %1805  ;;  %1825 = vrcp.f32 %v1202_v52  ;;  %v1204_v55 = vadd.f32 1.0, %v1804_v54  ;;  %v1535_v52 = vmul.f32 -1.442695, %v1094_v24  ;;  %v1098_v54 = vadd.f32 %v2425_v35, %v1059_v41 }
 0x195   : > { %v1808_v45 = vpop.eup %1807  ;;  %1827 = vrcp.f32 %v1203_v33  ;;  %v1205_v58 = vadd.f32 1.0, %v1806_v39  ;;  %v1536_v39 = vmul.f32 -1.442695, %v1095_v40  ;;  %v1538_v59 = vmul.f32 -1.442695, %v1097_v49 }
 0x196   : > { %v1810_v51 = vpop.eup %1809  ;;  %1829 = vrcp.f32 %v1204_v55  ;;  %v1206_v57 = vadd.f32 1.0, %v1808_v45  ;;  %v1537_v45 = vmul.f32 -1.442695, %v1096_v47 }
 0x197   : > { %v1812_v63 = vpop.eup %1811  ;;  %1831 = vrcp.f32 %v1205_v58  ;;  %v1207_v0 = vadd.f32 1.0, %v1810_v51 }
 0x198   : > { %v1814_v5 = vpop.eup %1813  ;;  %1833 = vrcp.f32 %v1206_v57  ;;  %v1208_v2 = vadd.f32 1.0, %v1812_v63  ;;  %v1539_v57 = vmul.f32 -1.442695, %v1098_v54 }
 0x199   : > { %v1816_v17 = vpop.eup %1815  ;;  %1835 = vrcp.f32 %v1207_v0  ;;  %v1209_v6 = vadd.f32 1.0, %v1814_v5 }
 0x19a   : > { %v1818_v53 = vpop.eup %1817  ;;  %1837 = vrcp.f32 %v1208_v2  ;;  %v1210_v61 = vadd.f32 1.0, %v1816_v17 }
 0x19b   : > { %v1820_v9 = vpop.eup %1819  ;;  %1839 = vrcp.f32 %v1209_v6  ;;  %v1211_v12 = vadd.f32 1.0, %v1818_v53  ;;  %v1060_v53 = vld [vmem:[%s2141_s15 + $0xd0] sm:$0xff] }
 0x19c   : > { %v1822_v15 = vpop.eup %1821  ;;  %1841 = vrcp.f32 %v1210_v61  ;;  %v1212_v20 = vadd.f32 1.0, %v1820_v9 }
 0x19d   : > { %v1824_v38 = vpop.eup %1823  ;;  %1843 = vrcp.f32 %v1211_v12  ;;  %v1213_v44 = vadd.f32 1.0, %v1822_v15 }
 0x19e   : > { %v1826_v23 = vpop.eup %1825  ;;  %1297 = vst [vmem:[%s2141_s15] sm:$0xff] %v1824_v38  ;;  %1845 = vrcp.f32 %v1212_v20  ;;  %v1099_v20 = vadd.f32 %v2425_v35, %v1060_v53  ;;  %v1100_v38 = vadd.f32 %v2425_v35, %v1061_v8 }
 0x19f   : > { %v1828_v4 = vpop.eup %1827  ;;  %1298 = vst [vmem:[%s2141_s15 + $0x8] sm:$0xff] %v1826_v23  ;;  %1847 = vrcp.f32 %v1213_v44  ;;  %v1064_v44 = vld [vmem:[%s2141_s15 + $0xf0] sm:$0xff]  ;;  %v1065_v23 = vld [vmem:[%s2141_s15 + $0xf8] sm:$0xff] }
 0x1a0   : > { %v1830_v16 = vpop.eup %1829  ;;  %1299 = vst [vmem:[%s2141_s15 + $0x10] sm:$0xff] %v1828_v4  ;;  %1849 = vpow2.f32 %v1527_v18  ;;  %v1063_v18 = vld [vmem:[%s2141_s15 + $0xe8] sm:$0xff]  ;;  %v1540_v30 = vmul.f32 -1.442695, %v1099_v20  ;;  %v1103_v10 = vadd.f32 %v2425_v35, %v1064_v44  ;;  %v1541_v24 = vmul.f32 -1.442695, %v1100_v38 }
 0x1a1   : > { %v1832_v37 = vpop.eup %1831  ;;  %1300 = vst [vmem:[%s2141_s15 + $0x18] sm:$0xff] %v1830_v16  ;;  %1851 = vpow2.f32 %v1528_v19  ;;  %v1102_v28 = vadd.f32 %v2425_v35, %v1063_v18  ;;  %v1104_v36 = vadd.f32 %v2425_v35, %v1065_v23 }
 0x1a2   : > { %v1834_v42 = vpop.eup %1833  ;;  %1301 = vst [vmem:[%s2141_s15 + $0x20] sm:$0xff] %v1832_v37  ;;  %1853 = vpow2.f32 %v1529_v56 }
 0x1a3   : > { %v1836_v48 = vpop.eup %1835  ;;  %1302 = vst [vmem:[%s2141_s15 + $0x28] sm:$0xff] %v1834_v42  ;;  %1855 = vpow2.f32 %v1530_v29  ;;  %v1543_v41 = vmul.f32 -1.442695, %v1102_v28  ;;  %v1545_v35 = vmul.f32 -1.442695, %v1104_v36 }
 0x1a4   : > { %v1838_v27 = vpop.eup %1837  ;;  %1303 = vst [vmem:[%s2141_s15 + $0x30] sm:$0xff] %v1836_v48  ;;  %1857 = vpow2.f32 %v1531_v31 }
 0x1a5   : > { %v1840_v33 = vpop.eup %1839  ;;  %1304 = vst [vmem:[%s2141_s15 + $0x38] sm:$0xff] %v1838_v27  ;;  %1859 = vpow2.f32 %v1532_v34  ;;  %v1542_v34 = vmul.f32 -1.442695, %v1101_v22 }
 0x1a6   : > { %v1842_v55 = vpop.eup %1841  ;;  %1305 = vst [vmem:[%s2141_s15 + $0x40] sm:$0xff] %v1840_v33  ;;  %1861 = vpow2.f32 %v1533_v46  ;;  %v1544_v46 = vmul.f32 -1.442695, %v1103_v10 }
 0x1a7   : > { %v1844_v58 = vpop.eup %1843  ;;  %1306 = vst [vmem:[%s2141_s15 + $0x48] sm:$0xff] %v1842_v55  ;;  %1863 = vpow2.f32 %v1534_v21 }
 0x1a8   : > { %v1846_v51 = vpop.eup %1845  ;;  %1307 = vst [vmem:[%s2141_s15 + $0x50] sm:$0xff] %v1844_v58  ;;  %1865 = vpow2.f32 %v1535_v52 }
 0x1a9   : > { %v1848_v60 = vpop.eup %1847  ;;  %1308 = vst [vmem:[%s2141_s15 + $0x58] sm:$0xff] %v1846_v51  ;;  %1867 = vpow2.f32 %v1536_v39 }
 0x1aa   : > { %v1850_v63 = vpop.eup %1849  ;;  %1309 = vst [vmem:[%s2141_s15 + $0x60] sm:$0xff] %v1848_v60  ;;  %1869 = vpow2.f32 %v1537_v45 }
 0x1ab   : > { %v1852_v0 = vpop.eup %1851  ;;  %v1214_v1 = vadd.f32 1.0, %v1850_v63  ;;  %1871 = vpow2.f32 %v1538_v59 }
 0x1ac   : > { %v1854_v5 = vpop.eup %1853  ;;  %v1215_v2 = vadd.f32 1.0, %v1852_v0  ;;  %1873 = vpow2.f32 %v1539_v57 }
 0x1ad   : > { %v1856_v11 = vpop.eup %1855  ;;  %1875 = vrcp.f32 %v1214_v1  ;;  %v1216_v3 = vadd.f32 1.0, %v1854_v5 }
 0x1ae   : > { %v1858_v17 = vpop.eup %1857  ;;  %1877 = vrcp.f32 %v1215_v2  ;;  %v1217_v6 = vadd.f32 1.0, %v1856_v11 }
 0x1af   : > { %v1860_v25 = vpop.eup %1859  ;;  %1879 = vrcp.f32 %v1216_v3  ;;  %v1218_v43 = vadd.f32 1.0, %v1858_v17 }
 0x1b0   : > { %v1862_v61 = vpop.eup %1861  ;;  %1881 = vrcp.f32 %v1217_v6  ;;  %v1219_v7 = vadd.f32 1.0, %v1860_v25 }
 0x1b1   : > { %v1864_v9 = vpop.eup %1863  ;;  %1883 = vrcp.f32 %v1218_v43  ;;  %v1220_v12 = vadd.f32 1.0, %v1862_v61 }
 0x1b2   : > { %v1866_v14 = vpop.eup %1865  ;;  %1885 = vrcp.f32 %v1219_v7  ;;  %v1221_v15 = vadd.f32 1.0, %v1864_v9 }
 0x1b3   : > { %v1868_v26 = vpop.eup %1867  ;;  %1887 = vrcp.f32 %v1220_v12  ;;  %v1222_v32 = vadd.f32 1.0, %v1866_v14 }
 0x1b4   : > { %v1870_v19 = vpop.eup %1869  ;;  %1889 = vrcp.f32 %v1221_v15  ;;  %v1223_v50 = vadd.f32 1.0, %v1868_v26 }
 0x1b5   : > { %v1872_v56 = vpop.eup %1871  ;;  %1891 = vrcp.f32 %v1222_v32  ;;  %v1224_v62 = vadd.f32 1.0, %v1870_v19 }
 0x1b6   : > { %v1874_v4 = vpop.eup %1873  ;;  %1893 = vrcp.f32 %v1223_v50  ;;  %v1225_v29 = vadd.f32 1.0, %v1872_v56 }
 0x1b7   : > { %v1876_v16 = vpop.eup %1875  ;;  %1895 = vrcp.f32 %v1224_v62  ;;  %v1226_v31 = vadd.f32 1.0, %v1874_v4 }
 0x1b8   : > { %v1878_v37 = vpop.eup %1877  ;;  %1310 = vst [vmem:[%s2141_s15 + $0x68] sm:$0xff] %v1876_v16  ;;  %1897 = vrcp.f32 %v1225_v29 }
 0x1b9   : > { %v1880_v40 = vpop.eup %1879  ;;  %1311 = vst [vmem:[%s2141_s15 + $0x70] sm:$0xff] %v1878_v37  ;;  %1899 = vrcp.f32 %v1226_v31 }
 0x1ba   : > { %v1882_v42 = vpop.eup %1881  ;;  %1312 = vst [vmem:[%s2141_s15 + $0x78] sm:$0xff] %v1880_v40  ;;  %1901 = vpow2.f32 %v1540_v30 }
 0x1bb   : > { %v1884_v47 = vpop.eup %1883  ;;  %1313 = vst [vmem:[%s2141_s15 + $0x80] sm:$0xff] %v1882_v42  ;;  %1903 = vpow2.f32 %v1541_v24 }
 0x1bc   : > { %v1886_v48 = vpop.eup %1885  ;;  %1314 = vst [vmem:[%s2141_s15 + $0x88] sm:$0xff] %v1884_v47  ;;  %1905 = vpow2.f32 %v1542_v34 }
 0x1bd   : > { %v1888_v21 = vpop.eup %1887  ;;  %1315 = vst [vmem:[%s2141_s15 + $0x90] sm:$0xff] %v1886_v48  ;;  %1907 = vpow2.f32 %v1543_v41 }
 0x1be   : > { %v1890_v49 = vpop.eup %1889  ;;  %1316 = vst [vmem:[%s2141_s15 + $0x98] sm:$0xff] %v1888_v21  ;;  %1909 = vpow2.f32 %v1544_v46 }
 0x1bf   : > { %v1892_v27 = vpop.eup %1891  ;;  %1317 = vst [vmem:[%s2141_s15 + $0xa0] sm:$0xff] %v1890_v49  ;;  %1911 = vpow2.f32 %v1545_v35 }
 0x1c0   : > { %v1894_v52 = vpop.eup %1893  ;;  %1318 = vst [vmem:[%s2141_s15 + $0xa8] sm:$0xff] %v1892_v27 }
 0x1c1   : > { %v1896_v54 = vpop.eup %1895  ;;  %1319 = vst [vmem:[%s2141_s15 + $0xb0] sm:$0xff] %v1894_v52 }
 0x1c2   : > { %v1898_v33 = vpop.eup %1897  ;;  %1320 = vst [vmem:[%s2141_s15 + $0xb8] sm:$0xff] %v1896_v54 }
 0x1c3   : > { %v1900_v39 = vpop.eup %1899  ;;  %1321 = vst [vmem:[%s2141_s15 + $0xc0] sm:$0xff] %v1898_v33 }
 0x1c4   : > { %v1902_v55 = vpop.eup %1901  ;;  %1322 = vst [vmem:[%s2141_s15 + $0xc8] sm:$0xff] %v1900_v39 }
 0x1c5   : > { %v1904_v45 = vpop.eup %1903  ;;  %v1227_v58 = vadd.f32 1.0, %v1902_v55 }
 0x1c6   : > { %v1906_v59 = vpop.eup %1905  ;;  %v1228_v51 = vadd.f32 1.0, %v1904_v45 }
 0x1c7   : > { %v1908_v57 = vpop.eup %1907  ;;  %1913 = vrcp.f32 %v1227_v58  ;;  %v1229_v60 = vadd.f32 1.0, %v1906_v59 }
 0x1c8   : > { %v1910_v63 = vpop.eup %1909  ;;  %1915 = vrcp.f32 %v1228_v51  ;;  %v1230_v0 = vadd.f32 1.0, %v1908_v57 }
 0x1c9   : > { %v1912_v1 = vpop.eup %1911  ;;  %1917 = vrcp.f32 %v1229_v60  ;;  %v1231_v5 = vadd.f32 1.0, %v1910_v63 }
 0x1ca   : > { %1919 = vrcp.f32 %v1230_v0  ;;  %v1232_v2 = vadd.f32 1.0, %v1912_v1 }
 0x1cb   : > { %1921 = vrcp.f32 %v1231_v5 }
 0x1cc   : > { %1923 = vrcp.f32 %v1232_v2 }
 0x1d1   : > { %v1914_v11 = vpop.eup %1913 }
 0x1d2   : > { %v1916_v3 = vpop.eup %1915  ;;  %1323 = vst [vmem:[%s2141_s15 + $0xd0] sm:$0xff] %v1914_v11 }
 0x1d3   : > { %v1918_v17 = vpop.eup %1917  ;;  %1324 = vst [vmem:[%s2141_s15 + $0xd8] sm:$0xff] %v1916_v3 }
 0x1d4   : > { %v1920_v6 = vpop.eup %1919  ;;  %1325 = vst [vmem:[%s2141_s15 + $0xe0] sm:$0xff] %v1918_v17 }
 0x1d5   : > { %v1922_v25 = vpop.eup %1921  ;;  %1326 = vst [vmem:[%s2141_s15 + $0xe8] sm:$0xff] %v1920_v6 }
 0x1d6   : > { %v1924_v43 = vpop.eup %1923  ;;  %1327 = vst [vmem:[%s2141_s15 + $0xf0] sm:$0xff] %v1922_v25 }
 0x1d7   : > { %1328 = vst [vmem:[%s2141_s15 + $0xf8] sm:$0xff] %v1924_v43 }
 0x1d8 PF: > { %s13_s18 = sadd.s32 1, %s1979_s18   ;;  %s2547_s12 = smov %s1959_s13 }
 0x1d9   : > { %p10_p1 = scmp.ge.s32.totalorder %s13_s18, 30   ;;  %s2548_s13 = smov %s2052_s25 }
 0x1da   : > { %s2549_s14 = smov %s1971_s16  ;;  %s2550_s15 = smov %s1975_s17 }
 0x1db   : > { %s2551_s16 = smov %s2554_s19  ;;  %s2552_s17 = smov %s2558_s20 }
 0x1dc   :  { %12 = sbr.rel (!%p10_p1) target bundleno = 4 (0x4), region = 123 }

// kernel: update_block3d_forward.15
= control target key start
LH: loop header
LB: loop body
LE: loop exit
PB: predicated region body
PF: predicated region fallthrough
CT: control target
= control target key end

     0   :  { %s2101_s18 = smov 0   ;;  %s2103_s19 = smov 0   ;;  %s2820_s0 = inlined_call_operand.vmem [shape: bf16[512,3584], index: 0, kind: input, shape index: {}]   ;;  %s2821_s1 = inlined_call_operand.vmem [shape: bf16[3584,128], index: 1, kind: input, shape index: {}]   ;;  %s2822_s2 = inlined_call_operand.vmem [shape: f32[1,128], index: 2, kind: input, shape index: {}]   ;;  %s2823_s3 = inlined_call_operand.vmem [shape: f32[512,128], index: 3, kind: input, shape index: {}]   ;;  %s2824_s4 = inlined_call_operand.vmem [shape: f32[512,128], index: 4, kind: input, shape index: {}]   ;;  %s2825_s5 = inlined_call_operand.vmem [shape: f32[512,128], index: 5, kind: output, shape index: {}]  }
   0x1   :  { %s2105_s20 = smov 0   ;;  %s2107_s21 = smov 0  }
   0x2   :  { %s2109_s22 = smov 0   ;;  %s2111_s23 = smov 0  }
   0x3   :  { %s2113_s24 = smov 0  }
   0x4 LB: > { %s27_s25 = sadd.s32 1, %s2061_s22  ;;  %s34_s26 = sadd.s32 1, %s2065_s23  ;;  %s2069_s24 = sphi %s2113_s24, %s15_s24   ;;  %s2065_s23 = sphi %s2111_s23, %s2831_s23   ;;  %s2061_s22 = sphi %s2109_s22, %s2830_s22   ;;  %s2057_s21 = sphi %s2107_s21, %s2829_s21   ;;  %s2053_s20 = sphi %s2105_s20, %s2828_s20   ;;  %s2049_s19 = sphi %s2103_s19, %s2827_s19   ;;  %s2045_s18 = sphi %s2101_s18, %s2826_s18  }
   0x5   : > { %p28_p0 = scmp.ge.s32.totalorder %s27_s25, 14  ;;  %p50_p1 = scmp.ne.s32.totalorder %s2049_s19, %s2045_s18 }
   0x6   : > { %p51_p2 = scmp.eq.s32.totalorder %s2069_s24, 0  ;;  %s43_s30 = sadd.s32 1, %s2049_s19 }
   0x7   : > { %s2833_s25 = smov (%p28_p0, %s27_s25), 0  ;;  %s2835_s26 = smov (!%p28_p0, %s34_s26), %s2065_s23 }
   0x8   : > { %p52_p3 = por %p51_p2, %p50_p1  ;;  %p36_p4 = scmp.ge.s32.totalorder %s2835_s26, 2 }
   0x9   : > { %s39_s27 = ssub.s32 %s2061_s22, %s2833_s25  ;;  %p1632_p6 = scmp.ge.s32.totalorder %s2069_s24, 28 }
   0xa   : > { %s2837_s26 = smov (%p36_p4, %s2835_s26), 0 }
   0xb   : > { %s38_s28 = ssub.s32 %s2065_s23, %s2837_s26  ;;  %220 = sbr.rel (%p1632_p6) target bundleno = 42 (0x2a), region = 20 }
   0xc   : > { %s40_s29 = sor.u32 %s39_s27, %s38_s28 }
   0xd   : > { %p41_p5 = scmp.eq.s32.totalorder %s40_s29, 0 }
   0xf   : > { %s2152_s6 = scalar_select %p41_p5, %s2049_s19, %s43_s30  }
  0x12   : > { %223 = sbr.rel (!%p52_p3) target bundleno = 42 (0x2a), region = 24  ;;  %s225_s7 = sand.u32 (%p52_p3), 1, %s2049_s19  }
  0x13   : > { %s1635_s8 = sshll.u32 (%p52_p3), %s2061_s22, 1  ;;  %s1633_s9 = sshll.u32 (%p52_p3), %s225_s7, 8 }
  0x14   : > { %s1830_s10 = smul.u32 (%p52_p3), 896, %s2065_s23  ;;  %s2166_s16 = scalar_lea.vmem (%p52_p3), [#allocation2], %s1633_s9 }
  0x16   : > { %s231_s11 = sadd.s32 (%p52_p3), %s1830_s10, %s1635_s8 }
  0x17   : > { %s1637_s12 = sshll.u32 (%p52_p3), %s231_s11, 2 }
  0x18   : > { %s2161_s15 = scalar_lea.vmem (%p52_p3), %s2820_s0, %s1637_s12 }
  0x19   : > { %v323_v0 = vld [vmem:[%s2161_s15] sm:$0xff]  ;;  %v325_v1 = vld [vmem:[%s2161_s15 + $0x70] sm:$0xff] }
  0x1a   : > { %v327_v2 = vld [vmem:[%s2161_s15 + $0xe0] sm:$0xff]  ;;  %324 = vst [vmem:[%s2166_s16] sm:$0xff] %v323_v0  ;;  %326 = vst [vmem:[%s2166_s16 + $0x8] sm:$0xff] %v325_v1  ;;  %v329_v3 = vld [vmem:[%s2161_s15 + $0x150] sm:$0xff] }
  0x1b   : > { %328 = vst [vmem:[%s2166_s16 + $0x10] sm:$0xff] %v327_v2  ;;  %v331_v4 = vld [vmem:[%s2161_s15 + $0x1c0] sm:$0xff]  ;;  %v333_v5 = vld [vmem:[%s2161_s15 + $0x230] sm:$0xff]  ;;  %330 = vst [vmem:[%s2166_s16 + $0x18] sm:$0xff] %v329_v3 }
  0x1c   : > { %332 = vst [vmem:[%s2166_s16 + $0x20] sm:$0xff] %v331_v4  ;;  %334 = vst [vmem:[%s2166_s16 + $0x28] sm:$0xff] %v333_v5  ;;  %v335_v6 = vld [vmem:[%s2161_s15 + $0x2a0] sm:$0xff]  ;;  %v337_v7 = vld [vmem:[%s2161_s15 + $0x310] sm:$0xff] }
  0x1d   : > { %v339_v8 = vld [vmem:[%s2161_s15 + $0x380] sm:$0xff]  ;;  %336 = vst [vmem:[%s2166_s16 + $0x30] sm:$0xff] %v335_v6  ;;  %338 = vst [vmem:[%s2166_s16 + $0x38] sm:$0xff] %v337_v7  ;;  %v341_v9 = vld [vmem:[%s2161_s15 + $0x3f0] sm:$0xff] }
  0x1e   : > { %340 = vst [vmem:[%s2166_s16 + $0x40] sm:$0xff] %v339_v8  ;;  %v343_v10 = vld [vmem:[%s2161_s15 + $0x460] sm:$0xff]  ;;  %v345_v11 = vld [vmem:[%s2161_s15 + $0x4d0] sm:$0xff]  ;;  %342 = vst [vmem:[%s2166_s16 + $0x48] sm:$0xff] %v341_v9 }
  0x1f   : > { %344 = vst [vmem:[%s2166_s16 + $0x50] sm:$0xff] %v343_v10  ;;  %346 = vst [vmem:[%s2166_s16 + $0x58] sm:$0xff] %v345_v11  ;;  %v347_v12 = vld [vmem:[%s2161_s15 + $0x540] sm:$0xff]  ;;  %v349_v13 = vld [vmem:[%s2161_s15 + $0x5b0] sm:$0xff] }
  0x20   : > { %v351_v14 = vld [vmem:[%s2161_s15 + $0x620] sm:$0xff]  ;;  %348 = vst [vmem:[%s2166_s16 + $0x60] sm:$0xff] %v347_v12  ;;  %350 = vst [vmem:[%s2166_s16 + $0x68] sm:$0xff] %v349_v13  ;;  %v353_v15 = vld [vmem:[%s2161_s15 + $0x690] sm:$0xff] }
  0x21   : > { %352 = vst [vmem:[%s2166_s16 + $0x70] sm:$0xff] %v351_v14  ;;  %v355_v16 = vld [vmem:[%s2161_s15 + $0x700] sm:$0xff]  ;;  %v357_v17 = vld [vmem:[%s2161_s15 + $0x770] sm:$0xff]  ;;  %354 = vst [vmem:[%s2166_s16 + $0x78] sm:$0xff] %v353_v15 }
  0x22   : > { %356 = vst [vmem:[%s2166_s16 + $0x80] sm:$0xff] %v355_v16  ;;  %358 = vst [vmem:[%s2166_s16 + $0x88] sm:$0xff] %v357_v17  ;;  %v359_v18 = vld [vmem:[%s2161_s15 + $0x7e0] sm:$0xff]  ;;  %v361_v19 = vld [vmem:[%s2161_s15 + $0x850] sm:$0xff] }
  0x23   : > { %v363_v20 = vld [vmem:[%s2161_s15 + $0x8c0] sm:$0xff]  ;;  %360 = vst [vmem:[%s2166_s16 + $0x90] sm:$0xff] %v359_v18  ;;  %362 = vst [vmem:[%s2166_s16 + $0x98] sm:$0xff] %v361_v19  ;;  %v365_v21 = vld [vmem:[%s2161_s15 + $0x930] sm:$0xff] }
  0x24   : > { %364 = vst [vmem:[%s2166_s16 + $0xa0] sm:$0xff] %v363_v20  ;;  %v367_v22 = vld [vmem:[%s2161_s15 + $0x9a0] sm:$0xff]  ;;  %v369_v23 = vld [vmem:[%s2161_s15 + $0xa10] sm:$0xff]  ;;  %366 = vst [vmem:[%s2166_s16 + $0xa8] sm:$0xff] %v365_v21 }
  0x25   : > { %368 = vst [vmem:[%s2166_s16 + $0xb0] sm:$0xff] %v367_v22  ;;  %370 = vst [vmem:[%s2166_s16 + $0xb8] sm:$0xff] %v369_v23  ;;  %v371_v24 = vld [vmem:[%s2161_s15 + $0xa80] sm:$0xff]  ;;  %v373_v25 = vld [vmem:[%s2161_s15 + $0xaf0] sm:$0xff] }
  0x26   : > { %v375_v26 = vld [vmem:[%s2161_s15 + $0xb60] sm:$0xff]  ;;  %372 = vst [vmem:[%s2166_s16 + $0xc0] sm:$0xff] %v371_v24  ;;  %374 = vst [vmem:[%s2166_s16 + $0xc8] sm:$0xff] %v373_v25  ;;  %v377_v27 = vld [vmem:[%s2161_s15 + $0xbd0] sm:$0xff] }
  0x27   : > { %376 = vst [vmem:[%s2166_s16 + $0xd0] sm:$0xff] %v375_v26  ;;  %v379_v28 = vld [vmem:[%s2161_s15 + $0xc40] sm:$0xff]  ;;  %v381_v29 = vld [vmem:[%s2161_s15 + $0xcb0] sm:$0xff]  ;;  %378 = vst [vmem:[%s2166_s16 + $0xd8] sm:$0xff] %v377_v27 }
  0x28   : > { %380 = vst [vmem:[%s2166_s16 + $0xe0] sm:$0xff] %v379_v28  ;;  %382 = vst [vmem:[%s2166_s16 + $0xe8] sm:$0xff] %v381_v29  ;;  %v383_v30 = vld [vmem:[%s2161_s15 + $0xd20] sm:$0xff]  ;;  %v385_v31 = vld [vmem:[%s2161_s15 + $0xd90] sm:$0xff] }
  0x29   : > { %384 = vst [vmem:[%s2166_s16 + $0xf0] sm:$0xff] %v383_v30  ;;  %386 = vst [vmem:[%s2166_s16 + $0xf8] sm:$0xff] %v385_v31 }
  0x2a PF: > { %p1638_p7 = scmp.ge.s32.totalorder %s2069_s24, 1  ;;  %p427_p8 = scmp.lt.s32.totalorder %s2069_s24, 29 }
  0x2c   : > { %p428_p9 = pnand %p1638_p7, %p427_p8 }
  0x2d   : > { %s1640_s17 = sshll.u32 (!%p428_p9), %s2053_s20, 5  ;;  %s1642_s27 = sshll.u32 (!%p428_p9), %s2057_s21, 5 }
  0x2e   : > { %431 = sbr.rel (%p428_p9) target bundleno = 444 (0x1bc), region = 74  ;;  %p494_p10 = scmp.lt.s32.totalorder (!%p428_p9), %s1640_s17, 447 }
  0x2f   : > { %p506_p11 = scmp.lt.s32.totalorder (!%p428_p9), %s1642_s27, 63  ;;  %p1696_p12 = scmp.ne.s32.totalorder (!%p428_p9), %s2053_s20, 0 }
  0x35   : > { %s2839_s17 = smov (!%p494_p10, %s1640_s17), 447  ;;  %s2841_s27 = smov (!%p506_p11, %s1642_s27), 63 }
  0x36   : > { %s1641_s28 = sshll.u32 %s2839_s17, 2  ;;  %s1643_s8 = sshll.u32 %s2841_s27, 3 }
  0x37   : > { %s2236_s7 = scalar_lea.vmem %s2821_s1, %s1641_s28  ;;  %s2241_s21 = scalar_lea.vmem %s2823_s3, %s1643_s8 }
  0x38   : > { %s2246_s13 = scalar_lea.vmem %s2824_s4, %s1643_s8  ;;  %v1887_v32 = vld [vmem:[%s2236_s7 + $0x40] sm:$0xff]   ;;  %s2252_s16 = scalar_lea.vmem %s2825_s5, %s1643_s8  ;;  %v1889_v34 = vld [vmem:[%s2236_s7 + $0x48] sm:$0xff]   ;;  %v1891_v36 = vld [vmem:[%s2236_s7 + $0x50] sm:$0xff]  }
  0x39   : > { %v1888_v33 = vld [vmem:[%s2236_s7] sm:$0xff]   ;;  %1702 = vmatprep.subr.bf16.mxu0 %v1887_v32  ;;  %1814 = vmatprep.subr.bf16.mxu1 %v1887_v32  ;;  %v1890_v35 = vld [vmem:[%s2236_s7 + $0x8] sm:$0xff]   ;;  %v1892_v37 = vld [vmem:[%s2236_s7 + $0x10] sm:$0xff]   ;;  %s434_s17 = sand.u32 1, %s2045_s18  }
  0x3a   : > { %1703 = vmatpush3.bf16.msra.mxu0 %v1888_v33  ;;  %1822 = vmatpush3.bf16.msra.mxu1 %v1888_v33  ;;  %v1893_v38 = vld [vmem:[%s2236_s7 + $0x58] sm:$0xff]   ;;  %s1639_s27 = sshll.u32 %s434_s17, 8  ;;  %v1895_v40 = vld [vmem:[%s2236_s7 + $0x60] sm:$0xff]   ;;  %v1897_v42 = vld [vmem:[%s2236_s7 + $0x68] sm:$0xff]  }
  0x3b   : > { %1704 = vmatprep.subr.bf16.mxu0 %v1889_v34  ;;  %1815 = vmatprep.subr.bf16.mxu1 %v1889_v34  ;;  %v1894_v39 = vld [vmem:[%s2236_s7 + $0x18] sm:$0xff]   ;;  %v1896_v41 = vld [vmem:[%s2236_s7 + $0x20] sm:$0xff]   ;;  %s2265_s28 = scalar_lea.vmem [#allocation2], %s1639_s27  ;;  %v1898_v45 = vld [vmem:[%s2236_s7 + $0x28] sm:$0xff]  }
  0x3c   : > { %v1905_v43 = vld [vmem:[%s2265_s28 + $0x4] ss:$8 sps:$4 sm:$0xff]   ;;  %v1899_v46 = vld [vmem:[%s2236_s7 + $0x70] sm:$0xff]   ;;  %v1901_v48 = vld [vmem:[%s2236_s7 + $0x78] sm:$0xff]  }
  0x3d   : > { %v1908_v44 = vld [vmem:[%s2265_s28 + $0x84] ss:$8 sps:$4 sm:$0xff]   ;;  %885 = vmatprep.mubr.bf16.mxu0 %v1905_v43  ;;  %v1900_v47 = vld [vmem:[%s2236_s7 + $0x30] sm:$0xff]   ;;  %v1902_v49 = vld [vmem:[%s2236_s7 + $0x38] sm:$0xff]  }
  0x3e   : > { %1705 = vmatpush3.bf16.msra.mxu0 %v1890_v35  ;;  %1823 = vmatpush3.bf16.msra.mxu1 %v1890_v35  ;;  %v1903_v50 = vld [vmem:[%s2265_s28] ss:$8 sps:$4 sm:$0xff]   ;;  %v1909_v52 = vld [vmem:[%s2265_s28 + $0x14] ss:$8 sps:$4 sm:$0xff]   ;;  %v1913_v54 = vld [vmem:[%s2265_s28 + $0x10] ss:$8 sps:$4 sm:$0xff]  }
  0x3f   : > { %1706 = vmatprep.subr.bf16.mxu0 %v1891_v36  ;;  %1816 = vmatprep.subr.bf16.mxu1 %v1891_v36  ;;  %v1906_v51 = vld [vmem:[%s2265_s28 + $0x80] ss:$8 sps:$4 sm:$0xff]   ;;  %v1911_v53 = vld [vmem:[%s2265_s28 + $0x94] ss:$8 sps:$4 sm:$0xff]   ;;  %v1914_v55 = vld [vmem:[%s2265_s28 + $0x90] ss:$8 sps:$4 sm:$0xff]  }
  0x40   : > { %949 = vmatprep.mubr.bf16.mxu1 %v1908_v44  ;;  %v1915_v56 = vld [vmem:[%s2265_s28 + $0x24] ss:$8 sps:$4 sm:$0xff]   ;;  %v1919_v58 = vld [vmem:[%s2265_s28 + $0x20] ss:$8 sps:$4 sm:$0xff]   ;;  %v1921_v60 = vld [vmem:[%s2265_s28 + $0x34] ss:$8 sps:$4 sm:$0xff]  }
  0x41   : > { %v1917_v57 = vld [vmem:[%s2265_s28 + $0xa4] ss:$8 sps:$4 sm:$0xff]   ;;  %v1920_v59 = vld [vmem:[%s2265_s28 + $0xa0] ss:$8 sps:$4 sm:$0xff]   ;;  %v1923_v61 = vld [vmem:[%s2265_s28 + $0xb4] ss:$8 sps:$4 sm:$0xff]  }
  0x42   : > { %1707 = vmatpush3.bf16.msra.mxu0 %v1892_v37  ;;  %1824 = vmatpush3.bf16.msra.mxu1 %v1892_v37  ;;  %v1925_v62 = vld [vmem:[%s2265_s28 + $0x30] ss:$8 sps:$4 sm:$0xff]   ;;  %v1927_v0 = vld [vmem:[%s2265_s28 + $0x44] ss:$8 sps:$4 sm:$0xff]   ;;  %v1931_v2 = vld [vmem:[%s2265_s28 + $0x40] ss:$8 sps:$4 sm:$0xff]  }
  0x43   : > { %1708 = vmatprep.subr.bf16.mxu0 %v1893_v38  ;;  %1817 = vmatprep.subr.bf16.mxu1 %v1893_v38  ;;  %v1926_v63 = vld [vmem:[%s2265_s28 + $0xb0] ss:$8 sps:$4 sm:$0xff]   ;;  %v1929_v1 = vld [vmem:[%s2265_s28 + $0xc4] ss:$8 sps:$4 sm:$0xff]   ;;  %v1932_v3 = vld [vmem:[%s2265_s28 + $0xc0] ss:$8 sps:$4 sm:$0xff]  }
  0x44   : > { %v1933_v4 = vld [vmem:[%s2265_s28 + $0x54] ss:$8 sps:$4 sm:$0xff]   ;;  %v1937_v6 = vld [vmem:[%s2265_s28 + $0x50] ss:$8 sps:$4 sm:$0xff]   ;;  %v1939_v8 = vld [vmem:[%s2265_s28 + $0x64] ss:$8 sps:$4 sm:$0xff]  }
  0x45   : > { %v1935_v5 = vld [vmem:[%s2265_s28 + $0xd4] ss:$8 sps:$4 sm:$0xff]   ;;  %v1938_v7 = vld [vmem:[%s2265_s28 + $0xd0] ss:$8 sps:$4 sm:$0xff]   ;;  %v1941_v9 = vld [vmem:[%s2265_s28 + $0xe4] ss:$8 sps:$4 sm:$0xff]  }
  0x46   : > { %1709 = vmatpush3.bf16.msra.mxu0 %v1894_v39  ;;  %1825 = vmatpush3.bf16.msra.mxu1 %v1894_v39  ;;  %v1943_v10 = vld [vmem:[%s2265_s28 + $0x60] ss:$8 sps:$4 sm:$0xff]   ;;  %v1945_v12 = vld [vmem:[%s2265_s28 + $0x74] ss:$8 sps:$4 sm:$0xff]   ;;  %v1949_v14 = vld [vmem:[%s2265_s28 + $0x70] ss:$8 sps:$4 sm:$0xff]  }
  0x47   : > { %1710 = vmatprep.subr.bf16.mxu0 %v1895_v40  ;;  %1818 = vmatprep.subr.bf16.mxu1 %v1895_v40  ;;  %v1944_v11 = vld [vmem:[%s2265_s28 + $0xe0] ss:$8 sps:$4 sm:$0xff]   ;;  %v1947_v13 = vld [vmem:[%s2265_s28 + $0xf4] ss:$8 sps:$4 sm:$0xff]   ;;  %v1950_v15 = vld [vmem:[%s2265_s28 + $0xf0] ss:$8 sps:$4 sm:$0xff]  }
  0x4a   : > { %1711 = vmatpush3.bf16.msra.mxu0 %v1896_v41  ;;  %1826 = vmatpush3.bf16.msra.mxu1 %v1896_v41 }
  0x4b   : > { %1712 = vmatprep.subr.bf16.mxu0 %v1897_v42  ;;  %1819 = vmatprep.subr.bf16.mxu1 %v1897_v42 }
  0x4e   : > { %1713 = vmatpush3.bf16.msra.mxu0 %v1898_v45  ;;  %1827 = vmatpush3.bf16.msra.mxu1 %v1898_v45 }
  0x4f   : > { %1714 = vmatprep.subr.bf16.mxu0 %v1899_v46  ;;  %1820 = vmatprep.subr.bf16.mxu1 %v1899_v46 }
  0x52   : > { %1715 = vmatpush3.bf16.msra.mxu0 %v1900_v47  ;;  %1828 = vmatpush3.bf16.msra.mxu1 %v1900_v47 }
  0x53   : > { %1716 = vmatprep.subr.bf16.mxu0 %v1901_v48  ;;  %1821 = vmatprep.subr.bf16.mxu1 %v1901_v48 }
  0x56   : > { %1717 = vmatpush3.bf16.msra.mxu0 %v1902_v49  ;;  %1829 = vmatpush3.bf16.msra.mxu1 %v1902_v49 }
  0x59   : > { %886 = vmatmul.mubr.bf16.vlgmr.msra.gmra.mrb[0].mxu0 %v1903_v50  ;;  %950 = vmatmul.mubr.bf16.vlgmr.msra.gmra.mrb[0].mxu1 %v1906_v51 }
  0x5a   : > { %893 = vmatprep.mubr.bf16.mxu0 %v1909_v52  ;;  %957 = vmatprep.mubr.bf16.mxu1 %v1911_v53 }
  0x61   : > { %894 = vmatmul.mubr.bf16.gmra.mrb[4].mxu0 %v1913_v54  ;;  %958 = vmatmul.mubr.bf16.gmra.mrb[4].mxu1 %v1914_v55 }
  0x62   : > { %901 = vmatprep.mubr.bf16.mxu0 %v1915_v56  ;;  %965 = vmatprep.mubr.bf16.mxu1 %v1917_v57 }
  0x69   : > { %902 = vmatmul.mubr.bf16.gmra.mrb[8].mxu0 %v1919_v58  ;;  %966 = vmatmul.mubr.bf16.gmra.mrb[8].mxu1 %v1920_v59 }
  0x6a   : > { %909 = vmatprep.mubr.bf16.mxu0 %v1921_v60  ;;  %973 = vmatprep.mubr.bf16.mxu1 %v1923_v61 }
  0x71   : > { %910 = vmatmul.mubr.bf16.gmra.mrb[12].mxu0 %v1925_v62  ;;  %974 = vmatmul.mubr.bf16.gmra.mrb[12].mxu1 %v1926_v63 }
  0x72   : > { %917 = vmatprep.mubr.bf16.mxu0 %v1927_v0  ;;  %981 = vmatprep.mubr.bf16.mxu1 %v1929_v1 }
  0x79   : > { %918 = vmatmul.mubr.bf16.gmra.mrb[16].mxu0 %v1931_v2  ;;  %982 = vmatmul.mubr.bf16.gmra.mrb[16].mxu1 %v1932_v3 }
  0x7a   : > { %925 = vmatprep.mubr.bf16.mxu0 %v1933_v4  ;;  %989 = vmatprep.mubr.bf16.mxu1 %v1935_v5 }
  0x81   : > { %926 = vmatmul.mubr.bf16.gmra.mrb[20].mxu0 %v1937_v6  ;;  %990 = vmatmul.mubr.bf16.gmra.mrb[20].mxu1 %v1938_v7 }
  0x82   : > { %933 = vmatprep.mubr.bf16.mxu0 %v1939_v8  ;;  %997 = vmatprep.mubr.bf16.mxu1 %v1941_v9 }
  0x89   : > { %934 = vmatmul.mubr.bf16.gmra.mrb[24].mxu0 %v1943_v10  ;;  %998 = vmatmul.mubr.bf16.gmra.mrb[24].mxu1 %v1944_v11 }
  0x8a   : > { %941 = vmatprep.mubr.bf16.mxu0 %v1945_v12  ;;  %1005 = vmatprep.mubr.bf16.mxu1 %v1947_v13 }
  0x91   : > { %942 = vmatmul.mubr.bf16.gmra.mrb[28].mxu0 %v1949_v14  ;;  %1006 = vmatmul.mubr.bf16.gmra.mrb[28].mxu1 %v1950_v15 }
 0x12c   : > { %v1718_v16 = vpop.f32.mrb[0].mxu0  ;;  %v1766_v17 = vpop.f32.mrb[0].mxu1 }
 0x12d   : > { %v1719_v18 = vpop.f32.mrb[1].mxu0  ;;  %v1767_v19 = vpop.f32.mrb[1].mxu1 }
 0x12e   : > { %v2304_v20 = vadd.f32 %v1719_v18, %v1718_v16  ;;  %v2306_v21 = vadd.f32 %v1767_v19, %v1766_v17  ;;  %v1721_v22 = vpop.f32.mrb[2].mxu0  ;;  %v1769_v23 = vpop.f32.mrb[2].mxu1 }
 0x12f   : > { %v1722_v24 = vpop.f32.mrb[3].mxu0  ;;  %v1770_v25 = vpop.f32.mrb[3].mxu1 }
 0x130   : > { %v2308_v26 = vadd.f32 %v1722_v24, %v1721_v22  ;;  %v2310_v27 = vadd.f32 %v1770_v25, %v1769_v23  ;;  %1018 = vst [vmem:[%s2252_s16] sm:$0xff] (!%p1696_p12), %v2304_v20  ;;  %1034 = vst [vmem:[%s2252_s16 + $0x80] sm:$0xff] (!%p1696_p12), %v2306_v21 }
 0x132   : > { %1019 = vst [vmem:[%s2252_s16 + $0x8] sm:$0xff] (!%p1696_p12), %v2308_v26  ;;  %1035 = vst [vmem:[%s2252_s16 + $0x88] sm:$0xff] (!%p1696_p12), %v2310_v27 }
 0x134   : > { %v1724_v28 = vpop.f32.mrb[4].mxu0  ;;  %v1772_v29 = vpop.f32.mrb[4].mxu1 }
 0x135   : > { %v1725_v30 = vpop.f32.mrb[5].mxu0  ;;  %v1773_v31 = vpop.f32.mrb[5].mxu1 }
 0x136   : > { %v2312_v32 = vadd.f32 %v1725_v30, %v1724_v28  ;;  %v2314_v33 = vadd.f32 %v1773_v31, %v1772_v29  ;;  %v1727_v34 = vpop.f32.mrb[6].mxu0  ;;  %v1775_v35 = vpop.f32.mrb[6].mxu1 }
 0x137   : > { %v1728_v36 = vpop.f32.mrb[7].mxu0  ;;  %v1776_v37 = vpop.f32.mrb[7].mxu1 }
 0x138   : > { %v2316_v38 = vadd.f32 %v1728_v36, %v1727_v34  ;;  %v2318_v39 = vadd.f32 %v1776_v37, %v1775_v35  ;;  %1020 = vst [vmem:[%s2252_s16 + $0x10] sm:$0xff] (!%p1696_p12), %v2312_v32  ;;  %1036 = vst [vmem:[%s2252_s16 + $0x90] sm:$0xff] (!%p1696_p12), %v2314_v33 }
 0x13a   : > { %1021 = vst [vmem:[%s2252_s16 + $0x18] sm:$0xff] (!%p1696_p12), %v2316_v38  ;;  %1037 = vst [vmem:[%s2252_s16 + $0x98] sm:$0xff] (!%p1696_p12), %v2318_v39 }
 0x13c   : > { %v1730_v40 = vpop.f32.mrb[8].mxu0  ;;  %v1778_v41 = vpop.f32.mrb[8].mxu1 }
 0x13d   : > { %v1731_v42 = vpop.f32.mrb[9].mxu0  ;;  %v1779_v43 = vpop.f32.mrb[9].mxu1 }
 0x13e   : > { %v2320_v44 = vadd.f32 %v1731_v42, %v1730_v40  ;;  %v2322_v45 = vadd.f32 %v1779_v43, %v1778_v41  ;;  %v1733_v46 = vpop.f32.mrb[10].mxu0  ;;  %v1781_v47 = vpop.f32.mrb[10].mxu1 }
 0x13f   : > { %v1734_v48 = vpop.f32.mrb[11].mxu0  ;;  %v1782_v49 = vpop.f32.mrb[11].mxu1 }
 0x140   : > { %v2324_v50 = vadd.f32 %v1734_v48, %v1733_v46  ;;  %v2326_v51 = vadd.f32 %v1782_v49, %v1781_v47  ;;  %1022 = vst [vmem:[%s2252_s16 + $0x20] sm:$0xff] (!%p1696_p12), %v2320_v44  ;;  %1038 = vst [vmem:[%s2252_s16 + $0xa0] sm:$0xff] (!%p1696_p12), %v2322_v45 }
 0x142   : > { %1023 = vst [vmem:[%s2252_s16 + $0x28] sm:$0xff] (!%p1696_p12), %v2324_v50  ;;  %1039 = vst [vmem:[%s2252_s16 + $0xa8] sm:$0xff] (!%p1696_p12), %v2326_v51 }
 0x144   : > { %v1736_v52 = vpop.f32.mrb[12].mxu0  ;;  %v1784_v53 = vpop.f32.mrb[12].mxu1 }
 0x145   : > { %v1737_v54 = vpop.f32.mrb[13].mxu0  ;;  %v1785_v55 = vpop.f32.mrb[13].mxu1 }
 0x146   : > { %v2328_v56 = vadd.f32 %v1737_v54, %v1736_v52  ;;  %v2330_v57 = vadd.f32 %v1785_v55, %v1784_v53  ;;  %v1739_v58 = vpop.f32.mrb[14].mxu0  ;;  %v1787_v59 = vpop.f32.mrb[14].mxu1 }
 0x147   : > { %v1740_v60 = vpop.f32.mrb[15].mxu0  ;;  %v1788_v61 = vpop.f32.mrb[15].mxu1 }
 0x148   : > { %v2332_v62 = vadd.f32 %v1740_v60, %v1739_v58  ;;  %v2334_v63 = vadd.f32 %v1788_v61, %v1787_v59  ;;  %1024 = vst [vmem:[%s2252_s16 + $0x30] sm:$0xff] (!%p1696_p12), %v2328_v56  ;;  %1040 = vst [vmem:[%s2252_s16 + $0xb0] sm:$0xff] (!%p1696_p12), %v2330_v57 }
 0x14a   : > { %1025 = vst [vmem:[%s2252_s16 + $0x38] sm:$0xff] (!%p1696_p12), %v2332_v62  ;;  %1041 = vst [vmem:[%s2252_s16 + $0xb8] sm:$0xff] (!%p1696_p12), %v2334_v63 }
 0x14c   : > { %v1742_v0 = vpop.f32.mrb[16].mxu0  ;;  %v1790_v1 = vpop.f32.mrb[16].mxu1 }
 0x14d   : > { %v1743_v2 = vpop.f32.mrb[17].mxu0  ;;  %v1791_v3 = vpop.f32.mrb[17].mxu1 }
 0x14e   : > { %v2336_v4 = vadd.f32 %v1743_v2, %v1742_v0  ;;  %v2338_v5 = vadd.f32 %v1791_v3, %v1790_v1  ;;  %v1745_v6 = vpop.f32.mrb[18].mxu0  ;;  %v1793_v7 = vpop.f32.mrb[18].mxu1 }
 0x14f   : > { %v1746_v8 = vpop.f32.mrb[19].mxu0  ;;  %v1794_v9 = vpop.f32.mrb[19].mxu1 }
 0x150   : > { %v2340_v10 = vadd.f32 %v1746_v8, %v1745_v6  ;;  %v2342_v11 = vadd.f32 %v1794_v9, %v1793_v7  ;;  %1026 = vst [vmem:[%s2252_s16 + $0x40] sm:$0xff] (!%p1696_p12), %v2336_v4  ;;  %1042 = vst [vmem:[%s2252_s16 + $0xc0] sm:$0xff] (!%p1696_p12), %v2338_v5 }
 0x152   : > { %1027 = vst [vmem:[%s2252_s16 + $0x48] sm:$0xff] (!%p1696_p12), %v2340_v10  ;;  %1043 = vst [vmem:[%s2252_s16 + $0xc8] sm:$0xff] (!%p1696_p12), %v2342_v11 }
 0x154   : > { %v1748_v12 = vpop.f32.mrb[20].mxu0  ;;  %v1796_v13 = vpop.f32.mrb[20].mxu1 }
 0x155   : > { %v1749_v14 = vpop.f32.mrb[21].mxu0  ;;  %v1797_v15 = vpop.f32.mrb[21].mxu1 }
 0x156   : > { %v2344_v16 = vadd.f32 %v1749_v14, %v1748_v12  ;;  %v2346_v17 = vadd.f32 %v1797_v15, %v1796_v13  ;;  %v1751_v18 = vpop.f32.mrb[22].mxu0  ;;  %v1799_v19 = vpop.f32.mrb[22].mxu1 }
 0x157   : > { %v1752_v22 = vpop.f32.mrb[23].mxu0  ;;  %v1800_v23 = vpop.f32.mrb[23].mxu1 }
 0x158   : > { %v2348_v24 = vadd.f32 %v1752_v22, %v1751_v18  ;;  %v2350_v25 = vadd.f32 %v1800_v23, %v1799_v19  ;;  %1028 = vst [vmem:[%s2252_s16 + $0x50] sm:$0xff] (!%p1696_p12), %v2344_v16  ;;  %1044 = vst [vmem:[%s2252_s16 + $0xd0] sm:$0xff] (!%p1696_p12), %v2346_v17 }
 0x15a   : > { %1029 = vst [vmem:[%s2252_s16 + $0x58] sm:$0xff] (!%p1696_p12), %v2348_v24  ;;  %1045 = vst [vmem:[%s2252_s16 + $0xd8] sm:$0xff] (!%p1696_p12), %v2350_v25 }
 0x15c   : > { %v1754_v28 = vpop.f32.mrb[24].mxu0  ;;  %v1802_v29 = vpop.f32.mrb[24].mxu1 }
 0x15d   : > { %v1755_v30 = vpop.f32.mrb[25].mxu0  ;;  %v1803_v31 = vpop.f32.mrb[25].mxu1 }
 0x15e   : > { %v2352_v34 = vadd.f32 %v1755_v30, %v1754_v28  ;;  %v2354_v35 = vadd.f32 %v1803_v31, %v1802_v29  ;;  %v1757_v36 = vpop.f32.mrb[26].mxu0  ;;  %v1805_v37 = vpop.f32.mrb[26].mxu1 }
 0x15f   : > { %v1758_v40 = vpop.f32.mrb[27].mxu0  ;;  %v1806_v41 = vpop.f32.mrb[27].mxu1 }
 0x160   : > { %v2356_v42 = vadd.f32 %v1758_v40, %v1757_v36  ;;  %v2358_v43 = vadd.f32 %v1806_v41, %v1805_v37  ;;  %1030 = vst [vmem:[%s2252_s16 + $0x60] sm:$0xff] (!%p1696_p12), %v2352_v34  ;;  %1046 = vst [vmem:[%s2252_s16 + $0xe0] sm:$0xff] (!%p1696_p12), %v2354_v35 }
 0x162   : > { %1017 = sbr.rel (%p1696_p12) target bundleno = 363 (0x16b), region = 82  ;;  %1031 = vst [vmem:[%s2252_s16 + $0x68] sm:$0xff] (!%p1696_p12), %v2356_v42  ;;  %1047 = vst [vmem:[%s2252_s16 + $0xe8] sm:$0xff] (!%p1696_p12), %v2358_v43 }
 0x164   : > { %v1760_v46 = vpop.f32.mrb[28].mxu0  ;;  %v1808_v47 = vpop.f32.mrb[28].mxu1 }
 0x165   : > { %v1761_v48 = vpop.f32.mrb[29].mxu0  ;;  %v1809_v49 = vpop.f32.mrb[29].mxu1 }
 0x166   : > { %v2360_v52 = vadd.f32 %v1761_v48, %v1760_v46  ;;  %v2362_v53 = vadd.f32 %v1809_v49, %v1808_v47  ;;  %v1763_v54 = vpop.f32.mrb[30].mxu0  ;;  %v1811_v55 = vpop.f32.mrb[30].mxu1 }
 0x167   : > { %v1764_v58 = vpop.f32.mrb[31].mxu0  ;;  %v1812_v59 = vpop.f32.mrb[31].mxu1 }
 0x168   : > { %v2364_v60 = vadd.f32 %v1764_v58, %v1763_v54  ;;  %v2366_v61 = vadd.f32 %v1812_v59, %v1811_v55  ;;  %1032 = vst [vmem:[%s2252_s16 + $0x70] sm:$0xff] (!%p1696_p12), %v2360_v52  ;;  %1048 = vst [vmem:[%s2252_s16 + $0xf0] sm:$0xff] (!%p1696_p12), %v2362_v53 }
 0x16a   : > { %1033 = vst [vmem:[%s2252_s16 + $0x78] sm:$0xff] %v2364_v60  ;;  %1049 = vst [vmem:[%s2252_s16 + $0xf8] sm:$0xff] %v2366_v61 }
 0x16b PF: > { %p1697_p13 = scmp.le.s32.totalorder %s2053_s20, 0 }
 0x16c   : > { %v1054_v0 = vld [vmem:[%s2252_s16] sm:$0xff] (!%p1697_p13)  ;;  %v1055_v1 = vld [vmem:[%s2252_s16 + $0x8] sm:$0xff] (!%p1697_p13)  ;;  %v1056_v2 = vld [vmem:[%s2252_s16 + $0x10] sm:$0xff] (!%p1697_p13) }
 0x16d   : > { %1053 = sbr.rel (%p1697_p13) target bundleno = 383 (0x17f), region = 86  ;;  %v1086_v3 = vadd.f32 (!%p1697_p13), %v2304_v20, %v1054_v0  ;;  %v1087_v6 = vadd.f32 (!%p1697_p13), %v2308_v26, %v1055_v1  ;;  %v1088_v7 = vadd.f32 (!%p1697_p13), %v2312_v32, %v1056_v2  ;;  %v1057_v8 = vld [vmem:[%s2252_s16 + $0x18] sm:$0xff] (!%p1697_p13)  ;;  %v1058_v9 = vld [vmem:[%s2252_s16 + $0x20] sm:$0xff] (!%p1697_p13)  ;;  %v1059_v12 = vld [vmem:[%s2252_s16 + $0x28] sm:$0xff] (!%p1697_p13) }
 0x16e   : > { %v1089_v13 = vadd.f32 (!%p1697_p13), %v2316_v38, %v1057_v8  ;;  %v1090_v14 = vadd.f32 (!%p1697_p13), %v2320_v44, %v1058_v9  ;;  %v1091_v15 = vadd.f32 (!%p1697_p13), %v2324_v50, %v1059_v12  ;;  %v1060_v20 = vld [vmem:[%s2252_s16 + $0x30] sm:$0xff] (!%p1697_p13)  ;;  %v1061_v18 = vld [vmem:[%s2252_s16 + $0x38] sm:$0xff] (!%p1697_p13)  ;;  %v1062_v26 = vld [vmem:[%s2252_s16 + $0x40] sm:$0xff] (!%p1697_p13) }
 0x16f   : > { %1118 = vst [vmem:[%s2252_s16] sm:$0xff] (!%p1697_p13), %v1086_v3  ;;  %1119 = vst [vmem:[%s2252_s16 + $0x8] sm:$0xff] (!%p1697_p13), %v1087_v6  ;;  %v1092_v32 = vadd.f32 (!%p1697_p13), %v2328_v56, %v1060_v20  ;;  %v1093_v38 = vadd.f32 (!%p1697_p13), %v2332_v62, %v1061_v18  ;;  %v1094_v44 = vadd.f32 (!%p1697_p13), %v2336_v4, %v1062_v26  ;;  %v1063_v19 = vld [vmem:[%s2252_s16 + $0x48] sm:$0xff] (!%p1697_p13)  ;;  %v1064_v50 = vld [vmem:[%s2252_s16 + $0x50] sm:$0xff] (!%p1697_p13) }
 0x170   : > { %1120 = vst [vmem:[%s2252_s16 + $0x10] sm:$0xff] (!%p1697_p13), %v1088_v7  ;;  %v1065_v22 = vld [vmem:[%s2252_s16 + $0x58] sm:$0xff] (!%p1697_p13)  ;;  %1121 = vst [vmem:[%s2252_s16 + $0x18] sm:$0xff] (!%p1697_p13), %v1089_v13  ;;  %v1095_v23 = vadd.f32 (!%p1697_p13), %v2340_v10, %v1063_v19  ;;  %v1096_v56 = vadd.f32 (!%p1697_p13), %v2344_v16, %v1064_v50  ;;  %v1066_v28 = vld [vmem:[%s2252_s16 + $0x60] sm:$0xff] (!%p1697_p13) }
 0x171   : > { %1122 = vst [vmem:[%s2252_s16 + $0x20] sm:$0xff] (!%p1697_p13), %v1090_v14  ;;  %1123 = vst [vmem:[%s2252_s16 + $0x28] sm:$0xff] (!%p1697_p13), %v1091_v15  ;;  %v1097_v62 = vadd.f32 (!%p1697_p13), %v2348_v24, %v1065_v22  ;;  %v1067_v4 = vld [vmem:[%s2252_s16 + $0x68] sm:$0xff] (!%p1697_p13)  ;;  %v1068_v29 = vld [vmem:[%s2252_s16 + $0x70] sm:$0xff] (!%p1697_p13)  ;;  %v1098_v30 = vadd.f32 (!%p1697_p13), %v2352_v34, %v1066_v28 }
 0x172   : > { %1124 = vst [vmem:[%s2252_s16 + $0x30] sm:$0xff] (!%p1697_p13), %v1092_v32  ;;  %1125 = vst [vmem:[%s2252_s16 + $0x38] sm:$0xff] (!%p1697_p13), %v1093_v38  ;;  %v1099_v10 = vadd.f32 (!%p1697_p13), %v2356_v42, %v1067_v4  ;;  %v1100_v16 = vadd.f32 (!%p1697_p13), %v2360_v52, %v1068_v29  ;;  %v1069_v31 = vld [vmem:[%s2252_s16 + $0x78] sm:$0xff] (!%p1697_p13)  ;;  %v1070_v24 = vld [vmem:[%s2252_s16 + $0x80] sm:$0xff] (!%p1697_p13) }
 0x173   : > { %1126 = vst [vmem:[%s2252_s16 + $0x40] sm:$0xff] (!%p1697_p13), %v1094_v44  ;;  %v1071_v36 = vld [vmem:[%s2252_s16 + $0x88] sm:$0xff] (!%p1697_p13)  ;;  %1127 = vst [vmem:[%s2252_s16 + $0x48] sm:$0xff] (!%p1697_p13), %v1095_v23  ;;  %v1101_v37 = vadd.f32 (!%p1697_p13), %v2364_v60, %v1069_v31  ;;  %v1102_v34 = vadd.f32 (!%p1697_p13), %v2306_v21, %v1070_v24  ;;  %v1072_v41 = vld [vmem:[%s2252_s16 + $0x90] sm:$0xff] (!%p1697_p13) }
 0x174   : > { %1128 = vst [vmem:[%s2252_s16 + $0x50] sm:$0xff] %v1096_v56  ;;  %1129 = vst [vmem:[%s2252_s16 + $0x58] sm:$0xff] %v1097_v62  ;;  %v1103_v40 = vadd.f32 %v2310_v27, %v1071_v36  ;;  %v1073_v42 = vld [vmem:[%s2252_s16 + $0x98] sm:$0xff]  ;;  %v1074_v46 = vld [vmem:[%s2252_s16 + $0xa0] sm:$0xff]  ;;  %v1104_v47 = vadd.f32 %v2314_v33, %v1072_v41 }
 0x175   : > { %1130 = vst [vmem:[%s2252_s16 + $0x60] sm:$0xff] %v1098_v30  ;;  %1131 = vst [vmem:[%s2252_s16 + $0x68] sm:$0xff] %v1099_v10  ;;  %v1105_v48 = vadd.f32 %v2318_v39, %v1073_v42  ;;  %v1106_v21 = vadd.f32 %v2322_v45, %v1074_v46  ;;  %v1075_v49 = vld [vmem:[%s2252_s16 + $0xa8] sm:$0xff]  ;;  %v1076_v27 = vld [vmem:[%s2252_s16 + $0xb0] sm:$0xff] }
 0x176   : > { %1132 = vst [vmem:[%s2252_s16 + $0x70] sm:$0xff] %v1100_v16  ;;  %v1077_v52 = vld [vmem:[%s2252_s16 + $0xb8] sm:$0xff]  ;;  %1133 = vst [vmem:[%s2252_s16 + $0x78] sm:$0xff] %v1101_v37  ;;  %v1107_v54 = vadd.f32 %v2326_v51, %v1075_v49  ;;  %v1108_v33 = vadd.f32 %v2330_v57, %v1076_v27  ;;  %v1078_v55 = vld [vmem:[%s2252_s16 + $0xc0] sm:$0xff] }
 0x177   : > { %1134 = vst [vmem:[%s2252_s16 + $0x80] sm:$0xff] %v1102_v34  ;;  %1135 = vst [vmem:[%s2252_s16 + $0x88] sm:$0xff] %v1103_v40  ;;  %v1109_v39 = vadd.f32 %v2334_v63, %v1077_v52  ;;  %v1079_v45 = vld [vmem:[%s2252_s16 + $0xc8] sm:$0xff]  ;;  %v1080_v58 = vld [vmem:[%s2252_s16 + $0xd0] sm:$0xff]  ;;  %v1110_v59 = vadd.f32 %v2338_v5, %v1078_v55 }
 0x178   : > { %1136 = vst [vmem:[%s2252_s16 + $0x90] sm:$0xff] %v1104_v47  ;;  %1137 = vst [vmem:[%s2252_s16 + $0x98] sm:$0xff] %v1105_v48  ;;  %v1111_v51 = vadd.f32 %v2342_v11, %v1079_v45  ;;  %v1112_v57 = vadd.f32 %v2346_v17, %v1080_v58  ;;  %v1081_v60 = vld [vmem:[%s2252_s16 + $0xd8] sm:$0xff]  ;;  %v1082_v63 = vld [vmem:[%s2252_s16 + $0xe0] sm:$0xff] }
 0x179   : > { %1138 = vst [vmem:[%s2252_s16 + $0xa0] sm:$0xff] %v1106_v21  ;;  %v1083_v0 = vld [vmem:[%s2252_s16 + $0xe8] sm:$0xff]  ;;  %1139 = vst [vmem:[%s2252_s16 + $0xa8] sm:$0xff] %v1107_v54  ;;  %v1113_v1 = vadd.f32 %v2350_v25, %v1081_v60  ;;  %v1114_v5 = vadd.f32 %v2354_v35, %v1082_v63  ;;  %v1084_v11 = vld [vmem:[%s2252_s16 + $0xf0] sm:$0xff] }
 0x17a   : > { %1140 = vst [vmem:[%s2252_s16 + $0xb0] sm:$0xff] %v1108_v33  ;;  %1141 = vst [vmem:[%s2252_s16 + $0xb8] sm:$0xff] %v1109_v39  ;;  %v1115_v2 = vadd.f32 %v2358_v43, %v1083_v0  ;;  %v1085_v3 = vld [vmem:[%s2252_s16 + $0xf8] sm:$0xff]  ;;  %v1116_v17 = vadd.f32 %v2362_v53, %v1084_v11 }
 0x17b   : > { %1142 = vst [vmem:[%s2252_s16 + $0xc0] sm:$0xff] %v1110_v59  ;;  %1143 = vst [vmem:[%s2252_s16 + $0xc8] sm:$0xff] %v1111_v51  ;;  %v1117_v6 = vadd.f32 %v2366_v61, %v1085_v3 }
 0x17c   : > { %1144 = vst [vmem:[%s2252_s16 + $0xd0] sm:$0xff] %v1112_v57  ;;  %1145 = vst [vmem:[%s2252_s16 + $0xd8] sm:$0xff] %v1113_v1 }
 0x17d   : > { %1146 = vst [vmem:[%s2252_s16 + $0xe0] sm:$0xff] %v1114_v5  ;;  %1147 = vst [vmem:[%s2252_s16 + $0xe8] sm:$0xff] %v1115_v2 }
 0x17e   : > { %1148 = vst [vmem:[%s2252_s16 + $0xf0] sm:$0xff] %v1116_v17  ;;  %1149 = vst [vmem:[%s2252_s16 + $0xf8] sm:$0xff] %v1117_v6 }
 0x17f PF: > { %p1698_p0 = scmp.ne.s32.totalorder %s2053_s20, 13 }
 0x180   : > { %v2535_v35 = vld [vmem:[%s2822_s2] ss:$0 sm:$0xff] (!%p1698_p0)  ;;  %v2545_v9 = vld [vmem:[%s2246_s13 + $0x8] sm:$0xff] (!%p1698_p0)  ;;  %v2551_v15 = vld [vmem:[%s2246_s13 + $0x10] sm:$0xff] (!%p1698_p0) }
 0x181   : > { %1153 = sbr.rel (%p1698_p0) target bundleno = 444 (0x1bc), region = 90  ;;  %v1154_v25 = vld [vmem:[%s2252_s16] sm:$0xff] (!%p1698_p0)  ;;  %v1155_v61 = vld [vmem:[%s2252_s16 + $0x8] sm:$0xff] (!%p1698_p0)  ;;  %v2556_v26 = vld [vmem:[%s2246_s13 + $0x18] sm:$0xff] (!%p1698_p0)  ;;  %v1290_v44 = vsub.f32 (!%p1698_p0), 1.0, %v2545_v9  ;;  %v1291_v62 = vsub.f32 (!%p1698_p0), 1.0, %v2551_v15 }
 0x182   : > { %v2538_v43 = vld [vmem:[%s2246_s13] sm:$0xff] (!%p1698_p0)  ;;  %v1193_v53 = vadd.f32 (!%p1698_p0), %v2535_v35, %v1154_v25  ;;  %v1194_v8 = vadd.f32 (!%p1698_p0), %v2535_v35, %v1155_v61  ;;  %v1156_v12 = vld [vmem:[%s2252_s16 + $0x10] sm:$0xff] (!%p1698_p0)  ;;  %v1157_v20 = vld [vmem:[%s2252_s16 + $0x18] sm:$0xff] (!%p1698_p0)  ;;  %v1292_v10 = vsub.f32 (!%p1698_p0), 1.0, %v2556_v26 }
 0x183   : > { %v1289_v7 = vsub.f32 (!%p1698_p0), 1.0, %v2538_v43  ;;  %v1321_v13 = vld [vmem:[%s2241_s21] sm:$0xff] (!%p1698_p0)  ;;  %v1195_v14 = vadd.f32 (!%p1698_p0), %v2535_v35, %v1156_v12  ;;  %v1196_v18 = vadd.f32 (!%p1698_p0), %v2535_v35, %v1157_v20  ;;  %v1322_v19 = vld [vmem:[%s2241_s21 + $0x8] sm:$0xff] (!%p1698_p0)  ;;  %v1323_v28 = vld [vmem:[%s2241_s21 + $0x10] sm:$0xff] (!%p1698_p0) }
 0x184   : > { %1951 = vtanh.f32 (!%p1698_p0), %v1193_v53  ;;  %v1158_v32 = vld [vmem:[%s2252_s16 + $0x20] sm:$0xff] (!%p1698_p0)  ;;  %v1159_v22 = vld [vmem:[%s2252_s16 + $0x28] sm:$0xff] (!%p1698_p0)  ;;  %v1160_v29 = vld [vmem:[%s2252_s16 + $0x30] sm:$0xff] (!%p1698_p0)  ;;  %v1354_v48 = vmul.f32 (!%p1698_p0), %v1322_v19, %v1290_v44  ;;  %v1355_v33 = vmul.f32 (!%p1698_p0), %v1323_v28, %v1291_v62 }
 0x185   : > { %1953 = vtanh.f32 (!%p1698_p0), %v1194_v8  ;;  %v2560_v38 = vld [vmem:[%s2246_s13 + $0x20] sm:$0xff] (!%p1698_p0)  ;;  %v1197_v50 = vadd.f32 (!%p1698_p0), %v2535_v35, %v1158_v32  ;;  %v2567_v23 = vld [vmem:[%s2246_s13 + $0x28] sm:$0xff] (!%p1698_p0)  ;;  %v2569_v56 = vmul.f32 (!%p1698_p0), %v1321_v13, %v1289_v7  ;;  %v1198_v4 = vadd.f32 (!%p1698_p0), %v2535_v35, %v1159_v22  ;;  %v2576_v30 = vld [vmem:[%s2246_s13 + $0x30] sm:$0xff] (!%p1698_p0) }
 0x186   : > { %1955 = vtanh.f32 (!%p1698_p0), %v1195_v14  ;;  %v1324_v16 = vld [vmem:[%s2241_s21 + $0x18] sm:$0xff] (!%p1698_p0)  ;;  %v1293_v31 = vsub.f32 (!%p1698_p0), 1.0, %v2560_v38  ;;  %v1199_v24 = vadd.f32 (!%p1698_p0), %v2535_v35, %v1160_v29  ;;  %v1325_v34 = vld [vmem:[%s2241_s21 + $0x20] sm:$0xff] (!%p1698_p0)  ;;  %v1294_v40 = vsub.f32 (!%p1698_p0), 1.0, %v2567_v23  ;;  %v1326_v21 = vld [vmem:[%s2241_s21 + $0x28] sm:$0xff] (!%p1698_p0) }
 0x187   : > { %1957 = vtanh.f32 (!%p1698_p0), %v1196_v18  ;;  %v1161_v36 = vld [vmem:[%s2252_s16 + $0x38] sm:$0xff] (!%p1698_p0)  ;;  %v1295_v41 = vsub.f32 (!%p1698_p0), 1.0, %v2576_v30  ;;  %v1162_v46 = vld [vmem:[%s2252_s16 + $0x40] sm:$0xff] (!%p1698_p0)  ;;  %v1327_v49 = vld [vmem:[%s2241_s21 + $0x30] sm:$0xff] (!%p1698_p0)  ;;  %v1356_v51 = vmul.f32 (!%p1698_p0), %v1324_v16, %v1292_v10 }
 0x188   : > { %1959 = vtanh.f32 %v1197_v50  ;;  %v2584_v37 = vld [vmem:[%s2246_s13 + $0x38] sm:$0xff]  ;;  %v1200_v42 = vadd.f32 %v2535_v35, %v1161_v36  ;;  %v2592_v47 = vld [vmem:[%s2246_s13 + $0x40] sm:$0xff]  ;;  %v1201_v52 = vadd.f32 %v2535_v35, %v1162_v46  ;;  %v1163_v54 = vld [vmem:[%s2252_s16 + $0x48] sm:$0xff]  ;;  %v1357_v57 = vmul.f32 %v1325_v34, %v1293_v31 }
 0x189   : > { %1961 = vtanh.f32 %v1198_v4  ;;  %v1296_v27 = vsub.f32 1.0, %v2584_v37  ;;  %v1328_v39 = vld [vmem:[%s2241_s21 + $0x38] sm:$0xff]  ;;  %v1297_v55 = vsub.f32 1.0, %v2592_v47  ;;  %v1202_v45 = vadd.f32 %v2535_v35, %v1163_v54  ;;  %v2603_v58 = vld [vmem:[%s2246_s13 + $0x48] sm:$0xff]  ;;  %v1164_v59 = vld [vmem:[%s2252_s16 + $0x50] sm:$0xff] }
 0x18a   : > { %1963 = vtanh.f32 %v1199_v24  ;;  %v1329_v60 = vld [vmem:[%s2241_s21 + $0x40] sm:$0xff]  ;;  %v1203_v63 = vadd.f32 %v2535_v35, %v1164_v59  ;;  %v1165_v0 = vld [vmem:[%s2252_s16 + $0x58] sm:$0xff]  ;;  %v2609_v1 = vmul.f32 %v1326_v21, %v1294_v40  ;;  %v2611_v5 = vmul.f32 %v1327_v49, %v1295_v41  ;;  %v2614_v2 = vld [vmem:[%s2246_s13 + $0x50] sm:$0xff] }
 0x18b   : > { %1965 = vtanh.f32 %v1200_v42  ;;  %v1204_v11 = vadd.f32 %v2535_v35, %v1165_v0  ;;  %v2618_v3 = vld [vmem:[%s2246_s13 + $0x58] sm:$0xff]  ;;  %v1166_v17 = vld [vmem:[%s2252_s16 + $0x60] sm:$0xff]  ;;  %v2621_v25 = vmul.f32 %v1328_v39, %v1296_v27  ;;  %v1298_v53 = vsub.f32 1.0, %v2603_v58  ;;  %v1167_v7 = vld [vmem:[%s2252_s16 + $0x68] sm:$0xff] }
 0x18c   : > { %1967 = vtanh.f32 %v1201_v52  ;;  %v1205_v61 = vadd.f32 %v2535_v35, %v1166_v17  ;;  %v2627_v13 = vmul.f32 %v1329_v60, %v1297_v55  ;;  %v1330_v14 = vld [vmem:[%s2241_s21 + $0x48] sm:$0xff]  ;;  %v2631_v20 = vld [vmem:[%s2246_s13 + $0x60] sm:$0xff]  ;;  %v1206_v18 = vadd.f32 %v2535_v35, %v1167_v7  ;;  %v1168_v32 = vld [vmem:[%s2252_s16 + $0x70] sm:$0xff] }
 0x18d   : > { %1969 = vtanh.f32 %v1202_v45  ;;  %v1299_v50 = vsub.f32 1.0, %v2614_v2  ;;  %v1300_v22 = vsub.f32 1.0, %v2618_v3  ;;  %v1331_v29 = vld [vmem:[%s2241_s21 + $0x50] sm:$0xff]  ;;  %v1332_v10 = vld [vmem:[%s2241_s21 + $0x58] sm:$0xff]  ;;  %v1362_v36 = vmul.f32 %v1330_v14, %v1298_v53  ;;  %v1170_v40 = vld [vmem:[%s2252_s16 + $0x80] sm:$0xff] }
 0x18e   : > { %v1952_v6 = vpop.eup %1951  ;;  %1971 = vtanh.f32 %v1203_v63  ;;  %v1301_v34 = vsub.f32 1.0, %v2631_v20  ;;  %v1333_v42 = vld [vmem:[%s2241_s21 + $0x60] sm:$0xff]  ;;  %v2651_v46 = vld [vmem:[%s2246_s13 + $0x68] sm:$0xff]  ;;  %v2660_v55 = vld [vmem:[%s2246_s13 + $0x70] sm:$0xff]  ;;  %v1209_v59 = vadd.f32 %v2535_v35, %v1170_v40 }
 0x18f   : > { %v1954_v8 = vpop.eup %1953  ;;  %v1385_v12 = vmul.f32 %v1952_v6, %v2538_v43  ;;  %1973 = vtanh.f32 %v1204_v11  ;;  %v1169_v43 = vld [vmem:[%s2252_s16 + $0x78] sm:$0xff]  ;;  %v1363_v27 = vmul.f32 %v1331_v29, %v1299_v50  ;;  %v1364_v52 = vmul.f32 %v1332_v10, %v1300_v22  ;;  %v1171_v54 = vld [vmem:[%s2252_s16 + $0x88] sm:$0xff]  ;;  %v1337_v40 = vld [vmem:[%s2241_s21 + $0x80] sm:$0xff] }
 0x190   : > { %v1956_v44 = vpop.eup %1955  ;;  %v1386_v19 = vmul.f32 %v1954_v8, %v2545_v9  ;;  %1975 = vtanh.f32 %v1205_v61  ;;  %v1207_v9 = vadd.f32 %v2535_v35, %v1168_v32  ;;  %v2663_v45 = vld [vmem:[%s2246_s13 + $0x78] sm:$0xff]  ;;  %v1365_v63 = vmul.f32 %v1333_v42, %v1301_v34  ;;  %v1334_v6 = vld [vmem:[%s2241_s21 + $0x68] sm:$0xff]  ;;  %v1273_v32 = vld [vmem:[%s2246_s13 + $0x80] sm:$0xff] }
 0x191   : > { %v1958_v62 = vpop.eup %1957  ;;  %v1417_v28 = vadd.f32 %v1385_v12, %v2569_v56  ;;  %v1387_v4 = vmul.f32 %v1956_v44, %v2551_v15  ;;  %1977 = vtanh.f32 %v1206_v18  ;;  %v1303_v7 = vsub.f32 1.0, %v2660_v55  ;;  %v1173_v8 = vld [vmem:[%s2252_s16 + $0x98] sm:$0xff]  ;;  %v1335_v18 = vld [vmem:[%s2241_s21 + $0x70] sm:$0xff]  ;;  %v1175_v29 = vld [vmem:[%s2252_s16 + $0xa8] sm:$0xff] }
 0x192   : > { %v1960_v16 = vpop.eup %1959  ;;  %v1418_v31 = vadd.f32 %v1386_v19, %v1354_v48  ;;  %v1388_v24 = vmul.f32 %v1958_v62, %v2556_v26  ;;  %1979 = vtanh.f32 %v1207_v9  ;;  %v1208_v48 = vadd.f32 %v2535_v35, %v1169_v43  ;;  %v1336_v22 = vld [vmem:[%s2241_s21 + $0x78] sm:$0xff] }
 0x193   : > { %v1962_v56 = vpop.eup %1961  ;;  %1449 = vst [vmem:[%s2252_s16] sm:$0xff] %v1417_v28  ;;  %v1419_v15 = vadd.f32 %v1387_v4, %v1355_v33  ;;  %v1389_v41 = vmul.f32 %v1960_v16, %v2560_v38  ;;  %v1274_v28 = vld [vmem:[%s2246_s13 + $0x88] sm:$0xff]  ;;  %v1212_v4 = vadd.f32 %v2535_v35, %v1173_v8  ;;  %v1367_v9 = vmul.f32 %v1335_v18, %v1303_v7  ;;  %v2742_v18 = vld [vmem:[%s2246_s13 + $0xb8] sm:$0xff] }
 0x194   : > { %v1964_v26 = vpop.eup %1963  ;;  %1450 = vst [vmem:[%s2252_s16 + $0x8] sm:$0xff] %v1418_v31  ;;  %v1420_v21 = vadd.f32 %v1388_v24, %v1356_v51  ;;  %v1390_v49 = vmul.f32 %v1962_v56, %v2567_v23  ;;  %1981 = vtanh.f32 %v1208_v48  ;;  %v1305_v16 = vsub.f32 1.0, %v1273_v32  ;;  %v2700_v31 = vld [vmem:[%s2246_s13 + $0x90] sm:$0xff] }
 0x195   : > { %v1966_v33 = vpop.eup %1965  ;;  %1451 = vst [vmem:[%s2252_s16 + $0x10] sm:$0xff] %v1419_v15  ;;  %v1421_v38 = vadd.f32 %v1389_v41, %v1357_v57  ;;  %v1391_v39 = vmul.f32 %v1964_v26, %v2576_v30  ;;  %v1302_v57 = vsub.f32 1.0, %v2651_v46  ;;  %v1172_v30 = vld [vmem:[%s2252_s16 + $0x90] sm:$0xff]  ;;  %1983 = vtanh.f32 %v1209_v59  ;;  %v1177_v26 = vld [vmem:[%s2252_s16 + $0xb8] sm:$0xff]  ;;  %v2722_v59 = vld [vmem:[%s2246_s13 + $0xa0] sm:$0xff] }
 0x196   : > { %v1968_v23 = vpop.eup %1967  ;;  %1452 = vst [vmem:[%s2252_s16 + $0x18] sm:$0xff] %v1420_v21  ;;  %v1422_v51 = vadd.f32 %v1390_v49, %v2609_v1  ;;  %v1392_v60 = vmul.f32 %v1966_v33, %v2584_v37  ;;  %v1210_v1 = vadd.f32 %v2535_v35, %v1171_v54  ;;  %v1176_v24 = vld [vmem:[%s2252_s16 + $0xb0] sm:$0xff]  ;;  %v1306_v42 = vsub.f32 1.0, %v1274_v28  ;;  %v1338_v49 = vld [vmem:[%s2241_s21 + $0x88] sm:$0xff]  ;;  %v1178_v54 = vld [vmem:[%s2252_s16 + $0xc0] sm:$0xff] }
 0x197   : > { %v1970_v0 = vpop.eup %1969  ;;  %1453 = vst [vmem:[%s2252_s16 + $0x20] sm:$0xff] %v1421_v38  ;;  %v1423_v11 = vadd.f32 %v1391_v39, %v2611_v5  ;;  %v1393_v17 = vmul.f32 %v1968_v23, %v2592_v47  ;;  %v1304_v5 = vsub.f32 1.0, %v2663_v45  ;;  %v1366_v50 = vmul.f32 %v1334_v6, %v1302_v57  ;;  %v1179_v23 = vld [vmem:[%s2252_s16 + $0xc8] sm:$0xff]  ;;  %v1180_v6 = vld [vmem:[%s2252_s16 + $0xd0] sm:$0xff] }
 0x198   : > { %v1972_v53 = vpop.eup %1971  ;;  %1454 = vst [vmem:[%s2252_s16 + $0x28] sm:$0xff] %v1422_v51  ;;  %v1424_v37 = vadd.f32 %v1392_v60, %v2621_v25  ;;  %v1394_v61 = vmul.f32 %v1970_v0, %v2603_v58  ;;  %1985 = vtanh.f32 %v1210_v1  ;;  %v1211_v58 = vadd.f32 %v2535_v35, %v1172_v30 }
 0x199   : > { %v1974_v47 = vpop.eup %1973  ;;  %1455 = vst [vmem:[%s2252_s16 + $0x30] sm:$0xff] %v1423_v11  ;;  %v1425_v12 = vadd.f32 %v1393_v17, %v2627_v13  ;;  %v1395_v14 = vmul.f32 %v1972_v53, %v2614_v2  ;;  %v1174_v13 = vld [vmem:[%s2252_s16 + $0xa0] sm:$0xff]  ;;  %v1368_v34 = vmul.f32 %v1336_v22, %v1304_v5  ;;  %v1214_v48 = vadd.f32 %v2535_v35, %v1175_v29  ;;  %v1340_v11 = vld [vmem:[%s2241_s21 + $0x98] sm:$0xff] }
 0x19a   : > { %v1976_v25 = vpop.eup %1975  ;;  %1456 = vst [vmem:[%s2252_s16 + $0x38] sm:$0xff] %v1424_v37  ;;  %v1426_v44 = vadd.f32 %v1394_v61, %v1362_v36  ;;  %v1396_v19 = vmul.f32 %v1974_v47, %v2618_v3  ;;  %1987 = vtanh.f32 %v1211_v58  ;;  %v1213_v56 = vadd.f32 %v2535_v35, %v1174_v13  ;;  %v1279_v61 = vld [vmem:[%s2246_s13 + $0xb0] sm:$0xff]  ;;  %v1181_v5 = vld [vmem:[%s2252_s16 + $0xd8] sm:$0xff] }
 0x19b   : > { %v1978_v43 = vpop.eup %1977  ;;  %1457 = vst [vmem:[%s2252_s16 + $0x40] sm:$0xff] %v1425_v12  ;;  %v1427_v2 = vadd.f32 %v1395_v14, %v1363_v27  ;;  %v1397_v62 = vmul.f32 %v1976_v25, %v2631_v20  ;;  %1989 = vtanh.f32 %v1212_v4  ;;  %v1307_v27 = vsub.f32 1.0, %v2700_v31  ;;  %v1341_v12 = vld [vmem:[%s2241_s21 + $0xa0] sm:$0xff] }
 0x19c   : > { %1458 = vst [vmem:[%s2252_s16 + $0x48] sm:$0xff] %v1426_v44  ;;  %v1428_v3 = vadd.f32 %v1396_v19, %v1364_v52  ;;  %v1398_v10 = vmul.f32 %v1978_v43, %v2651_v46  ;;  %v1980_v20 = vpop.eup %1979  ;;  %v2709_v46 = vld [vmem:[%s2246_s13 + $0x98] sm:$0xff]  ;;  %1991 = vtanh.f32 %v1213_v56  ;;  %v1215_v52 = vadd.f32 %v2535_v35, %v1176_v24  ;;  %v1342_v44 = vld [vmem:[%s2241_s21 + $0xa8] sm:$0xff]  ;;  %v1281_v43 = vld [vmem:[%s2246_s13 + $0xc0] sm:$0xff] }
 0x19d   : > { %1459 = vst [vmem:[%s2252_s16 + $0x50] sm:$0xff] %v1427_v2  ;;  %v1429_v36 = vadd.f32 %v1397_v62, %v1365_v63  ;;  %v1399_v41 = vmul.f32 %v1980_v20, %v2660_v55  ;;  %v1369_v39 = vmul.f32 %v1337_v40, %v1305_v16  ;;  %v1339_v55 = vld [vmem:[%s2241_s21 + $0x90] sm:$0xff]  ;;  %1993 = vtanh.f32 %v1214_v48  ;;  %v2727_v63 = vld [vmem:[%s2246_s13 + $0xa8] sm:$0xff] }
 0x19e   : > { %1460 = vst [vmem:[%s2252_s16 + $0x58] sm:$0xff] %v1428_v3  ;;  %v1430_v15 = vadd.f32 %v1398_v10, %v1366_v50  ;;  %v1982_v21 = vpop.eup %1981  ;;  %v1308_v60 = vsub.f32 1.0, %v2709_v46  ;;  %1995 = vtanh.f32 %v1215_v52  ;;  %v1216_v57 = vadd.f32 %v2535_v35, %v1177_v26  ;;  %v2751_v2 = vld [vmem:[%s2246_s13 + $0xc8] sm:$0xff]  ;;  %v1343_v3 = vld [vmem:[%s2241_s21 + $0xb0] sm:$0xff]  ;;  %v1284_v52 = vld [vmem:[%s2246_s13 + $0xd8] sm:$0xff] }
 0x19f   : > { %1461 = vst [vmem:[%s2252_s16 + $0x60] sm:$0xff] %v1429_v36  ;;  %v1431_v33 = vadd.f32 %v1399_v41, %v1367_v9  ;;  %v1400_v38 = vmul.f32 %v1982_v21, %v2663_v45  ;;  %v1984_v51 = vpop.eup %1983  ;;  %v1370_v0 = vmul.f32 %v1338_v49, %v1306_v42  ;;  %v1217_v17 = vadd.f32 %v2535_v35, %v1178_v54  ;;  %v1184_v16 = vld [vmem:[%s2252_s16 + $0xf0] sm:$0xff]  ;;  %v1344_v36 = vld [vmem:[%s2241_s21 + $0xb8] sm:$0xff]  ;;  %v1345_v49 = vld [vmem:[%s2241_s21 + $0xc0] sm:$0xff] }
 0x1a0   : > { %1462 = vst [vmem:[%s2252_s16 + $0x68] sm:$0xff] %v1430_v15  ;;  %v1401_v30 = vmul.f32 %v1984_v51, %v1273_v32  ;;  %v1371_v53 = vmul.f32 %v1339_v55, %v1307_v27  ;;  %v1309_v37 = vsub.f32 1.0, %v2722_v59  ;;  %1997 = vtanh.f32 %v1216_v57  ;;  %v1182_v32 = vld [vmem:[%s2252_s16 + $0xe0] sm:$0xff]  ;;  %v1185_v42 = vld [vmem:[%s2252_s16 + $0xf8] sm:$0xff]  ;;  %v1346_v27 = vld [vmem:[%s2241_s21 + $0xc8] sm:$0xff] }
 0x1a1   : > { %1463 = vst [vmem:[%s2252_s16 + $0x70] sm:$0xff] %v1431_v33  ;;  %v1432_v45 = vadd.f32 %v1400_v38, %v1368_v34  ;;  %v1218_v7 = vadd.f32 %v2535_v35, %v1179_v23  ;;  %v1310_v14 = vsub.f32 1.0, %v2727_v63  ;;  %1999 = vtanh.f32 %v1217_v17  ;;  %v1283_v34 = vld [vmem:[%s2246_s13 + $0xd0] sm:$0xff]  ;;  %v1285_v23 = vld [vmem:[%s2246_s13 + $0xe0] sm:$0xff]  ;;  %v1286_v17 = vld [vmem:[%s2246_s13 + $0xe8] sm:$0xff] }
 0x1a2   : > { %v1986_v1 = vpop.eup %1985  ;;  %v1433_v8 = vadd.f32 %v1401_v30, %v1369_v39  ;;  %v1372_v25 = vmul.f32 %v1340_v11, %v1308_v60  ;;  %v1219_v19 = vadd.f32 %v2535_v35, %v1180_v6  ;;  %v1311_v13 = vsub.f32 1.0, %v1279_v61 }
 0x1a3   : > { %1464 = vst [vmem:[%s2252_s16 + $0x78] sm:$0xff] %v1432_v45  ;;  %v1402_v47 = vmul.f32 %v1986_v1, %v1274_v28  ;;  %2001 = vtanh.f32 %v1218_v7  ;;  %v1220_v62 = vadd.f32 %v2535_v35, %v1181_v5  ;;  %v1183_v28 = vld [vmem:[%s2252_s16 + $0xe8] sm:$0xff]  ;;  %v1373_v29 = vmul.f32 %v1341_v12, %v1309_v37  ;;  %v1348_v37 = vld [vmem:[%s2241_s21 + $0xd8] sm:$0xff] }
 0x1a4   : > { %v1988_v58 = vpop.eup %1987  ;;  %1465 = vst [vmem:[%s2252_s16 + $0x80] sm:$0xff] %v1433_v8  ;;  %v1312_v10 = vsub.f32 1.0, %v2742_v18  ;;  %2003 = vtanh.f32 %v1219_v19  ;;  %v1221_v9 = vadd.f32 %v2535_v35, %v1182_v32  ;;  %v1374_v20 = vmul.f32 %v1342_v44, %v1310_v14  ;;  %v1349_v8 = vld [vmem:[%s2241_s21 + $0xe0] sm:$0xff]  ;;  %v1350_v19 = vld [vmem:[%s2241_s21 + $0xe8] sm:$0xff] }
 0x1a5   : > { %v1434_v50 = vadd.f32 %v1402_v47, %v1370_v0  ;;  %v1403_v22 = vmul.f32 %v1988_v58, %v2700_v31  ;;  %v1990_v4 = vpop.eup %1989  ;;  %2005 = vtanh.f32 %v1220_v62  ;;  %v1313_v56 = vsub.f32 1.0, %v1281_v43  ;;  %v1347_v0 = vld [vmem:[%s2241_s21 + $0xd0] sm:$0xff]  ;;  %v1288_v58 = vld [vmem:[%s2246_s13 + $0xf8] sm:$0xff] }
 0x1a6   : > { %v1404_v24 = vmul.f32 %v1990_v4, %v2709_v46  ;;  %v1992_v40 = vpop.eup %1991  ;;  %v1314_v15 = vsub.f32 1.0, %v2751_v2  ;;  %2007 = vtanh.f32 %v1221_v9  ;;  %v1222_v41 = vadd.f32 %v2535_v35, %v1183_v28  ;;  %v1351_v28 = vld [vmem:[%s2241_s21 + $0xf0] sm:$0xff] }
 0x1a7   : > { %1466 = vst [vmem:[%s2252_s16 + $0x88] sm:$0xff] %v1434_v50  ;;  %v1435_v31 = vadd.f32 %v1403_v22, %v1371_v53  ;;  %v1994_v48 = vpop.eup %1993  ;;  %v1405_v26 = vmul.f32 %v1992_v40, %v2722_v59  ;;  %v1375_v21 = vmul.f32 %v1343_v3, %v1311_v13  ;;  %v1223_v54 = vadd.f32 %v2535_v35, %v1184_v16  ;;  %v1352_v16 = vld [vmem:[%s2241_s21 + $0xf8] sm:$0xff] }
 0x1a8   : > { %v1436_v46 = vadd.f32 %v1404_v24, %v1372_v25  ;;  %v1996_v33 = vpop.eup %1995  ;;  %v1406_v38 = vmul.f32 %v1994_v48, %v2727_v63  ;;  %v1376_v39 = vmul.f32 %v1344_v36, %v1312_v10  ;;  %v1315_v55 = vsub.f32 1.0, %v1283_v34 }
 0x1a9   : > { %1467 = vst [vmem:[%s2252_s16 + $0x90] sm:$0xff] %v1435_v31  ;;  %2009 = vtanh.f32 %v1222_v41  ;;  %v1437_v51 = vadd.f32 %v1405_v26, %v1373_v29  ;;  %v1407_v59 = vmul.f32 %v1996_v33, %v1279_v61  ;;  %v1224_v60 = vadd.f32 %v2535_v35, %v1185_v42  ;;  %v1287_v35 = vld [vmem:[%s2246_s13 + $0xf0] sm:$0xff] }
 0x1aa   : > { %1468 = vst [vmem:[%s2252_s16 + $0x98] sm:$0xff] %v1436_v46  ;;  %2011 = vtanh.f32 %v1223_v54  ;;  %v1998_v57 = vpop.eup %1997  ;;  %v1438_v45 = vadd.f32 %v1406_v38, %v1374_v20  ;;  %v1377_v30 = vmul.f32 %v1345_v49, %v1313_v56  ;;  %v1378_v63 = vmul.f32 %v1346_v27, %v1314_v15 }
 0x1ab   : > { %v1316_v11 = vsub.f32 1.0, %v1284_v52  ;;  %v2000_v6 = vpop.eup %1999  ;;  %1469 = vst [vmem:[%s2252_s16 + $0xa0] sm:$0xff] %v1437_v51  ;;  %v1439_v1 = vadd.f32 %v1407_v59, %v1375_v21  ;;  %v1408_v53 = vmul.f32 %v1998_v57, %v2742_v18  ;;  %v1317_v61 = vsub.f32 1.0, %v1285_v23 }
 0x1ac   : > { %2013 = vtanh.f32 %v1224_v60  ;;  %1470 = vst [vmem:[%s2252_s16 + $0xa8] sm:$0xff] %v1438_v45  ;;  %v1409_v5 = vmul.f32 %v2000_v6, %v1281_v43  ;;  %v1379_v14 = vmul.f32 %v1347_v0, %v1315_v55  ;;  %v1318_v32 = vsub.f32 1.0, %v1286_v17 }
 0x1ad   : > { %v2002_v7 = vpop.eup %2001  ;;  %1471 = vst [vmem:[%s2252_s16 + $0xb0] sm:$0xff] %v1439_v1  ;;  %v1440_v47 = vadd.f32 %v1408_v53, %v1376_v39  ;;  %v1380_v44 = vmul.f32 %v1348_v37, %v1316_v11  ;;  %v1319_v50 = vsub.f32 1.0, %v1287_v35  ;;  %v1381_v62 = vmul.f32 %v1349_v8, %v1317_v61 }
 0x1ae   : > { %v1410_v12 = vmul.f32 %v2002_v7, %v2751_v2  ;;  %v2004_v18 = vpop.eup %2003  ;;  %v1441_v25 = vadd.f32 %v1409_v5, %v1377_v30  ;;  %v1320_v29 = vsub.f32 1.0, %v1288_v58  ;;  %v1382_v9 = vmul.f32 %v1350_v19, %v1318_v32 }
 0x1af   : > { %v2006_v22 = vpop.eup %2005  ;;  %1472 = vst [vmem:[%s2252_s16 + $0xb8] sm:$0xff] %v1440_v47  ;;  %v1411_v43 = vmul.f32 %v2004_v18, %v1283_v34  ;;  %v1383_v20 = vmul.f32 %v1351_v28, %v1319_v50 }
 0x1b0   : > { %v1442_v13 = vadd.f32 %v1410_v12, %v1378_v63  ;;  %v2008_v4 = vpop.eup %2007  ;;  %1473 = vst [vmem:[%s2252_s16 + $0xc0] sm:$0xff] %v1441_v25  ;;  %v1412_v2 = vmul.f32 %v2006_v22, %v1284_v52  ;;  %v1384_v15 = vmul.f32 %v1352_v16, %v1320_v29 }
 0x1b1   : > { %v1443_v3 = vadd.f32 %v1411_v43, %v1379_v14  ;;  %v1413_v10 = vmul.f32 %v2008_v4, %v1285_v23 }
 0x1b2   : > { %1474 = vst [vmem:[%s2252_s16 + $0xc8] sm:$0xff] %v1442_v13  ;;  %v1444_v24 = vadd.f32 %v1412_v2, %v1380_v44 }
 0x1b3   : > { %v2010_v31 = vpop.eup %2009  ;;  %1475 = vst [vmem:[%s2252_s16 + $0xd0] sm:$0xff] %v1443_v3  ;;  %v1445_v34 = vadd.f32 %v1413_v10, %v1381_v62 }
 0x1b4   : > { %v2012_v36 = vpop.eup %2011  ;;  %v1414_v40 = vmul.f32 %v2010_v31, %v1286_v17  ;;  %1476 = vst [vmem:[%s2252_s16 + $0xd8] sm:$0xff] %v1444_v24 }
 0x1b5   : > { %v1415_v56 = vmul.f32 %v2012_v36, %v1287_v35  ;;  %1477 = vst [vmem:[%s2252_s16 + $0xe0] sm:$0xff] %v1445_v34 }
 0x1b6   : > { %v2014_v41 = vpop.eup %2013  ;;  %v1446_v42 = vadd.f32 %v1414_v40, %v1382_v9 }
 0x1b7   : > { %v1447_v48 = vadd.f32 %v1415_v56, %v1383_v20  ;;  %v1416_v46 = vmul.f32 %v2014_v41, %v1288_v58 }
 0x1b8   : > { %1478 = vst [vmem:[%s2252_s16 + $0xe8] sm:$0xff] %v1446_v42 }
 0x1b9   : > { %1479 = vst [vmem:[%s2252_s16 + $0xf0] sm:$0xff] %v1447_v48  ;;  %v1448_v26 = vadd.f32 %v1416_v46, %v1384_v15 }
 0x1bb   : > { %1480 = vst [vmem:[%s2252_s16 + $0xf8] sm:$0xff] %v1448_v26 }
 0x1bc PF: > { %s15_s24 = sadd.s32 1, %s2069_s24   ;;  %s2826_s18 = smov %s2049_s19 }
 0x1bd   : > { %p12_p1 = scmp.ge.s32.totalorder %s15_s24, 30   ;;  %s2827_s19 = smov %s2152_s6 }
 0x1be   : > { %s2828_s20 = smov %s2061_s22  ;;  %s2829_s21 = smov %s2065_s23 }
 0x1bf   : > { %s2830_s22 = smov %s2833_s25  ;;  %s2831_s23 = smov %s2837_s26 }
 0x1c0   :  { %14 = sbr.rel (!%p12_p1) target bundleno = 4 (0x4), region = 137 }

// kernel: update_block3d_forward.16
= control target key start
LH: loop header
LB: loop body
LE: loop exit
PB: predicated region body
PF: predicated region fallthrough
CT: control target
= control target key end

     0   :  { %s1681_s12 = smov 0   ;;  %s1683_s13 = smov 0   ;;  %s2223_s0 = inlined_call_operand.vmem [shape: bf16[512,1024], index: 0, kind: input, shape index: {}]   ;;  %s2224_s1 = inlined_call_operand.vmem [shape: bf16[1024,128], index: 1, kind: input, shape index: {}]   ;;  %s2225_s2 = inlined_call_operand.vmem [shape: f32[1,128], index: 2, kind: input, shape index: {}]   ;;  %s2226_s3 = inlined_call_operand.vmem [shape: f32[512,128], index: 3, kind: output, shape index: {}]  }
   0x1   :  { %s1685_s14 = smov 0   ;;  %s1687_s15 = smov 0  }
   0x2   :  { %s1689_s16 = smov 0   ;;  %s1691_s17 = smov 0  }
   0x3   :  { %s1693_s18 = smov 0  }
   0x4 LB: > { %s25_s19 = sadd.s32 1, %s1651_s16  ;;  %s32_s20 = sadd.s32 1, %s1655_s17  ;;  %s1659_s18 = sphi %s1693_s18, %s13_s18   ;;  %s1655_s17 = sphi %s1691_s17, %s2232_s17   ;;  %s1651_s16 = sphi %s1689_s16, %s2231_s16   ;;  %s1647_s15 = sphi %s1687_s15, %s2230_s15   ;;  %s1643_s14 = sphi %s1685_s14, %s2229_s14   ;;  %s1639_s13 = sphi %s1683_s13, %s2228_s13   ;;  %s1635_s12 = sphi %s1681_s12, %s2227_s12  }
   0x5   : > { %p26_p0 = scmp.ge.s32.totalorder %s25_s19, 4  ;;  %p48_p1 = scmp.ne.s32.totalorder %s1639_s13, %s1635_s12 }
   0x6   : > { %p49_p2 = scmp.eq.s32.totalorder %s1659_s18, 0  ;;  %s41_s24 = sadd.s32 1, %s1639_s13 }
   0x7   : > { %s2234_s19 = smov (%p26_p0, %s25_s19), 0  ;;  %s2236_s20 = smov (!%p26_p0, %s32_s20), %s1655_s17 }
   0x8   : > { %p50_p3 = por %p49_p2, %p48_p1  ;;  %p34_p4 = scmp.ge.s32.totalorder %s2236_s20, 2 }
   0x9   : > { %s37_s21 = ssub.s32 %s1651_s16, %s2234_s19  ;;  %p1290_p6 = scmp.ge.s32.totalorder %s1659_s18, 8 }
   0xa   : > { %s2238_s20 = smov (%p34_p4, %s2236_s20), 0 }
   0xb   : > { %s36_s22 = ssub.s32 %s1655_s17, %s2238_s20  ;;  %162 = sbr.rel (%p1290_p6) target bundleno = 57 (0x39), region = 20 }
   0xc   : > { %s38_s23 = sor.u32 %s37_s21, %s36_s22 }
   0xd   : > { %p39_p5 = scmp.eq.s32.totalorder %s38_s23, 0 }
   0xf   : > { %s1732_s25 = scalar_select %p39_p5, %s1639_s13, %s41_s24  }
  0x12   : > { %165 = sbr.rel (!%p50_p3) target bundleno = 57 (0x39), region = 24  ;;  %s167_s26 = sand.u32 (%p50_p3), 1, %s1639_s13  }
  0x13   : > { %s1293_s27 = sshll.u32 (%p50_p3), %s1651_s16, 1  ;;  %s1291_s28 = sshll.u32 (%p50_p3), %s167_s26, 8 }
  0x14   : > { %s1356_s29 = sshll.u32 (%p50_p3), %s1655_s17, 8  ;;  %s1746_s8 = scalar_lea.vmem (%p50_p3), [#allocation2], %s1291_s28 }
  0x15   : > { %s173_s30 = sadd.s32 (%p50_p3), %s1356_s29, %s1293_s27 }
  0x16   : > { %s1295_s4 = sshll.u32 (%p50_p3), %s173_s30, 2 }
  0x17   : > { %s1741_s7 = scalar_lea.vmem (%p50_p3), %s2223_s0, %s1295_s4 }
  0x18   : > { %v265_v0 = vld [vmem:[%s1741_s7] sm:$0xff] (%p50_p3) }
  0x19   : > { %v267_v1 = vld [vmem:[%s1741_s7 + $0x20] sm:$0xff]  ;;  %266 = vst [vmem:[%s1746_s8] sm:$0xff] %v265_v0 }
  0x1a   : > { %v269_v2 = vld [vmem:[%s1741_s7 + $0x40] sm:$0xff]  ;;  %268 = vst [vmem:[%s1746_s8 + $0x8] sm:$0xff] %v267_v1 }
  0x1b   : > { %270 = vst [vmem:[%s1746_s8 + $0x10] sm:$0xff] %v269_v2  ;;  %v271_v3 = vld [vmem:[%s1741_s7 + $0x60] sm:$0xff] }
  0x1c   : > { %v273_v4 = vld [vmem:[%s1741_s7 + $0x80] sm:$0xff]  ;;  %272 = vst [vmem:[%s1746_s8 + $0x18] sm:$0xff] %v271_v3 }
  0x1d   : > { %v275_v5 = vld [vmem:[%s1741_s7 + $0xa0] sm:$0xff]  ;;  %274 = vst [vmem:[%s1746_s8 + $0x20] sm:$0xff] %v273_v4 }
  0x1e   : > { %276 = vst [vmem:[%s1746_s8 + $0x28] sm:$0xff] %v275_v5  ;;  %v277_v6 = vld [vmem:[%s1741_s7 + $0xc0] sm:$0xff] }
  0x1f   : > { %v279_v7 = vld [vmem:[%s1741_s7 + $0xe0] sm:$0xff]  ;;  %278 = vst [vmem:[%s1746_s8 + $0x30] sm:$0xff] %v277_v6 }
  0x20   : > { %v281_v8 = vld [vmem:[%s1741_s7 + $0x100] sm:$0xff]  ;;  %280 = vst [vmem:[%s1746_s8 + $0x38] sm:$0xff] %v279_v7 }
  0x21   : > { %282 = vst [vmem:[%s1746_s8 + $0x40] sm:$0xff] %v281_v8  ;;  %v283_v9 = vld [vmem:[%s1741_s7 + $0x120] sm:$0xff] }
  0x22   : > { %v285_v10 = vld [vmem:[%s1741_s7 + $0x140] sm:$0xff]  ;;  %284 = vst [vmem:[%s1746_s8 + $0x48] sm:$0xff] %v283_v9 }
  0x23   : > { %v287_v11 = vld [vmem:[%s1741_s7 + $0x160] sm:$0xff]  ;;  %286 = vst [vmem:[%s1746_s8 + $0x50] sm:$0xff] %v285_v10 }
  0x24   : > { %288 = vst [vmem:[%s1746_s8 + $0x58] sm:$0xff] %v287_v11  ;;  %v289_v12 = vld [vmem:[%s1741_s7 + $0x180] sm:$0xff] }
  0x25   : > { %v291_v13 = vld [vmem:[%s1741_s7 + $0x1a0] sm:$0xff]  ;;  %290 = vst [vmem:[%s1746_s8 + $0x60] sm:$0xff] %v289_v12 }
  0x26   : > { %v293_v14 = vld [vmem:[%s1741_s7 + $0x1c0] sm:$0xff]  ;;  %292 = vst [vmem:[%s1746_s8 + $0x68] sm:$0xff] %v291_v13 }
  0x27   : > { %294 = vst [vmem:[%s1746_s8 + $0x70] sm:$0xff] %v293_v14  ;;  %v295_v15 = vld [vmem:[%s1741_s7 + $0x1e0] sm:$0xff] }
  0x28   : > { %v297_v16 = vld [vmem:[%s1741_s7 + $0x200] sm:$0xff]  ;;  %296 = vst [vmem:[%s1746_s8 + $0x78] sm:$0xff] %v295_v15 }
  0x29   : > { %v299_v17 = vld [vmem:[%s1741_s7 + $0x220] sm:$0xff]  ;;  %298 = vst [vmem:[%s1746_s8 + $0x80] sm:$0xff] %v297_v16 }
  0x2a   : > { %300 = vst [vmem:[%s1746_s8 + $0x88] sm:$0xff] %v299_v17  ;;  %v301_v18 = vld [vmem:[%s1741_s7 + $0x240] sm:$0xff] }
  0x2b   : > { %v303_v19 = vld [vmem:[%s1741_s7 + $0x260] sm:$0xff]  ;;  %302 = vst [vmem:[%s1746_s8 + $0x90] sm:$0xff] %v301_v18 }
  0x2c   : > { %v305_v20 = vld [vmem:[%s1741_s7 + $0x280] sm:$0xff]  ;;  %304 = vst [vmem:[%s1746_s8 + $0x98] sm:$0xff] %v303_v19 }
  0x2d   : > { %306 = vst [vmem:[%s1746_s8 + $0xa0] sm:$0xff] %v305_v20  ;;  %v307_v21 = vld [vmem:[%s1741_s7 + $0x2a0] sm:$0xff] }
  0x2e   : > { %v309_v22 = vld [vmem:[%s1741_s7 + $0x2c0] sm:$0xff]  ;;  %308 = vst [vmem:[%s1746_s8 + $0xa8] sm:$0xff] %v307_v21 }
  0x2f   : > { %v311_v23 = vld [vmem:[%s1741_s7 + $0x2e0] sm:$0xff]  ;;  %310 = vst [vmem:[%s1746_s8 + $0xb0] sm:$0xff] %v309_v22 }
  0x30   : > { %312 = vst [vmem:[%s1746_s8 + $0xb8] sm:$0xff] %v311_v23  ;;  %v313_v24 = vld [vmem:[%s1741_s7 + $0x300] sm:$0xff] }
  0x31   : > { %v315_v25 = vld [vmem:[%s1741_s7 + $0x320] sm:$0xff]  ;;  %314 = vst [vmem:[%s1746_s8 + $0xc0] sm:$0xff] %v313_v24 }
  0x32   : > { %v317_v26 = vld [vmem:[%s1741_s7 + $0x340] sm:$0xff]  ;;  %316 = vst [vmem:[%s1746_s8 + $0xc8] sm:$0xff] %v315_v25 }
  0x33   : > { %318 = vst [vmem:[%s1746_s8 + $0xd0] sm:$0xff] %v317_v26  ;;  %v319_v27 = vld [vmem:[%s1741_s7 + $0x360] sm:$0xff] }
  0x34   : > { %v321_v28 = vld [vmem:[%s1741_s7 + $0x380] sm:$0xff]  ;;  %320 = vst [vmem:[%s1746_s8 + $0xd8] sm:$0xff] %v319_v27 }
  0x35   : > { %v323_v29 = vld [vmem:[%s1741_s7 + $0x3a0] sm:$0xff]  ;;  %322 = vst [vmem:[%s1746_s8 + $0xe0] sm:$0xff] %v321_v28 }
  0x36   : > { %324 = vst [vmem:[%s1746_s8 + $0xe8] sm:$0xff] %v323_v29  ;;  %v325_v30 = vld [vmem:[%s1741_s7 + $0x3c0] sm:$0xff] }
  0x37   : > { %v327_v31 = vld [vmem:[%s1741_s7 + $0x3e0] sm:$0xff]  ;;  %326 = vst [vmem:[%s1746_s8 + $0xf0] sm:$0xff] %v325_v30 }
  0x38   : > { %328 = vst [vmem:[%s1746_s8 + $0xf8] sm:$0xff] %v327_v31 }
  0x39 PF: > { %p1296_p7 = scmp.ge.s32.totalorder %s1659_s18, 1  ;;  %p345_p8 = scmp.lt.s32.totalorder %s1659_s18, 9 }
  0x3b   : > { %p346_p9 = pnand %p1296_p7, %p345_p8 }
  0x3c   : > { %s1298_s9 = sshll.u32 (!%p346_p9), %s1643_s14, 5  ;;  %s1300_s10 = sshll.u32 (!%p346_p9), %s1647_s15, 5 }
  0x3d   : > { %349 = sbr.rel (%p346_p9) target bundleno = 421 (0x1a5), region = 66  ;;  %p392_p10 = scmp.lt.s32.totalorder (!%p346_p9), %s1298_s9, 127 }
  0x3e   : > { %p404_p11 = scmp.lt.s32.totalorder (!%p346_p9), %s1300_s10, 63  ;;  %s352_s28 = sand.u32 (!%p346_p9), 1, %s1635_s12  }
  0x3f   : > { %s1297_s29 = sshll.u32 (!%p346_p9), %s352_s28, 8  ;;  %p1350_p12 = scmp.ne.s32.totalorder (!%p346_p9), %s1643_s14, 0 }
  0x40   : > { %s1835_s30 = scalar_lea.vmem (!%p346_p9), [#allocation2], %s1297_s29 }
  0x41   : > { %v1559_v43 = vld [vmem:[%s1835_s30 + $0x4] ss:$8 sps:$4 sm:$0xff] (!%p346_p9)   ;;  %v1557_v50 = vld [vmem:[%s1835_s30] ss:$8 sps:$4 sm:$0xff] (!%p346_p9)   ;;  %v1563_v52 = vld [vmem:[%s1835_s30 + $0x14] ss:$8 sps:$4 sm:$0xff] (!%p346_p9)  }
  0x42   : > { %v1562_v44 = vld [vmem:[%s1835_s30 + $0x84] ss:$8 sps:$4 sm:$0xff] (!%p346_p9)   ;;  %765 = vmatprep.mubr.bf16.mxu0 (!%p346_p9), %v1559_v43  ;;  %v1560_v51 = vld [vmem:[%s1835_s30 + $0x80] ss:$8 sps:$4 sm:$0xff] (!%p346_p9)   ;;  %v1565_v53 = vld [vmem:[%s1835_s30 + $0x94] ss:$8 sps:$4 sm:$0xff] (!%p346_p9)  }
  0x43   : > { %829 = vmatprep.mubr.bf16.mxu1 (!%p346_p9), %v1562_v44  ;;  %v1567_v54 = vld [vmem:[%s1835_s30 + $0x10] ss:$8 sps:$4 sm:$0xff] (!%p346_p9)   ;;  %v1569_v56 = vld [vmem:[%s1835_s30 + $0x24] ss:$8 sps:$4 sm:$0xff] (!%p346_p9)   ;;  %v1573_v58 = vld [vmem:[%s1835_s30 + $0x20] ss:$8 sps:$4 sm:$0xff] (!%p346_p9)  }
  0x44   : > { %s2240_s9 = smov (!%p392_p10, %s1298_s9), 127  ;;  %s2242_s10 = smov (!%p404_p11, %s1300_s10), 63  ;;  %v1568_v55 = vld [vmem:[%s1835_s30 + $0x90] ss:$8 sps:$4 sm:$0xff]   ;;  %v1571_v57 = vld [vmem:[%s1835_s30 + $0xa4] ss:$8 sps:$4 sm:$0xff]  }
  0x45   : > { %s1299_s11 = sshll.u32 %s2240_s9, 2  ;;  %s1301_s24 = sshll.u32 %s2242_s10, 3  ;;  %v1574_v59 = vld [vmem:[%s1835_s30 + $0xa0] ss:$8 sps:$4 sm:$0xff]   ;;  %v1575_v60 = vld [vmem:[%s1835_s30 + $0x34] ss:$8 sps:$4 sm:$0xff]  }
  0x46   : > { %s1816_s23 = scalar_lea.vmem %s2224_s1, %s1299_s11  ;;  %s1821_s15 = scalar_lea.vmem %s2226_s3, %s1301_s24  ;;  %v1577_v61 = vld [vmem:[%s1835_s30 + $0xb4] ss:$8 sps:$4 sm:$0xff]   ;;  %v1579_v62 = vld [vmem:[%s1835_s30 + $0x30] ss:$8 sps:$4 sm:$0xff]   ;;  %v1581_v0 = vld [vmem:[%s1835_s30 + $0x44] ss:$8 sps:$4 sm:$0xff]  }
  0x47   : > { %v1541_v32 = vld [vmem:[%s1816_s23 + $0x40] sm:$0xff]   ;;  %v1543_v34 = vld [vmem:[%s1816_s23 + $0x48] sm:$0xff]   ;;  %v1545_v36 = vld [vmem:[%s1816_s23 + $0x50] sm:$0xff]  }
  0x48   : > { %v1542_v33 = vld [vmem:[%s1816_s23] sm:$0xff]   ;;  %1357 = vmatprep.subr.bf16.mxu0 %v1541_v32  ;;  %1469 = vmatprep.subr.bf16.mxu1 %v1541_v32  ;;  %v1544_v35 = vld [vmem:[%s1816_s23 + $0x8] sm:$0xff]   ;;  %v1546_v37 = vld [vmem:[%s1816_s23 + $0x10] sm:$0xff]  }
  0x49   : > { %1358 = vmatpush3.bf16.msra.mxu0 %v1542_v33  ;;  %1477 = vmatpush3.bf16.msra.mxu1 %v1542_v33  ;;  %v1547_v38 = vld [vmem:[%s1816_s23 + $0x58] sm:$0xff]   ;;  %v1549_v40 = vld [vmem:[%s1816_s23 + $0x60] sm:$0xff]   ;;  %v1551_v42 = vld [vmem:[%s1816_s23 + $0x68] sm:$0xff]  }
  0x4a   : > { %1359 = vmatprep.subr.bf16.mxu0 %v1543_v34  ;;  %1470 = vmatprep.subr.bf16.mxu1 %v1543_v34  ;;  %v1548_v39 = vld [vmem:[%s1816_s23 + $0x18] sm:$0xff]   ;;  %v1550_v41 = vld [vmem:[%s1816_s23 + $0x20] sm:$0xff]   ;;  %v1552_v45 = vld [vmem:[%s1816_s23 + $0x28] sm:$0xff]  }
  0x4b   : > { %v1553_v46 = vld [vmem:[%s1816_s23 + $0x70] sm:$0xff]   ;;  %v1555_v48 = vld [vmem:[%s1816_s23 + $0x78] sm:$0xff]   ;;  %v1583_v1 = vld [vmem:[%s1835_s30 + $0xc4] ss:$8 sps:$4 sm:$0xff]  }
  0x4c   : > { %v1554_v47 = vld [vmem:[%s1816_s23 + $0x30] sm:$0xff]   ;;  %v1556_v49 = vld [vmem:[%s1816_s23 + $0x38] sm:$0xff]   ;;  %v1585_v2 = vld [vmem:[%s1835_s30 + $0x40] ss:$8 sps:$4 sm:$0xff]  }
  0x4d   : > { %1360 = vmatpush3.bf16.msra.mxu0 %v1544_v35  ;;  %1478 = vmatpush3.bf16.msra.mxu1 %v1544_v35  ;;  %v1580_v63 = vld [vmem:[%s1835_s30 + $0xb0] ss:$8 sps:$4 sm:$0xff]   ;;  %v1586_v3 = vld [vmem:[%s1835_s30 + $0xc0] ss:$8 sps:$4 sm:$0xff]   ;;  %v1587_v4 = vld [vmem:[%s1835_s30 + $0x54] ss:$8 sps:$4 sm:$0xff]  }
  0x4e   : > { %1361 = vmatprep.subr.bf16.mxu0 %v1545_v36  ;;  %1471 = vmatprep.subr.bf16.mxu1 %v1545_v36  ;;  %v1589_v5 = vld [vmem:[%s1835_s30 + $0xd4] ss:$8 sps:$4 sm:$0xff]   ;;  %v1591_v6 = vld [vmem:[%s1835_s30 + $0x50] ss:$8 sps:$4 sm:$0xff]   ;;  %v1593_v8 = vld [vmem:[%s1835_s30 + $0x64] ss:$8 sps:$4 sm:$0xff]  }
  0x4f   : > { %v1592_v7 = vld [vmem:[%s1835_s30 + $0xd0] ss:$8 sps:$4 sm:$0xff]   ;;  %v1595_v9 = vld [vmem:[%s1835_s30 + $0xe4] ss:$8 sps:$4 sm:$0xff]   ;;  %v1597_v10 = vld [vmem:[%s1835_s30 + $0x60] ss:$8 sps:$4 sm:$0xff]  }
  0x50   : > { %v1598_v11 = vld [vmem:[%s1835_s30 + $0xe0] ss:$8 sps:$4 sm:$0xff]   ;;  %v1599_v12 = vld [vmem:[%s1835_s30 + $0x74] ss:$8 sps:$4 sm:$0xff]   ;;  %v1603_v14 = vld [vmem:[%s1835_s30 + $0x70] ss:$8 sps:$4 sm:$0xff]  }
  0x51   : > { %1362 = vmatpush3.bf16.msra.mxu0 %v1546_v37  ;;  %1479 = vmatpush3.bf16.msra.mxu1 %v1546_v37  ;;  %v1601_v13 = vld [vmem:[%s1835_s30 + $0xf4] ss:$8 sps:$4 sm:$0xff]   ;;  %v1604_v15 = vld [vmem:[%s1835_s30 + $0xf0] ss:$8 sps:$4 sm:$0xff]  }
  0x52   : > { %1363 = vmatprep.subr.bf16.mxu0 %v1547_v38  ;;  %1472 = vmatprep.subr.bf16.mxu1 %v1547_v38 }
  0x55   : > { %1364 = vmatpush3.bf16.msra.mxu0 %v1548_v39  ;;  %1480 = vmatpush3.bf16.msra.mxu1 %v1548_v39 }
  0x56   : > { %1365 = vmatprep.subr.bf16.mxu0 %v1549_v40  ;;  %1473 = vmatprep.subr.bf16.mxu1 %v1549_v40 }
  0x59   : > { %1366 = vmatpush3.bf16.msra.mxu0 %v1550_v41  ;;  %1481 = vmatpush3.bf16.msra.mxu1 %v1550_v41 }
  0x5a   : > { %1367 = vmatprep.subr.bf16.mxu0 %v1551_v42  ;;  %1474 = vmatprep.subr.bf16.mxu1 %v1551_v42 }
  0x5d   : > { %1368 = vmatpush3.bf16.msra.mxu0 %v1552_v45  ;;  %1482 = vmatpush3.bf16.msra.mxu1 %v1552_v45 }
  0x5e   : > { %1369 = vmatprep.subr.bf16.mxu0 %v1553_v46  ;;  %1475 = vmatprep.subr.bf16.mxu1 %v1553_v46 }
  0x61   : > { %1370 = vmatpush3.bf16.msra.mxu0 %v1554_v47  ;;  %1483 = vmatpush3.bf16.msra.mxu1 %v1554_v47 }
  0x62   : > { %1371 = vmatprep.subr.bf16.mxu0 %v1555_v48  ;;  %1476 = vmatprep.subr.bf16.mxu1 %v1555_v48 }
  0x65   : > { %1372 = vmatpush3.bf16.msra.mxu0 %v1556_v49  ;;  %1484 = vmatpush3.bf16.msra.mxu1 %v1556_v49 }
  0x68   : > { %766 = vmatmul.mubr.bf16.vlgmr.msra.gmra.mrb[0].mxu0 %v1557_v50  ;;  %830 = vmatmul.mubr.bf16.vlgmr.msra.gmra.mrb[0].mxu1 %v1560_v51 }
  0x69   : > { %773 = vmatprep.mubr.bf16.mxu0 %v1563_v52  ;;  %837 = vmatprep.mubr.bf16.mxu1 %v1565_v53 }
  0x70   : > { %774 = vmatmul.mubr.bf16.gmra.mrb[4].mxu0 %v1567_v54  ;;  %838 = vmatmul.mubr.bf16.gmra.mrb[4].mxu1 %v1568_v55 }
  0x71   : > { %781 = vmatprep.mubr.bf16.mxu0 %v1569_v56  ;;  %845 = vmatprep.mubr.bf16.mxu1 %v1571_v57 }
  0x78   : > { %782 = vmatmul.mubr.bf16.gmra.mrb[8].mxu0 %v1573_v58  ;;  %846 = vmatmul.mubr.bf16.gmra.mrb[8].mxu1 %v1574_v59 }
  0x79   : > { %789 = vmatprep.mubr.bf16.mxu0 %v1575_v60  ;;  %853 = vmatprep.mubr.bf16.mxu1 %v1577_v61 }
  0x80   : > { %790 = vmatmul.mubr.bf16.gmra.mrb[12].mxu0 %v1579_v62  ;;  %854 = vmatmul.mubr.bf16.gmra.mrb[12].mxu1 %v1580_v63 }
  0x81   : > { %797 = vmatprep.mubr.bf16.mxu0 %v1581_v0  ;;  %861 = vmatprep.mubr.bf16.mxu1 %v1583_v1 }
  0x88   : > { %798 = vmatmul.mubr.bf16.gmra.mrb[16].mxu0 %v1585_v2  ;;  %862 = vmatmul.mubr.bf16.gmra.mrb[16].mxu1 %v1586_v3 }
  0x89   : > { %805 = vmatprep.mubr.bf16.mxu0 %v1587_v4  ;;  %869 = vmatprep.mubr.bf16.mxu1 %v1589_v5 }
  0x90   : > { %806 = vmatmul.mubr.bf16.gmra.mrb[20].mxu0 %v1591_v6  ;;  %870 = vmatmul.mubr.bf16.gmra.mrb[20].mxu1 %v1592_v7 }
  0x91   : > { %813 = vmatprep.mubr.bf16.mxu0 %v1593_v8  ;;  %877 = vmatprep.mubr.bf16.mxu1 %v1595_v9 }
  0x98   : > { %814 = vmatmul.mubr.bf16.gmra.mrb[24].mxu0 %v1597_v10  ;;  %878 = vmatmul.mubr.bf16.gmra.mrb[24].mxu1 %v1598_v11 }
  0x99   : > { %821 = vmatprep.mubr.bf16.mxu0 %v1599_v12  ;;  %885 = vmatprep.mubr.bf16.mxu1 %v1601_v13 }
  0xa0   : > { %822 = vmatmul.mubr.bf16.gmra.mrb[28].mxu0 %v1603_v14  ;;  %886 = vmatmul.mubr.bf16.gmra.mrb[28].mxu1 %v1604_v15 }
 0x13b   : > { %v1373_v16 = vpop.f32.mrb[0].mxu0  ;;  %v1421_v17 = vpop.f32.mrb[0].mxu1 }
 0x13c   : > { %v1374_v18 = vpop.f32.mrb[1].mxu0  ;;  %v1422_v19 = vpop.f32.mrb[1].mxu1 }
 0x13d   : > { %v1874_v20 = vadd.f32 %v1374_v18, %v1373_v16  ;;  %v1876_v21 = vadd.f32 %v1422_v19, %v1421_v17  ;;  %v1376_v22 = vpop.f32.mrb[2].mxu0  ;;  %v1424_v23 = vpop.f32.mrb[2].mxu1 }
 0x13e   : > { %v1377_v24 = vpop.f32.mrb[3].mxu0  ;;  %v1425_v25 = vpop.f32.mrb[3].mxu1 }
 0x13f   : > { %v1878_v26 = vadd.f32 %v1377_v24, %v1376_v22  ;;  %v1880_v27 = vadd.f32 %v1425_v25, %v1424_v23  ;;  %898 = vst [vmem:[%s1821_s15] sm:$0xff] (!%p1350_p12), %v1874_v20  ;;  %914 = vst [vmem:[%s1821_s15 + $0x80] sm:$0xff] (!%p1350_p12), %v1876_v21 }
 0x141   : > { %899 = vst [vmem:[%s1821_s15 + $0x8] sm:$0xff] (!%p1350_p12), %v1878_v26  ;;  %915 = vst [vmem:[%s1821_s15 + $0x88] sm:$0xff] (!%p1350_p12), %v1880_v27 }
 0x143   : > { %v1379_v28 = vpop.f32.mrb[4].mxu0  ;;  %v1427_v29 = vpop.f32.mrb[4].mxu1 }
 0x144   : > { %v1380_v30 = vpop.f32.mrb[5].mxu0  ;;  %v1428_v31 = vpop.f32.mrb[5].mxu1 }
 0x145   : > { %v1882_v32 = vadd.f32 %v1380_v30, %v1379_v28  ;;  %v1884_v33 = vadd.f32 %v1428_v31, %v1427_v29  ;;  %v1382_v34 = vpop.f32.mrb[6].mxu0  ;;  %v1430_v35 = vpop.f32.mrb[6].mxu1 }
 0x146   : > { %v1383_v36 = vpop.f32.mrb[7].mxu0  ;;  %v1431_v37 = vpop.f32.mrb[7].mxu1 }
 0x147   : > { %v1886_v38 = vadd.f32 %v1383_v36, %v1382_v34  ;;  %v1888_v39 = vadd.f32 %v1431_v37, %v1430_v35  ;;  %900 = vst [vmem:[%s1821_s15 + $0x10] sm:$0xff] (!%p1350_p12), %v1882_v32  ;;  %916 = vst [vmem:[%s1821_s15 + $0x90] sm:$0xff] (!%p1350_p12), %v1884_v33 }
 0x149   : > { %901 = vst [vmem:[%s1821_s15 + $0x18] sm:$0xff] (!%p1350_p12), %v1886_v38  ;;  %917 = vst [vmem:[%s1821_s15 + $0x98] sm:$0xff] (!%p1350_p12), %v1888_v39 }
 0x14b   : > { %v1385_v40 = vpop.f32.mrb[8].mxu0  ;;  %v1433_v41 = vpop.f32.mrb[8].mxu1 }
 0x14c   : > { %v1386_v42 = vpop.f32.mrb[9].mxu0  ;;  %v1434_v43 = vpop.f32.mrb[9].mxu1 }
 0x14d   : > { %v1890_v44 = vadd.f32 %v1386_v42, %v1385_v40  ;;  %v1892_v45 = vadd.f32 %v1434_v43, %v1433_v41  ;;  %v1388_v46 = vpop.f32.mrb[10].mxu0  ;;  %v1436_v47 = vpop.f32.mrb[10].mxu1 }
 0x14e   : > { %v1389_v48 = vpop.f32.mrb[11].mxu0  ;;  %v1437_v49 = vpop.f32.mrb[11].mxu1 }
 0x14f   : > { %v1894_v50 = vadd.f32 %v1389_v48, %v1388_v46  ;;  %v1896_v51 = vadd.f32 %v1437_v49, %v1436_v47  ;;  %902 = vst [vmem:[%s1821_s15 + $0x20] sm:$0xff] (!%p1350_p12), %v1890_v44  ;;  %918 = vst [vmem:[%s1821_s15 + $0xa0] sm:$0xff] (!%p1350_p12), %v1892_v45 }
 0x151   : > { %903 = vst [vmem:[%s1821_s15 + $0x28] sm:$0xff] (!%p1350_p12), %v1894_v50  ;;  %919 = vst [vmem:[%s1821_s15 + $0xa8] sm:$0xff] (!%p1350_p12), %v1896_v51 }
 0x153   : > { %v1391_v52 = vpop.f32.mrb[12].mxu0  ;;  %v1439_v53 = vpop.f32.mrb[12].mxu1 }
 0x154   : > { %v1392_v54 = vpop.f32.mrb[13].mxu0  ;;  %v1440_v55 = vpop.f32.mrb[13].mxu1 }
 0x155   : > { %v1898_v56 = vadd.f32 %v1392_v54, %v1391_v52  ;;  %v1900_v57 = vadd.f32 %v1440_v55, %v1439_v53  ;;  %v1394_v58 = vpop.f32.mrb[14].mxu0  ;;  %v1442_v59 = vpop.f32.mrb[14].mxu1 }
 0x156   : > { %v1395_v60 = vpop.f32.mrb[15].mxu0  ;;  %v1443_v61 = vpop.f32.mrb[15].mxu1 }
 0x157   : > { %v1902_v62 = vadd.f32 %v1395_v60, %v1394_v58  ;;  %v1904_v63 = vadd.f32 %v1443_v61, %v1442_v59  ;;  %904 = vst [vmem:[%s1821_s15 + $0x30] sm:$0xff] (!%p1350_p12), %v1898_v56  ;;  %920 = vst [vmem:[%s1821_s15 + $0xb0] sm:$0xff] (!%p1350_p12), %v1900_v57 }
 0x159   : > { %905 = vst [vmem:[%s1821_s15 + $0x38] sm:$0xff] (!%p1350_p12), %v1902_v62  ;;  %921 = vst [vmem:[%s1821_s15 + $0xb8] sm:$0xff] (!%p1350_p12), %v1904_v63 }
 0x15b   : > { %v1397_v0 = vpop.f32.mrb[16].mxu0  ;;  %v1445_v1 = vpop.f32.mrb[16].mxu1 }
 0x15c   : > { %v1398_v2 = vpop.f32.mrb[17].mxu0  ;;  %v1446_v3 = vpop.f32.mrb[17].mxu1 }
 0x15d   : > { %v1906_v4 = vadd.f32 %v1398_v2, %v1397_v0  ;;  %v1908_v5 = vadd.f32 %v1446_v3, %v1445_v1  ;;  %v1400_v6 = vpop.f32.mrb[18].mxu0  ;;  %v1448_v7 = vpop.f32.mrb[18].mxu1 }
 0x15e   : > { %v1401_v8 = vpop.f32.mrb[19].mxu0  ;;  %v1449_v9 = vpop.f32.mrb[19].mxu1 }
 0x15f   : > { %v1910_v10 = vadd.f32 %v1401_v8, %v1400_v6  ;;  %v1912_v11 = vadd.f32 %v1449_v9, %v1448_v7  ;;  %906 = vst [vmem:[%s1821_s15 + $0x40] sm:$0xff] (!%p1350_p12), %v1906_v4  ;;  %922 = vst [vmem:[%s1821_s15 + $0xc0] sm:$0xff] (!%p1350_p12), %v1908_v5 }
 0x161   : > { %907 = vst [vmem:[%s1821_s15 + $0x48] sm:$0xff] (!%p1350_p12), %v1910_v10  ;;  %923 = vst [vmem:[%s1821_s15 + $0xc8] sm:$0xff] (!%p1350_p12), %v1912_v11 }
 0x163   : > { %v1403_v12 = vpop.f32.mrb[20].mxu0  ;;  %v1451_v13 = vpop.f32.mrb[20].mxu1 }
 0x164   : > { %v1404_v14 = vpop.f32.mrb[21].mxu0  ;;  %v1452_v15 = vpop.f32.mrb[21].mxu1 }
 0x165   : > { %v1914_v16 = vadd.f32 %v1404_v14, %v1403_v12  ;;  %v1916_v17 = vadd.f32 %v1452_v15, %v1451_v13  ;;  %v1406_v18 = vpop.f32.mrb[22].mxu0  ;;  %v1454_v19 = vpop.f32.mrb[22].mxu1 }
 0x166   : > { %v1407_v22 = vpop.f32.mrb[23].mxu0  ;;  %v1455_v23 = vpop.f32.mrb[23].mxu1 }
 0x167   : > { %v1918_v24 = vadd.f32 %v1407_v22, %v1406_v18  ;;  %v1920_v25 = vadd.f32 %v1455_v23, %v1454_v19  ;;  %908 = vst [vmem:[%s1821_s15 + $0x50] sm:$0xff] (!%p1350_p12), %v1914_v16  ;;  %924 = vst [vmem:[%s1821_s15 + $0xd0] sm:$0xff] (!%p1350_p12), %v1916_v17 }
 0x169   : > { %909 = vst [vmem:[%s1821_s15 + $0x58] sm:$0xff] (!%p1350_p12), %v1918_v24  ;;  %925 = vst [vmem:[%s1821_s15 + $0xd8] sm:$0xff] (!%p1350_p12), %v1920_v25 }
 0x16b   : > { %v1409_v28 = vpop.f32.mrb[24].mxu0  ;;  %v1457_v29 = vpop.f32.mrb[24].mxu1 }
 0x16c   : > { %v1410_v30 = vpop.f32.mrb[25].mxu0  ;;  %v1458_v31 = vpop.f32.mrb[25].mxu1 }
 0x16d   : > { %v1922_v34 = vadd.f32 %v1410_v30, %v1409_v28  ;;  %v1924_v35 = vadd.f32 %v1458_v31, %v1457_v29  ;;  %v1412_v36 = vpop.f32.mrb[26].mxu0  ;;  %v1460_v37 = vpop.f32.mrb[26].mxu1 }
 0x16e   : > { %v1413_v40 = vpop.f32.mrb[27].mxu0  ;;  %v1461_v41 = vpop.f32.mrb[27].mxu1 }
 0x16f   : > { %v1926_v42 = vadd.f32 %v1413_v40, %v1412_v36  ;;  %v1928_v43 = vadd.f32 %v1461_v41, %v1460_v37  ;;  %910 = vst [vmem:[%s1821_s15 + $0x60] sm:$0xff] (!%p1350_p12), %v1922_v34  ;;  %926 = vst [vmem:[%s1821_s15 + $0xe0] sm:$0xff] (!%p1350_p12), %v1924_v35 }
 0x171   : > { %897 = sbr.rel (%p1350_p12) target bundleno = 378 (0x17a), region = 74  ;;  %911 = vst [vmem:[%s1821_s15 + $0x68] sm:$0xff] (!%p1350_p12), %v1926_v42  ;;  %927 = vst [vmem:[%s1821_s15 + $0xe8] sm:$0xff] (!%p1350_p12), %v1928_v43 }
 0x173   : > { %v1415_v46 = vpop.f32.mrb[28].mxu0  ;;  %v1463_v47 = vpop.f32.mrb[28].mxu1 }
 0x174   : > { %v1416_v48 = vpop.f32.mrb[29].mxu0  ;;  %v1464_v49 = vpop.f32.mrb[29].mxu1 }
 0x175   : > { %v1930_v52 = vadd.f32 %v1416_v48, %v1415_v46  ;;  %v1932_v53 = vadd.f32 %v1464_v49, %v1463_v47  ;;  %v1418_v54 = vpop.f32.mrb[30].mxu0  ;;  %v1466_v55 = vpop.f32.mrb[30].mxu1 }
 0x176   : > { %v1419_v58 = vpop.f32.mrb[31].mxu0  ;;  %v1467_v59 = vpop.f32.mrb[31].mxu1 }
 0x177   : > { %v1934_v60 = vadd.f32 %v1419_v58, %v1418_v54  ;;  %v1936_v61 = vadd.f32 %v1467_v59, %v1466_v55  ;;  %912 = vst [vmem:[%s1821_s15 + $0x70] sm:$0xff] (!%p1350_p12), %v1930_v52  ;;  %928 = vst [vmem:[%s1821_s15 + $0xf0] sm:$0xff] (!%p1350_p12), %v1932_v53 }
 0x179   : > { %913 = vst [vmem:[%s1821_s15 + $0x78] sm:$0xff] %v1934_v60  ;;  %929 = vst [vmem:[%s1821_s15 + $0xf8] sm:$0xff] %v1936_v61 }
 0x17a PF: > { %p1351_p13 = scmp.le.s32.totalorder %s1643_s14, 0 }
 0x17b   : > { %v934_v0 = vld [vmem:[%s1821_s15] sm:$0xff] (!%p1351_p13)  ;;  %v935_v1 = vld [vmem:[%s1821_s15 + $0x8] sm:$0xff] (!%p1351_p13)  ;;  %v936_v2 = vld [vmem:[%s1821_s15 + $0x10] sm:$0xff] (!%p1351_p13) }
 0x17c   : > { %933 = sbr.rel (%p1351_p13) target bundleno = 398 (0x18e), region = 78  ;;  %v966_v3 = vadd.f32 (!%p1351_p13), %v1874_v20, %v934_v0  ;;  %v967_v6 = vadd.f32 (!%p1351_p13), %v1878_v26, %v935_v1  ;;  %v968_v7 = vadd.f32 (!%p1351_p13), %v1882_v32, %v936_v2  ;;  %v937_v8 = vld [vmem:[%s1821_s15 + $0x18] sm:$0xff] (!%p1351_p13)  ;;  %v938_v9 = vld [vmem:[%s1821_s15 + $0x20] sm:$0xff] (!%p1351_p13)  ;;  %v939_v12 = vld [vmem:[%s1821_s15 + $0x28] sm:$0xff] (!%p1351_p13) }
 0x17d   : > { %v969_v13 = vadd.f32 (!%p1351_p13), %v1886_v38, %v937_v8  ;;  %v970_v14 = vadd.f32 (!%p1351_p13), %v1890_v44, %v938_v9  ;;  %v971_v15 = vadd.f32 (!%p1351_p13), %v1894_v50, %v939_v12  ;;  %v940_v20 = vld [vmem:[%s1821_s15 + $0x30] sm:$0xff] (!%p1351_p13)  ;;  %v941_v18 = vld [vmem:[%s1821_s15 + $0x38] sm:$0xff] (!%p1351_p13)  ;;  %v942_v26 = vld [vmem:[%s1821_s15 + $0x40] sm:$0xff] (!%p1351_p13) }
 0x17e   : > { %998 = vst [vmem:[%s1821_s15] sm:$0xff] (!%p1351_p13), %v966_v3  ;;  %999 = vst [vmem:[%s1821_s15 + $0x8] sm:$0xff] (!%p1351_p13), %v967_v6  ;;  %v972_v32 = vadd.f32 (!%p1351_p13), %v1898_v56, %v940_v20  ;;  %v973_v38 = vadd.f32 (!%p1351_p13), %v1902_v62, %v941_v18  ;;  %v974_v44 = vadd.f32 (!%p1351_p13), %v1906_v4, %v942_v26  ;;  %v943_v19 = vld [vmem:[%s1821_s15 + $0x48] sm:$0xff] (!%p1351_p13)  ;;  %v944_v50 = vld [vmem:[%s1821_s15 + $0x50] sm:$0xff] (!%p1351_p13) }
 0x17f   : > { %1000 = vst [vmem:[%s1821_s15 + $0x10] sm:$0xff] (!%p1351_p13), %v968_v7  ;;  %v945_v22 = vld [vmem:[%s1821_s15 + $0x58] sm:$0xff] (!%p1351_p13)  ;;  %1001 = vst [vmem:[%s1821_s15 + $0x18] sm:$0xff] (!%p1351_p13), %v969_v13  ;;  %v975_v23 = vadd.f32 (!%p1351_p13), %v1910_v10, %v943_v19  ;;  %v976_v56 = vadd.f32 (!%p1351_p13), %v1914_v16, %v944_v50  ;;  %v946_v28 = vld [vmem:[%s1821_s15 + $0x60] sm:$0xff] (!%p1351_p13) }
 0x180   : > { %1002 = vst [vmem:[%s1821_s15 + $0x20] sm:$0xff] (!%p1351_p13), %v970_v14  ;;  %1003 = vst [vmem:[%s1821_s15 + $0x28] sm:$0xff] (!%p1351_p13), %v971_v15  ;;  %v977_v62 = vadd.f32 (!%p1351_p13), %v1918_v24, %v945_v22  ;;  %v947_v4 = vld [vmem:[%s1821_s15 + $0x68] sm:$0xff] (!%p1351_p13)  ;;  %v948_v29 = vld [vmem:[%s1821_s15 + $0x70] sm:$0xff] (!%p1351_p13)  ;;  %v978_v30 = vadd.f32 (!%p1351_p13), %v1922_v34, %v946_v28 }
 0x181   : > { %1004 = vst [vmem:[%s1821_s15 + $0x30] sm:$0xff] (!%p1351_p13), %v972_v32  ;;  %1005 = vst [vmem:[%s1821_s15 + $0x38] sm:$0xff] (!%p1351_p13), %v973_v38  ;;  %v979_v10 = vadd.f32 (!%p1351_p13), %v1926_v42, %v947_v4  ;;  %v980_v16 = vadd.f32 (!%p1351_p13), %v1930_v52, %v948_v29  ;;  %v949_v31 = vld [vmem:[%s1821_s15 + $0x78] sm:$0xff] (!%p1351_p13)  ;;  %v950_v24 = vld [vmem:[%s1821_s15 + $0x80] sm:$0xff] (!%p1351_p13) }
 0x182   : > { %1006 = vst [vmem:[%s1821_s15 + $0x40] sm:$0xff] (!%p1351_p13), %v974_v44  ;;  %v951_v36 = vld [vmem:[%s1821_s15 + $0x88] sm:$0xff] (!%p1351_p13)  ;;  %1007 = vst [vmem:[%s1821_s15 + $0x48] sm:$0xff] (!%p1351_p13), %v975_v23  ;;  %v981_v37 = vadd.f32 (!%p1351_p13), %v1934_v60, %v949_v31  ;;  %v982_v34 = vadd.f32 (!%p1351_p13), %v1876_v21, %v950_v24  ;;  %v952_v41 = vld [vmem:[%s1821_s15 + $0x90] sm:$0xff] (!%p1351_p13) }
 0x183   : > { %1008 = vst [vmem:[%s1821_s15 + $0x50] sm:$0xff] %v976_v56  ;;  %1009 = vst [vmem:[%s1821_s15 + $0x58] sm:$0xff] %v977_v62  ;;  %v983_v40 = vadd.f32 %v1880_v27, %v951_v36  ;;  %v953_v42 = vld [vmem:[%s1821_s15 + $0x98] sm:$0xff]  ;;  %v954_v46 = vld [vmem:[%s1821_s15 + $0xa0] sm:$0xff]  ;;  %v984_v47 = vadd.f32 %v1884_v33, %v952_v41 }
 0x184   : > { %1010 = vst [vmem:[%s1821_s15 + $0x60] sm:$0xff] %v978_v30  ;;  %1011 = vst [vmem:[%s1821_s15 + $0x68] sm:$0xff] %v979_v10  ;;  %v985_v48 = vadd.f32 %v1888_v39, %v953_v42  ;;  %v986_v21 = vadd.f32 %v1892_v45, %v954_v46  ;;  %v955_v49 = vld [vmem:[%s1821_s15 + $0xa8] sm:$0xff]  ;;  %v956_v27 = vld [vmem:[%s1821_s15 + $0xb0] sm:$0xff] }
 0x185   : > { %1012 = vst [vmem:[%s1821_s15 + $0x70] sm:$0xff] %v980_v16  ;;  %v957_v52 = vld [vmem:[%s1821_s15 + $0xb8] sm:$0xff]  ;;  %1013 = vst [vmem:[%s1821_s15 + $0x78] sm:$0xff] %v981_v37  ;;  %v987_v54 = vadd.f32 %v1896_v51, %v955_v49  ;;  %v988_v33 = vadd.f32 %v1900_v57, %v956_v27  ;;  %v958_v55 = vld [vmem:[%s1821_s15 + $0xc0] sm:$0xff] }
 0x186   : > { %1014 = vst [vmem:[%s1821_s15 + $0x80] sm:$0xff] %v982_v34  ;;  %1015 = vst [vmem:[%s1821_s15 + $0x88] sm:$0xff] %v983_v40  ;;  %v989_v39 = vadd.f32 %v1904_v63, %v957_v52  ;;  %v959_v45 = vld [vmem:[%s1821_s15 + $0xc8] sm:$0xff]  ;;  %v960_v58 = vld [vmem:[%s1821_s15 + $0xd0] sm:$0xff]  ;;  %v990_v59 = vadd.f32 %v1908_v5, %v958_v55 }
 0x187   : > { %1016 = vst [vmem:[%s1821_s15 + $0x90] sm:$0xff] %v984_v47  ;;  %1017 = vst [vmem:[%s1821_s15 + $0x98] sm:$0xff] %v985_v48  ;;  %v991_v51 = vadd.f32 %v1912_v11, %v959_v45  ;;  %v992_v57 = vadd.f32 %v1916_v17, %v960_v58  ;;  %v961_v60 = vld [vmem:[%s1821_s15 + $0xd8] sm:$0xff]  ;;  %v962_v63 = vld [vmem:[%s1821_s15 + $0xe0] sm:$0xff] }
 0x188   : > { %1018 = vst [vmem:[%s1821_s15 + $0xa0] sm:$0xff] %v986_v21  ;;  %v963_v0 = vld [vmem:[%s1821_s15 + $0xe8] sm:$0xff]  ;;  %1019 = vst [vmem:[%s1821_s15 + $0xa8] sm:$0xff] %v987_v54  ;;  %v993_v1 = vadd.f32 %v1920_v25, %v961_v60  ;;  %v994_v5 = vadd.f32 %v1924_v35, %v962_v63  ;;  %v964_v11 = vld [vmem:[%s1821_s15 + $0xf0] sm:$0xff] }
 0x189   : > { %1020 = vst [vmem:[%s1821_s15 + $0xb0] sm:$0xff] %v988_v33  ;;  %1021 = vst [vmem:[%s1821_s15 + $0xb8] sm:$0xff] %v989_v39  ;;  %v995_v2 = vadd.f32 %v1928_v43, %v963_v0  ;;  %v965_v3 = vld [vmem:[%s1821_s15 + $0xf8] sm:$0xff]  ;;  %v996_v17 = vadd.f32 %v1932_v53, %v964_v11 }
 0x18a   : > { %1022 = vst [vmem:[%s1821_s15 + $0xc0] sm:$0xff] %v990_v59  ;;  %1023 = vst [vmem:[%s1821_s15 + $0xc8] sm:$0xff] %v991_v51  ;;  %v997_v6 = vadd.f32 %v1936_v61, %v965_v3 }
 0x18b   : > { %1024 = vst [vmem:[%s1821_s15 + $0xd0] sm:$0xff] %v992_v57  ;;  %1025 = vst [vmem:[%s1821_s15 + $0xd8] sm:$0xff] %v993_v1 }
 0x18c   : > { %1026 = vst [vmem:[%s1821_s15 + $0xe0] sm:$0xff] %v994_v5  ;;  %1027 = vst [vmem:[%s1821_s15 + $0xe8] sm:$0xff] %v995_v2 }
 0x18d   : > { %1028 = vst [vmem:[%s1821_s15 + $0xf0] sm:$0xff] %v996_v17  ;;  %1029 = vst [vmem:[%s1821_s15 + $0xf8] sm:$0xff] %v997_v6 }
 0x18e PF: > { %p1352_p0 = scmp.ne.s32.totalorder %s1643_s14, 3 }
 0x18f   : > { %v2105_v35 = vld [vmem:[%s2225_s2] ss:$0 sm:$0xff] (!%p1352_p0)  ;;  %v1047_v30 = vld [vmem:[%s1821_s15 + $0x68] sm:$0xff] (!%p1352_p0)  ;;  %v1048_v36 = vld [vmem:[%s1821_s15 + $0x70] sm:$0xff] (!%p1352_p0) }
 0x190   : > { %1033 = sbr.rel (%p1352_p0) target bundleno = 421 (0x1a5), region = 82  ;;  %v1034_v25 = vld [vmem:[%s1821_s15] sm:$0xff] (!%p1352_p0)  ;;  %v1035_v43 = vld [vmem:[%s1821_s15 + $0x8] sm:$0xff] (!%p1352_p0)  ;;  %v1049_v37 = vld [vmem:[%s1821_s15 + $0x78] sm:$0xff] (!%p1352_p0)  ;;  %v1086_v49 = vadd.f32 (!%p1352_p0), %v2105_v35, %v1047_v30  ;;  %v1087_v27 = vadd.f32 (!%p1352_p0), %v2105_v35, %v1048_v36 }
 0x191   : > { %v1073_v53 = vadd.f32 (!%p1352_p0), %v2105_v35, %v1034_v25  ;;  %v1074_v61 = vadd.f32 (!%p1352_p0), %v2105_v35, %v1035_v43  ;;  %v1036_v7 = vld [vmem:[%s1821_s15 + $0x10] sm:$0xff] (!%p1352_p0)  ;;  %v1037_v8 = vld [vmem:[%s1821_s15 + $0x18] sm:$0xff] (!%p1352_p0)  ;;  %v1046_v29 = vld [vmem:[%s1821_s15 + $0x60] sm:$0xff] (!%p1352_p0)  ;;  %v1088_v58 = vadd.f32 (!%p1352_p0), %v2105_v35, %v1049_v37 }
 0x192   : > { %v1038_v9 = vld [vmem:[%s1821_s15 + $0x20] sm:$0xff] (!%p1352_p0)  ;;  %v1075_v12 = vadd.f32 (!%p1352_p0), %v2105_v35, %v1036_v7  ;;  %v1076_v13 = vadd.f32 (!%p1352_p0), %v2105_v35, %v1037_v8  ;;  %v1039_v15 = vld [vmem:[%s1821_s15 + $0x28] sm:$0xff] (!%p1352_p0)  ;;  %v1085_v42 = vadd.f32 (!%p1352_p0), %v2105_v35, %v1046_v29  ;;  %v1052_v52 = vld [vmem:[%s1821_s15 + $0x90] sm:$0xff] (!%p1352_p0)  ;;  %v1118_v57 = vmax.f32 (!%p1352_p0), %v1086_v49, 0.0 }
 0x193   : > { %v1077_v14 = vadd.f32 (!%p1352_p0), %v2105_v35, %v1038_v9  ;;  %v1040_v20 = vld [vmem:[%s1821_s15 + $0x30] sm:$0xff] (!%p1352_p0)  ;;  %v1041_v18 = vld [vmem:[%s1821_s15 + $0x38] sm:$0xff] (!%p1352_p0)  ;;  %v1105_v26 = vmax.f32 (!%p1352_p0), %v1073_v53, 0.0  ;;  %v1106_v32 = vmax.f32 (!%p1352_p0), %v1074_v61, 0.0  ;;  %v1078_v38 = vadd.f32 (!%p1352_p0), %v2105_v35, %v1039_v15  ;;  %v1050_v46 = vld [vmem:[%s1821_s15 + $0x80] sm:$0xff] (!%p1352_p0) }
 0x194   : > { %v1079_v44 = vadd.f32 (!%p1352_p0), %v2105_v35, %v1040_v20  ;;  %v1042_v19 = vld [vmem:[%s1821_s15 + $0x40] sm:$0xff] (!%p1352_p0)  ;;  %v1043_v50 = vld [vmem:[%s1821_s15 + $0x48] sm:$0xff] (!%p1352_p0)  ;;  %v1107_v23 = vmax.f32 (!%p1352_p0), %v1075_v12, 0.0  ;;  %v1108_v56 = vmax.f32 (!%p1352_p0), %v1076_v13, 0.0  ;;  %v1080_v28 = vadd.f32 (!%p1352_p0), %v2105_v35, %v1041_v18  ;;  %v1053_v54 = vld [vmem:[%s1821_s15 + $0x98] sm:$0xff] (!%p1352_p0)  ;;  %1150 = vst [vmem:[%s1821_s15 + $0x68] sm:$0xff] (!%p1352_p0), %v1118_v57 }
 0x195   : > { %v1044_v22 = vld [vmem:[%s1821_s15 + $0x50] sm:$0xff] (!%p1352_p0)  ;;  %v1109_v62 = vmax.f32 (!%p1352_p0), %v1077_v14, 0.0  ;;  %v1045_v4 = vld [vmem:[%s1821_s15 + $0x58] sm:$0xff] (!%p1352_p0)  ;;  %1137 = vst [vmem:[%s1821_s15] sm:$0xff] (!%p1352_p0), %v1105_v26  ;;  %1138 = vst [vmem:[%s1821_s15 + $0x8] sm:$0xff] (!%p1352_p0), %v1106_v32  ;;  %v1110_v10 = vmax.f32 (!%p1352_p0), %v1078_v38, 0.0  ;;  %v1081_v31 = vadd.f32 (!%p1352_p0), %v2105_v35, %v1042_v19  ;;  %v1082_v24 = vadd.f32 (!%p1352_p0), %v2105_v35, %v1043_v50 }
 0x196   : > { %v1111_v16 = vmax.f32 (!%p1352_p0), %v1079_v44, 0.0  ;;  %1139 = vst [vmem:[%s1821_s15 + $0x10] sm:$0xff] (!%p1352_p0), %v1107_v23  ;;  %1140 = vst [vmem:[%s1821_s15 + $0x18] sm:$0xff] (!%p1352_p0), %v1108_v56  ;;  %v1112_v34 = vmax.f32 (!%p1352_p0), %v1080_v28, 0.0  ;;  %v1083_v40 = vadd.f32 (!%p1352_p0), %v2105_v35, %v1044_v22  ;;  %v1084_v41 = vadd.f32 (!%p1352_p0), %v2105_v35, %v1045_v4  ;;  %v1051_v47 = vld [vmem:[%s1821_s15 + $0x88] sm:$0xff] (!%p1352_p0)  ;;  %v1054_v33 = vld [vmem:[%s1821_s15 + $0xa0] sm:$0xff] (!%p1352_p0) }
 0x197   : > { %1141 = vst [vmem:[%s1821_s15 + $0x20] sm:$0xff] %v1109_v62  ;;  %1142 = vst [vmem:[%s1821_s15 + $0x28] sm:$0xff] %v1110_v10  ;;  %v1113_v48 = vmax.f32 %v1081_v31, 0.0  ;;  %v1114_v21 = vmax.f32 %v1082_v24, 0.0  ;;  %v1117_v45 = vmax.f32 %v1085_v42, 0.0  ;;  %v1055_v59 = vld [vmem:[%s1821_s15 + $0xa8] sm:$0xff]  ;;  %v1089_v63 = vadd.f32 %v2105_v35, %v1050_v46 }
 0x198   : > { %1143 = vst [vmem:[%s1821_s15 + $0x30] sm:$0xff] %v1111_v16  ;;  %1144 = vst [vmem:[%s1821_s15 + $0x38] sm:$0xff] %v1112_v34  ;;  %v1115_v39 = vmax.f32 %v1083_v40, 0.0  ;;  %v1116_v55 = vmax.f32 %v1084_v41, 0.0  ;;  %v1056_v51 = vld [vmem:[%s1821_s15 + $0xb0] sm:$0xff]  ;;  %v1119_v60 = vmax.f32 %v1087_v27, 0.0  ;;  %v1090_v0 = vadd.f32 %v2105_v35, %v1051_v47 }
 0x199   : > { %1145 = vst [vmem:[%s1821_s15 + $0x40] sm:$0xff] %v1113_v48  ;;  %1146 = vst [vmem:[%s1821_s15 + $0x48] sm:$0xff] %v1114_v21  ;;  %v1057_v1 = vld [vmem:[%s1821_s15 + $0xb8] sm:$0xff]  ;;  %v1120_v5 = vmax.f32 %v1088_v58, 0.0  ;;  %v1091_v2 = vadd.f32 %v2105_v35, %v1052_v52  ;;  %v1092_v11 = vadd.f32 %v2105_v35, %v1053_v54  ;;  %v1093_v3 = vadd.f32 %v2105_v35, %v1054_v33  ;;  %v1058_v17 = vld [vmem:[%s1821_s15 + $0xc0] sm:$0xff] }
 0x19a   : > { %1147 = vst [vmem:[%s1821_s15 + $0x50] sm:$0xff] %v1115_v39  ;;  %1148 = vst [vmem:[%s1821_s15 + $0x58] sm:$0xff] %v1116_v55  ;;  %v1059_v6 = vld [vmem:[%s1821_s15 + $0xc8] sm:$0xff]  ;;  %v1121_v25 = vmax.f32 %v1089_v63, 0.0  ;;  %v1122_v43 = vmax.f32 %v1090_v0, 0.0  ;;  %v1094_v53 = vadd.f32 %v2105_v35, %v1055_v59  ;;  %v1095_v61 = vadd.f32 %v2105_v35, %v1056_v51  ;;  %v1060_v7 = vld [vmem:[%s1821_s15 + $0xd0] sm:$0xff] }
 0x19b   : > { %1149 = vst [vmem:[%s1821_s15 + $0x60] sm:$0xff] %v1117_v45  ;;  %1151 = vst [vmem:[%s1821_s15 + $0x70] sm:$0xff] %v1119_v60  ;;  %v1061_v8 = vld [vmem:[%s1821_s15 + $0xd8] sm:$0xff]  ;;  %v1062_v9 = vld [vmem:[%s1821_s15 + $0xe0] sm:$0xff]  ;;  %v1123_v12 = vmax.f32 %v1091_v2, 0.0  ;;  %v1124_v13 = vmax.f32 %v1092_v11, 0.0  ;;  %v1096_v15 = vadd.f32 %v2105_v35, %v1057_v1  ;;  %v1097_v38 = vadd.f32 %v2105_v35, %v1058_v17 }
 0x19c   : > { %1152 = vst [vmem:[%s1821_s15 + $0x78] sm:$0xff] %v1120_v5  ;;  %v1125_v14 = vmax.f32 %v1093_v3, 0.0  ;;  %v1063_v20 = vld [vmem:[%s1821_s15 + $0xe8] sm:$0xff]  ;;  %v1064_v18 = vld [vmem:[%s1821_s15 + $0xf0] sm:$0xff]  ;;  %1153 = vst [vmem:[%s1821_s15 + $0x80] sm:$0xff] %v1121_v25  ;;  %v1126_v26 = vmax.f32 %v1094_v53, 0.0  ;;  %v1098_v44 = vadd.f32 %v2105_v35, %v1059_v6  ;;  %v1099_v22 = vadd.f32 %v2105_v35, %v1060_v7 }
 0x19d   : > { %1154 = vst [vmem:[%s1821_s15 + $0x88] sm:$0xff] %v1122_v43  ;;  %v1127_v32 = vmax.f32 %v1095_v61, 0.0  ;;  %v1065_v19 = vld [vmem:[%s1821_s15 + $0xf8] sm:$0xff]  ;;  %1155 = vst [vmem:[%s1821_s15 + $0x90] sm:$0xff] %v1123_v12  ;;  %v1128_v50 = vmax.f32 %v1096_v15, 0.0  ;;  %v1100_v23 = vadd.f32 %v2105_v35, %v1061_v8  ;;  %v1101_v56 = vadd.f32 %v2105_v35, %v1062_v9 }
 0x19e   : > { %1156 = vst [vmem:[%s1821_s15 + $0x98] sm:$0xff] %v1124_v13  ;;  %1157 = vst [vmem:[%s1821_s15 + $0xa0] sm:$0xff] %v1125_v14  ;;  %v1129_v62 = vmax.f32 %v1097_v38, 0.0  ;;  %v1130_v28 = vmax.f32 %v1098_v44, 0.0  ;;  %v1102_v4 = vadd.f32 %v2105_v35, %v1063_v20  ;;  %v1103_v29 = vadd.f32 %v2105_v35, %v1064_v18 }
 0x19f   : > { %1158 = vst [vmem:[%s1821_s15 + $0xa8] sm:$0xff] %v1126_v26  ;;  %1159 = vst [vmem:[%s1821_s15 + $0xb0] sm:$0xff] %v1127_v32  ;;  %v1131_v30 = vmax.f32 %v1099_v22, 0.0  ;;  %v1132_v10 = vmax.f32 %v1100_v23, 0.0  ;;  %v1133_v16 = vmax.f32 %v1101_v56, 0.0  ;;  %v1104_v31 = vadd.f32 %v2105_v35, %v1065_v19 }
 0x1a0   : > { %1160 = vst [vmem:[%s1821_s15 + $0xb8] sm:$0xff] %v1128_v50  ;;  %1161 = vst [vmem:[%s1821_s15 + $0xc0] sm:$0xff] %v1129_v62  ;;  %v1134_v24 = vmax.f32 %v1102_v4, 0.0  ;;  %v1135_v36 = vmax.f32 %v1103_v29, 0.0 }
 0x1a1   : > { %1162 = vst [vmem:[%s1821_s15 + $0xc8] sm:$0xff] %v1130_v28  ;;  %1163 = vst [vmem:[%s1821_s15 + $0xd0] sm:$0xff] %v1131_v30  ;;  %v1136_v37 = vmax.f32 %v1104_v31, 0.0 }
 0x1a2   : > { %1164 = vst [vmem:[%s1821_s15 + $0xd8] sm:$0xff] %v1132_v10  ;;  %1165 = vst [vmem:[%s1821_s15 + $0xe0] sm:$0xff] %v1133_v16 }
 0x1a3   : > { %1166 = vst [vmem:[%s1821_s15 + $0xe8] sm:$0xff] %v1134_v24  ;;  %1167 = vst [vmem:[%s1821_s15 + $0xf0] sm:$0xff] %v1135_v36 }
 0x1a4   : > { %1168 = vst [vmem:[%s1821_s15 + $0xf8] sm:$0xff] %v1136_v37 }
 0x1a5 PF: > { %s13_s18 = sadd.s32 1, %s1659_s18   ;;  %s2227_s12 = smov %s1639_s13 }
 0x1a6   : > { %p10_p1 = scmp.ge.s32.totalorder %s13_s18, 10   ;;  %s2228_s13 = smov %s1732_s25 }
 0x1a7   : > { %s2229_s14 = smov %s1651_s16  ;;  %s2230_s15 = smov %s1655_s17 }
 0x1a8   : > { %s2231_s16 = smov %s2234_s19  ;;  %s2232_s17 = smov %s2238_s20 }
 0x1a9   :  { %12 = sbr.rel (!%p10_p1) target bundleno = 4 (0x4), region = 123 }

// kernel: update_block3d_forward.17
= control target key start
LH: loop header
LB: loop body
LE: loop exit
PB: predicated region body
PF: predicated region fallthrough
CT: control target
= control target key end

     0   :  { %s1649_s12 = smov 0   ;;  %s1651_s13 = smov 0   ;;  %s2191_s0 = inlined_call_operand.vmem [shape: bf16[512,1792], index: 0, kind: input, shape index: {}]   ;;  %s2192_s1 = inlined_call_operand.vmem [shape: bf16[1792,128], index: 1, kind: input, shape index: {}]   ;;  %s2193_s2 = inlined_call_operand.vmem [shape: f32[1,128], index: 2, kind: input, shape index: {}]   ;;  %s2194_s3 = inlined_call_operand.vmem [shape: f32[512,128], index: 3, kind: output, shape index: {}]  }
   0x1   :  { %s1653_s14 = smov 0   ;;  %s1655_s15 = smov 0  }
   0x2   :  { %s1657_s16 = smov 0   ;;  %s1659_s17 = smov 0  }
   0x3   :  { %s1661_s18 = smov 0  }
   0x4 LB: > { %s25_s19 = sadd.s32 1, %s1619_s16  ;;  %s32_s20 = sadd.s32 1, %s1623_s17  ;;  %s1627_s18 = sphi %s1661_s18, %s13_s18   ;;  %s1623_s17 = sphi %s1659_s17, %s2200_s17   ;;  %s1619_s16 = sphi %s1657_s16, %s2199_s16   ;;  %s1615_s15 = sphi %s1655_s15, %s2198_s15   ;;  %s1611_s14 = sphi %s1653_s14, %s2197_s14   ;;  %s1607_s13 = sphi %s1651_s13, %s2196_s13   ;;  %s1603_s12 = sphi %s1649_s12, %s2195_s12  }
   0x5   : > { %p26_p0 = scmp.ge.s32.totalorder %s25_s19, 7  ;;  %p48_p1 = scmp.ne.s32.totalorder %s1607_s13, %s1603_s12 }
   0x6   : > { %p49_p2 = scmp.eq.s32.totalorder %s1627_s18, 0  ;;  %s41_s24 = sadd.s32 1, %s1607_s13 }
   0x7   : > { %s2202_s19 = smov (%p26_p0, %s25_s19), 0  ;;  %s2204_s20 = smov (!%p26_p0, %s32_s20), %s1623_s17 }
   0x8   : > { %p50_p3 = por %p49_p2, %p48_p1  ;;  %p34_p4 = scmp.ge.s32.totalorder %s2204_s20, 2 }
   0x9   : > { %s37_s21 = ssub.s32 %s1619_s16, %s2202_s19  ;;  %p1258_p6 = scmp.ge.s32.totalorder %s1627_s18, 14 }
   0xa   : > { %s2206_s20 = smov (%p34_p4, %s2204_s20), 0 }
   0xb   : > { %s36_s22 = ssub.s32 %s1623_s17, %s2206_s20  ;;  %162 = sbr.rel (%p1258_p6) target bundleno = 42 (0x2a), region = 20 }
   0xc   : > { %s38_s23 = sor.u32 %s37_s21, %s36_s22 }
   0xd   : > { %p39_p5 = scmp.eq.s32.totalorder %s38_s23, 0 }
   0xf   : > { %s1700_s25 = scalar_select %p39_p5, %s1607_s13, %s41_s24  }
  0x12   : > { %165 = sbr.rel (!%p50_p3) target bundleno = 42 (0x2a), region = 24  ;;  %s167_s26 = sand.u32 (%p50_p3), 1, %s1607_s13  }
  0x13   : > { %s1261_s27 = sshll.u32 (%p50_p3), %s1619_s16, 1  ;;  %s1259_s28 = sshll.u32 (%p50_p3), %s167_s26, 8 }
  0x14   : > { %s1452_s29 = smul.u32 (%p50_p3), 448, %s1623_s17  ;;  %s1714_s8 = scalar_lea.vmem (%p50_p3), [#allocation2], %s1259_s28 }
  0x16   : > { %s173_s30 = sadd.s32 (%p50_p3), %s1452_s29, %s1261_s27 }
  0x17   : > { %s1263_s4 = sshll.u32 (%p50_p3), %s173_s30, 2 }
  0x18   : > { %s1709_s7 = scalar_lea.vmem (%p50_p3), %s2191_s0, %s1263_s4 }
  0x19   : > { %v265_v0 = vld [vmem:[%s1709_s7] sm:$0xff]  ;;  %v267_v1 = vld [vmem:[%s1709_s7 + $0x38] sm:$0xff]  ;;  %v269_v2 = vld [vmem:[%s1709_s7 + $0x70] sm:$0xff] }
  0x1a   : > { %266 = vst [vmem:[%s1714_s8] sm:$0xff] %v265_v0  ;;  %268 = vst [vmem:[%s1714_s8 + $0x8] sm:$0xff] %v267_v1  ;;  %v271_v3 = vld [vmem:[%s1709_s7 + $0xa8] sm:$0xff]  ;;  %v273_v4 = vld [vmem:[%s1709_s7 + $0xe0] sm:$0xff] }
  0x1b   : > { %270 = vst [vmem:[%s1714_s8 + $0x10] sm:$0xff] %v269_v2  ;;  %v275_v5 = vld [vmem:[%s1709_s7 + $0x118] sm:$0xff]  ;;  %272 = vst [vmem:[%s1714_s8 + $0x18] sm:$0xff] %v271_v3  ;;  %v277_v6 = vld [vmem:[%s1709_s7 + $0x150] sm:$0xff] }
  0x1c   : > { %274 = vst [vmem:[%s1714_s8 + $0x20] sm:$0xff] %v273_v4  ;;  %276 = vst [vmem:[%s1714_s8 + $0x28] sm:$0xff] %v275_v5  ;;  %v279_v7 = vld [vmem:[%s1709_s7 + $0x188] sm:$0xff]  ;;  %v281_v8 = vld [vmem:[%s1709_s7 + $0x1c0] sm:$0xff] }
  0x1d   : > { %278 = vst [vmem:[%s1714_s8 + $0x30] sm:$0xff] %v277_v6  ;;  %280 = vst [vmem:[%s1714_s8 + $0x38] sm:$0xff] %v279_v7  ;;  %v283_v9 = vld [vmem:[%s1709_s7 + $0x1f8] sm:$0xff]  ;;  %v285_v10 = vld [vmem:[%s1709_s7 + $0x230] sm:$0xff] }
  0x1e   : > { %282 = vst [vmem:[%s1714_s8 + $0x40] sm:$0xff] %v281_v8  ;;  %v287_v11 = vld [vmem:[%s1709_s7 + $0x268] sm:$0xff]  ;;  %284 = vst [vmem:[%s1714_s8 + $0x48] sm:$0xff] %v283_v9  ;;  %v289_v12 = vld [vmem:[%s1709_s7 + $0x2a0] sm:$0xff] }
  0x1f   : > { %286 = vst [vmem:[%s1714_s8 + $0x50] sm:$0xff] %v285_v10  ;;  %288 = vst [vmem:[%s1714_s8 + $0x58] sm:$0xff] %v287_v11  ;;  %v291_v13 = vld [vmem:[%s1709_s7 + $0x2d8] sm:$0xff]  ;;  %v293_v14 = vld [vmem:[%s1709_s7 + $0x310] sm:$0xff] }
  0x20   : > { %290 = vst [vmem:[%s1714_s8 + $0x60] sm:$0xff] %v289_v12  ;;  %292 = vst [vmem:[%s1714_s8 + $0x68] sm:$0xff] %v291_v13  ;;  %v295_v15 = vld [vmem:[%s1709_s7 + $0x348] sm:$0xff]  ;;  %v297_v16 = vld [vmem:[%s1709_s7 + $0x380] sm:$0xff] }
  0x21   : > { %294 = vst [vmem:[%s1714_s8 + $0x70] sm:$0xff] %v293_v14  ;;  %v299_v17 = vld [vmem:[%s1709_s7 + $0x3b8] sm:$0xff]  ;;  %296 = vst [vmem:[%s1714_s8 + $0x78] sm:$0xff] %v295_v15  ;;  %v301_v18 = vld [vmem:[%s1709_s7 + $0x3f0] sm:$0xff] }
  0x22   : > { %298 = vst [vmem:[%s1714_s8 + $0x80] sm:$0xff] %v297_v16  ;;  %300 = vst [vmem:[%s1714_s8 + $0x88] sm:$0xff] %v299_v17  ;;  %v303_v19 = vld [vmem:[%s1709_s7 + $0x428] sm:$0xff]  ;;  %v305_v20 = vld [vmem:[%s1709_s7 + $0x460] sm:$0xff] }
  0x23   : > { %302 = vst [vmem:[%s1714_s8 + $0x90] sm:$0xff] %v301_v18  ;;  %304 = vst [vmem:[%s1714_s8 + $0x98] sm:$0xff] %v303_v19  ;;  %v307_v21 = vld [vmem:[%s1709_s7 + $0x498] sm:$0xff]  ;;  %v309_v22 = vld [vmem:[%s1709_s7 + $0x4d0] sm:$0xff] }
  0x24   : > { %306 = vst [vmem:[%s1714_s8 + $0xa0] sm:$0xff] %v305_v20  ;;  %v311_v23 = vld [vmem:[%s1709_s7 + $0x508] sm:$0xff]  ;;  %308 = vst [vmem:[%s1714_s8 + $0xa8] sm:$0xff] %v307_v21  ;;  %v313_v24 = vld [vmem:[%s1709_s7 + $0x540] sm:$0xff] }
  0x25   : > { %310 = vst [vmem:[%s1714_s8 + $0xb0] sm:$0xff] %v309_v22  ;;  %312 = vst [vmem:[%s1714_s8 + $0xb8] sm:$0xff] %v311_v23  ;;  %v315_v25 = vld [vmem:[%s1709_s7 + $0x578] sm:$0xff]  ;;  %v317_v26 = vld [vmem:[%s1709_s7 + $0x5b0] sm:$0xff] }
  0x26   : > { %314 = vst [vmem:[%s1714_s8 + $0xc0] sm:$0xff] %v313_v24  ;;  %316 = vst [vmem:[%s1714_s8 + $0xc8] sm:$0xff] %v315_v25  ;;  %v319_v27 = vld [vmem:[%s1709_s7 + $0x5e8] sm:$0xff]  ;;  %v321_v28 = vld [vmem:[%s1709_s7 + $0x620] sm:$0xff] }
  0x27   : > { %318 = vst [vmem:[%s1714_s8 + $0xd0] sm:$0xff] %v317_v26  ;;  %v323_v29 = vld [vmem:[%s1709_s7 + $0x658] sm:$0xff]  ;;  %320 = vst [vmem:[%s1714_s8 + $0xd8] sm:$0xff] %v319_v27  ;;  %v325_v30 = vld [vmem:[%s1709_s7 + $0x690] sm:$0xff] }
  0x28   : > { %322 = vst [vmem:[%s1714_s8 + $0xe0] sm:$0xff] %v321_v28  ;;  %324 = vst [vmem:[%s1714_s8 + $0xe8] sm:$0xff] %v323_v29  ;;  %v327_v31 = vld [vmem:[%s1709_s7 + $0x6c8] sm:$0xff] }
  0x29   : > { %326 = vst [vmem:[%s1714_s8 + $0xf0] sm:$0xff] %v325_v30  ;;  %328 = vst [vmem:[%s1714_s8 + $0xf8] sm:$0xff] %v327_v31 }
  0x2a PF: > { %p1264_p7 = scmp.ge.s32.totalorder %s1627_s18, 1  ;;  %p345_p8 = scmp.lt.s32.totalorder %s1627_s18, 15 }
  0x2c   : > { %p346_p9 = pnand %p1264_p7, %p345_p8 }
  0x2d   : > { %s1266_s9 = sshll.u32 (!%p346_p9), %s1611_s14, 5  ;;  %s1268_s10 = sshll.u32 (!%p346_p9), %s1615_s15, 5 }
  0x2e   : > { %349 = sbr.rel (%p346_p9) target bundleno = 404 (0x194), region = 66  ;;  %p392_p10 = scmp.lt.s32.totalorder (!%p346_p9), %s1266_s9, 223 }
  0x2f   : > { %p404_p11 = scmp.lt.s32.totalorder (!%p346_p9), %s1268_s10, 63  ;;  %s352_s28 = sand.u32 (!%p346_p9), 1, %s1603_s12  }
  0x30   : > { %s1265_s29 = sshll.u32 (!%p346_p9), %s352_s28, 8  ;;  %p1318_p12 = scmp.ne.s32.totalorder (!%p346_p9), %s1611_s14, 0 }
  0x31   : > { %s1803_s30 = scalar_lea.vmem (!%p346_p9), [#allocation2], %s1265_s29 }
  0x32   : > { %v1527_v43 = vld [vmem:[%s1803_s30 + $0x4] ss:$8 sps:$4 sm:$0xff] (!%p346_p9)   ;;  %v1525_v50 = vld [vmem:[%s1803_s30] ss:$8 sps:$4 sm:$0xff] (!%p346_p9)   ;;  %v1531_v52 = vld [vmem:[%s1803_s30 + $0x14] ss:$8 sps:$4 sm:$0xff] (!%p346_p9)  }
  0x33   : > { %v1530_v44 = vld [vmem:[%s1803_s30 + $0x84] ss:$8 sps:$4 sm:$0xff] (!%p346_p9)   ;;  %765 = vmatprep.mubr.bf16.mxu0 (!%p346_p9), %v1527_v43  ;;  %v1528_v51 = vld [vmem:[%s1803_s30 + $0x80] ss:$8 sps:$4 sm:$0xff] (!%p346_p9)   ;;  %v1533_v53 = vld [vmem:[%s1803_s30 + $0x94] ss:$8 sps:$4 sm:$0xff] (!%p346_p9)  }
  0x34   : > { %829 = vmatprep.mubr.bf16.mxu1 (!%p346_p9), %v1530_v44  ;;  %v1535_v54 = vld [vmem:[%s1803_s30 + $0x10] ss:$8 sps:$4 sm:$0xff] (!%p346_p9)   ;;  %v1537_v56 = vld [vmem:[%s1803_s30 + $0x24] ss:$8 sps:$4 sm:$0xff] (!%p346_p9)   ;;  %v1541_v58 = vld [vmem:[%s1803_s30 + $0x20] ss:$8 sps:$4 sm:$0xff] (!%p346_p9)  }
  0x35   : > { %s2208_s9 = smov (!%p392_p10, %s1266_s9), 223  ;;  %s2210_s10 = smov (!%p404_p11, %s1268_s10), 63  ;;  %v1536_v55 = vld [vmem:[%s1803_s30 + $0x90] ss:$8 sps:$4 sm:$0xff]   ;;  %v1539_v57 = vld [vmem:[%s1803_s30 + $0xa4] ss:$8 sps:$4 sm:$0xff]  }
  0x36   : > { %s1267_s11 = sshll.u32 %s2208_s9, 2  ;;  %s1269_s24 = sshll.u32 %s2210_s10, 3  ;;  %v1542_v59 = vld [vmem:[%s1803_s30 + $0xa0] ss:$8 sps:$4 sm:$0xff]   ;;  %v1543_v60 = vld [vmem:[%s1803_s30 + $0x34] ss:$8 sps:$4 sm:$0xff]  }
  0x37   : > { %s1784_s23 = scalar_lea.vmem %s2192_s1, %s1267_s11  ;;  %s1789_s15 = scalar_lea.vmem %s2194_s3, %s1269_s24  ;;  %v1545_v61 = vld [vmem:[%s1803_s30 + $0xb4] ss:$8 sps:$4 sm:$0xff]   ;;  %v1547_v62 = vld [vmem:[%s1803_s30 + $0x30] ss:$8 sps:$4 sm:$0xff]   ;;  %v1549_v0 = vld [vmem:[%s1803_s30 + $0x44] ss:$8 sps:$4 sm:$0xff]  }
  0x38   : > { %v1509_v32 = vld [vmem:[%s1784_s23 + $0x40] sm:$0xff]   ;;  %v1511_v34 = vld [vmem:[%s1784_s23 + $0x48] sm:$0xff]   ;;  %v1513_v36 = vld [vmem:[%s1784_s23 + $0x50] sm:$0xff]  }
  0x39   : > { %v1510_v33 = vld [vmem:[%s1784_s23] sm:$0xff]   ;;  %1324 = vmatprep.subr.bf16.mxu0 %v1509_v32  ;;  %1436 = vmatprep.subr.bf16.mxu1 %v1509_v32  ;;  %v1512_v35 = vld [vmem:[%s1784_s23 + $0x8] sm:$0xff]   ;;  %v1514_v37 = vld [vmem:[%s1784_s23 + $0x10] sm:$0xff]  }
  0x3a   : > { %1325 = vmatpush3.bf16.msra.mxu0 %v1510_v33  ;;  %1444 = vmatpush3.bf16.msra.mxu1 %v1510_v33  ;;  %v1515_v38 = vld [vmem:[%s1784_s23 + $0x58] sm:$0xff]   ;;  %v1517_v40 = vld [vmem:[%s1784_s23 + $0x60] sm:$0xff]   ;;  %v1519_v42 = vld [vmem:[%s1784_s23 + $0x68] sm:$0xff]  }
  0x3b   : > { %1326 = vmatprep.subr.bf16.mxu0 %v1511_v34  ;;  %1437 = vmatprep.subr.bf16.mxu1 %v1511_v34  ;;  %v1516_v39 = vld [vmem:[%s1784_s23 + $0x18] sm:$0xff]   ;;  %v1518_v41 = vld [vmem:[%s1784_s23 + $0x20] sm:$0xff]   ;;  %v1520_v45 = vld [vmem:[%s1784_s23 + $0x28] sm:$0xff]  }
  0x3c   : > { %v1521_v46 = vld [vmem:[%s1784_s23 + $0x70] sm:$0xff]   ;;  %v1523_v48 = vld [vmem:[%s1784_s23 + $0x78] sm:$0xff]   ;;  %v1551_v1 = vld [vmem:[%s1803_s30 + $0xc4] ss:$8 sps:$4 sm:$0xff]  }
  0x3d   : > { %v1522_v47 = vld [vmem:[%s1784_s23 + $0x30] sm:$0xff]   ;;  %v1524_v49 = vld [vmem:[%s1784_s23 + $0x38] sm:$0xff]   ;;  %v1553_v2 = vld [vmem:[%s1803_s30 + $0x40] ss:$8 sps:$4 sm:$0xff]  }
  0x3e   : > { %1327 = vmatpush3.bf16.msra.mxu0 %v1512_v35  ;;  %1445 = vmatpush3.bf16.msra.mxu1 %v1512_v35  ;;  %v1548_v63 = vld [vmem:[%s1803_s30 + $0xb0] ss:$8 sps:$4 sm:$0xff]   ;;  %v1554_v3 = vld [vmem:[%s1803_s30 + $0xc0] ss:$8 sps:$4 sm:$0xff]   ;;  %v1555_v4 = vld [vmem:[%s1803_s30 + $0x54] ss:$8 sps:$4 sm:$0xff]  }
  0x3f   : > { %1328 = vmatprep.subr.bf16.mxu0 %v1513_v36  ;;  %1438 = vmatprep.subr.bf16.mxu1 %v1513_v36  ;;  %v1557_v5 = vld [vmem:[%s1803_s30 + $0xd4] ss:$8 sps:$4 sm:$0xff]   ;;  %v1559_v6 = vld [vmem:[%s1803_s30 + $0x50] ss:$8 sps:$4 sm:$0xff]   ;;  %v1561_v8 = vld [vmem:[%s1803_s30 + $0x64] ss:$8 sps:$4 sm:$0xff]  }
  0x40   : > { %v1560_v7 = vld [vmem:[%s1803_s30 + $0xd0] ss:$8 sps:$4 sm:$0xff]   ;;  %v1563_v9 = vld [vmem:[%s1803_s30 + $0xe4] ss:$8 sps:$4 sm:$0xff]   ;;  %v1565_v10 = vld [vmem:[%s1803_s30 + $0x60] ss:$8 sps:$4 sm:$0xff]  }
  0x41   : > { %v1566_v11 = vld [vmem:[%s1803_s30 + $0xe0] ss:$8 sps:$4 sm:$0xff]   ;;  %v1567_v12 = vld [vmem:[%s1803_s30 + $0x74] ss:$8 sps:$4 sm:$0xff]   ;;  %v1571_v14 = vld [vmem:[%s1803_s30 + $0x70] ss:$8 sps:$4 sm:$0xff]  }
  0x42   : > { %1329 = vmatpush3.bf16.msra.mxu0 %v1514_v37  ;;  %1446 = vmatpush3.bf16.msra.mxu1 %v1514_v37  ;;  %v1569_v13 = vld [vmem:[%s1803_s30 + $0xf4] ss:$8 sps:$4 sm:$0xff]   ;;  %v1572_v15 = vld [vmem:[%s1803_s30 + $0xf0] ss:$8 sps:$4 sm:$0xff]  }
  0x43   : > { %1330 = vmatprep.subr.bf16.mxu0 %v1515_v38  ;;  %1439 = vmatprep.subr.bf16.mxu1 %v1515_v38 }
  0x46   : > { %1331 = vmatpush3.bf16.msra.mxu0 %v1516_v39  ;;  %1447 = vmatpush3.bf16.msra.mxu1 %v1516_v39 }
  0x47   : > { %1332 = vmatprep.subr.bf16.mxu0 %v1517_v40  ;;  %1440 = vmatprep.subr.bf16.mxu1 %v1517_v40 }
  0x4a   : > { %1333 = vmatpush3.bf16.msra.mxu0 %v1518_v41  ;;  %1448 = vmatpush3.bf16.msra.mxu1 %v1518_v41 }
  0x4b   : > { %1334 = vmatprep.subr.bf16.mxu0 %v1519_v42  ;;  %1441 = vmatprep.subr.bf16.mxu1 %v1519_v42 }
  0x4e   : > { %1335 = vmatpush3.bf16.msra.mxu0 %v1520_v45  ;;  %1449 = vmatpush3.bf16.msra.mxu1 %v1520_v45 }
  0x4f   : > { %1336 = vmatprep.subr.bf16.mxu0 %v1521_v46  ;;  %1442 = vmatprep.subr.bf16.mxu1 %v1521_v46 }
  0x52   : > { %1337 = vmatpush3.bf16.msra.mxu0 %v1522_v47  ;;  %1450 = vmatpush3.bf16.msra.mxu1 %v1522_v47 }
  0x53   : > { %1338 = vmatprep.subr.bf16.mxu0 %v1523_v48  ;;  %1443 = vmatprep.subr.bf16.mxu1 %v1523_v48 }
  0x56   : > { %1339 = vmatpush3.bf16.msra.mxu0 %v1524_v49  ;;  %1451 = vmatpush3.bf16.msra.mxu1 %v1524_v49 }
  0x59   : > { %766 = vmatmul.mubr.bf16.vlgmr.msra.gmra.mrb[0].mxu0 %v1525_v50  ;;  %830 = vmatmul.mubr.bf16.vlgmr.msra.gmra.mrb[0].mxu1 %v1528_v51 }
  0x5a   : > { %773 = vmatprep.mubr.bf16.mxu0 %v1531_v52  ;;  %837 = vmatprep.mubr.bf16.mxu1 %v1533_v53 }
  0x61   : > { %774 = vmatmul.mubr.bf16.gmra.mrb[4].mxu0 %v1535_v54  ;;  %838 = vmatmul.mubr.bf16.gmra.mrb[4].mxu1 %v1536_v55 }
  0x62   : > { %781 = vmatprep.mubr.bf16.mxu0 %v1537_v56  ;;  %845 = vmatprep.mubr.bf16.mxu1 %v1539_v57 }
  0x69   : > { %782 = vmatmul.mubr.bf16.gmra.mrb[8].mxu0 %v1541_v58  ;;  %846 = vmatmul.mubr.bf16.gmra.mrb[8].mxu1 %v1542_v59 }
  0x6a   : > { %789 = vmatprep.mubr.bf16.mxu0 %v1543_v60  ;;  %853 = vmatprep.mubr.bf16.mxu1 %v1545_v61 }
  0x71   : > { %790 = vmatmul.mubr.bf16.gmra.mrb[12].mxu0 %v1547_v62  ;;  %854 = vmatmul.mubr.bf16.gmra.mrb[12].mxu1 %v1548_v63 }
  0x72   : > { %797 = vmatprep.mubr.bf16.mxu0 %v1549_v0  ;;  %861 = vmatprep.mubr.bf16.mxu1 %v1551_v1 }
  0x79   : > { %798 = vmatmul.mubr.bf16.gmra.mrb[16].mxu0 %v1553_v2  ;;  %862 = vmatmul.mubr.bf16.gmra.mrb[16].mxu1 %v1554_v3 }
  0x7a   : > { %805 = vmatprep.mubr.bf16.mxu0 %v1555_v4  ;;  %869 = vmatprep.mubr.bf16.mxu1 %v1557_v5 }
  0x81   : > { %806 = vmatmul.mubr.bf16.gmra.mrb[20].mxu0 %v1559_v6  ;;  %870 = vmatmul.mubr.bf16.gmra.mrb[20].mxu1 %v1560_v7 }
  0x82   : > { %813 = vmatprep.mubr.bf16.mxu0 %v1561_v8  ;;  %877 = vmatprep.mubr.bf16.mxu1 %v1563_v9 }
  0x89   : > { %814 = vmatmul.mubr.bf16.gmra.mrb[24].mxu0 %v1565_v10  ;;  %878 = vmatmul.mubr.bf16.gmra.mrb[24].mxu1 %v1566_v11 }
  0x8a   : > { %821 = vmatprep.mubr.bf16.mxu0 %v1567_v12  ;;  %885 = vmatprep.mubr.bf16.mxu1 %v1569_v13 }
  0x91   : > { %822 = vmatmul.mubr.bf16.gmra.mrb[28].mxu0 %v1571_v14  ;;  %886 = vmatmul.mubr.bf16.gmra.mrb[28].mxu1 %v1572_v15 }
 0x12c   : > { %v1340_v16 = vpop.f32.mrb[0].mxu0  ;;  %v1388_v17 = vpop.f32.mrb[0].mxu1 }
 0x12d   : > { %v1341_v18 = vpop.f32.mrb[1].mxu0  ;;  %v1389_v19 = vpop.f32.mrb[1].mxu1 }
 0x12e   : > { %v1842_v20 = vadd.f32 %v1341_v18, %v1340_v16  ;;  %v1844_v21 = vadd.f32 %v1389_v19, %v1388_v17  ;;  %v1343_v22 = vpop.f32.mrb[2].mxu0  ;;  %v1391_v23 = vpop.f32.mrb[2].mxu1 }
 0x12f   : > { %v1344_v24 = vpop.f32.mrb[3].mxu0  ;;  %v1392_v25 = vpop.f32.mrb[3].mxu1 }
 0x130   : > { %v1846_v26 = vadd.f32 %v1344_v24, %v1343_v22  ;;  %v1848_v27 = vadd.f32 %v1392_v25, %v1391_v23  ;;  %898 = vst [vmem:[%s1789_s15] sm:$0xff] (!%p1318_p12), %v1842_v20  ;;  %914 = vst [vmem:[%s1789_s15 + $0x80] sm:$0xff] (!%p1318_p12), %v1844_v21 }
 0x132   : > { %899 = vst [vmem:[%s1789_s15 + $0x8] sm:$0xff] (!%p1318_p12), %v1846_v26  ;;  %915 = vst [vmem:[%s1789_s15 + $0x88] sm:$0xff] (!%p1318_p12), %v1848_v27 }
 0x134   : > { %v1346_v28 = vpop.f32.mrb[4].mxu0  ;;  %v1394_v29 = vpop.f32.mrb[4].mxu1 }
 0x135   : > { %v1347_v30 = vpop.f32.mrb[5].mxu0  ;;  %v1395_v31 = vpop.f32.mrb[5].mxu1 }
 0x136   : > { %v1850_v32 = vadd.f32 %v1347_v30, %v1346_v28  ;;  %v1852_v33 = vadd.f32 %v1395_v31, %v1394_v29  ;;  %v1349_v34 = vpop.f32.mrb[6].mxu0  ;;  %v1397_v35 = vpop.f32.mrb[6].mxu1 }
 0x137   : > { %v1350_v36 = vpop.f32.mrb[7].mxu0  ;;  %v1398_v37 = vpop.f32.mrb[7].mxu1 }
 0x138   : > { %v1854_v38 = vadd.f32 %v1350_v36, %v1349_v34  ;;  %v1856_v39 = vadd.f32 %v1398_v37, %v1397_v35  ;;  %900 = vst [vmem:[%s1789_s15 + $0x10] sm:$0xff] (!%p1318_p12), %v1850_v32  ;;  %916 = vst [vmem:[%s1789_s15 + $0x90] sm:$0xff] (!%p1318_p12), %v1852_v33 }
 0x13a   : > { %901 = vst [vmem:[%s1789_s15 + $0x18] sm:$0xff] (!%p1318_p12), %v1854_v38  ;;  %917 = vst [vmem:[%s1789_s15 + $0x98] sm:$0xff] (!%p1318_p12), %v1856_v39 }
 0x13c   : > { %v1352_v40 = vpop.f32.mrb[8].mxu0  ;;  %v1400_v41 = vpop.f32.mrb[8].mxu1 }
 0x13d   : > { %v1353_v42 = vpop.f32.mrb[9].mxu0  ;;  %v1401_v43 = vpop.f32.mrb[9].mxu1 }
 0x13e   : > { %v1858_v44 = vadd.f32 %v1353_v42, %v1352_v40  ;;  %v1860_v45 = vadd.f32 %v1401_v43, %v1400_v41  ;;  %v1355_v46 = vpop.f32.mrb[10].mxu0  ;;  %v1403_v47 = vpop.f32.mrb[10].mxu1 }
 0x13f   : > { %v1356_v48 = vpop.f32.mrb[11].mxu0  ;;  %v1404_v49 = vpop.f32.mrb[11].mxu1 }
 0x140   : > { %v1862_v50 = vadd.f32 %v1356_v48, %v1355_v46  ;;  %v1864_v51 = vadd.f32 %v1404_v49, %v1403_v47  ;;  %902 = vst [vmem:[%s1789_s15 + $0x20] sm:$0xff] (!%p1318_p12), %v1858_v44  ;;  %918 = vst [vmem:[%s1789_s15 + $0xa0] sm:$0xff] (!%p1318_p12), %v1860_v45 }
 0x142   : > { %903 = vst [vmem:[%s1789_s15 + $0x28] sm:$0xff] (!%p1318_p12), %v1862_v50  ;;  %919 = vst [vmem:[%s1789_s15 + $0xa8] sm:$0xff] (!%p1318_p12), %v1864_v51 }
 0x144   : > { %v1358_v52 = vpop.f32.mrb[12].mxu0  ;;  %v1406_v53 = vpop.f32.mrb[12].mxu1 }
 0x145   : > { %v1359_v54 = vpop.f32.mrb[13].mxu0  ;;  %v1407_v55 = vpop.f32.mrb[13].mxu1 }
 0x146   : > { %v1866_v56 = vadd.f32 %v1359_v54, %v1358_v52  ;;  %v1868_v57 = vadd.f32 %v1407_v55, %v1406_v53  ;;  %v1361_v58 = vpop.f32.mrb[14].mxu0  ;;  %v1409_v59 = vpop.f32.mrb[14].mxu1 }
 0x147   : > { %v1362_v60 = vpop.f32.mrb[15].mxu0  ;;  %v1410_v61 = vpop.f32.mrb[15].mxu1 }
 0x148   : > { %v1870_v62 = vadd.f32 %v1362_v60, %v1361_v58  ;;  %v1872_v63 = vadd.f32 %v1410_v61, %v1409_v59  ;;  %904 = vst [vmem:[%s1789_s15 + $0x30] sm:$0xff] (!%p1318_p12), %v1866_v56  ;;  %920 = vst [vmem:[%s1789_s15 + $0xb0] sm:$0xff] (!%p1318_p12), %v1868_v57 }
 0x14a   : > { %905 = vst [vmem:[%s1789_s15 + $0x38] sm:$0xff] (!%p1318_p12), %v1870_v62  ;;  %921 = vst [vmem:[%s1789_s15 + $0xb8] sm:$0xff] (!%p1318_p12), %v1872_v63 }
 0x14c   : > { %v1364_v0 = vpop.f32.mrb[16].mxu0  ;;  %v1412_v1 = vpop.f32.mrb[16].mxu1 }
 0x14d   : > { %v1365_v2 = vpop.f32.mrb[17].mxu0  ;;  %v1413_v3 = vpop.f32.mrb[17].mxu1 }
 0x14e   : > { %v1874_v4 = vadd.f32 %v1365_v2, %v1364_v0  ;;  %v1876_v5 = vadd.f32 %v1413_v3, %v1412_v1  ;;  %v1367_v6 = vpop.f32.mrb[18].mxu0  ;;  %v1415_v7 = vpop.f32.mrb[18].mxu1 }
 0x14f   : > { %v1368_v8 = vpop.f32.mrb[19].mxu0  ;;  %v1416_v9 = vpop.f32.mrb[19].mxu1 }
 0x150   : > { %v1878_v10 = vadd.f32 %v1368_v8, %v1367_v6  ;;  %v1880_v11 = vadd.f32 %v1416_v9, %v1415_v7  ;;  %906 = vst [vmem:[%s1789_s15 + $0x40] sm:$0xff] (!%p1318_p12), %v1874_v4  ;;  %922 = vst [vmem:[%s1789_s15 + $0xc0] sm:$0xff] (!%p1318_p12), %v1876_v5 }
 0x152   : > { %907 = vst [vmem:[%s1789_s15 + $0x48] sm:$0xff] (!%p1318_p12), %v1878_v10  ;;  %923 = vst [vmem:[%s1789_s15 + $0xc8] sm:$0xff] (!%p1318_p12), %v1880_v11 }
 0x154   : > { %v1370_v12 = vpop.f32.mrb[20].mxu0  ;;  %v1418_v13 = vpop.f32.mrb[20].mxu1 }
 0x155   : > { %v1371_v14 = vpop.f32.mrb[21].mxu0  ;;  %v1419_v15 = vpop.f32.mrb[21].mxu1 }
 0x156   : > { %v1882_v16 = vadd.f32 %v1371_v14, %v1370_v12  ;;  %v1884_v17 = vadd.f32 %v1419_v15, %v1418_v13  ;;  %v1373_v18 = vpop.f32.mrb[22].mxu0  ;;  %v1421_v19 = vpop.f32.mrb[22].mxu1 }
 0x157   : > { %v1374_v22 = vpop.f32.mrb[23].mxu0  ;;  %v1422_v23 = vpop.f32.mrb[23].mxu1 }
 0x158   : > { %v1886_v24 = vadd.f32 %v1374_v22, %v1373_v18  ;;  %v1888_v25 = vadd.f32 %v1422_v23, %v1421_v19  ;;  %908 = vst [vmem:[%s1789_s15 + $0x50] sm:$0xff] (!%p1318_p12), %v1882_v16  ;;  %924 = vst [vmem:[%s1789_s15 + $0xd0] sm:$0xff] (!%p1318_p12), %v1884_v17 }
 0x15a   : > { %909 = vst [vmem:[%s1789_s15 + $0x58] sm:$0xff] (!%p1318_p12), %v1886_v24  ;;  %925 = vst [vmem:[%s1789_s15 + $0xd8] sm:$0xff] (!%p1318_p12), %v1888_v25 }
 0x15c   : > { %v1376_v28 = vpop.f32.mrb[24].mxu0  ;;  %v1424_v29 = vpop.f32.mrb[24].mxu1 }
 0x15d   : > { %v1377_v30 = vpop.f32.mrb[25].mxu0  ;;  %v1425_v31 = vpop.f32.mrb[25].mxu1 }
 0x15e   : > { %v1890_v34 = vadd.f32 %v1377_v30, %v1376_v28  ;;  %v1892_v35 = vadd.f32 %v1425_v31, %v1424_v29  ;;  %v1379_v36 = vpop.f32.mrb[26].mxu0  ;;  %v1427_v37 = vpop.f32.mrb[26].mxu1 }
 0x15f   : > { %v1380_v40 = vpop.f32.mrb[27].mxu0  ;;  %v1428_v41 = vpop.f32.mrb[27].mxu1 }
 0x160   : > { %v1894_v42 = vadd.f32 %v1380_v40, %v1379_v36  ;;  %v1896_v43 = vadd.f32 %v1428_v41, %v1427_v37  ;;  %910 = vst [vmem:[%s1789_s15 + $0x60] sm:$0xff] (!%p1318_p12), %v1890_v34  ;;  %926 = vst [vmem:[%s1789_s15 + $0xe0] sm:$0xff] (!%p1318_p12), %v1892_v35 }
 0x162   : > { %897 = sbr.rel (%p1318_p12) target bundleno = 363 (0x16b), region = 74  ;;  %911 = vst [vmem:[%s1789_s15 + $0x68] sm:$0xff] (!%p1318_p12), %v1894_v42  ;;  %927 = vst [vmem:[%s1789_s15 + $0xe8] sm:$0xff] (!%p1318_p12), %v1896_v43 }
 0x164   : > { %v1382_v46 = vpop.f32.mrb[28].mxu0  ;;  %v1430_v47 = vpop.f32.mrb[28].mxu1 }
 0x165   : > { %v1383_v48 = vpop.f32.mrb[29].mxu0  ;;  %v1431_v49 = vpop.f32.mrb[29].mxu1 }
 0x166   : > { %v1898_v52 = vadd.f32 %v1383_v48, %v1382_v46  ;;  %v1900_v53 = vadd.f32 %v1431_v49, %v1430_v47  ;;  %v1385_v54 = vpop.f32.mrb[30].mxu0  ;;  %v1433_v55 = vpop.f32.mrb[30].mxu1 }
 0x167   : > { %v1386_v58 = vpop.f32.mrb[31].mxu0  ;;  %v1434_v59 = vpop.f32.mrb[31].mxu1 }
 0x168   : > { %v1902_v60 = vadd.f32 %v1386_v58, %v1385_v54  ;;  %v1904_v61 = vadd.f32 %v1434_v59, %v1433_v55  ;;  %912 = vst [vmem:[%s1789_s15 + $0x70] sm:$0xff] (!%p1318_p12), %v1898_v52  ;;  %928 = vst [vmem:[%s1789_s15 + $0xf0] sm:$0xff] (!%p1318_p12), %v1900_v53 }
 0x16a   : > { %913 = vst [vmem:[%s1789_s15 + $0x78] sm:$0xff] %v1902_v60  ;;  %929 = vst [vmem:[%s1789_s15 + $0xf8] sm:$0xff] %v1904_v61 }
 0x16b PF: > { %p1319_p13 = scmp.le.s32.totalorder %s1611_s14, 0 }
 0x16c   : > { %v934_v0 = vld [vmem:[%s1789_s15] sm:$0xff] (!%p1319_p13)  ;;  %v935_v1 = vld [vmem:[%s1789_s15 + $0x8] sm:$0xff] (!%p1319_p13)  ;;  %v936_v2 = vld [vmem:[%s1789_s15 + $0x10] sm:$0xff] (!%p1319_p13) }
 0x16d   : > { %933 = sbr.rel (%p1319_p13) target bundleno = 383 (0x17f), region = 78  ;;  %v966_v3 = vadd.f32 (!%p1319_p13), %v1842_v20, %v934_v0  ;;  %v967_v6 = vadd.f32 (!%p1319_p13), %v1846_v26, %v935_v1  ;;  %v968_v7 = vadd.f32 (!%p1319_p13), %v1850_v32, %v936_v2  ;;  %v937_v8 = vld [vmem:[%s1789_s15 + $0x18] sm:$0xff] (!%p1319_p13)  ;;  %v938_v9 = vld [vmem:[%s1789_s15 + $0x20] sm:$0xff] (!%p1319_p13)  ;;  %v939_v12 = vld [vmem:[%s1789_s15 + $0x28] sm:$0xff] (!%p1319_p13) }
 0x16e   : > { %v969_v13 = vadd.f32 (!%p1319_p13), %v1854_v38, %v937_v8  ;;  %v970_v14 = vadd.f32 (!%p1319_p13), %v1858_v44, %v938_v9  ;;  %v971_v15 = vadd.f32 (!%p1319_p13), %v1862_v50, %v939_v12  ;;  %v940_v20 = vld [vmem:[%s1789_s15 + $0x30] sm:$0xff] (!%p1319_p13)  ;;  %v941_v18 = vld [vmem:[%s1789_s15 + $0x38] sm:$0xff] (!%p1319_p13)  ;;  %v942_v26 = vld [vmem:[%s1789_s15 + $0x40] sm:$0xff] (!%p1319_p13) }
 0x16f   : > { %998 = vst [vmem:[%s1789_s15] sm:$0xff] (!%p1319_p13), %v966_v3  ;;  %999 = vst [vmem:[%s1789_s15 + $0x8] sm:$0xff] (!%p1319_p13), %v967_v6  ;;  %v972_v32 = vadd.f32 (!%p1319_p13), %v1866_v56, %v940_v20  ;;  %v973_v38 = vadd.f32 (!%p1319_p13), %v1870_v62, %v941_v18  ;;  %v974_v44 = vadd.f32 (!%p1319_p13), %v1874_v4, %v942_v26  ;;  %v943_v19 = vld [vmem:[%s1789_s15 + $0x48] sm:$0xff] (!%p1319_p13)  ;;  %v944_v50 = vld [vmem:[%s1789_s15 + $0x50] sm:$0xff] (!%p1319_p13) }
 0x170   : > { %1000 = vst [vmem:[%s1789_s15 + $0x10] sm:$0xff] (!%p1319_p13), %v968_v7  ;;  %v945_v22 = vld [vmem:[%s1789_s15 + $0x58] sm:$0xff] (!%p1319_p13)  ;;  %1001 = vst [vmem:[%s1789_s15 + $0x18] sm:$0xff] (!%p1319_p13), %v969_v13  ;;  %v975_v23 = vadd.f32 (!%p1319_p13), %v1878_v10, %v943_v19  ;;  %v976_v56 = vadd.f32 (!%p1319_p13), %v1882_v16, %v944_v50  ;;  %v946_v28 = vld [vmem:[%s1789_s15 + $0x60] sm:$0xff] (!%p1319_p13) }
 0x171   : > { %1002 = vst [vmem:[%s1789_s15 + $0x20] sm:$0xff] (!%p1319_p13), %v970_v14  ;;  %1003 = vst [vmem:[%s1789_s15 + $0x28] sm:$0xff] (!%p1319_p13), %v971_v15  ;;  %v977_v62 = vadd.f32 (!%p1319_p13), %v1886_v24, %v945_v22  ;;  %v947_v4 = vld [vmem:[%s1789_s15 + $0x68] sm:$0xff] (!%p1319_p13)  ;;  %v948_v29 = vld [vmem:[%s1789_s15 + $0x70] sm:$0xff] (!%p1319_p13)  ;;  %v978_v30 = vadd.f32 (!%p1319_p13), %v1890_v34, %v946_v28 }
 0x172   : > { %1004 = vst [vmem:[%s1789_s15 + $0x30] sm:$0xff] (!%p1319_p13), %v972_v32  ;;  %1005 = vst [vmem:[%s1789_s15 + $0x38] sm:$0xff] (!%p1319_p13), %v973_v38  ;;  %v979_v10 = vadd.f32 (!%p1319_p13), %v1894_v42, %v947_v4  ;;  %v980_v16 = vadd.f32 (!%p1319_p13), %v1898_v52, %v948_v29  ;;  %v949_v31 = vld [vmem:[%s1789_s15 + $0x78] sm:$0xff] (!%p1319_p13)  ;;  %v950_v24 = vld [vmem:[%s1789_s15 + $0x80] sm:$0xff] (!%p1319_p13) }
 0x173   : > { %1006 = vst [vmem:[%s1789_s15 + $0x40] sm:$0xff] (!%p1319_p13), %v974_v44  ;;  %v951_v36 = vld [vmem:[%s1789_s15 + $0x88] sm:$0xff] (!%p1319_p13)  ;;  %1007 = vst [vmem:[%s1789_s15 + $0x48] sm:$0xff] (!%p1319_p13), %v975_v23  ;;  %v981_v37 = vadd.f32 (!%p1319_p13), %v1902_v60, %v949_v31  ;;  %v982_v34 = vadd.f32 (!%p1319_p13), %v1844_v21, %v950_v24  ;;  %v952_v41 = vld [vmem:[%s1789_s15 + $0x90] sm:$0xff] (!%p1319_p13) }
 0x174   : > { %1008 = vst [vmem:[%s1789_s15 + $0x50] sm:$0xff] %v976_v56  ;;  %1009 = vst [vmem:[%s1789_s15 + $0x58] sm:$0xff] %v977_v62  ;;  %v983_v40 = vadd.f32 %v1848_v27, %v951_v36  ;;  %v953_v42 = vld [vmem:[%s1789_s15 + $0x98] sm:$0xff]  ;;  %v954_v46 = vld [vmem:[%s1789_s15 + $0xa0] sm:$0xff]  ;;  %v984_v47 = vadd.f32 %v1852_v33, %v952_v41 }
 0x175   : > { %1010 = vst [vmem:[%s1789_s15 + $0x60] sm:$0xff] %v978_v30  ;;  %1011 = vst [vmem:[%s1789_s15 + $0x68] sm:$0xff] %v979_v10  ;;  %v985_v48 = vadd.f32 %v1856_v39, %v953_v42  ;;  %v986_v21 = vadd.f32 %v1860_v45, %v954_v46  ;;  %v955_v49 = vld [vmem:[%s1789_s15 + $0xa8] sm:$0xff]  ;;  %v956_v27 = vld [vmem:[%s1789_s15 + $0xb0] sm:$0xff] }
 0x176   : > { %1012 = vst [vmem:[%s1789_s15 + $0x70] sm:$0xff] %v980_v16  ;;  %v957_v52 = vld [vmem:[%s1789_s15 + $0xb8] sm:$0xff]  ;;  %1013 = vst [vmem:[%s1789_s15 + $0x78] sm:$0xff] %v981_v37  ;;  %v987_v54 = vadd.f32 %v1864_v51, %v955_v49  ;;  %v988_v33 = vadd.f32 %v1868_v57, %v956_v27  ;;  %v958_v55 = vld [vmem:[%s1789_s15 + $0xc0] sm:$0xff] }
 0x177   : > { %1014 = vst [vmem:[%s1789_s15 + $0x80] sm:$0xff] %v982_v34  ;;  %1015 = vst [vmem:[%s1789_s15 + $0x88] sm:$0xff] %v983_v40  ;;  %v989_v39 = vadd.f32 %v1872_v63, %v957_v52  ;;  %v959_v45 = vld [vmem:[%s1789_s15 + $0xc8] sm:$0xff]  ;;  %v960_v58 = vld [vmem:[%s1789_s15 + $0xd0] sm:$0xff]  ;;  %v990_v59 = vadd.f32 %v1876_v5, %v958_v55 }
 0x178   : > { %1016 = vst [vmem:[%s1789_s15 + $0x90] sm:$0xff] %v984_v47  ;;  %1017 = vst [vmem:[%s1789_s15 + $0x98] sm:$0xff] %v985_v48  ;;  %v991_v51 = vadd.f32 %v1880_v11, %v959_v45  ;;  %v992_v57 = vadd.f32 %v1884_v17, %v960_v58  ;;  %v961_v60 = vld [vmem:[%s1789_s15 + $0xd8] sm:$0xff]  ;;  %v962_v63 = vld [vmem:[%s1789_s15 + $0xe0] sm:$0xff] }
 0x179   : > { %1018 = vst [vmem:[%s1789_s15 + $0xa0] sm:$0xff] %v986_v21  ;;  %v963_v0 = vld [vmem:[%s1789_s15 + $0xe8] sm:$0xff]  ;;  %1019 = vst [vmem:[%s1789_s15 + $0xa8] sm:$0xff] %v987_v54  ;;  %v993_v1 = vadd.f32 %v1888_v25, %v961_v60  ;;  %v994_v5 = vadd.f32 %v1892_v35, %v962_v63  ;;  %v964_v11 = vld [vmem:[%s1789_s15 + $0xf0] sm:$0xff] }
 0x17a   : > { %1020 = vst [vmem:[%s1789_s15 + $0xb0] sm:$0xff] %v988_v33  ;;  %1021 = vst [vmem:[%s1789_s15 + $0xb8] sm:$0xff] %v989_v39  ;;  %v995_v2 = vadd.f32 %v1896_v43, %v963_v0  ;;  %v965_v3 = vld [vmem:[%s1789_s15 + $0xf8] sm:$0xff]  ;;  %v996_v17 = vadd.f32 %v1900_v53, %v964_v11 }
 0x17b   : > { %1022 = vst [vmem:[%s1789_s15 + $0xc0] sm:$0xff] %v990_v59  ;;  %1023 = vst [vmem:[%s1789_s15 + $0xc8] sm:$0xff] %v991_v51  ;;  %v997_v6 = vadd.f32 %v1904_v61, %v965_v3 }
 0x17c   : > { %1024 = vst [vmem:[%s1789_s15 + $0xd0] sm:$0xff] %v992_v57  ;;  %1025 = vst [vmem:[%s1789_s15 + $0xd8] sm:$0xff] %v993_v1 }
 0x17d   : > { %1026 = vst [vmem:[%s1789_s15 + $0xe0] sm:$0xff] %v994_v5  ;;  %1027 = vst [vmem:[%s1789_s15 + $0xe8] sm:$0xff] %v995_v2 }
 0x17e   : > { %1028 = vst [vmem:[%s1789_s15 + $0xf0] sm:$0xff] %v996_v17  ;;  %1029 = vst [vmem:[%s1789_s15 + $0xf8] sm:$0xff] %v997_v6 }
 0x17f PF: > { %p1320_p0 = scmp.ne.s32.totalorder %s1611_s14, 6 }
 0x180   : > { %v2073_v35 = vld [vmem:[%s2193_s2] ss:$0 sm:$0xff] (!%p1320_p0)  ;;  %v1047_v4 = vld [vmem:[%s1789_s15 + $0x68] sm:$0xff] (!%p1320_p0)  ;;  %v1048_v16 = vld [vmem:[%s1789_s15 + $0x70] sm:$0xff] (!%p1320_p0) }
 0x181   : > { %1033 = sbr.rel (%p1320_p0) target bundleno = 404 (0x194), region = 82  ;;  %v1034_v25 = vld [vmem:[%s1789_s15] sm:$0xff] (!%p1320_p0)  ;;  %v1035_v43 = vld [vmem:[%s1789_s15 + $0x8] sm:$0xff] (!%p1320_p0)  ;;  %v1086_v10 = vadd.f32 (!%p1320_p0), %v2073_v35, %v1047_v4  ;;  %v1049_v31 = vld [vmem:[%s1789_s15 + $0x78] sm:$0xff] (!%p1320_p0)  ;;  %v1087_v36 = vadd.f32 (!%p1320_p0), %v2073_v35, %v1048_v16 }
 0x182   : > { %v1073_v53 = vadd.f32 (!%p1320_p0), %v2073_v35, %v1034_v25  ;;  %v1074_v61 = vadd.f32 (!%p1320_p0), %v2073_v35, %v1035_v43  ;;  %v1036_v7 = vld [vmem:[%s1789_s15 + $0x10] sm:$0xff] (!%p1320_p0)  ;;  %v1037_v8 = vld [vmem:[%s1789_s15 + $0x18] sm:$0xff] (!%p1320_p0)  ;;  %v1046_v28 = vld [vmem:[%s1789_s15 + $0x60] sm:$0xff] (!%p1320_p0)  ;;  %v1088_v37 = vadd.f32 (!%p1320_p0), %v2073_v35, %v1049_v31 }
 0x183   : > { %v1038_v9 = vld [vmem:[%s1789_s15 + $0x20] sm:$0xff] (!%p1320_p0)  ;;  %v1075_v12 = vadd.f32 (!%p1320_p0), %v2073_v35, %v1036_v7  ;;  %v1076_v13 = vadd.f32 (!%p1320_p0), %v2073_v35, %v1037_v8  ;;  %v1039_v15 = vld [vmem:[%s1789_s15 + $0x28] sm:$0xff] (!%p1320_p0)  ;;  %v1085_v30 = vadd.f32 (!%p1320_p0), %v2073_v35, %v1046_v28  ;;  %v1052_v41 = vld [vmem:[%s1789_s15 + $0x90] sm:$0xff] (!%p1320_p0)  ;;  %1118 = vst [vmem:[%s1789_s15 + $0x68] sm:$0xff] (!%p1320_p0), %v1086_v10 }
 0x184   : > { %v1077_v14 = vadd.f32 (!%p1320_p0), %v2073_v35, %v1038_v9  ;;  %v1040_v20 = vld [vmem:[%s1789_s15 + $0x30] sm:$0xff] (!%p1320_p0)  ;;  %v1041_v18 = vld [vmem:[%s1789_s15 + $0x38] sm:$0xff] (!%p1320_p0)  ;;  %1105 = vst [vmem:[%s1789_s15] sm:$0xff] (!%p1320_p0), %v1073_v53  ;;  %1106 = vst [vmem:[%s1789_s15 + $0x8] sm:$0xff] (!%p1320_p0), %v1074_v61  ;;  %v1078_v26 = vadd.f32 (!%p1320_p0), %v2073_v35, %v1039_v15  ;;  %v1091_v47 = vadd.f32 (!%p1320_p0), %v2073_v35, %v1052_v41 }
 0x185   : > { %v1079_v32 = vadd.f32 (!%p1320_p0), %v2073_v35, %v1040_v20  ;;  %v1080_v38 = vadd.f32 (!%p1320_p0), %v2073_v35, %v1041_v18  ;;  %v1042_v44 = vld [vmem:[%s1789_s15 + $0x40] sm:$0xff] (!%p1320_p0)  ;;  %v1043_v19 = vld [vmem:[%s1789_s15 + $0x48] sm:$0xff] (!%p1320_p0)  ;;  %1107 = vst [vmem:[%s1789_s15 + $0x10] sm:$0xff] (!%p1320_p0), %v1075_v12  ;;  %1108 = vst [vmem:[%s1789_s15 + $0x18] sm:$0xff] (!%p1320_p0), %v1076_v13 }
 0x186   : > { %v1044_v50 = vld [vmem:[%s1789_s15 + $0x50] sm:$0xff] (!%p1320_p0)  ;;  %1109 = vst [vmem:[%s1789_s15 + $0x20] sm:$0xff] (!%p1320_p0), %v1077_v14  ;;  %v1081_v22 = vadd.f32 (!%p1320_p0), %v2073_v35, %v1042_v44  ;;  %v1082_v23 = vadd.f32 (!%p1320_p0), %v2073_v35, %v1043_v19  ;;  %v1045_v62 = vld [vmem:[%s1789_s15 + $0x58] sm:$0xff] (!%p1320_p0)  ;;  %1110 = vst [vmem:[%s1789_s15 + $0x28] sm:$0xff] (!%p1320_p0), %v1078_v26 }
 0x187   : > { %v1083_v56 = vadd.f32 (!%p1320_p0), %v2073_v35, %v1044_v50  ;;  %1111 = vst [vmem:[%s1789_s15 + $0x30] sm:$0xff] (!%p1320_p0), %v1079_v32  ;;  %1112 = vst [vmem:[%s1789_s15 + $0x38] sm:$0xff] (!%p1320_p0), %v1080_v38  ;;  %v1084_v29 = vadd.f32 (!%p1320_p0), %v2073_v35, %v1045_v62  ;;  %v1050_v24 = vld [vmem:[%s1789_s15 + $0x80] sm:$0xff] (!%p1320_p0)  ;;  %v1051_v40 = vld [vmem:[%s1789_s15 + $0x88] sm:$0xff] (!%p1320_p0) }
 0x188   : > { %1113 = vst [vmem:[%s1789_s15 + $0x40] sm:$0xff] %v1081_v22  ;;  %1114 = vst [vmem:[%s1789_s15 + $0x48] sm:$0xff] %v1082_v23  ;;  %v1089_v34 = vadd.f32 %v2073_v35, %v1050_v24  ;;  %v1053_v42 = vld [vmem:[%s1789_s15 + $0x98] sm:$0xff]  ;;  %v1090_v46 = vadd.f32 %v2073_v35, %v1051_v40  ;;  %v1054_v21 = vld [vmem:[%s1789_s15 + $0xa0] sm:$0xff] }
 0x189   : > { %1115 = vst [vmem:[%s1789_s15 + $0x50] sm:$0xff] %v1083_v56  ;;  %1116 = vst [vmem:[%s1789_s15 + $0x58] sm:$0xff] %v1084_v29  ;;  %v1092_v48 = vadd.f32 %v2073_v35, %v1053_v42  ;;  %v1055_v49 = vld [vmem:[%s1789_s15 + $0xa8] sm:$0xff]  ;;  %v1056_v27 = vld [vmem:[%s1789_s15 + $0xb0] sm:$0xff]  ;;  %v1093_v52 = vadd.f32 %v2073_v35, %v1054_v21 }
 0x18a   : > { %1117 = vst [vmem:[%s1789_s15 + $0x60] sm:$0xff] %v1085_v30  ;;  %1119 = vst [vmem:[%s1789_s15 + $0x70] sm:$0xff] %v1087_v36  ;;  %v1094_v54 = vadd.f32 %v2073_v35, %v1055_v49  ;;  %v1095_v33 = vadd.f32 %v2073_v35, %v1056_v27  ;;  %v1057_v39 = vld [vmem:[%s1789_s15 + $0xb8] sm:$0xff]  ;;  %v1058_v55 = vld [vmem:[%s1789_s15 + $0xc0] sm:$0xff] }
 0x18b   : > { %1120 = vst [vmem:[%s1789_s15 + $0x78] sm:$0xff] %v1088_v37  ;;  %1121 = vst [vmem:[%s1789_s15 + $0x80] sm:$0xff] %v1089_v34  ;;  %v1059_v45 = vld [vmem:[%s1789_s15 + $0xc8] sm:$0xff]  ;;  %v1096_v58 = vadd.f32 %v2073_v35, %v1057_v39  ;;  %v1097_v59 = vadd.f32 %v2073_v35, %v1058_v55  ;;  %v1060_v57 = vld [vmem:[%s1789_s15 + $0xd0] sm:$0xff] }
 0x18c   : > { %1122 = vst [vmem:[%s1789_s15 + $0x88] sm:$0xff] %v1090_v46  ;;  %1123 = vst [vmem:[%s1789_s15 + $0x90] sm:$0xff] %v1091_v47  ;;  %v1098_v51 = vadd.f32 %v2073_v35, %v1059_v45  ;;  %v1061_v60 = vld [vmem:[%s1789_s15 + $0xd8] sm:$0xff]  ;;  %v1062_v63 = vld [vmem:[%s1789_s15 + $0xe0] sm:$0xff]  ;;  %v1099_v0 = vadd.f32 %v2073_v35, %v1060_v57 }
 0x18d   : > { %1124 = vst [vmem:[%s1789_s15 + $0x98] sm:$0xff] %v1092_v48  ;;  %1125 = vst [vmem:[%s1789_s15 + $0xa0] sm:$0xff] %v1093_v52  ;;  %v1100_v1 = vadd.f32 %v2073_v35, %v1061_v60  ;;  %v1101_v5 = vadd.f32 %v2073_v35, %v1062_v63  ;;  %v1063_v2 = vld [vmem:[%s1789_s15 + $0xe8] sm:$0xff]  ;;  %v1064_v11 = vld [vmem:[%s1789_s15 + $0xf0] sm:$0xff] }
 0x18e   : > { %1126 = vst [vmem:[%s1789_s15 + $0xa8] sm:$0xff] %v1094_v54  ;;  %1127 = vst [vmem:[%s1789_s15 + $0xb0] sm:$0xff] %v1095_v33  ;;  %v1065_v3 = vld [vmem:[%s1789_s15 + $0xf8] sm:$0xff]  ;;  %v1102_v17 = vadd.f32 %v2073_v35, %v1063_v2  ;;  %v1103_v6 = vadd.f32 %v2073_v35, %v1064_v11 }
 0x18f   : > { %1128 = vst [vmem:[%s1789_s15 + $0xb8] sm:$0xff] %v1096_v58  ;;  %1129 = vst [vmem:[%s1789_s15 + $0xc0] sm:$0xff] %v1097_v59  ;;  %v1104_v25 = vadd.f32 %v2073_v35, %v1065_v3 }
 0x190   : > { %1130 = vst [vmem:[%s1789_s15 + $0xc8] sm:$0xff] %v1098_v51  ;;  %1131 = vst [vmem:[%s1789_s15 + $0xd0] sm:$0xff] %v1099_v0 }
 0x191   : > { %1132 = vst [vmem:[%s1789_s15 + $0xd8] sm:$0xff] %v1100_v1  ;;  %1133 = vst [vmem:[%s1789_s15 + $0xe0] sm:$0xff] %v1101_v5 }
 0x192   : > { %1134 = vst [vmem:[%s1789_s15 + $0xe8] sm:$0xff] %v1102_v17  ;;  %1135 = vst [vmem:[%s1789_s15 + $0xf0] sm:$0xff] %v1103_v6 }
 0x193   : > { %1136 = vst [vmem:[%s1789_s15 + $0xf8] sm:$0xff] %v1104_v25 }
 0x194 PF: > { %s13_s18 = sadd.s32 1, %s1627_s18   ;;  %s2195_s12 = smov %s1607_s13 }
 0x195   : > { %p10_p1 = scmp.ge.s32.totalorder %s13_s18, 16   ;;  %s2196_s13 = smov %s1700_s25 }
 0x196   : > { %s2197_s14 = smov %s1619_s16  ;;  %s2198_s15 = smov %s1623_s17 }
 0x197   : > { %s2199_s16 = smov %s2202_s19  ;;  %s2200_s17 = smov %s2206_s20 }
 0x198   :  { %12 = sbr.rel (!%p10_p1) target bundleno = 4 (0x4), region = 123 }

</bundles_post_ra>
